<compile_context>
chip_gen: v7x
topology: tpu7x:2x2x1
jax: 0.10.0
libtpu: 0.0.40
codegen_flags: <defaults>
</compile_context>

<pallas_src>
import jax
import jax.numpy as jnp
from jax.experimental import pallas as pl
from jax.experimental.pallas import tpu as pltpu


IN_NC = 2048
HID = 1000
OUT_NC = 1404
BN_EPS = 1e-5

HID_PAD = 1024   # 1000 -> 1024 : 8 x 128 lanes, 4 x 256 MXU tiles (v6e/v7x)
OUT_PAD = 1408   # 1404 -> 1408 : 11 x 128 lanes, lane-dense output stores


def id_duke_kernel(x_ref, b1_ref, b2_ref, b3_ref,
                   w1_hbm, w2_hbm, w3_hbm, w4_hbm,
                   o_ref,
                   w1_buf, w2_buf, w3_buf, w4_buf, sem):
    # Kick off all four weight DMAs immediately; each layer only waits for its
    # own weight, so compute of layer k hides the fetch of later layers.
    cp1 = pltpu.make_async_copy(w1_hbm, w1_buf, sem.at[0]); cp1.start()
    cp2 = pltpu.make_async_copy(w2_hbm, w2_buf, sem.at[1]); cp2.start()
    cp3 = pltpu.make_async_copy(w3_hbm, w3_buf, sem.at[2]); cp3.start()
    cp4 = pltpu.make_async_copy(w4_hbm, w4_buf, sem.at[3]); cp4.start()

    x = x_ref[...].astype(jnp.bfloat16)

    # Layer 1: Linear (BN scale pre-folded into columns) -> +shift -> ReLU
    cp1.wait()
    h = jnp.dot(x, w1_buf[...], preferred_element_type=jnp.float32)
    h = jnp.maximum(h + b1_ref[...], 0.0).astype(jnp.bfloat16)

    # Layer 2
    cp2.wait()
    h = jnp.dot(h, w2_buf[...], preferred_element_type=jnp.float32)
    h = jnp.maximum(h + b2_ref[...], 0.0).astype(jnp.bfloat16)

    # Layer 3
    cp3.wait()
    h = jnp.dot(h, w3_buf[...], preferred_element_type=jnp.float32)
    h = jnp.maximum(h + b3_ref[...], 0.0).astype(jnp.bfloat16)

    # Final classifier Linear (no bias, no BN, no ReLU); f32 store.
    cp4.wait()
    o_ref[...] = jnp.dot(h, w4_buf[...],
                         preferred_element_type=jnp.float32).astype(o_ref.dtype)


def init_params(key):
    """Deterministic init matching the PyTorch module's __init__ (std=0.001,
    bias-free Linears, BatchNorm1d defaults).  Weights stored as [in, out]."""
    k1, k2, k3, k4 = jax.random.split(key, 4)
    w1 = 0.001 * jax.random.normal(k1, (IN_NC, HID), dtype=jnp.float32)
    w2 = 0.001 * jax.random.normal(k2, (HID, HID), dtype=jnp.float32)
    w3 = 0.001 * jax.random.normal(k3, (HID, HID), dtype=jnp.float32)
    w4 = 0.001 * jax.random.normal(k4, (HID, OUT_NC), dtype=jnp.float32)

    # BatchNorm1d eval-mode fold (defaults: gamma=1, beta=0, mean=0, var=1):
    #   scale = gamma / sqrt(var + eps), shift = beta - mean * scale
    def bn_fold():
        gamma = jnp.ones((HID,), jnp.float32)
        beta = jnp.zeros((HID,), jnp.float32)
        mean = jnp.zeros((HID,), jnp.float32)
        var = jnp.ones((HID,), jnp.float32)
        scale = gamma / jnp.sqrt(var + BN_EPS)
        shift = beta - mean * scale
        return scale.reshape(1, HID), shift.reshape(1, HID)

    s1, b1 = bn_fold()
    s2, b2 = bn_fold()
    s3, b3 = bn_fold()
    return dict(w1=w1, w2=w2, w3=w3, w4=w4,
                s1=s1, b1=b1, s2=s2, b2=b2, s3=s3, b3=b3)


def prepare_params(p):
    """Fold BN scale into weight columns, zero-pad to lane multiples, cast to bf16."""
    def pad2(a, rows, cols):
        r, c = a.shape
        return jnp.pad(a, ((0, rows - r), (0, cols - c)))

    w1 = pad2(p["w1"] * p["s1"], IN_NC, HID_PAD).astype(jnp.bfloat16)
    w2 = pad2(p["w2"] * p["s2"], HID_PAD, HID_PAD).astype(jnp.bfloat16)
    w3 = pad2(p["w3"] * p["s3"], HID_PAD, HID_PAD).astype(jnp.bfloat16)
    w4 = pad2(p["w4"], HID_PAD, OUT_PAD).astype(jnp.bfloat16)
    b1 = pad2(p["b1"], 1, HID_PAD).astype(jnp.float32)
    b2 = pad2(p["b2"], 1, HID_PAD).astype(jnp.float32)
    b3 = pad2(p["b3"], 1, HID_PAD).astype(jnp.float32)
    return dict(w1=w1, w2=w2, w3=w3, w4=w4, b1=b1, b2=b2, b3=b3)


def id_duke_net_forward(feature, prepped):
    """feature: [B, 2048] f32.  prepped: output of prepare_params."""
    B = feature.shape[0]
    B_pad = max(8, ((B + 7) // 8) * 8)
    if B_pad != B:
        feature = jnp.pad(feature, ((0, B_pad - B), (0, 0)))

    vmem = pl.BlockSpec(memory_space=pltpu.MemorySpace.VMEM)
    hbm = pl.BlockSpec(memory_space=pl.ANY)   # weights stay in HBM, DMA'd manually

    out_pad = pl.pallas_call(
        id_duke_kernel,
        out_shape=jax.ShapeDtypeStruct((B_pad, OUT_PAD), jnp.float32),
        in_specs=[vmem, vmem, vmem, vmem, hbm, hbm, hbm, hbm],
        out_specs=vmem,
        scratch_shapes=[
            pltpu.VMEM((IN_NC, HID_PAD), jnp.bfloat16),     # w1 buffer (4 MiB)
            pltpu.VMEM((HID_PAD, HID_PAD), jnp.bfloat16),   # w2 buffer (2 MiB)
            pltpu.VMEM((HID_PAD, HID_PAD), jnp.bfloat16),   # w3 buffer (2 MiB)
            pltpu.VMEM((HID_PAD, OUT_PAD), jnp.bfloat16),   # w4 buffer (2.75 MiB)
            pltpu.SemaphoreType.DMA((4,)),
        ],
        compiler_params=pltpu.CompilerParams(
            # ~11 MiB of weight scratch + tiny activations; 48 MiB fits every
            # generation incl. v7x (64 MiB physical VMEM per TensorCore).
            vmem_limit_bytes=48 * 1024 * 1024,
        ),
    )(feature, prepped["b1"], prepped["b2"], prepped["b3"],
      prepped["w1"], prepped["w2"], prepped["w3"], prepped["w4"])

    return out_pad[:B, :OUT_NC]


def reference_forward_f32(feature, p):
    """Pure-f32 reference on the original (unpadded, unfolded) parameters."""
    h = jnp.maximum(feature @ p["w1"] * p["s1"] + p["b1"], 0.0)
    h = jnp.maximum(h @ p["w2"] * p["s2"] + p["b2"], 0.0)
    h = jnp.maximum(h @ p["w3"] * p["s3"] + p["b3"], 0.0)
    return h @ p["w4"]


def reference_forward_bf16(feature, prepped):
    """Reference using the exact bf16 operands the kernel sees."""
    h = feature.astype(jnp.bfloat16)
    h = jnp.dot(h, prepped["w1"], preferred_element_type=jnp.float32) + prepped["b1"]
    h = jnp.maximum(h, 0.0).astype(jnp.bfloat16)
    h = jnp.dot(h, prepped["w2"], preferred_element_type=jnp.float32) + prepped["b2"]
    h = jnp.maximum(h, 0.0).astype(jnp.bfloat16)
    h = jnp.dot(h, prepped["w3"], preferred_element_type=jnp.float32) + prepped["b3"]
    h = jnp.maximum(h, 0.0).astype(jnp.bfloat16)
    out = jnp.dot(h, prepped["w4"], preferred_element_type=jnp.float32)
    return out[:, :OUT_NC]


if __name__ == "__main__":
    key = jax.random.PRNGKey(0)
    k_feat, k_param = jax.random.split(key)

    B = 8
    feature = jax.random.normal(k_feat, (B, IN_NC), dtype=jnp.float32)
    raw_params = init_params(k_param)
    prepped = prepare_params(raw_params)

    out = id_duke_net_forward(feature, prepped)
    out = jax.block_until_ready(out)
    assert out.shape == (B, OUT_NC), out.shape

    ref_bf16 = reference_forward_bf16(feature, prepped)
    ref_f32 = reference_forward_f32(feature, raw_params)

    def max_rel_err(a, b):
        return float(jnp.max(jnp.abs(a - b)) / (jnp.max(jnp.abs(b)) + 1e-12))

    # Tight check vs. a reference using identical bf16 operands (same math path).
    assert max_rel_err(out, ref_bf16) < 2e-3, "mismatch vs bf16-matched reference"
    # Looser check vs. the pure-f32 module semantics (bf16 weight quantization).
    assert max_rel_err(out, ref_f32) < 5e-2, "mismatch vs f32 reference"

    print("KERNEL_OK")
</pallas_src>

<mosaic_0001>
module attributes {stable_mosaic.version = 11 : i64} {
  func.func @id_duke_kernel(%arg0: memref<8x2048xf32, #tpu.memory_space<vmem>>, %arg1: memref<1x1024xf32, #tpu.memory_space<vmem>>, %arg2: memref<1x1024xf32, #tpu.memory_space<vmem>>, %arg3: memref<1x1024xf32, #tpu.memory_space<vmem>>, %arg4: memref<2048x1024xbf16, #tpu.memory_space<any>>, %arg5: memref<1024x1024xbf16, #tpu.memory_space<any>>, %arg6: memref<1024x1024xbf16, #tpu.memory_space<any>>, %arg7: memref<1024x1408xbf16, #tpu.memory_space<any>>, %arg8: memref<8x1408xf32, #tpu.memory_space<vmem>>, %arg9: memref<2048x1024xbf16, #tpu.memory_space<vmem>>, %arg10: memref<1024x1024xbf16, #tpu.memory_space<vmem>>, %arg11: memref<1024x1024xbf16, #tpu.memory_space<vmem>>, %arg12: memref<1024x1408xbf16, #tpu.memory_space<vmem>>, %arg13: memref<4x!tpu.dma_semaphore, #tpu.memory_space<semaphore_mem>>) attributes {dimension_semantics = [], scalar_prefetch = 0 : i64, scratch_operands = 5 : i64, tpu.core_type = #tpu.core_type<tc>} {
    %c0_i32 = arith.constant 0 : i32
    %0 = tpu.memref_slice %arg13[%c0_i32] : memref<4x!tpu.dma_semaphore, #tpu.memory_space<semaphore_mem>> -> memref<1x!tpu.dma_semaphore, #tpu.memory_space<semaphore_mem>>
    %1 = tpu.memref_squeeze %0 : memref<1x!tpu.dma_semaphore, #tpu.memory_space<semaphore_mem>> -> memref<!tpu.dma_semaphore, #tpu.memory_space<semaphore_mem>>
    tpu.enqueue_dma source(%arg4 : memref<2048x1024xbf16, #tpu.memory_space<any>>) target(%arg9 : memref<2048x1024xbf16, #tpu.memory_space<vmem>>) target_semaphore(%1 : memref<!tpu.dma_semaphore, #tpu.memory_space<semaphore_mem>>)
    %c1_i32 = arith.constant 1 : i32
    %2 = tpu.memref_slice %arg13[%c1_i32] : memref<4x!tpu.dma_semaphore, #tpu.memory_space<semaphore_mem>> -> memref<1x!tpu.dma_semaphore, #tpu.memory_space<semaphore_mem>>
    %3 = tpu.memref_squeeze %2 : memref<1x!tpu.dma_semaphore, #tpu.memory_space<semaphore_mem>> -> memref<!tpu.dma_semaphore, #tpu.memory_space<semaphore_mem>>
    tpu.enqueue_dma source(%arg5 : memref<1024x1024xbf16, #tpu.memory_space<any>>) target(%arg10 : memref<1024x1024xbf16, #tpu.memory_space<vmem>>) target_semaphore(%3 : memref<!tpu.dma_semaphore, #tpu.memory_space<semaphore_mem>>)
    %c2_i32 = arith.constant 2 : i32
    %4 = tpu.memref_slice %arg13[%c2_i32] : memref<4x!tpu.dma_semaphore, #tpu.memory_space<semaphore_mem>> -> memref<1x!tpu.dma_semaphore, #tpu.memory_space<semaphore_mem>>
    %5 = tpu.memref_squeeze %4 : memref<1x!tpu.dma_semaphore, #tpu.memory_space<semaphore_mem>> -> memref<!tpu.dma_semaphore, #tpu.memory_space<semaphore_mem>>
    tpu.enqueue_dma source(%arg6 : memref<1024x1024xbf16, #tpu.memory_space<any>>) target(%arg11 : memref<1024x1024xbf16, #tpu.memory_space<vmem>>) target_semaphore(%5 : memref<!tpu.dma_semaphore, #tpu.memory_space<semaphore_mem>>)
    %c3_i32 = arith.constant 3 : i32
    %6 = tpu.memref_slice %arg13[%c3_i32] : memref<4x!tpu.dma_semaphore, #tpu.memory_space<semaphore_mem>> -> memref<1x!tpu.dma_semaphore, #tpu.memory_space<semaphore_mem>>
    %7 = tpu.memref_squeeze %6 : memref<1x!tpu.dma_semaphore, #tpu.memory_space<semaphore_mem>> -> memref<!tpu.dma_semaphore, #tpu.memory_space<semaphore_mem>>
    tpu.enqueue_dma source(%arg7 : memref<1024x1408xbf16, #tpu.memory_space<any>>) target(%arg12 : memref<1024x1408xbf16, #tpu.memory_space<vmem>>) target_semaphore(%7 : memref<!tpu.dma_semaphore, #tpu.memory_space<semaphore_mem>>)
    %c0 = arith.constant 0 : index
    %c0_0 = arith.constant 0 : index
    %8 = vector.load %arg0[%c0, %c0_0] : memref<8x2048xf32, #tpu.memory_space<vmem>>, vector<8x2048xf32>
    %9 = arith.truncf %8 : vector<8x2048xf32> to vector<8x2048xbf16>
    %c0_i32_1 = arith.constant 0 : i32
    %10 = tpu.memref_slice %arg13[%c0_i32_1] : memref<4x!tpu.dma_semaphore, #tpu.memory_space<semaphore_mem>> -> memref<1x!tpu.dma_semaphore, #tpu.memory_space<semaphore_mem>>
    %11 = tpu.memref_squeeze %10 : memref<1x!tpu.dma_semaphore, #tpu.memory_space<semaphore_mem>> -> memref<!tpu.dma_semaphore, #tpu.memory_space<semaphore_mem>>
    tpu.wait_dma2 semaphore(%11 : memref<!tpu.dma_semaphore, #tpu.memory_space<semaphore_mem>>) src(%arg4 : memref<2048x1024xbf16, #tpu.memory_space<any>>) dst(%arg9 : memref<2048x1024xbf16, #tpu.memory_space<vmem>>)
    %c0_2 = arith.constant 0 : index
    %c0_3 = arith.constant 0 : index
    %12 = vector.load %arg9[%c0_2, %c0_3] : memref<2048x1024xbf16, #tpu.memory_space<vmem>>, vector<2048x1024xbf16>
    %cst = arith.constant dense<0.000000e+00> : vector<8x1024xf32>
    %13 = tpu.matmul %9, %12, %cst {dimension_numbers = #tpu.dot_dimension_numbers<[1], [0], [0], [1], [0, 0, 1, 1], [], []>} : vector<8x2048xbf16>, vector<2048x1024xbf16>, vector<8x1024xf32> -> vector<8x1024xf32>
    %c0_4 = arith.constant 0 : index
    %c0_5 = arith.constant 0 : index
    %14 = vector.load %arg1[%c0_4, %c0_5] : memref<1x1024xf32, #tpu.memory_space<vmem>>, vector<1x1024xf32>
    %15 = vector.broadcast %14 : vector<1x1024xf32> to vector<8x1024xf32>
    %16 = arith.addf %13, %15 : vector<8x1024xf32>
    %cst_6 = arith.constant 0.000000e+00 : f32
    %17 = vector.broadcast %cst_6 : f32 to vector<8x1024xf32>
    %18 = arith.maximumf %16, %17 : vector<8x1024xf32>
    %19 = arith.truncf %18 : vector<8x1024xf32> to vector<8x1024xbf16>
    %c1_i32_7 = arith.constant 1 : i32
    %20 = tpu.memref_slice %arg13[%c1_i32_7] : memref<4x!tpu.dma_semaphore, #tpu.memory_space<semaphore_mem>> -> memref<1x!tpu.dma_semaphore, #tpu.memory_space<semaphore_mem>>
    %21 = tpu.memref_squeeze %20 : memref<1x!tpu.dma_semaphore, #tpu.memory_space<semaphore_mem>> -> memref<!tpu.dma_semaphore, #tpu.memory_space<semaphore_mem>>
    tpu.wait_dma2 semaphore(%21 : memref<!tpu.dma_semaphore, #tpu.memory_space<semaphore_mem>>) src(%arg5 : memref<1024x1024xbf16, #tpu.memory_space<any>>) dst(%arg10 : memref<1024x1024xbf16, #tpu.memory_space<vmem>>)
    %c0_8 = arith.constant 0 : index
    %c0_9 = arith.constant 0 : index
    %22 = vector.load %arg10[%c0_8, %c0_9] : memref<1024x1024xbf16, #tpu.memory_space<vmem>>, vector<1024x1024xbf16>
    %cst_10 = arith.constant dense<0.000000e+00> : vector<8x1024xf32>
    %23 = tpu.matmul %19, %22, %cst_10 {dimension_numbers = #tpu.dot_dimension_numbers<[1], [0], [0], [1], [0, 0, 1, 1], [], []>} : vector<8x1024xbf16>, vector<1024x1024xbf16>, vector<8x1024xf32> -> vector<8x1024xf32>
    %c0_11 = arith.constant 0 : index
    %c0_12 = arith.constant 0 : index
    %24 = vector.load %arg2[%c0_11, %c0_12] : memref<1x1024xf32, #tpu.memory_space<vmem>>, vector<1x1024xf32>
    %25 = vector.broadcast %24 : vector<1x1024xf32> to vector<8x1024xf32>
    %26 = arith.addf %23, %25 : vector<8x1024xf32>
    %cst_13 = arith.constant 0.000000e+00 : f32
    %27 = vector.broadcast %cst_13 : f32 to vector<8x1024xf32>
    %28 = arith.maximumf %26, %27 : vector<8x1024xf32>
    %29 = arith.truncf %28 : vector<8x1024xf32> to vector<8x1024xbf16>
    %c2_i32_14 = arith.constant 2 : i32
    %30 = tpu.memref_slice %arg13[%c2_i32_14] : memref<4x!tpu.dma_semaphore, #tpu.memory_space<semaphore_mem>> -> memref<1x!tpu.dma_semaphore, #tpu.memory_space<semaphore_mem>>
    %31 = tpu.memref_squeeze %30 : memref<1x!tpu.dma_semaphore, #tpu.memory_space<semaphore_mem>> -> memref<!tpu.dma_semaphore, #tpu.memory_space<semaphore_mem>>
    tpu.wait_dma2 semaphore(%31 : memref<!tpu.dma_semaphore, #tpu.memory_space<semaphore_mem>>) src(%arg6 : memref<1024x1024xbf16, #tpu.memory_space<any>>) dst(%arg11 : memref<1024x1024xbf16, #tpu.memory_space<vmem>>)
    %c0_15 = arith.constant 0 : index
    %c0_16 = arith.constant 0 : index
    %32 = vector.load %arg11[%c0_15, %c0_16] : memref<1024x1024xbf16, #tpu.memory_space<vmem>>, vector<1024x1024xbf16>
    %cst_17 = arith.constant dense<0.000000e+00> : vector<8x1024xf32>
    %33 = tpu.matmul %29, %32, %cst_17 {dimension_numbers = #tpu.dot_dimension_numbers<[1], [0], [0], [1], [0, 0, 1, 1], [], []>} : vector<8x1024xbf16>, vector<1024x1024xbf16>, vector<8x1024xf32> -> vector<8x1024xf32>
    %c0_18 = arith.constant 0 : index
    %c0_19 = arith.constant 0 : index
    %34 = vector.load %arg3[%c0_18, %c0_19] : memref<1x1024xf32, #tpu.memory_space<vmem>>, vector<1x1024xf32>
    %35 = vector.broadcast %34 : vector<1x1024xf32> to vector<8x1024xf32>
    %36 = arith.addf %33, %35 : vector<8x1024xf32>
    %cst_20 = arith.constant 0.000000e+00 : f32
    %37 = vector.broadcast %cst_20 : f32 to vector<8x1024xf32>
    %38 = arith.maximumf %36, %37 : vector<8x1024xf32>
    %39 = arith.truncf %38 : vector<8x1024xf32> to vector<8x1024xbf16>
    %c3_i32_21 = arith.constant 3 : i32
    %40 = tpu.memref_slice %arg13[%c3_i32_21] : memref<4x!tpu.dma_semaphore, #tpu.memory_space<semaphore_mem>> -> memref<1x!tpu.dma_semaphore, #tpu.memory_space<semaphore_mem>>
    %41 = tpu.memref_squeeze %40 : memref<1x!tpu.dma_semaphore, #tpu.memory_space<semaphore_mem>> -> memref<!tpu.dma_semaphore, #tpu.memory_space<semaphore_mem>>
    tpu.wait_dma2 semaphore(%41 : memref<!tpu.dma_semaphore, #tpu.memory_space<semaphore_mem>>) src(%arg7 : memref<1024x1408xbf16, #tpu.memory_space<any>>) dst(%arg12 : memref<1024x1408xbf16, #tpu.memory_space<vmem>>)
    %c0_22 = arith.constant 0 : index
    %c0_23 = arith.constant 0 : index
    %42 = vector.load %arg12[%c0_22, %c0_23] : memref<1024x1408xbf16, #tpu.memory_space<vmem>>, vector<1024x1408xbf16>
    %cst_24 = arith.constant dense<0.000000e+00> : vector<8x1408xf32>
    %43 = tpu.matmul %39, %42, %cst_24 {dimension_numbers = #tpu.dot_dimension_numbers<[1], [0], [0], [1], [0, 0, 1, 1], [], []>} : vector<8x1024xbf16>, vector<1024x1408xbf16>, vector<8x1408xf32> -> vector<8x1408xf32>
    %c0_25 = arith.constant 0 : index
    %c0_26 = arith.constant 0 : index
    %44 = vector.load %arg8[%c0_25, %c0_26] : memref<8x1408xf32, #tpu.memory_space<vmem>>, vector<8x1408xf32>
    tpu.vector_store %arg8[%c0_25, %c0_26], %43 {strides = array<i32>} : memref<8x1408xf32, #tpu.memory_space<vmem>>, vector<8x1408xf32>,
    return
  }
}

</mosaic_0001>

<bundles_post_ra>
// kernel: tpu_custom_call.1
= control target key start
LH: loop header
LB: loop body
LE: loop exit
PB: predicated region body
PF: predicated region fallthrough
CT: control target
= control target key end

     0   :  { %13 = vsyncpa [#allocation8], 0  ;;  %s7904_s0 = inlined_call_operand.hbm [shape: f32[8,2048], index: 0, kind: input, shape index: {}]   ;;  %s7905_s1 = inlined_call_operand.hbm [shape: f32[1,1024], index: 1, kind: input, shape index: {}]   ;;  %s7906_s2 = inlined_call_operand.hbm [shape: f32[1,1024], index: 2, kind: input, shape index: {}]   ;;  %s7907_s3 = inlined_call_operand.hbm [shape: f32[1,1024], index: 3, kind: input, shape index: {}]   ;;  %s7908_s4 = inlined_call_operand.hbm [shape: bf16[2048,1024], index: 4, kind: input, shape index: {}]   ;;  %s7909_s5 = inlined_call_operand.hbm [shape: bf16[1024,1024], index: 5, kind: input, shape index: {}]   ;;  %s7910_s6 = inlined_call_operand.hbm [shape: bf16[1024,1024], index: 6, kind: input, shape index: {}]   ;;  %s7911_s7 = inlined_call_operand.hbm [shape: bf16[1024,1408], index: 7, kind: input, shape index: {}]   ;;  %s7912_s8 = inlined_call_operand.hbm [shape: f32[8,1408], index: 8, kind: output, shape index: {}]  }
   0x1   :  { %14 = vsyncpa [#allocation11], 0 }
   0x2   :  { %15 = vsyncpa [#allocation14], 0 }
   0x3   :  { %16 = vsyncpa [#allocation9], 0  ;;  %s7384_s27 = smov [#allocation10]   ;;  %s7385_s29 = smov [#allocation7]  }
   0x4   :  { %s33_s28 = sshll.u32 %s7384_s27, 4  ;;  %s23_s30 = sshll.u32 %s7385_s29, 4  ;;  %s34_s28 = int_to_ptr.vmem [resolvable:$true] %s33_s28  ;;  %s24_s30 = int_to_ptr.vmem [resolvable:$true] %s23_s30 }
   0x5   :  { %s7258_s11 = scalar_lea.hbm %s7905_s1, 128 }
   0x6   :  { %p7259_p0 = scmp.ne.s32.totalorder %s7905_s1, %s7258_s11  ;;  %p7262_p1 = scmp.lt.u32.totalorder %s7258_s11, %s7905_s1 }
   0x8   :  { %p7264_p2 = pnand %p7262_p1, %p7259_p0 }
   0xa   :  { %7267 = shalt.err (!%p7264_p2)
}
   0xb   :  { %s7268_s16 = scalar_lea.vmem %s34_s28, 128  ;;  %p7273_p4 = scmp.lt.s32.totalorder %s34_s28, %s34_s28 }
   0xc   :  { %p7269_p3 = scmp.ne.s32.totalorder %s34_s28, %s7268_s16  ;;  %p7274_p5 = scmp.lt.s32.totalorder %s7268_s16, %s7268_s16 }
   0xe   :  { %p7275_p6 = por %p7274_p5, %p7273_p4 }
  0x10   :  { %p7276_p7 = pnand %p7275_p6, %p7269_p3 }
  0x12   :  { %7279 = shalt.err (!%p7276_p7)
}
  0x13   :  { %36 = dma.hbm_to_vmem [thread:$0]  %s7905_s1, 128, %s34_s28, [#allocation11]  }
  0x14   :  { %s7280_s21 = scalar_lea.hbm %s7904_s0, 2048 }
  0x15   :  { %p7281_p8 = scmp.ne.s32.totalorder %s7904_s0, %s7280_s21  ;;  %p7284_p9 = scmp.lt.u32.totalorder %s7280_s21, %s7904_s0 }
  0x17   :  { %p7286_p10 = pnand %p7284_p9, %p7281_p8 }
  0x19   :  { %7289 = shalt.err (!%p7286_p10)
}
  0x1a   :  { %s7290_s26 = scalar_lea.vmem %s24_s30, 2048  ;;  %p7295_p12 = scmp.lt.s32.totalorder %s24_s30, %s24_s30 }
  0x1b   :  { %p7291_p11 = scmp.ne.s32.totalorder %s24_s30, %s7290_s26  ;;  %p7296_p13 = scmp.lt.s32.totalorder %s7290_s26, %s7290_s26 }
  0x1d   :  { %p7297_p0 = por %p7296_p13, %p7295_p12 }
  0x1f   :  { %p7298_p1 = pnand %p7297_p0, %p7291_p11 }
  0x21   :  { %7301 = shalt.err (!%p7298_p1)
}
  0x22   :  { %26 = dma.hbm_to_vmem [thread:$0]  %s7904_s0, 2048, %s24_s30, [#allocation8]  }
  0x23   :  { %s7386_s28 = smov [#allocation12]   ;;  %s7387_s9 = smov [#allocation13]  }
  0x24   :  { %s43_s29 = sshll.u32 %s7386_s28, 4  ;;  %s53_s10 = sshll.u32 %s7387_s9, 4  ;;  %s44_s29 = int_to_ptr.vmem [resolvable:$true] %s43_s29  ;;  %s54_s10 = int_to_ptr.vmem [resolvable:$true] %s53_s10 }
  0x25   :  { %s7302_s13 = scalar_lea.hbm %s7906_s2, 128 }
  0x26   :  { %p7303_p2 = scmp.ne.s32.totalorder %s7906_s2, %s7302_s13  ;;  %p7306_p3 = scmp.lt.u32.totalorder %s7302_s13, %s7906_s2 }
  0x28   :  { %p7308_p4 = pnand %p7306_p3, %p7303_p2 }
  0x2a   :  { %7311 = shalt.err (!%p7308_p4)
}
  0x2b   :  { %s7312_s0 = scalar_lea.vmem %s44_s29, 128  ;;  %p7317_p6 = scmp.lt.s32.totalorder %s44_s29, %s44_s29 }
  0x2c   :  { %p7313_p5 = scmp.ne.s32.totalorder %s44_s29, %s7312_s0  ;;  %p7318_p7 = scmp.lt.s32.totalorder %s7312_s0, %s7312_s0 }
  0x2e   :  { %p7319_p8 = por %p7318_p7, %p7317_p6 }
  0x30   :  { %p7320_p9 = pnand %p7319_p8, %p7313_p5 }
  0x32   :  { %7323 = shalt.err (!%p7320_p9)
}
  0x33   :  { %46 = dma.hbm_to_vmem [thread:$0]  %s7906_s2, 128, %s44_s29, [#allocation11]  }
  0x34   :  { %s7324_s21 = scalar_lea.hbm %s7907_s3, 128 }
  0x35   :  { %p7325_p10 = scmp.ne.s32.totalorder %s7907_s3, %s7324_s21  ;;  %p7328_p11 = scmp.lt.u32.totalorder %s7324_s21, %s7907_s3 }
  0x37   :  { %p7330_p12 = pnand %p7328_p11, %p7325_p10 }
  0x39   :  { %7333 = shalt.err (!%p7330_p12)
}
  0x3a   :  { %s7334_s26 = scalar_lea.vmem %s54_s10, 128  ;;  %p7339_p0 = scmp.lt.s32.totalorder %s54_s10, %s54_s10 }
  0x3b   :  { %p7335_p13 = scmp.ne.s32.totalorder %s54_s10, %s7334_s26  ;;  %p7340_p1 = scmp.lt.s32.totalorder %s7334_s26, %s7334_s26 }
  0x3d   :  { %p7341_p2 = por %p7340_p1, %p7339_p0 }
  0x3f   :  { %p7342_p3 = pnand %p7341_p2, %p7335_p13 }
  0x41   :  { %7345 = shalt.err (!%p7342_p3)
}
  0x42   :  { %56 = dma.hbm_to_vmem [thread:$0]  %s7907_s3, 128, %s54_s10, [#allocation14]  }
  0x43   :  { %7368 = dma.done.wait [#allocation8], 2048  }
  0x44   :  { %7369 = vsyncadd [#allocation8], 4294965248 }
  0x45   :  { %7370 = dma.done.wait [#allocation11], 256  }
  0x46   :  { %7371 = vsyncadd [#allocation11], 4294967040 }
  0x47   :  { %7372 = dma.done.wait [#allocation14], 128  }
  0x48   :  { %7373 = vsyncadd [#allocation14], 4294967168  ;;  %s74_s27 = sld [smem:[#allocation0]]   ;;  %s7388_s28 = smov 1024  }
  0x49   :  { %86 = sst [smem:[#allocation17]] %s7388_s28  ;;  %s7389_s29 = smov 64  }
  0x4a   :  { %88 = sst [smem:[#allocation17 + $0x1]] %s7388_s28  ;;  %s7390_s9 = smov [#allocation2]  }
  0x4b   :  { %92 = sst [smem:[#allocation17 + $0x3]] %s7389_s29  ;;  %s82_s11 = sshll.u32 %s7390_s9, 4  ;;  %s83_s11 = int_to_ptr.vmem [resolvable:$true] %s82_s11 }
  0x4c   :  { %100 = sst [smem:[#allocation17 + $0x7]] %s7389_s29  ;;  %s7391_s3 = smov 8  }
  0x4d   :  { %90 = sst [smem:[#allocation17 + $0x2]] %s7391_s3  ;;  %s7392_s12 = smov 128  }
  0x4e   :  { %s6840_s10 = sshll.u32 %s74_s27, 26  ;;  %94 = sst [smem:[#allocation17 + $0x4]] %s7392_s12 }
  0x4f   :  { %s7510_s13 = sadd.s32 134217728, %s6840_s10  ;;  %s7393_s14 = smov 2  }
  0x50   :  { %96 = sst [smem:[#allocation17 + $0x5]] %s7393_s14  ;;  %s7394_s15 = smov 512  }
  0x51   :  { %98 = sst [smem:[#allocation17 + $0x6]] %s7394_s15  ;;  %s7395_s16 = smov 4  }
  0x52   :  { %102 = sst [smem:[#allocation17 + $0x8]] %s7395_s16  ;;  %s7396_s17 = smov [#allocation6]  }
  0x53   :  { %s7397_s0 = smov [#allocation16]   ;;  %s7398_s19 = smov [#allocation3]  }
  0x54   :  { %104 = dma.general %s7908_s4, 131072, %s83_s11, %s7396_s17, %s7397_s0, [#allocation17], %s7510_s13, 0  }
  0x55   :  { %121 = sst [smem:[#allocation19]] %s7388_s28  ;;  %s117_s20 = sshll.u32 %s7398_s19, 4  ;;  %s118_s20 = int_to_ptr.vmem [resolvable:$true] %s117_s20 }
  0x56   :  { %123 = sst [smem:[#allocation19 + $0x1]] %s7388_s28  ;;  %s7399_s4 = smov [#allocation6 + $0x1]  }
  0x57   :  { %125 = sst [smem:[#allocation19 + $0x2]] %s7391_s3  ;;  %s7400_s21 = smov [#allocation18]  }
  0x58   :  { %127 = sst [smem:[#allocation19 + $0x3]] %s7389_s29  ;;  %s7401_s24 = smov [#allocation4]  }
  0x59   :  { %129 = sst [smem:[#allocation19 + $0x4]] %s7392_s12  ;;  %s152_s25 = sshll.u32 %s7401_s24, 4  ;;  %s153_s25 = int_to_ptr.vmem [resolvable:$true] %s152_s25 }
  0x5a   :  { %131 = sst [smem:[#allocation19 + $0x5]] %s7393_s14  ;;  %s7403_s26 = smov [#allocation20]  }
  0x5b   :  { %133 = sst [smem:[#allocation19 + $0x6]] %s7394_s15  ;;  %s7404_s27 = smov 1408  }
  0x5c   :  { %135 = sst [smem:[#allocation19 + $0x7]] %s7389_s29  ;;  %s7406_s11 = smov 11  }
  0x5d   :  { %137 = sst [smem:[#allocation19 + $0x8]] %s7395_s16  ;;  %s7409_s10 = smov [#allocation22]  }
  0x5e   :  { %139 = dma.general %s7909_s5, 65536, %s118_s20, %s7399_s4, %s7400_s21, [#allocation19], %s7510_s13, 0  }
  0x5f   :  { %156 = sst [smem:[#allocation21]] %s7388_s28  ;;  %s7402_s5 = smov [#allocation6 + $0x2]  }
  0x60   :  { %158 = sst [smem:[#allocation21 + $0x1]] %s7388_s28  ;;  %s7405_s28 = smov [#allocation5]  }
  0x61   :  { %160 = sst [smem:[#allocation21 + $0x2]] %s7391_s3  ;;  %s187_s9 = sshll.u32 %s7405_s28, 4  ;;  %s188_s9 = int_to_ptr.vmem [resolvable:$true] %s187_s9 }
  0x62   :  { %162 = sst [smem:[#allocation21 + $0x3]] %s7389_s29  ;;  %s7407_s3 = smov 704  }
  0x63   :  { %164 = sst [smem:[#allocation21 + $0x4]] %s7392_s12 }
  0x64   :  { %166 = sst [smem:[#allocation21 + $0x5]] %s7393_s14 }
  0x65   :  { %168 = sst [smem:[#allocation21 + $0x6]] %s7394_s15 }
  0x66   :  { %170 = sst [smem:[#allocation21 + $0x7]] %s7389_s29 }
  0x67   :  { %172 = sst [smem:[#allocation21 + $0x8]] %s7395_s16 }
  0x68   :  { %174 = dma.general %s7910_s6, 65536, %s153_s25, %s7402_s5, %s7403_s26, [#allocation21], %s7510_s13, 0  }
  0x69   :  { %191 = sst [smem:[#allocation23]] %s7404_s27  ;;  %s7408_s6 = smov [#allocation6 + $0x3]  }
  0x6a   :  { %193 = sst [smem:[#allocation23 + $0x1]] %s7404_s27 }
  0x6b   :  { %195 = sst [smem:[#allocation23 + $0x2]] %s7406_s11 }
  0x6c   :  { %197 = sst [smem:[#allocation23 + $0x3]] %s7389_s29 }
  0x6d   :  { %199 = sst [smem:[#allocation23 + $0x4]] %s7392_s12 }
  0x6e   :  { %201 = sst [smem:[#allocation23 + $0x5]] %s7393_s14 }
  0x6f   :  { %203 = sst [smem:[#allocation23 + $0x6]] %s7407_s3 }
  0x70   :  { %205 = sst [smem:[#allocation23 + $0x7]] %s7389_s29 }
  0x71   :  { %207 = sst [smem:[#allocation23 + $0x8]] %s7395_s16 }
  0x72   :  { %209 = dma.general %s7911_s7, 90112, %s188_s9, %s7408_s6, %s7409_s10, [#allocation23], %s7510_s13, 0  }
  0x73   :  { %v210_v0 = vld [vmem:[#allocation7] sm:$0xff]  ;;  %v211_v1 = vld [vmem:[#allocation7 + $0x8] sm:$0xff]  ;;  %v212_v2 = vld [vmem:[#allocation7 + $0x10] sm:$0xff] }
  0x74   :  { %v213_v3 = vld [vmem:[#allocation7 + $0x18] sm:$0xff]  ;;  %v214_v4 = vld [vmem:[#allocation7 + $0x20] sm:$0xff]  ;;  %v215_v5 = vld [vmem:[#allocation7 + $0x28] sm:$0xff]  ;;  %v7554_v6 = vpack.c.bf16 %v210_v0, %v210_v0  ;;  %v7556_v7 = vpack.c.bf16 %v211_v1, %v211_v1  ;;  %v7558_v8 = vpack.c.bf16 %v212_v2, %v212_v2 }
  0x75   :  { %v216_v9 = vld [vmem:[#allocation7 + $0x30] sm:$0xff]  ;;  %v217_v10 = vld [vmem:[#allocation7 + $0x38] sm:$0xff]  ;;  %v218_v11 = vld [vmem:[#allocation7 + $0x40] sm:$0xff]  ;;  %v7560_v12 = vpack.c.bf16 %v213_v3, %v213_v3  ;;  %v7562_v13 = vpack.c.bf16 %v214_v4, %v214_v4  ;;  %v7564_v14 = vpack.c.bf16 %v215_v5, %v215_v5 }
  0x76   :  { %v219_v15 = vld [vmem:[#allocation7 + $0x48] sm:$0xff]  ;;  %v220_v16 = vld [vmem:[#allocation7 + $0x50] sm:$0xff]  ;;  %v221_v17 = vld [vmem:[#allocation7 + $0x58] sm:$0xff]  ;;  %v7566_v18 = vpack.c.bf16 %v216_v9, %v216_v9  ;;  %v7568_v19 = vpack.c.bf16 %v217_v10, %v217_v10  ;;  %v7570_v20 = vpack.c.bf16 %v218_v11, %v218_v11 }
  0x77   :  { %v222_v21 = vld [vmem:[#allocation7 + $0x60] sm:$0xff]  ;;  %v223_v22 = vld [vmem:[#allocation7 + $0x68] sm:$0xff]  ;;  %v224_v23 = vld [vmem:[#allocation7 + $0x70] sm:$0xff]  ;;  %v7572_v24 = vpack.c.bf16 %v219_v15, %v219_v15  ;;  %v7574_v25 = vpack.c.bf16 %v220_v16, %v220_v16  ;;  %v7576_v26 = vpack.c.bf16 %v221_v17, %v221_v17 }
  0x78   :  { %v225_v27 = vld [vmem:[#allocation7 + $0x78] sm:$0xff]  ;;  %v7578_v28 = vpack.c.bf16 %v222_v21, %v222_v21  ;;  %v7580_v29 = vpack.c.bf16 %v223_v22, %v223_v22  ;;  %v7582_v30 = vpack.c.bf16 %v224_v23, %v224_v23 }
  0x79   :  { %v7584_v31 = vpack.c.bf16 %v225_v27, %v225_v27 }
  0x7a   :  { %7374 = dma.done.wait [#allocation6], 131072 }
  0x7b   :  { %7375 = vsyncadd [#allocation6], 4294836224  ;;  %1344 = vmatprep.mubr.bf16.mxu1 %v7556_v7  ;;  %1385 = vmatprep.mubr.bf16.mxu0 %v7560_v12  ;;  %v247_v32 = vld [vmem:[#allocation2 + $0x8] sm:$0xff]  ;;  %v246_v34 = vld [vmem:[#allocation2] sm:$0xff] }
  0x7c   :  { %v375_v33 = vld [vmem:[#allocation2 + $0x408] sm:$0xff]  ;;  %1312 = vmatprep.subr.bf16.mxu1 %v247_v32  ;;  %v374_v35 = vld [vmem:[#allocation2 + $0x400] sm:$0xff] }
  0x7d   :  { %1353 = vmatprep.subr.bf16.mxu0 %v375_v33  ;;  %v255_v36 = vld [vmem:[#allocation2 + $0x48] sm:$0xff]  ;;  %1313 = vmatpush1.bf16.msra.mxu1 %v246_v34  ;;  %v254_v38 = vld [vmem:[#allocation2 + $0x40] sm:$0xff] }
  0x7e   :  { %v383_v37 = vld [vmem:[#allocation2 + $0x448] sm:$0xff]  ;;  %1354 = vmatpush1.bf16.msra.mxu0 %v374_v35  ;;  %1314 = vmatprep.subr.bf16.mxu1 %v255_v36  ;;  %v382_v39 = vld [vmem:[#allocation2 + $0x440] sm:$0xff] }
  0x7f   :  { %1355 = vmatprep.subr.bf16.mxu0 %v383_v37  ;;  %v263_v40 = vld [vmem:[#allocation2 + $0x88] sm:$0xff]  ;;  %v262_v42 = vld [vmem:[#allocation2 + $0x80] sm:$0xff] }
  0x80   :  { %v391_v41 = vld [vmem:[#allocation2 + $0x488] sm:$0xff]  ;;  %v390_v43 = vld [vmem:[#allocation2 + $0x480] sm:$0xff] }
  0x81   :  { %1315 = vmatpush1.bf16.msra.mxu1 %v254_v38  ;;  %v271_v44 = vld [vmem:[#allocation2 + $0xc8] sm:$0xff]  ;;  %v270_v46 = vld [vmem:[#allocation2 + $0xc0] sm:$0xff] }
  0x82   :  { %1356 = vmatpush1.bf16.msra.mxu0 %v382_v39  ;;  %1316 = vmatprep.subr.bf16.mxu1 %v263_v40  ;;  %v399_v45 = vld [vmem:[#allocation2 + $0x4c8] sm:$0xff]  ;;  %v398_v47 = vld [vmem:[#allocation2 + $0x4c0] sm:$0xff] }
  0x83   :  { %1357 = vmatprep.subr.bf16.mxu0 %v391_v41  ;;  %v279_v48 = vld [vmem:[#allocation2 + $0x108] sm:$0xff]  ;;  %v278_v50 = vld [vmem:[#allocation2 + $0x100] sm:$0xff] }
  0x84   :  { %v407_v49 = vld [vmem:[#allocation2 + $0x508] sm:$0xff]  ;;  %v406_v51 = vld [vmem:[#allocation2 + $0x500] sm:$0xff] }
  0x85   :  { %1317 = vmatpush1.bf16.msra.mxu1 %v262_v42  ;;  %v287_v52 = vld [vmem:[#allocation2 + $0x148] sm:$0xff]  ;;  %v286_v54 = vld [vmem:[#allocation2 + $0x140] sm:$0xff] }
  0x86   :  { %1358 = vmatpush1.bf16.msra.mxu0 %v390_v43  ;;  %1318 = vmatprep.subr.bf16.mxu1 %v271_v44  ;;  %v415_v53 = vld [vmem:[#allocation2 + $0x548] sm:$0xff]  ;;  %v414_v55 = vld [vmem:[#allocation2 + $0x540] sm:$0xff] }
  0x87   :  { %1359 = vmatprep.subr.bf16.mxu0 %v399_v45  ;;  %v295_v56 = vld [vmem:[#allocation2 + $0x188] sm:$0xff]  ;;  %v294_v58 = vld [vmem:[#allocation2 + $0x180] sm:$0xff] }
  0x88   :  { %v423_v57 = vld [vmem:[#allocation2 + $0x588] sm:$0xff]  ;;  %v422_v59 = vld [vmem:[#allocation2 + $0x580] sm:$0xff] }
  0x89   :  { %1319 = vmatpush1.bf16.msra.mxu1 %v270_v46  ;;  %v303_v60 = vld [vmem:[#allocation2 + $0x1c8] sm:$0xff]  ;;  %v302_v62 = vld [vmem:[#allocation2 + $0x1c0] sm:$0xff] }
  0x8a   :  { %1360 = vmatpush1.bf16.msra.mxu0 %v398_v47  ;;  %1320 = vmatprep.subr.bf16.mxu1 %v279_v48  ;;  %v431_v61 = vld [vmem:[#allocation2 + $0x5c8] sm:$0xff]  ;;  %v430_v63 = vld [vmem:[#allocation2 + $0x5c0] sm:$0xff] }
  0x8b   :  { %1361 = vmatprep.subr.bf16.mxu0 %v407_v49  ;;  %v311_v0 = vld [vmem:[#allocation2 + $0x208] sm:$0xff]  ;;  %v310_v2 = vld [vmem:[#allocation2 + $0x200] sm:$0xff]  ;;  %v249_v49 = vld [vmem:[#allocation2 + $0x18] sm:$0xff] }
  0x8c   :  { %v439_v1 = vld [vmem:[#allocation2 + $0x608] sm:$0xff]  ;;  %v438_v3 = vld [vmem:[#allocation2 + $0x600] sm:$0xff] }
  0x8d   :  { %1321 = vmatpush1.bf16.msra.mxu1 %v278_v50  ;;  %v319_v4 = vld [vmem:[#allocation2 + $0x248] sm:$0xff]  ;;  %v318_v9 = vld [vmem:[#allocation2 + $0x240] sm:$0xff] }
  0x8e   :  { %1362 = vmatpush1.bf16.msra.mxu0 %v406_v51  ;;  %1322 = vmatprep.subr.bf16.mxu1 %v287_v52  ;;  %v447_v5 = vld [vmem:[#allocation2 + $0x648] sm:$0xff]  ;;  %v446_v10 = vld [vmem:[#allocation2 + $0x640] sm:$0xff]  ;;  %v248_v51 = vld [vmem:[#allocation2 + $0x10] sm:$0xff] }
  0x8f   :  { %1363 = vmatprep.subr.bf16.mxu0 %v415_v53  ;;  %v327_v11 = vld [vmem:[#allocation2 + $0x288] sm:$0xff]  ;;  %v326_v16 = vld [vmem:[#allocation2 + $0x280] sm:$0xff]  ;;  %v257_v53 = vld [vmem:[#allocation2 + $0x58] sm:$0xff] }
  0x90   :  { %v455_v15 = vld [vmem:[#allocation2 + $0x688] sm:$0xff]  ;;  %v454_v17 = vld [vmem:[#allocation2 + $0x680] sm:$0xff] }
  0x91   :  { %1323 = vmatpush1.bf16.msra.mxu1 %v286_v54  ;;  %v335_v21 = vld [vmem:[#allocation2 + $0x2c8] sm:$0xff]  ;;  %v334_v23 = vld [vmem:[#allocation2 + $0x2c0] sm:$0xff] }
  0x92   :  { %1364 = vmatpush1.bf16.msra.mxu0 %v414_v55  ;;  %1324 = vmatprep.subr.bf16.mxu1 %v295_v56  ;;  %v463_v22 = vld [vmem:[#allocation2 + $0x6c8] sm:$0xff]  ;;  %v462_v27 = vld [vmem:[#allocation2 + $0x6c0] sm:$0xff]  ;;  %v256_v55 = vld [vmem:[#allocation2 + $0x50] sm:$0xff] }
  0x93   :  { %1365 = vmatprep.subr.bf16.mxu0 %v423_v57  ;;  %v343_v32 = vld [vmem:[#allocation2 + $0x308] sm:$0xff]  ;;  %v342_v34 = vld [vmem:[#allocation2 + $0x300] sm:$0xff]  ;;  %v265_v57 = vld [vmem:[#allocation2 + $0x98] sm:$0xff] }
  0x94   :  { %v471_v33 = vld [vmem:[#allocation2 + $0x708] sm:$0xff]  ;;  %v470_v35 = vld [vmem:[#allocation2 + $0x700] sm:$0xff] }
  0x95   :  { %1325 = vmatpush1.bf16.msra.mxu1 %v294_v58  ;;  %v351_v36 = vld [vmem:[#allocation2 + $0x348] sm:$0xff]  ;;  %v350_v38 = vld [vmem:[#allocation2 + $0x340] sm:$0xff] }
  0x96   :  { %1366 = vmatpush1.bf16.msra.mxu0 %v422_v59  ;;  %1326 = vmatprep.subr.bf16.mxu1 %v303_v60  ;;  %v479_v37 = vld [vmem:[#allocation2 + $0x748] sm:$0xff]  ;;  %v478_v39 = vld [vmem:[#allocation2 + $0x740] sm:$0xff]  ;;  %v264_v59 = vld [vmem:[#allocation2 + $0x90] sm:$0xff] }
  0x97   :  { %1367 = vmatprep.subr.bf16.mxu0 %v431_v61  ;;  %v359_v40 = vld [vmem:[#allocation2 + $0x388] sm:$0xff]  ;;  %v358_v42 = vld [vmem:[#allocation2 + $0x380] sm:$0xff]  ;;  %v273_v61 = vld [vmem:[#allocation2 + $0xd8] sm:$0xff] }
  0x98   :  { %v487_v41 = vld [vmem:[#allocation2 + $0x788] sm:$0xff]  ;;  %v486_v43 = vld [vmem:[#allocation2 + $0x780] sm:$0xff] }
  0x99   :  { %1327 = vmatpush1.bf16.msra.mxu1 %v302_v62  ;;  %v367_v44 = vld [vmem:[#allocation2 + $0x3c8] sm:$0xff]  ;;  %v366_v46 = vld [vmem:[#allocation2 + $0x3c0] sm:$0xff] }
  0x9a   :  { %1368 = vmatpush1.bf16.msra.mxu0 %v430_v63  ;;  %1328 = vmatprep.subr.bf16.mxu1 %v311_v0  ;;  %v495_v45 = vld [vmem:[#allocation2 + $0x7c8] sm:$0xff]  ;;  %v494_v47 = vld [vmem:[#allocation2 + $0x7c0] sm:$0xff]  ;;  %v272_v63 = vld [vmem:[#allocation2 + $0xd0] sm:$0xff] }
  0x9b   :  { %1369 = vmatprep.subr.bf16.mxu0 %v439_v1  ;;  %v503_v48 = vld [vmem:[#allocation2 + $0x808] sm:$0xff]  ;;  %v502_v50 = vld [vmem:[#allocation2 + $0x800] sm:$0xff]  ;;  %v281_v1 = vld [vmem:[#allocation2 + $0x118] sm:$0xff] }
  0x9c   :  { %v511_v52 = vld [vmem:[#allocation2 + $0x848] sm:$0xff]  ;;  %v510_v54 = vld [vmem:[#allocation2 + $0x840] sm:$0xff] }
  0x9d   :  { %1329 = vmatpush1.bf16.msra.mxu1 %v310_v2  ;;  %v519_v56 = vld [vmem:[#allocation2 + $0x888] sm:$0xff]  ;;  %v518_v58 = vld [vmem:[#allocation2 + $0x880] sm:$0xff] }
  0x9e   :  { %1370 = vmatpush1.bf16.msra.mxu0 %v438_v3  ;;  %1330 = vmatprep.subr.bf16.mxu1 %v319_v4  ;;  %v527_v60 = vld [vmem:[#allocation2 + $0x8c8] sm:$0xff]  ;;  %v526_v62 = vld [vmem:[#allocation2 + $0x8c0] sm:$0xff]  ;;  %v280_v3 = vld [vmem:[#allocation2 + $0x110] sm:$0xff] }
  0x9f   :  { %1371 = vmatprep.subr.bf16.mxu0 %v447_v5  ;;  %v535_v0 = vld [vmem:[#allocation2 + $0x908] sm:$0xff]  ;;  %v534_v2 = vld [vmem:[#allocation2 + $0x900] sm:$0xff]  ;;  %v289_v5 = vld [vmem:[#allocation2 + $0x158] sm:$0xff] }
  0xa0   :  { %v543_v4 = vld [vmem:[#allocation2 + $0x948] sm:$0xff] }
  0xa1   :  { %1331 = vmatpush1.bf16.msra.mxu1 %v318_v9  ;;  %v542_v9 = vld [vmem:[#allocation2 + $0x940] sm:$0xff] }
  0xa2   :  { %1372 = vmatpush1.bf16.msra.mxu0 %v446_v10  ;;  %1332 = vmatprep.subr.bf16.mxu1 %v327_v11  ;;  %v288_v10 = vld [vmem:[#allocation2 + $0x150] sm:$0xff]  ;;  %v551_v11 = vld [vmem:[#allocation2 + $0x988] sm:$0xff] }
  0xa3   :  { %1373 = vmatprep.subr.bf16.mxu0 %v455_v15  ;;  %v297_v15 = vld [vmem:[#allocation2 + $0x198] sm:$0xff] }
  0xa5   :  { %1333 = vmatpush1.bf16.msra.mxu1 %v326_v16  ;;  %v550_v16 = vld [vmem:[#allocation2 + $0x980] sm:$0xff] }
  0xa6   :  { %1374 = vmatpush1.bf16.msra.mxu0 %v454_v17  ;;  %1334 = vmatprep.subr.bf16.mxu1 %v335_v21  ;;  %v296_v17 = vld [vmem:[#allocation2 + $0x190] sm:$0xff]  ;;  %v559_v21 = vld [vmem:[#allocation2 + $0x9c8] sm:$0xff] }
  0xa7   :  { %1375 = vmatprep.subr.bf16.mxu0 %v463_v22  ;;  %v305_v22 = vld [vmem:[#allocation2 + $0x1d8] sm:$0xff] }
  0xa9   :  { %1335 = vmatpush1.bf16.msra.mxu1 %v334_v23  ;;  %v558_v23 = vld [vmem:[#allocation2 + $0x9c0] sm:$0xff] }
  0xaa   :  { %1376 = vmatpush1.bf16.msra.mxu0 %v462_v27  ;;  %1336 = vmatprep.subr.bf16.mxu1 %v343_v32  ;;  %v304_v27 = vld [vmem:[#allocation2 + $0x1d0] sm:$0xff]  ;;  %v567_v32 = vld [vmem:[#allocation2 + $0xa08] sm:$0xff] }
  0xab   :  { %1377 = vmatprep.subr.bf16.mxu0 %v471_v33  ;;  %v313_v33 = vld [vmem:[#allocation2 + $0x218] sm:$0xff] }
  0xad   :  { %1337 = vmatpush1.bf16.msra.mxu1 %v342_v34  ;;  %v566_v34 = vld [vmem:[#allocation2 + $0xa00] sm:$0xff] }
  0xae   :  { %1378 = vmatpush1.bf16.msra.mxu0 %v470_v35  ;;  %1338 = vmatprep.subr.bf16.mxu1 %v351_v36  ;;  %v312_v35 = vld [vmem:[#allocation2 + $0x210] sm:$0xff]  ;;  %v575_v36 = vld [vmem:[#allocation2 + $0xa48] sm:$0xff] }
  0xaf   :  { %1379 = vmatprep.subr.bf16.mxu0 %v479_v37  ;;  %v321_v37 = vld [vmem:[#allocation2 + $0x258] sm:$0xff] }
  0xb1   :  { %1339 = vmatpush1.bf16.msra.mxu1 %v350_v38  ;;  %v574_v38 = vld [vmem:[#allocation2 + $0xa40] sm:$0xff] }
  0xb2   :  { %1380 = vmatpush1.bf16.msra.mxu0 %v478_v39  ;;  %1340 = vmatprep.subr.bf16.mxu1 %v359_v40  ;;  %v320_v39 = vld [vmem:[#allocation2 + $0x250] sm:$0xff]  ;;  %v583_v40 = vld [vmem:[#allocation2 + $0xa88] sm:$0xff] }
  0xb3   :  { %1381 = vmatprep.subr.bf16.mxu0 %v487_v41  ;;  %v329_v41 = vld [vmem:[#allocation2 + $0x298] sm:$0xff] }
  0xb5   :  { %1341 = vmatpush1.bf16.msra.mxu1 %v358_v42  ;;  %v582_v42 = vld [vmem:[#allocation2 + $0xa80] sm:$0xff] }
  0xb6   :  { %1382 = vmatpush1.bf16.msra.mxu0 %v486_v43  ;;  %1342 = vmatprep.subr.bf16.mxu1 %v367_v44  ;;  %v328_v43 = vld [vmem:[#allocation2 + $0x290] sm:$0xff]  ;;  %v591_v44 = vld [vmem:[#allocation2 + $0xac8] sm:$0xff] }
  0xb7   :  { %1383 = vmatprep.subr.bf16.mxu0 %v495_v45  ;;  %v337_v45 = vld [vmem:[#allocation2 + $0x2d8] sm:$0xff] }
  0xb9   :  { %1343 = vmatpush1.bf16.msra.mxu1 %v366_v46  ;;  %v590_v46 = vld [vmem:[#allocation2 + $0xac0] sm:$0xff] }
  0xba   :  { %1384 = vmatpush1.bf16.msra.mxu0 %v494_v47  ;;  %1640 = vmatprep.subr.bf16.mxu1 %v249_v49  ;;  %v336_v47 = vld [vmem:[#allocation2 + $0x2d0] sm:$0xff]  ;;  %v345_v49 = vld [vmem:[#allocation2 + $0x318] sm:$0xff] }
  0xbb   :  { %1394 = vmatprep.subr.bf16.mxu0 %v503_v48  ;;  %v599_v48 = vld [vmem:[#allocation2 + $0xb08] sm:$0xff] }
  0xbc   :  { %1345 = vmatmul.mubr.bf16.vlgmr.msra.gmra.mrb[0].mxu1 %v7554_v6 }
  0xbd   :  { %1386 = vmatmul.mubr.bf16.vlgmr.msra.gmra.mrb[0].mxu0 %v7558_v8  ;;  %1641 = vmatpush1.bf16.msra.mxu1 %v248_v51  ;;  %v344_v51 = vld [vmem:[#allocation2 + $0x310] sm:$0xff] }
  0xbe   :  { %1395 = vmatpush1.bf16.msra.mxu0 %v502_v50  ;;  %1642 = vmatprep.subr.bf16.mxu1 %v257_v53  ;;  %v598_v50 = vld [vmem:[#allocation2 + $0xb00] sm:$0xff]  ;;  %v353_v53 = vld [vmem:[#allocation2 + $0x358] sm:$0xff] }
  0xbf   :  { %1396 = vmatprep.subr.bf16.mxu0 %v511_v52  ;;  %1426 = vmatprep.mubr.bf16.mxu0 %v7564_v14  ;;  %v607_v52 = vld [vmem:[#allocation2 + $0xb48] sm:$0xff] }
  0xc0   :  { %1672 = vmatprep.mubr.bf16.mxu1 %v7556_v7 }
  0xc1   :  { %1643 = vmatpush1.bf16.msra.mxu1 %v256_v55  ;;  %v352_v55 = vld [vmem:[#allocation2 + $0x350] sm:$0xff] }
  0xc2   :  { %1397 = vmatpush1.bf16.msra.mxu0 %v510_v54  ;;  %1644 = vmatprep.subr.bf16.mxu1 %v265_v57  ;;  %v606_v54 = vld [vmem:[#allocation2 + $0xb40] sm:$0xff]  ;;  %v361_v57 = vld [vmem:[#allocation2 + $0x398] sm:$0xff] }
  0xc3   :  { %1398 = vmatprep.subr.bf16.mxu0 %v519_v56  ;;  %v615_v56 = vld [vmem:[#allocation2 + $0xb88] sm:$0xff] }
  0xc5   :  { %1645 = vmatpush1.bf16.msra.mxu1 %v264_v59  ;;  %v360_v59 = vld [vmem:[#allocation2 + $0x390] sm:$0xff] }
  0xc6   :  { %1399 = vmatpush1.bf16.msra.mxu0 %v518_v58  ;;  %1646 = vmatprep.subr.bf16.mxu1 %v273_v61  ;;  %v614_v58 = vld [vmem:[#allocation2 + $0xb80] sm:$0xff]  ;;  %v369_v61 = vld [vmem:[#allocation2 + $0x3d8] sm:$0xff] }
  0xc7   :  { %1400 = vmatprep.subr.bf16.mxu0 %v527_v60  ;;  %v623_v60 = vld [vmem:[#allocation2 + $0xbc8] sm:$0xff] }
  0xc9   :  { %1647 = vmatpush1.bf16.msra.mxu1 %v272_v63  ;;  %v368_v63 = vld [vmem:[#allocation2 + $0x3d0] sm:$0xff] }
  0xca   :  { %1401 = vmatpush1.bf16.msra.mxu0 %v526_v62  ;;  %1648 = vmatprep.subr.bf16.mxu1 %v281_v1  ;;  %v622_v62 = vld [vmem:[#allocation2 + $0xbc0] sm:$0xff]  ;;  %v377_v1 = vld [vmem:[#allocation2 + $0x418] sm:$0xff] }
  0xcb   :  { %1402 = vmatprep.subr.bf16.mxu0 %v535_v0  ;;  %v631_v0 = vld [vmem:[#allocation2 + $0xc08] sm:$0xff] }
  0xcd   :  { %1649 = vmatpush1.bf16.msra.mxu1 %v280_v3  ;;  %v376_v3 = vld [vmem:[#allocation2 + $0x410] sm:$0xff] }
  0xce   :  { %1403 = vmatpush1.bf16.msra.mxu0 %v534_v2  ;;  %1650 = vmatprep.subr.bf16.mxu1 %v289_v5  ;;  %v630_v2 = vld [vmem:[#allocation2 + $0xc00] sm:$0xff]  ;;  %v385_v5 = vld [vmem:[#allocation2 + $0x458] sm:$0xff] }
  0xcf   :  { %1404 = vmatprep.subr.bf16.mxu0 %v543_v4  ;;  %v639_v4 = vld [vmem:[#allocation2 + $0xc48] sm:$0xff] }
  0xd1   :  { %1651 = vmatpush1.bf16.msra.mxu1 %v288_v10  ;;  %v384_v10 = vld [vmem:[#allocation2 + $0x450] sm:$0xff] }
  0xd2   :  { %1405 = vmatpush1.bf16.msra.mxu0 %v542_v9  ;;  %1652 = vmatprep.subr.bf16.mxu1 %v297_v15  ;;  %v638_v9 = vld [vmem:[#allocation2 + $0xc40] sm:$0xff]  ;;  %v393_v15 = vld [vmem:[#allocation2 + $0x498] sm:$0xff] }
  0xd3   :  { %1406 = vmatprep.subr.bf16.mxu0 %v551_v11  ;;  %v647_v11 = vld [vmem:[#allocation2 + $0xc88] sm:$0xff] }
  0xd5   :  { %1653 = vmatpush1.bf16.msra.mxu1 %v296_v17  ;;  %v392_v17 = vld [vmem:[#allocation2 + $0x490] sm:$0xff] }
  0xd6   :  { %1407 = vmatpush1.bf16.msra.mxu0 %v550_v16  ;;  %1654 = vmatprep.subr.bf16.mxu1 %v305_v22  ;;  %v646_v16 = vld [vmem:[#allocation2 + $0xc80] sm:$0xff]  ;;  %v401_v22 = vld [vmem:[#allocation2 + $0x4d8] sm:$0xff] }
  0xd7   :  { %1408 = vmatprep.subr.bf16.mxu0 %v559_v21  ;;  %v655_v21 = vld [vmem:[#allocation2 + $0xcc8] sm:$0xff] }
  0xd9   :  { %1655 = vmatpush1.bf16.msra.mxu1 %v304_v27  ;;  %v400_v27 = vld [vmem:[#allocation2 + $0x4d0] sm:$0xff] }
  0xda   :  { %1409 = vmatpush1.bf16.msra.mxu0 %v558_v23  ;;  %1656 = vmatprep.subr.bf16.mxu1 %v313_v33  ;;  %v654_v23 = vld [vmem:[#allocation2 + $0xcc0] sm:$0xff]  ;;  %v409_v33 = vld [vmem:[#allocation2 + $0x518] sm:$0xff] }
  0xdb   :  { %1410 = vmatprep.subr.bf16.mxu0 %v567_v32  ;;  %v663_v32 = vld [vmem:[#allocation2 + $0xd08] sm:$0xff] }
  0xdd   :  { %1657 = vmatpush1.bf16.msra.mxu1 %v312_v35  ;;  %v408_v35 = vld [vmem:[#allocation2 + $0x510] sm:$0xff] }
  0xde   :  { %1411 = vmatpush1.bf16.msra.mxu0 %v566_v34  ;;  %1658 = vmatprep.subr.bf16.mxu1 %v321_v37  ;;  %v662_v34 = vld [vmem:[#allocation2 + $0xd00] sm:$0xff]  ;;  %v417_v37 = vld [vmem:[#allocation2 + $0x558] sm:$0xff] }
  0xdf   :  { %1412 = vmatprep.subr.bf16.mxu0 %v575_v36  ;;  %v671_v36 = vld [vmem:[#allocation2 + $0xd48] sm:$0xff] }
  0xe1   :  { %1659 = vmatpush1.bf16.msra.mxu1 %v320_v39  ;;  %v416_v39 = vld [vmem:[#allocation2 + $0x550] sm:$0xff] }
  0xe2   :  { %1413 = vmatpush1.bf16.msra.mxu0 %v574_v38  ;;  %1660 = vmatprep.subr.bf16.mxu1 %v329_v41  ;;  %v670_v38 = vld [vmem:[#allocation2 + $0xd40] sm:$0xff]  ;;  %v425_v41 = vld [vmem:[#allocation2 + $0x598] sm:$0xff] }
  0xe3   :  { %1414 = vmatprep.subr.bf16.mxu0 %v583_v40  ;;  %v679_v40 = vld [vmem:[#allocation2 + $0xd88] sm:$0xff] }
  0xe5   :  { %1661 = vmatpush1.bf16.msra.mxu1 %v328_v43  ;;  %v424_v43 = vld [vmem:[#allocation2 + $0x590] sm:$0xff] }
  0xe6   :  { %1415 = vmatpush1.bf16.msra.mxu0 %v582_v42  ;;  %1662 = vmatprep.subr.bf16.mxu1 %v337_v45  ;;  %v678_v42 = vld [vmem:[#allocation2 + $0xd80] sm:$0xff]  ;;  %v433_v45 = vld [vmem:[#allocation2 + $0x5d8] sm:$0xff] }
  0xe7   :  { %1416 = vmatprep.subr.bf16.mxu0 %v591_v44  ;;  %v687_v44 = vld [vmem:[#allocation2 + $0xdc8] sm:$0xff] }
  0xe9   :  { %1663 = vmatpush1.bf16.msra.mxu1 %v336_v47  ;;  %v432_v47 = vld [vmem:[#allocation2 + $0x5d0] sm:$0xff] }
  0xea   :  { %1417 = vmatpush1.bf16.msra.mxu0 %v590_v46  ;;  %1664 = vmatprep.subr.bf16.mxu1 %v345_v49  ;;  %v686_v46 = vld [vmem:[#allocation2 + $0xdc0] sm:$0xff]  ;;  %v441_v49 = vld [vmem:[#allocation2 + $0x618] sm:$0xff] }
  0xeb   :  { %1418 = vmatprep.subr.bf16.mxu0 %v599_v48  ;;  %v695_v48 = vld [vmem:[#allocation2 + $0xe08] sm:$0xff] }
  0xed   :  { %1665 = vmatpush1.bf16.msra.mxu1 %v344_v51  ;;  %v440_v51 = vld [vmem:[#allocation2 + $0x610] sm:$0xff] }
  0xee   :  { %1419 = vmatpush1.bf16.msra.mxu0 %v598_v50  ;;  %1666 = vmatprep.subr.bf16.mxu1 %v353_v53  ;;  %v694_v50 = vld [vmem:[#allocation2 + $0xe00] sm:$0xff]  ;;  %v449_v53 = vld [vmem:[#allocation2 + $0x658] sm:$0xff] }
  0xef   :  { %1420 = vmatprep.subr.bf16.mxu0 %v607_v52  ;;  %v703_v52 = vld [vmem:[#allocation2 + $0xe48] sm:$0xff] }
  0xf1   :  { %1667 = vmatpush1.bf16.msra.mxu1 %v352_v55  ;;  %v448_v55 = vld [vmem:[#allocation2 + $0x650] sm:$0xff] }
  0xf2   :  { %1421 = vmatpush1.bf16.msra.mxu0 %v606_v54  ;;  %1668 = vmatprep.subr.bf16.mxu1 %v361_v57  ;;  %v702_v54 = vld [vmem:[#allocation2 + $0xe40] sm:$0xff]  ;;  %v457_v57 = vld [vmem:[#allocation2 + $0x698] sm:$0xff] }
  0xf3   :  { %1422 = vmatprep.subr.bf16.mxu0 %v615_v56  ;;  %v711_v56 = vld [vmem:[#allocation2 + $0xe88] sm:$0xff] }
  0xf5   :  { %1669 = vmatpush1.bf16.msra.mxu1 %v360_v59  ;;  %v456_v59 = vld [vmem:[#allocation2 + $0x690] sm:$0xff] }
  0xf6   :  { %1423 = vmatpush1.bf16.msra.mxu0 %v614_v58  ;;  %1670 = vmatprep.subr.bf16.mxu1 %v369_v61  ;;  %v710_v58 = vld [vmem:[#allocation2 + $0xe80] sm:$0xff]  ;;  %v465_v61 = vld [vmem:[#allocation2 + $0x6d8] sm:$0xff] }
  0xf7   :  { %1424 = vmatprep.subr.bf16.mxu0 %v623_v60  ;;  %v719_v60 = vld [vmem:[#allocation2 + $0xec8] sm:$0xff] }
  0xf9   :  { %1671 = vmatpush1.bf16.msra.mxu1 %v368_v63  ;;  %v464_v63 = vld [vmem:[#allocation2 + $0x6d0] sm:$0xff] }
  0xfa   :  { %1425 = vmatpush1.bf16.msra.mxu0 %v622_v62  ;;  %1681 = vmatprep.subr.bf16.mxu1 %v377_v1  ;;  %v718_v62 = vld [vmem:[#allocation2 + $0xec0] sm:$0xff]  ;;  %v473_v1 = vld [vmem:[#allocation2 + $0x718] sm:$0xff] }
  0xfb   :  { %1435 = vmatprep.subr.bf16.mxu0 %v631_v0  ;;  %v727_v0 = vld [vmem:[#allocation2 + $0xf08] sm:$0xff] }
  0xfc   :  { %1673 = vmatmul.mubr.bf16.vlgmr.msra.gmra.mrb[4].mxu1 %v7554_v6 }
  0xfd   :  { %1427 = vmatmul.mubr.bf16.vlgmr.msra.gmra.mrb[0].mxu0 %v7562_v13  ;;  %1682 = vmatpush1.bf16.msra.mxu1 %v376_v3  ;;  %v472_v3 = vld [vmem:[#allocation2 + $0x710] sm:$0xff] }
  0xfe   :  { %1436 = vmatpush1.bf16.msra.mxu0 %v630_v2  ;;  %1683 = vmatprep.subr.bf16.mxu1 %v385_v5  ;;  %v726_v2 = vld [vmem:[#allocation2 + $0xf00] sm:$0xff]  ;;  %v481_v5 = vld [vmem:[#allocation2 + $0x758] sm:$0xff] }
  0xff   :  { %1437 = vmatprep.subr.bf16.mxu0 %v639_v4  ;;  %1467 = vmatprep.mubr.bf16.mxu0 %v7568_v19  ;;  %v735_v4 = vld [vmem:[#allocation2 + $0xf48] sm:$0xff] }
 0x100   :  { %1713 = vmatprep.mubr.bf16.mxu1 %v7560_v12 }
 0x101   :  { %1684 = vmatpush1.bf16.msra.mxu1 %v384_v10  ;;  %v480_v10 = vld [vmem:[#allocation2 + $0x750] sm:$0xff] }
 0x102   :  { %1438 = vmatpush1.bf16.msra.mxu0 %v638_v9  ;;  %1685 = vmatprep.subr.bf16.mxu1 %v393_v15  ;;  %v734_v9 = vld [vmem:[#allocation2 + $0xf40] sm:$0xff]  ;;  %v489_v15 = vld [vmem:[#allocation2 + $0x798] sm:$0xff] }
 0x103   :  { %1439 = vmatprep.subr.bf16.mxu0 %v647_v11  ;;  %v743_v11 = vld [vmem:[#allocation2 + $0xf88] sm:$0xff] }
 0x105   :  { %1686 = vmatpush1.bf16.msra.mxu1 %v392_v17  ;;  %v488_v17 = vld [vmem:[#allocation2 + $0x790] sm:$0xff] }
 0x106   :  { %1440 = vmatpush1.bf16.msra.mxu0 %v646_v16  ;;  %1687 = vmatprep.subr.bf16.mxu1 %v401_v22  ;;  %v742_v16 = vld [vmem:[#allocation2 + $0xf80] sm:$0xff]  ;;  %v497_v22 = vld [vmem:[#allocation2 + $0x7d8] sm:$0xff] }
 0x107   :  { %1441 = vmatprep.subr.bf16.mxu0 %v655_v21  ;;  %v751_v21 = vld [vmem:[#allocation2 + $0xfc8] sm:$0xff] }
 0x109   :  { %1688 = vmatpush1.bf16.msra.mxu1 %v400_v27  ;;  %v496_v27 = vld [vmem:[#allocation2 + $0x7d0] sm:$0xff] }
 0x10a   :  { %1442 = vmatpush1.bf16.msra.mxu0 %v654_v23  ;;  %1689 = vmatprep.subr.bf16.mxu1 %v409_v33  ;;  %v750_v23 = vld [vmem:[#allocation2 + $0xfc0] sm:$0xff]  ;;  %v505_v33 = vld [vmem:[#allocation2 + $0x818] sm:$0xff] }
 0x10b   :  { %1443 = vmatprep.subr.bf16.mxu0 %v663_v32  ;;  %v759_v32 = vld [vmem:[#allocation2 + $0x1008] sm:$0xff] }
 0x10d   :  { %1690 = vmatpush1.bf16.msra.mxu1 %v408_v35  ;;  %v504_v35 = vld [vmem:[#allocation2 + $0x810] sm:$0xff] }
 0x10e   :  { %1444 = vmatpush1.bf16.msra.mxu0 %v662_v34  ;;  %1691 = vmatprep.subr.bf16.mxu1 %v417_v37  ;;  %v758_v34 = vld [vmem:[#allocation2 + $0x1000] sm:$0xff]  ;;  %v513_v37 = vld [vmem:[#allocation2 + $0x858] sm:$0xff] }
 0x10f   :  { %1445 = vmatprep.subr.bf16.mxu0 %v671_v36  ;;  %v767_v36 = vld [vmem:[#allocation2 + $0x1048] sm:$0xff] }
 0x111   :  { %1692 = vmatpush1.bf16.msra.mxu1 %v416_v39  ;;  %v512_v39 = vld [vmem:[#allocation2 + $0x850] sm:$0xff] }
 0x112   :  { %1446 = vmatpush1.bf16.msra.mxu0 %v670_v38  ;;  %1693 = vmatprep.subr.bf16.mxu1 %v425_v41  ;;  %v766_v38 = vld [vmem:[#allocation2 + $0x1040] sm:$0xff]  ;;  %v521_v41 = vld [vmem:[#allocation2 + $0x898] sm:$0xff] }
 0x113   :  { %1447 = vmatprep.subr.bf16.mxu0 %v679_v40  ;;  %v775_v40 = vld [vmem:[#allocation2 + $0x1088] sm:$0xff] }
 0x115   :  { %1694 = vmatpush1.bf16.msra.mxu1 %v424_v43  ;;  %v520_v43 = vld [vmem:[#allocation2 + $0x890] sm:$0xff] }
 0x116   :  { %1448 = vmatpush1.bf16.msra.mxu0 %v678_v42  ;;  %1695 = vmatprep.subr.bf16.mxu1 %v433_v45  ;;  %v774_v42 = vld [vmem:[#allocation2 + $0x1080] sm:$0xff]  ;;  %v529_v45 = vld [vmem:[#allocation2 + $0x8d8] sm:$0xff] }
 0x117   :  { %1449 = vmatprep.subr.bf16.mxu0 %v687_v44  ;;  %v783_v44 = vld [vmem:[#allocation2 + $0x10c8] sm:$0xff] }
 0x119   :  { %1696 = vmatpush1.bf16.msra.mxu1 %v432_v47  ;;  %v528_v47 = vld [vmem:[#allocation2 + $0x8d0] sm:$0xff] }
 0x11a   :  { %1450 = vmatpush1.bf16.msra.mxu0 %v686_v46  ;;  %1697 = vmatprep.subr.bf16.mxu1 %v441_v49  ;;  %v782_v46 = vld [vmem:[#allocation2 + $0x10c0] sm:$0xff]  ;;  %v537_v49 = vld [vmem:[#allocation2 + $0x918] sm:$0xff] }
 0x11b   :  { %1451 = vmatprep.subr.bf16.mxu0 %v695_v48  ;;  %v791_v48 = vld [vmem:[#allocation2 + $0x1108] sm:$0xff] }
 0x11d   :  { %1698 = vmatpush1.bf16.msra.mxu1 %v440_v51  ;;  %v536_v51 = vld [vmem:[#allocation2 + $0x910] sm:$0xff] }
 0x11e   :  { %1452 = vmatpush1.bf16.msra.mxu0 %v694_v50  ;;  %1699 = vmatprep.subr.bf16.mxu1 %v449_v53  ;;  %v790_v50 = vld [vmem:[#allocation2 + $0x1100] sm:$0xff]  ;;  %v545_v53 = vld [vmem:[#allocation2 + $0x958] sm:$0xff] }
 0x11f   :  { %1453 = vmatprep.subr.bf16.mxu0 %v703_v52  ;;  %v799_v52 = vld [vmem:[#allocation2 + $0x1148] sm:$0xff] }
 0x121   :  { %1700 = vmatpush1.bf16.msra.mxu1 %v448_v55  ;;  %v544_v55 = vld [vmem:[#allocation2 + $0x950] sm:$0xff] }
 0x122   :  { %1454 = vmatpush1.bf16.msra.mxu0 %v702_v54  ;;  %1701 = vmatprep.subr.bf16.mxu1 %v457_v57  ;;  %v798_v54 = vld [vmem:[#allocation2 + $0x1140] sm:$0xff]  ;;  %v553_v57 = vld [vmem:[#allocation2 + $0x998] sm:$0xff] }
 0x123   :  { %1455 = vmatprep.subr.bf16.mxu0 %v711_v56  ;;  %v807_v56 = vld [vmem:[#allocation2 + $0x1188] sm:$0xff] }
 0x125   :  { %1702 = vmatpush1.bf16.msra.mxu1 %v456_v59  ;;  %v552_v59 = vld [vmem:[#allocation2 + $0x990] sm:$0xff] }
 0x126   :  { %1456 = vmatpush1.bf16.msra.mxu0 %v710_v58  ;;  %1703 = vmatprep.subr.bf16.mxu1 %v465_v61  ;;  %v806_v58 = vld [vmem:[#allocation2 + $0x1180] sm:$0xff]  ;;  %v561_v61 = vld [vmem:[#allocation2 + $0x9d8] sm:$0xff] }
 0x127   :  { %1457 = vmatprep.subr.bf16.mxu0 %v719_v60  ;;  %v815_v60 = vld [vmem:[#allocation2 + $0x11c8] sm:$0xff] }
 0x129   :  { %1704 = vmatpush1.bf16.msra.mxu1 %v464_v63  ;;  %v560_v63 = vld [vmem:[#allocation2 + $0x9d0] sm:$0xff] }
 0x12a   :  { %1458 = vmatpush1.bf16.msra.mxu0 %v718_v62  ;;  %1705 = vmatprep.subr.bf16.mxu1 %v473_v1  ;;  %v814_v62 = vld [vmem:[#allocation2 + $0x11c0] sm:$0xff]  ;;  %v569_v1 = vld [vmem:[#allocation2 + $0xa18] sm:$0xff] }
 0x12b   :  { %1459 = vmatprep.subr.bf16.mxu0 %v727_v0  ;;  %v823_v0 = vld [vmem:[#allocation2 + $0x1208] sm:$0xff] }
 0x12d   :  { %1706 = vmatpush1.bf16.msra.mxu1 %v472_v3  ;;  %v568_v3 = vld [vmem:[#allocation2 + $0xa10] sm:$0xff] }
 0x12e   :  { %1460 = vmatpush1.bf16.msra.mxu0 %v726_v2  ;;  %1707 = vmatprep.subr.bf16.mxu1 %v481_v5  ;;  %v822_v2 = vld [vmem:[#allocation2 + $0x1200] sm:$0xff]  ;;  %v577_v5 = vld [vmem:[#allocation2 + $0xa58] sm:$0xff] }
 0x12f   :  { %1461 = vmatprep.subr.bf16.mxu0 %v735_v4  ;;  %v831_v4 = vld [vmem:[#allocation2 + $0x1248] sm:$0xff] }
 0x131   :  { %1708 = vmatpush1.bf16.msra.mxu1 %v480_v10  ;;  %v576_v10 = vld [vmem:[#allocation2 + $0xa50] sm:$0xff] }
 0x132   :  { %1462 = vmatpush1.bf16.msra.mxu0 %v734_v9  ;;  %1709 = vmatprep.subr.bf16.mxu1 %v489_v15  ;;  %v830_v9 = vld [vmem:[#allocation2 + $0x1240] sm:$0xff]  ;;  %v585_v15 = vld [vmem:[#allocation2 + $0xa98] sm:$0xff] }
 0x133   :  { %1463 = vmatprep.subr.bf16.mxu0 %v743_v11  ;;  %v839_v11 = vld [vmem:[#allocation2 + $0x1288] sm:$0xff] }
 0x135   :  { %1710 = vmatpush1.bf16.msra.mxu1 %v488_v17  ;;  %v584_v17 = vld [vmem:[#allocation2 + $0xa90] sm:$0xff] }
 0x136   :  { %1464 = vmatpush1.bf16.msra.mxu0 %v742_v16  ;;  %1711 = vmatprep.subr.bf16.mxu1 %v497_v22  ;;  %v838_v16 = vld [vmem:[#allocation2 + $0x1280] sm:$0xff]  ;;  %v593_v22 = vld [vmem:[#allocation2 + $0xad8] sm:$0xff] }
 0x137   :  { %1465 = vmatprep.subr.bf16.mxu0 %v751_v21  ;;  %v847_v21 = vld [vmem:[#allocation2 + $0x12c8] sm:$0xff] }
 0x139   :  { %1712 = vmatpush1.bf16.msra.mxu1 %v496_v27  ;;  %v592_v27 = vld [vmem:[#allocation2 + $0xad0] sm:$0xff] }
 0x13a   :  { %1466 = vmatpush1.bf16.msra.mxu0 %v750_v23  ;;  %1722 = vmatprep.subr.bf16.mxu1 %v505_v33  ;;  %v846_v23 = vld [vmem:[#allocation2 + $0x12c0] sm:$0xff]  ;;  %v601_v33 = vld [vmem:[#allocation2 + $0xb18] sm:$0xff] }
 0x13b   :  { %1476 = vmatprep.subr.bf16.mxu0 %v759_v32  ;;  %v855_v32 = vld [vmem:[#allocation2 + $0x1308] sm:$0xff] }
 0x13c   :  { %1714 = vmatmul.mubr.bf16.vlgmr.msra.gmra.mrb[4].mxu1 %v7558_v8 }
 0x13d   :  { %1468 = vmatmul.mubr.bf16.vlgmr.msra.gmra.mrb[0].mxu0 %v7566_v18  ;;  %1723 = vmatpush1.bf16.msra.mxu1 %v504_v35  ;;  %v600_v35 = vld [vmem:[#allocation2 + $0xb10] sm:$0xff] }
 0x13e   :  { %1477 = vmatpush1.bf16.msra.mxu0 %v758_v34  ;;  %1724 = vmatprep.subr.bf16.mxu1 %v513_v37  ;;  %v854_v34 = vld [vmem:[#allocation2 + $0x1300] sm:$0xff]  ;;  %v609_v37 = vld [vmem:[#allocation2 + $0xb58] sm:$0xff] }
 0x13f   :  { %1478 = vmatprep.subr.bf16.mxu0 %v767_v36  ;;  %1508 = vmatprep.mubr.bf16.mxu0 %v7572_v24  ;;  %v863_v36 = vld [vmem:[#allocation2 + $0x1348] sm:$0xff] }
 0x140   :  { %1754 = vmatprep.mubr.bf16.mxu1 %v7564_v14 }
 0x141   :  { %1725 = vmatpush1.bf16.msra.mxu1 %v512_v39  ;;  %v608_v39 = vld [vmem:[#allocation2 + $0xb50] sm:$0xff] }
 0x142   :  { %1479 = vmatpush1.bf16.msra.mxu0 %v766_v38  ;;  %1726 = vmatprep.subr.bf16.mxu1 %v521_v41  ;;  %v862_v38 = vld [vmem:[#allocation2 + $0x1340] sm:$0xff]  ;;  %v617_v41 = vld [vmem:[#allocation2 + $0xb98] sm:$0xff] }
 0x143   :  { %1480 = vmatprep.subr.bf16.mxu0 %v775_v40  ;;  %v871_v40 = vld [vmem:[#allocation2 + $0x1388] sm:$0xff] }
 0x145   :  { %1727 = vmatpush1.bf16.msra.mxu1 %v520_v43  ;;  %v616_v43 = vld [vmem:[#allocation2 + $0xb90] sm:$0xff] }
 0x146   :  { %1481 = vmatpush1.bf16.msra.mxu0 %v774_v42  ;;  %1728 = vmatprep.subr.bf16.mxu1 %v529_v45  ;;  %v870_v42 = vld [vmem:[#allocation2 + $0x1380] sm:$0xff]  ;;  %v625_v45 = vld [vmem:[#allocation2 + $0xbd8] sm:$0xff] }
 0x147   :  { %1482 = vmatprep.subr.bf16.mxu0 %v783_v44  ;;  %v879_v44 = vld [vmem:[#allocation2 + $0x13c8] sm:$0xff] }
 0x149   :  { %1729 = vmatpush1.bf16.msra.mxu1 %v528_v47  ;;  %v624_v47 = vld [vmem:[#allocation2 + $0xbd0] sm:$0xff] }
 0x14a   :  { %1483 = vmatpush1.bf16.msra.mxu0 %v782_v46  ;;  %1730 = vmatprep.subr.bf16.mxu1 %v537_v49  ;;  %v878_v46 = vld [vmem:[#allocation2 + $0x13c0] sm:$0xff]  ;;  %v633_v49 = vld [vmem:[#allocation2 + $0xc18] sm:$0xff] }
 0x14b   :  { %1484 = vmatprep.subr.bf16.mxu0 %v791_v48  ;;  %v887_v48 = vld [vmem:[#allocation2 + $0x1408] sm:$0xff] }
 0x14d   :  { %1731 = vmatpush1.bf16.msra.mxu1 %v536_v51  ;;  %v632_v51 = vld [vmem:[#allocation2 + $0xc10] sm:$0xff] }
 0x14e   :  { %1485 = vmatpush1.bf16.msra.mxu0 %v790_v50  ;;  %1732 = vmatprep.subr.bf16.mxu1 %v545_v53  ;;  %v886_v50 = vld [vmem:[#allocation2 + $0x1400] sm:$0xff]  ;;  %v641_v53 = vld [vmem:[#allocation2 + $0xc58] sm:$0xff] }
 0x14f   :  { %1486 = vmatprep.subr.bf16.mxu0 %v799_v52  ;;  %v895_v52 = vld [vmem:[#allocation2 + $0x1448] sm:$0xff] }
 0x151   :  { %1733 = vmatpush1.bf16.msra.mxu1 %v544_v55  ;;  %v640_v55 = vld [vmem:[#allocation2 + $0xc50] sm:$0xff] }
 0x152   :  { %1487 = vmatpush1.bf16.msra.mxu0 %v798_v54  ;;  %1734 = vmatprep.subr.bf16.mxu1 %v553_v57  ;;  %v894_v54 = vld [vmem:[#allocation2 + $0x1440] sm:$0xff]  ;;  %v649_v57 = vld [vmem:[#allocation2 + $0xc98] sm:$0xff] }
 0x153   :  { %1488 = vmatprep.subr.bf16.mxu0 %v807_v56  ;;  %v903_v56 = vld [vmem:[#allocation2 + $0x1488] sm:$0xff] }
 0x155   :  { %1735 = vmatpush1.bf16.msra.mxu1 %v552_v59  ;;  %v648_v59 = vld [vmem:[#allocation2 + $0xc90] sm:$0xff] }
 0x156   :  { %1489 = vmatpush1.bf16.msra.mxu0 %v806_v58  ;;  %1736 = vmatprep.subr.bf16.mxu1 %v561_v61  ;;  %v902_v58 = vld [vmem:[#allocation2 + $0x1480] sm:$0xff]  ;;  %v657_v61 = vld [vmem:[#allocation2 + $0xcd8] sm:$0xff] }
 0x157   :  { %1490 = vmatprep.subr.bf16.mxu0 %v815_v60  ;;  %v911_v60 = vld [vmem:[#allocation2 + $0x14c8] sm:$0xff] }
 0x159   :  { %1737 = vmatpush1.bf16.msra.mxu1 %v560_v63  ;;  %v656_v63 = vld [vmem:[#allocation2 + $0xcd0] sm:$0xff] }
 0x15a   :  { %1491 = vmatpush1.bf16.msra.mxu0 %v814_v62  ;;  %1738 = vmatprep.subr.bf16.mxu1 %v569_v1  ;;  %v910_v62 = vld [vmem:[#allocation2 + $0x14c0] sm:$0xff]  ;;  %v665_v1 = vld [vmem:[#allocation2 + $0xd18] sm:$0xff] }
 0x15b   :  { %1492 = vmatprep.subr.bf16.mxu0 %v823_v0  ;;  %v919_v0 = vld [vmem:[#allocation2 + $0x1508] sm:$0xff] }
 0x15d   :  { %1739 = vmatpush1.bf16.msra.mxu1 %v568_v3  ;;  %v664_v3 = vld [vmem:[#allocation2 + $0xd10] sm:$0xff] }
 0x15e   :  { %1493 = vmatpush1.bf16.msra.mxu0 %v822_v2  ;;  %1740 = vmatprep.subr.bf16.mxu1 %v577_v5  ;;  %v918_v2 = vld [vmem:[#allocation2 + $0x1500] sm:$0xff]  ;;  %v673_v5 = vld [vmem:[#allocation2 + $0xd58] sm:$0xff] }
 0x15f   :  { %1494 = vmatprep.subr.bf16.mxu0 %v831_v4  ;;  %v927_v4 = vld [vmem:[#allocation2 + $0x1548] sm:$0xff] }
 0x161   :  { %1741 = vmatpush1.bf16.msra.mxu1 %v576_v10  ;;  %v672_v10 = vld [vmem:[#allocation2 + $0xd50] sm:$0xff] }
 0x162   :  { %1495 = vmatpush1.bf16.msra.mxu0 %v830_v9  ;;  %1742 = vmatprep.subr.bf16.mxu1 %v585_v15  ;;  %v926_v9 = vld [vmem:[#allocation2 + $0x1540] sm:$0xff]  ;;  %v935_v15 = vld [vmem:[#allocation2 + $0x1588] sm:$0xff] }
 0x163   :  { %1496 = vmatprep.subr.bf16.mxu0 %v839_v11 }
 0x165   :  { %1743 = vmatpush1.bf16.msra.mxu1 %v584_v17 }
 0x166   :  { %1497 = vmatpush1.bf16.msra.mxu0 %v838_v16  ;;  %1744 = vmatprep.subr.bf16.mxu1 %v593_v22  ;;  %v681_v16 = vld [vmem:[#allocation2 + $0xd98] sm:$0xff] }
 0x167   :  { %1498 = vmatprep.subr.bf16.mxu0 %v847_v21 }
 0x169   :  { %1745 = vmatpush1.bf16.msra.mxu1 %v592_v27  ;;  %v680_v27 = vld [vmem:[#allocation2 + $0xd90] sm:$0xff] }
 0x16a   :  { %1499 = vmatpush1.bf16.msra.mxu0 %v846_v23  ;;  %1746 = vmatprep.subr.bf16.mxu1 %v601_v33  ;;  %v934_v23 = vld [vmem:[#allocation2 + $0x1580] sm:$0xff]  ;;  %v689_v33 = vld [vmem:[#allocation2 + $0xdd8] sm:$0xff] }
 0x16b   :  { %1500 = vmatprep.subr.bf16.mxu0 %v855_v32  ;;  %v943_v32 = vld [vmem:[#allocation2 + $0x15c8] sm:$0xff] }
 0x16d   :  { %1747 = vmatpush1.bf16.msra.mxu1 %v600_v35  ;;  %v688_v35 = vld [vmem:[#allocation2 + $0xdd0] sm:$0xff] }
 0x16e   :  { %1501 = vmatpush1.bf16.msra.mxu0 %v854_v34  ;;  %1748 = vmatprep.subr.bf16.mxu1 %v609_v37  ;;  %v942_v34 = vld [vmem:[#allocation2 + $0x15c0] sm:$0xff]  ;;  %v697_v37 = vld [vmem:[#allocation2 + $0xe18] sm:$0xff] }
 0x16f   :  { %1502 = vmatprep.subr.bf16.mxu0 %v863_v36  ;;  %v951_v36 = vld [vmem:[#allocation2 + $0x1608] sm:$0xff] }
 0x171   :  { %1749 = vmatpush1.bf16.msra.mxu1 %v608_v39  ;;  %v696_v39 = vld [vmem:[#allocation2 + $0xe10] sm:$0xff] }
 0x172   :  { %1503 = vmatpush1.bf16.msra.mxu0 %v862_v38  ;;  %1750 = vmatprep.subr.bf16.mxu1 %v617_v41  ;;  %v950_v38 = vld [vmem:[#allocation2 + $0x1600] sm:$0xff]  ;;  %v705_v41 = vld [vmem:[#allocation2 + $0xe58] sm:$0xff] }
 0x173   :  { %1504 = vmatprep.subr.bf16.mxu0 %v871_v40  ;;  %v959_v40 = vld [vmem:[#allocation2 + $0x1648] sm:$0xff] }
 0x175   :  { %1751 = vmatpush1.bf16.msra.mxu1 %v616_v43  ;;  %v704_v43 = vld [vmem:[#allocation2 + $0xe50] sm:$0xff] }
 0x176   :  { %1505 = vmatpush1.bf16.msra.mxu0 %v870_v42  ;;  %1752 = vmatprep.subr.bf16.mxu1 %v625_v45  ;;  %v958_v42 = vld [vmem:[#allocation2 + $0x1640] sm:$0xff]  ;;  %v713_v45 = vld [vmem:[#allocation2 + $0xe98] sm:$0xff] }
 0x177   :  { %1506 = vmatprep.subr.bf16.mxu0 %v879_v44  ;;  %v967_v44 = vld [vmem:[#allocation2 + $0x1688] sm:$0xff] }
 0x179   :  { %1753 = vmatpush1.bf16.msra.mxu1 %v624_v47  ;;  %v712_v47 = vld [vmem:[#allocation2 + $0xe90] sm:$0xff] }
 0x17a   :  { %1507 = vmatpush1.bf16.msra.mxu0 %v878_v46  ;;  %1763 = vmatprep.subr.bf16.mxu1 %v633_v49  ;;  %v966_v46 = vld [vmem:[#allocation2 + $0x1680] sm:$0xff]  ;;  %v721_v49 = vld [vmem:[#allocation2 + $0xed8] sm:$0xff] }
 0x17b   :  { %1517 = vmatprep.subr.bf16.mxu0 %v887_v48  ;;  %v975_v48 = vld [vmem:[#allocation2 + $0x16c8] sm:$0xff] }
 0x17c   :  { %1755 = vmatmul.mubr.bf16.vlgmr.msra.gmra.mrb[4].mxu1 %v7562_v13 }
 0x17d   :  { %1509 = vmatmul.mubr.bf16.vlgmr.msra.gmra.mrb[0].mxu0 %v7570_v20  ;;  %1764 = vmatpush1.bf16.msra.mxu1 %v632_v51  ;;  %v720_v51 = vld [vmem:[#allocation2 + $0xed0] sm:$0xff] }
 0x17e   :  { %1518 = vmatpush1.bf16.msra.mxu0 %v886_v50  ;;  %1765 = vmatprep.subr.bf16.mxu1 %v641_v53  ;;  %v974_v50 = vld [vmem:[#allocation2 + $0x16c0] sm:$0xff]  ;;  %v729_v53 = vld [vmem:[#allocation2 + $0xf18] sm:$0xff] }
 0x17f   :  { %1519 = vmatprep.subr.bf16.mxu0 %v895_v52  ;;  %1549 = vmatprep.mubr.bf16.mxu0 %v7576_v26  ;;  %v983_v52 = vld [vmem:[#allocation2 + $0x1708] sm:$0xff] }
 0x180   :  { %1795 = vmatprep.mubr.bf16.mxu1 %v7568_v19 }
 0x181   :  { %1766 = vmatpush1.bf16.msra.mxu1 %v640_v55  ;;  %v728_v55 = vld [vmem:[#allocation2 + $0xf10] sm:$0xff] }
 0x182   :  { %1520 = vmatpush1.bf16.msra.mxu0 %v894_v54  ;;  %1767 = vmatprep.subr.bf16.mxu1 %v649_v57  ;;  %v982_v54 = vld [vmem:[#allocation2 + $0x1700] sm:$0xff]  ;;  %v737_v57 = vld [vmem:[#allocation2 + $0xf58] sm:$0xff] }
 0x183   :  { %1521 = vmatprep.subr.bf16.mxu0 %v903_v56  ;;  %v991_v56 = vld [vmem:[#allocation2 + $0x1748] sm:$0xff] }
 0x185   :  { %1768 = vmatpush1.bf16.msra.mxu1 %v648_v59  ;;  %v736_v59 = vld [vmem:[#allocation2 + $0xf50] sm:$0xff] }
 0x186   :  { %1522 = vmatpush1.bf16.msra.mxu0 %v902_v58  ;;  %1769 = vmatprep.subr.bf16.mxu1 %v657_v61  ;;  %v990_v58 = vld [vmem:[#allocation2 + $0x1740] sm:$0xff]  ;;  %v745_v61 = vld [vmem:[#allocation2 + $0xf98] sm:$0xff] }
 0x187   :  { %1523 = vmatprep.subr.bf16.mxu0 %v911_v60  ;;  %v999_v60 = vld [vmem:[#allocation2 + $0x1788] sm:$0xff] }
 0x189   :  { %1770 = vmatpush1.bf16.msra.mxu1 %v656_v63  ;;  %v744_v63 = vld [vmem:[#allocation2 + $0xf90] sm:$0xff] }
 0x18a   :  { %1524 = vmatpush1.bf16.msra.mxu0 %v910_v62  ;;  %1771 = vmatprep.subr.bf16.mxu1 %v665_v1  ;;  %v998_v62 = vld [vmem:[#allocation2 + $0x1780] sm:$0xff]  ;;  %v753_v1 = vld [vmem:[#allocation2 + $0xfd8] sm:$0xff] }
 0x18b   :  { %1525 = vmatprep.subr.bf16.mxu0 %v919_v0  ;;  %v1007_v0 = vld [vmem:[#allocation2 + $0x17c8] sm:$0xff] }
 0x18d   :  { %1772 = vmatpush1.bf16.msra.mxu1 %v664_v3  ;;  %v752_v3 = vld [vmem:[#allocation2 + $0xfd0] sm:$0xff] }
 0x18e   :  { %1526 = vmatpush1.bf16.msra.mxu0 %v918_v2  ;;  %1773 = vmatprep.subr.bf16.mxu1 %v673_v5  ;;  %v1006_v2 = vld [vmem:[#allocation2 + $0x17c0] sm:$0xff]  ;;  %v761_v5 = vld [vmem:[#allocation2 + $0x1018] sm:$0xff] }
 0x18f   :  { %1527 = vmatprep.subr.bf16.mxu0 %v927_v4  ;;  %v7604_v11 = vpop.f32.mrb[0].mxu1  ;;  %v1015_v4 = vld [vmem:[#allocation2 + $0x1808] sm:$0xff] }
 0x190   :  { %v7606_v17 = vpop.f32.mrb[1].mxu1 }
 0x191   :  { %v1350_v21 = vpop.f32.mrb[2].mxu1  ;;  %1774 = vmatpush1.bf16.msra.mxu1 %v672_v10  ;;  %v760_v10 = vld [vmem:[#allocation2 + $0x1010] sm:$0xff] }
 0x192   :  { %1528 = vmatpush1.bf16.msra.mxu0 %v926_v9  ;;  %v1351_v22 = vpop.f32.mrb[3].mxu1  ;;  %1775 = vmatprep.subr.bf16.mxu1 %v681_v16  ;;  %v1014_v9 = vld [vmem:[#allocation2 + $0x1800] sm:$0xff]  ;;  %v769_v16 = vld [vmem:[#allocation2 + $0x1058] sm:$0xff] }
 0x193   :  { %1529 = vmatprep.subr.bf16.mxu0 %v935_v15  ;;  %v1023_v15 = vld [vmem:[#allocation2 + $0x1848] sm:$0xff]  ;;  %v1022_v21 = vld [vmem:[#allocation2 + $0x1840] sm:$0xff]  ;;  %v768_v22 = vld [vmem:[#allocation2 + $0x1050] sm:$0xff] }
 0x195   :  { %1776 = vmatpush1.bf16.msra.mxu1 %v680_v27  ;;  %v777_v27 = vld [vmem:[#allocation2 + $0x1098] sm:$0xff] }
 0x196   :  { %1530 = vmatpush1.bf16.msra.mxu0 %v934_v23  ;;  %1777 = vmatprep.subr.bf16.mxu1 %v689_v33  ;;  %v1031_v23 = vld [vmem:[#allocation2 + $0x1888] sm:$0xff]  ;;  %v776_v33 = vld [vmem:[#allocation2 + $0x1090] sm:$0xff] }
 0x197   :  { %1531 = vmatprep.subr.bf16.mxu0 %v943_v32  ;;  %v1030_v32 = vld [vmem:[#allocation2 + $0x1880] sm:$0xff] }
 0x199   :  { %1778 = vmatpush1.bf16.msra.mxu1 %v688_v35  ;;  %v785_v35 = vld [vmem:[#allocation2 + $0x10d8] sm:$0xff] }
 0x19a   :  { %1532 = vmatpush1.bf16.msra.mxu0 %v942_v34  ;;  %1779 = vmatprep.subr.bf16.mxu1 %v697_v37  ;;  %v1039_v34 = vld [vmem:[#allocation2 + $0x18c8] sm:$0xff]  ;;  %v784_v37 = vld [vmem:[#allocation2 + $0x10d0] sm:$0xff] }
 0x19b   :  { %1533 = vmatprep.subr.bf16.mxu0 %v951_v36  ;;  %v1038_v36 = vld [vmem:[#allocation2 + $0x18c0] sm:$0xff] }
 0x19d   :  { %1780 = vmatpush1.bf16.msra.mxu1 %v696_v39  ;;  %v793_v39 = vld [vmem:[#allocation2 + $0x1118] sm:$0xff] }
 0x19e   :  { %1534 = vmatpush1.bf16.msra.mxu0 %v950_v38  ;;  %1781 = vmatprep.subr.bf16.mxu1 %v705_v41  ;;  %v1047_v38 = vld [vmem:[#allocation2 + $0x1908] sm:$0xff]  ;;  %v792_v41 = vld [vmem:[#allocation2 + $0x1110] sm:$0xff] }
 0x19f   :  { %1535 = vmatprep.subr.bf16.mxu0 %v959_v40  ;;  %v1046_v40 = vld [vmem:[#allocation2 + $0x1900] sm:$0xff] }
 0x1a1   :  { %1782 = vmatpush1.bf16.msra.mxu1 %v704_v43  ;;  %v801_v43 = vld [vmem:[#allocation2 + $0x1158] sm:$0xff] }
 0x1a2   :  { %1536 = vmatpush1.bf16.msra.mxu0 %v958_v42  ;;  %1783 = vmatprep.subr.bf16.mxu1 %v713_v45  ;;  %v1055_v42 = vld [vmem:[#allocation2 + $0x1948] sm:$0xff]  ;;  %v800_v45 = vld [vmem:[#allocation2 + $0x1150] sm:$0xff] }
 0x1a3   :  { %1537 = vmatprep.subr.bf16.mxu0 %v967_v44  ;;  %v1054_v44 = vld [vmem:[#allocation2 + $0x1940] sm:$0xff] }
 0x1a5   :  { %1784 = vmatpush1.bf16.msra.mxu1 %v712_v47  ;;  %v809_v47 = vld [vmem:[#allocation2 + $0x1198] sm:$0xff] }
 0x1a6   :  { %1538 = vmatpush1.bf16.msra.mxu0 %v966_v46  ;;  %1785 = vmatprep.subr.bf16.mxu1 %v721_v49  ;;  %v1063_v46 = vld [vmem:[#allocation2 + $0x1988] sm:$0xff]  ;;  %v808_v49 = vld [vmem:[#allocation2 + $0x1190] sm:$0xff] }
 0x1a7   :  { %1539 = vmatprep.subr.bf16.mxu0 %v975_v48  ;;  %v1062_v48 = vld [vmem:[#allocation2 + $0x1980] sm:$0xff] }
 0x1a9   :  { %1786 = vmatpush1.bf16.msra.mxu1 %v720_v51  ;;  %v817_v51 = vld [vmem:[#allocation2 + $0x11d8] sm:$0xff] }
 0x1aa   :  { %1540 = vmatpush1.bf16.msra.mxu0 %v974_v50  ;;  %1787 = vmatprep.subr.bf16.mxu1 %v729_v53  ;;  %v1071_v50 = vld [vmem:[#allocation2 + $0x19c8] sm:$0xff]  ;;  %v816_v53 = vld [vmem:[#allocation2 + $0x11d0] sm:$0xff] }
 0x1ab   :  { %1541 = vmatprep.subr.bf16.mxu0 %v983_v52  ;;  %v1070_v52 = vld [vmem:[#allocation2 + $0x19c0] sm:$0xff] }
 0x1ad   :  { %1788 = vmatpush1.bf16.msra.mxu1 %v728_v55  ;;  %v825_v55 = vld [vmem:[#allocation2 + $0x1218] sm:$0xff] }
 0x1ae   :  { %1542 = vmatpush1.bf16.msra.mxu0 %v982_v54  ;;  %1789 = vmatprep.subr.bf16.mxu1 %v737_v57  ;;  %v1079_v54 = vld [vmem:[#allocation2 + $0x1a08] sm:$0xff]  ;;  %v824_v57 = vld [vmem:[#allocation2 + $0x1210] sm:$0xff] }
 0x1af   :  { %1543 = vmatprep.subr.bf16.mxu0 %v991_v56  ;;  %v1078_v56 = vld [vmem:[#allocation2 + $0x1a00] sm:$0xff] }
 0x1b1   :  { %1790 = vmatpush1.bf16.msra.mxu1 %v736_v59  ;;  %v833_v59 = vld [vmem:[#allocation2 + $0x1258] sm:$0xff] }
 0x1b2   :  { %1544 = vmatpush1.bf16.msra.mxu0 %v990_v58  ;;  %1791 = vmatprep.subr.bf16.mxu1 %v745_v61  ;;  %v1087_v58 = vld [vmem:[#allocation2 + $0x1a48] sm:$0xff]  ;;  %v832_v61 = vld [vmem:[#allocation2 + $0x1250] sm:$0xff] }
 0x1b3   :  { %1545 = vmatprep.subr.bf16.mxu0 %v999_v60  ;;  %v1086_v60 = vld [vmem:[#allocation2 + $0x1a40] sm:$0xff] }
 0x1b5   :  { %1792 = vmatpush1.bf16.msra.mxu1 %v744_v63  ;;  %v841_v63 = vld [vmem:[#allocation2 + $0x1298] sm:$0xff] }
 0x1b6   :  { %1546 = vmatpush1.bf16.msra.mxu0 %v998_v62  ;;  %1793 = vmatprep.subr.bf16.mxu1 %v753_v1  ;;  %v1095_v62 = vld [vmem:[#allocation2 + $0x1a88] sm:$0xff]  ;;  %v840_v1 = vld [vmem:[#allocation2 + $0x1290] sm:$0xff] }
 0x1b7   :  { %1547 = vmatprep.subr.bf16.mxu0 %v1007_v0  ;;  %v1094_v0 = vld [vmem:[#allocation2 + $0x1a80] sm:$0xff] }
 0x1b9   :  { %1794 = vmatpush1.bf16.msra.mxu1 %v752_v3  ;;  %v849_v3 = vld [vmem:[#allocation2 + $0x12d8] sm:$0xff] }
 0x1ba   :  { %1548 = vmatpush1.bf16.msra.mxu0 %v1006_v2  ;;  %1804 = vmatprep.subr.bf16.mxu1 %v761_v5  ;;  %v1103_v2 = vld [vmem:[#allocation2 + $0x1ac8] sm:$0xff]  ;;  %v848_v5 = vld [vmem:[#allocation2 + $0x12d0] sm:$0xff] }
 0x1bb   :  { %1558 = vmatprep.subr.bf16.mxu0 %v1015_v4  ;;  %v1102_v4 = vld [vmem:[#allocation2 + $0x1ac0] sm:$0xff] }
 0x1bc   :  { %1796 = vmatmul.mubr.bf16.vlgmr.msra.gmra.mrb[4].mxu1 %v7566_v18 }
 0x1bd   :  { %1550 = vmatmul.mubr.bf16.vlgmr.msra.gmra.mrb[0].mxu0 %v7574_v25  ;;  %1805 = vmatpush1.bf16.msra.mxu1 %v760_v10  ;;  %v857_v10 = vld [vmem:[#allocation2 + $0x1318] sm:$0xff] }
 0x1be   :  { %1559 = vmatpush1.bf16.msra.mxu0 %v1014_v9  ;;  %1806 = vmatprep.subr.bf16.mxu1 %v769_v16  ;;  %v1111_v9 = vld [vmem:[#allocation2 + $0x1b08] sm:$0xff]  ;;  %v856_v16 = vld [vmem:[#allocation2 + $0x1310] sm:$0xff] }
 0x1bf   :  { %1560 = vmatprep.subr.bf16.mxu0 %v1023_v15  ;;  %1590 = vmatprep.mubr.bf16.mxu0 %v7580_v29  ;;  %v1110_v15 = vld [vmem:[#allocation2 + $0x1b00] sm:$0xff] }
 0x1c0   :  { %1836 = vmatprep.mubr.bf16.mxu1 %v7572_v24 }
 0x1c1   :  { %1807 = vmatpush1.bf16.msra.mxu1 %v768_v22  ;;  %v865_v22 = vld [vmem:[#allocation2 + $0x1358] sm:$0xff] }
 0x1c2   :  { %1561 = vmatpush1.bf16.msra.mxu0 %v1022_v21  ;;  %1808 = vmatprep.subr.bf16.mxu1 %v777_v27  ;;  %v1119_v21 = vld [vmem:[#allocation2 + $0x1b48] sm:$0xff]  ;;  %v864_v27 = vld [vmem:[#allocation2 + $0x1350] sm:$0xff] }
 0x1c3   :  { %1562 = vmatprep.subr.bf16.mxu0 %v1031_v23  ;;  %v1118_v23 = vld [vmem:[#allocation2 + $0x1b40] sm:$0xff] }
 0x1c5   :  { %1809 = vmatpush1.bf16.msra.mxu1 %v776_v33  ;;  %v873_v33 = vld [vmem:[#allocation2 + $0x1398] sm:$0xff] }
 0x1c6   :  { %1563 = vmatpush1.bf16.msra.mxu0 %v1030_v32  ;;  %1810 = vmatprep.subr.bf16.mxu1 %v785_v35  ;;  %v1127_v32 = vld [vmem:[#allocation2 + $0x1b88] sm:$0xff]  ;;  %v872_v35 = vld [vmem:[#allocation2 + $0x1390] sm:$0xff] }
 0x1c7   :  { %1564 = vmatprep.subr.bf16.mxu0 %v1039_v34  ;;  %v1126_v34 = vld [vmem:[#allocation2 + $0x1b80] sm:$0xff] }
 0x1c9   :  { %1811 = vmatpush1.bf16.msra.mxu1 %v784_v37  ;;  %v881_v37 = vld [vmem:[#allocation2 + $0x13d8] sm:$0xff] }
 0x1ca   :  { %1565 = vmatpush1.bf16.msra.mxu0 %v1038_v36  ;;  %1812 = vmatprep.subr.bf16.mxu1 %v793_v39  ;;  %v1135_v36 = vld [vmem:[#allocation2 + $0x1bc8] sm:$0xff]  ;;  %v880_v39 = vld [vmem:[#allocation2 + $0x13d0] sm:$0xff] }
 0x1cb   :  { %1566 = vmatprep.subr.bf16.mxu0 %v1047_v38  ;;  %v1134_v38 = vld [vmem:[#allocation2 + $0x1bc0] sm:$0xff] }
 0x1cd   :  { %1813 = vmatpush1.bf16.msra.mxu1 %v792_v41  ;;  %v889_v41 = vld [vmem:[#allocation2 + $0x1418] sm:$0xff] }
 0x1ce   :  { %1567 = vmatpush1.bf16.msra.mxu0 %v1046_v40  ;;  %1814 = vmatprep.subr.bf16.mxu1 %v801_v43  ;;  %v1143_v40 = vld [vmem:[#allocation2 + $0x1c08] sm:$0xff]  ;;  %v888_v43 = vld [vmem:[#allocation2 + $0x1410] sm:$0xff] }
 0x1cf   :  { %1568 = vmatprep.subr.bf16.mxu0 %v1055_v42  ;;  %v1142_v42 = vld [vmem:[#allocation2 + $0x1c00] sm:$0xff] }
 0x1d1   :  { %1815 = vmatpush1.bf16.msra.mxu1 %v800_v45  ;;  %v897_v45 = vld [vmem:[#allocation2 + $0x1458] sm:$0xff] }
 0x1d2   :  { %1569 = vmatpush1.bf16.msra.mxu0 %v1054_v44  ;;  %1816 = vmatprep.subr.bf16.mxu1 %v809_v47  ;;  %v1151_v44 = vld [vmem:[#allocation2 + $0x1c48] sm:$0xff]  ;;  %v896_v47 = vld [vmem:[#allocation2 + $0x1450] sm:$0xff] }
 0x1d3   :  { %1570 = vmatprep.subr.bf16.mxu0 %v1063_v46  ;;  %v1150_v46 = vld [vmem:[#allocation2 + $0x1c40] sm:$0xff] }
 0x1d5   :  { %1817 = vmatpush1.bf16.msra.mxu1 %v808_v49  ;;  %v905_v49 = vld [vmem:[#allocation2 + $0x1498] sm:$0xff] }
 0x1d6   :  { %1571 = vmatpush1.bf16.msra.mxu0 %v1062_v48  ;;  %1818 = vmatprep.subr.bf16.mxu1 %v817_v51  ;;  %v1159_v48 = vld [vmem:[#allocation2 + $0x1c88] sm:$0xff]  ;;  %v904_v51 = vld [vmem:[#allocation2 + $0x1490] sm:$0xff] }
 0x1d7   :  { %1572 = vmatprep.subr.bf16.mxu0 %v1071_v50  ;;  %v1158_v50 = vld [vmem:[#allocation2 + $0x1c80] sm:$0xff] }
 0x1d9   :  { %1819 = vmatpush1.bf16.msra.mxu1 %v816_v53  ;;  %v913_v53 = vld [vmem:[#allocation2 + $0x14d8] sm:$0xff] }
 0x1da   :  { %1573 = vmatpush1.bf16.msra.mxu0 %v1070_v52  ;;  %1820 = vmatprep.subr.bf16.mxu1 %v825_v55  ;;  %v1167_v52 = vld [vmem:[#allocation2 + $0x1cc8] sm:$0xff]  ;;  %v912_v55 = vld [vmem:[#allocation2 + $0x14d0] sm:$0xff] }
 0x1db   :  { %1574 = vmatprep.subr.bf16.mxu0 %v1079_v54  ;;  %v1166_v54 = vld [vmem:[#allocation2 + $0x1cc0] sm:$0xff] }
 0x1dd   :  { %1821 = vmatpush1.bf16.msra.mxu1 %v824_v57  ;;  %v921_v57 = vld [vmem:[#allocation2 + $0x1518] sm:$0xff] }
 0x1de   :  { %1575 = vmatpush1.bf16.msra.mxu0 %v1078_v56  ;;  %1822 = vmatprep.subr.bf16.mxu1 %v833_v59  ;;  %v1175_v56 = vld [vmem:[#allocation2 + $0x1d08] sm:$0xff]  ;;  %v920_v59 = vld [vmem:[#allocation2 + $0x1510] sm:$0xff] }
 0x1df   :  { %1576 = vmatprep.subr.bf16.mxu0 %v1087_v58  ;;  %v1174_v58 = vld [vmem:[#allocation2 + $0x1d00] sm:$0xff] }
 0x1e1   :  { %1823 = vmatpush1.bf16.msra.mxu1 %v832_v61  ;;  %v929_v61 = vld [vmem:[#allocation2 + $0x1558] sm:$0xff] }
 0x1e2   :  { %1577 = vmatpush1.bf16.msra.mxu0 %v1086_v60  ;;  %1824 = vmatprep.subr.bf16.mxu1 %v841_v63  ;;  %v1183_v60 = vld [vmem:[#allocation2 + $0x1d48] sm:$0xff]  ;;  %v928_v63 = vld [vmem:[#allocation2 + $0x1550] sm:$0xff] }
 0x1e3   :  { %1578 = vmatprep.subr.bf16.mxu0 %v1095_v62  ;;  %v1182_v62 = vld [vmem:[#allocation2 + $0x1d40] sm:$0xff] }
 0x1e5   :  { %1825 = vmatpush1.bf16.msra.mxu1 %v840_v1  ;;  %v937_v1 = vld [vmem:[#allocation2 + $0x1598] sm:$0xff] }
 0x1e6   :  { %1579 = vmatpush1.bf16.msra.mxu0 %v1094_v0  ;;  %1826 = vmatprep.subr.bf16.mxu1 %v849_v3  ;;  %v1191_v0 = vld [vmem:[#allocation2 + $0x1d88] sm:$0xff]  ;;  %v936_v3 = vld [vmem:[#allocation2 + $0x1590] sm:$0xff] }
 0x1e7   :  { %1580 = vmatprep.subr.bf16.mxu0 %v1103_v2  ;;  %v1190_v2 = vld [vmem:[#allocation2 + $0x1d80] sm:$0xff] }
 0x1e9   :  { %1827 = vmatpush1.bf16.msra.mxu1 %v848_v5  ;;  %v945_v5 = vld [vmem:[#allocation2 + $0x15d8] sm:$0xff] }
 0x1ea   :  { %1581 = vmatpush1.bf16.msra.mxu0 %v1102_v4  ;;  %1828 = vmatprep.subr.bf16.mxu1 %v857_v10  ;;  %v1199_v4 = vld [vmem:[#allocation2 + $0x1dc8] sm:$0xff]  ;;  %v944_v10 = vld [vmem:[#allocation2 + $0x15d0] sm:$0xff] }
 0x1eb   :  { %1582 = vmatprep.subr.bf16.mxu0 %v1111_v9  ;;  %v1198_v9 = vld [vmem:[#allocation2 + $0x1dc0] sm:$0xff] }
 0x1ed   :  { %1829 = vmatpush1.bf16.msra.mxu1 %v856_v16  ;;  %v953_v16 = vld [vmem:[#allocation2 + $0x1618] sm:$0xff] }
 0x1ee   :  { %1583 = vmatpush1.bf16.msra.mxu0 %v1110_v15  ;;  %1830 = vmatprep.subr.bf16.mxu1 %v865_v22  ;;  %v1207_v15 = vld [vmem:[#allocation2 + $0x1e08] sm:$0xff]  ;;  %v952_v22 = vld [vmem:[#allocation2 + $0x1610] sm:$0xff] }
 0x1ef   :  { %1584 = vmatprep.subr.bf16.mxu0 %v1119_v21  ;;  %v1206_v21 = vld [vmem:[#allocation2 + $0x1e00] sm:$0xff] }
 0x1f1   :  { %1831 = vmatpush1.bf16.msra.mxu1 %v864_v27  ;;  %v961_v27 = vld [vmem:[#allocation2 + $0x1658] sm:$0xff] }
 0x1f2   :  { %1585 = vmatpush1.bf16.msra.mxu0 %v1118_v23  ;;  %1832 = vmatprep.subr.bf16.mxu1 %v873_v33  ;;  %v1215_v23 = vld [vmem:[#allocation2 + $0x1e48] sm:$0xff]  ;;  %v960_v33 = vld [vmem:[#allocation2 + $0x1650] sm:$0xff] }
 0x1f3   :  { %1586 = vmatprep.subr.bf16.mxu0 %v1127_v32  ;;  %v1214_v32 = vld [vmem:[#allocation2 + $0x1e40] sm:$0xff] }
 0x1f5   :  { %1833 = vmatpush1.bf16.msra.mxu1 %v872_v35  ;;  %v969_v35 = vld [vmem:[#allocation2 + $0x1698] sm:$0xff] }
 0x1f6   :  { %1587 = vmatpush1.bf16.msra.mxu0 %v1126_v34  ;;  %1834 = vmatprep.subr.bf16.mxu1 %v881_v37  ;;  %v1223_v34 = vld [vmem:[#allocation2 + $0x1e88] sm:$0xff]  ;;  %v968_v37 = vld [vmem:[#allocation2 + $0x1690] sm:$0xff] }
 0x1f7   :  { %1588 = vmatprep.subr.bf16.mxu0 %v1135_v36  ;;  %v1222_v36 = vld [vmem:[#allocation2 + $0x1e80] sm:$0xff] }
 0x1f9   :  { %1835 = vmatpush1.bf16.msra.mxu1 %v880_v39  ;;  %v977_v39 = vld [vmem:[#allocation2 + $0x16d8] sm:$0xff] }
 0x1fa   :  { %1589 = vmatpush1.bf16.msra.mxu0 %v1134_v38  ;;  %1845 = vmatprep.subr.bf16.mxu1 %v889_v41  ;;  %v1231_v38 = vld [vmem:[#allocation2 + $0x1ec8] sm:$0xff]  ;;  %v976_v41 = vld [vmem:[#allocation2 + $0x16d0] sm:$0xff] }
 0x1fb   :  { %1599 = vmatprep.subr.bf16.mxu0 %v1143_v40  ;;  %v1230_v40 = vld [vmem:[#allocation2 + $0x1ec0] sm:$0xff] }
 0x1fc   :  { %1837 = vmatmul.mubr.bf16.vlgmr.msra.gmra.mrb[4].mxu1 %v7570_v20 }
 0x1fd   :  { %1591 = vmatmul.mubr.bf16.vlgmr.msra.gmra.mrb[0].mxu0 %v7578_v28  ;;  %1846 = vmatpush1.bf16.msra.mxu1 %v888_v43  ;;  %v985_v43 = vld [vmem:[#allocation2 + $0x1718] sm:$0xff] }
 0x1fe   :  { %1600 = vmatpush1.bf16.msra.mxu0 %v1142_v42  ;;  %1847 = vmatprep.subr.bf16.mxu1 %v897_v45  ;;  %v1239_v42 = vld [vmem:[#allocation2 + $0x1f08] sm:$0xff]  ;;  %v984_v45 = vld [vmem:[#allocation2 + $0x1710] sm:$0xff] }
 0x1ff   :  { %1601 = vmatprep.subr.bf16.mxu0 %v1151_v44  ;;  %1631 = vmatprep.mubr.bf16.mxu0 %v7584_v31  ;;  %v1238_v44 = vld [vmem:[#allocation2 + $0x1f00] sm:$0xff] }
 0x200   :  { %1877 = vmatprep.mubr.bf16.mxu1 %v7576_v26 }
 0x201   :  { %1848 = vmatpush1.bf16.msra.mxu1 %v896_v47  ;;  %v993_v47 = vld [vmem:[#allocation2 + $0x1758] sm:$0xff] }
 0x202   :  { %1602 = vmatpush1.bf16.msra.mxu0 %v1150_v46  ;;  %1849 = vmatprep.subr.bf16.mxu1 %v905_v49  ;;  %v1247_v46 = vld [vmem:[#allocation2 + $0x1f48] sm:$0xff]  ;;  %v992_v49 = vld [vmem:[#allocation2 + $0x1750] sm:$0xff] }
 0x203   :  { %1603 = vmatprep.subr.bf16.mxu0 %v1159_v48  ;;  %v1246_v48 = vld [vmem:[#allocation2 + $0x1f40] sm:$0xff] }
 0x205   :  { %1850 = vmatpush1.bf16.msra.mxu1 %v904_v51  ;;  %v1001_v51 = vld [vmem:[#allocation2 + $0x1798] sm:$0xff] }
 0x206   :  { %1604 = vmatpush1.bf16.msra.mxu0 %v1158_v50  ;;  %1851 = vmatprep.subr.bf16.mxu1 %v913_v53  ;;  %v1255_v50 = vld [vmem:[#allocation2 + $0x1f88] sm:$0xff]  ;;  %v1000_v53 = vld [vmem:[#allocation2 + $0x1790] sm:$0xff] }
 0x207   :  { %1605 = vmatprep.subr.bf16.mxu0 %v1167_v52  ;;  %v1254_v52 = vld [vmem:[#allocation2 + $0x1f80] sm:$0xff] }
 0x209   :  { %1852 = vmatpush1.bf16.msra.mxu1 %v912_v55  ;;  %v1009_v55 = vld [vmem:[#allocation2 + $0x17d8] sm:$0xff] }
 0x20a   :  { %1606 = vmatpush1.bf16.msra.mxu0 %v1166_v54  ;;  %1853 = vmatprep.subr.bf16.mxu1 %v921_v57  ;;  %v1263_v54 = vld [vmem:[#allocation2 + $0x1fc8] sm:$0xff]  ;;  %v1008_v57 = vld [vmem:[#allocation2 + $0x17d0] sm:$0xff] }
 0x20b   :  { %1607 = vmatprep.subr.bf16.mxu0 %v1175_v56  ;;  %v1262_v56 = vld [vmem:[#allocation2 + $0x1fc0] sm:$0xff] }
 0x20d   :  { %1854 = vmatpush1.bf16.msra.mxu1 %v920_v59  ;;  %v251_v59 = vld [vmem:[#allocation2 + $0x28] sm:$0xff] }
 0x20e   :  { %1608 = vmatpush1.bf16.msra.mxu0 %v1174_v58  ;;  %1855 = vmatprep.subr.bf16.mxu1 %v929_v61  ;;  %v1017_v58 = vld [vmem:[#allocation2 + $0x1818] sm:$0xff]  ;;  %v250_v61 = vld [vmem:[#allocation2 + $0x20] sm:$0xff] }
 0x20f   :  { %1609 = vmatprep.subr.bf16.mxu0 %v1183_v60  ;;  %v1016_v60 = vld [vmem:[#allocation2 + $0x1810] sm:$0xff] }
 0x211   :  { %1856 = vmatpush1.bf16.msra.mxu1 %v928_v63  ;;  %v259_v63 = vld [vmem:[#allocation2 + $0x68] sm:$0xff] }
 0x212   :  { %1610 = vmatpush1.bf16.msra.mxu0 %v1182_v62  ;;  %1857 = vmatprep.subr.bf16.mxu1 %v937_v1  ;;  %v1025_v62 = vld [vmem:[#allocation2 + $0x1858] sm:$0xff]  ;;  %v258_v1 = vld [vmem:[#allocation2 + $0x60] sm:$0xff] }
 0x213   :  { %1611 = vmatprep.subr.bf16.mxu0 %v1191_v0  ;;  %v1024_v0 = vld [vmem:[#allocation2 + $0x1850] sm:$0xff] }
 0x215   :  { %1858 = vmatpush1.bf16.msra.mxu1 %v936_v3  ;;  %v267_v3 = vld [vmem:[#allocation2 + $0xa8] sm:$0xff] }
 0x216   :  { %1612 = vmatpush1.bf16.msra.mxu0 %v1190_v2  ;;  %1859 = vmatprep.subr.bf16.mxu1 %v945_v5  ;;  %v1033_v2 = vld [vmem:[#allocation2 + $0x1898] sm:$0xff]  ;;  %v266_v5 = vld [vmem:[#allocation2 + $0xa0] sm:$0xff] }
 0x217   :  { %1613 = vmatprep.subr.bf16.mxu0 %v1199_v4  ;;  %v1032_v4 = vld [vmem:[#allocation2 + $0x1890] sm:$0xff] }
 0x219   :  { %1860 = vmatpush1.bf16.msra.mxu1 %v944_v10  ;;  %v275_v10 = vld [vmem:[#allocation2 + $0xe8] sm:$0xff] }
 0x21a   :  { %1614 = vmatpush1.bf16.msra.mxu0 %v1198_v9  ;;  %1861 = vmatprep.subr.bf16.mxu1 %v953_v16  ;;  %v1041_v9 = vld [vmem:[#allocation2 + $0x18d8] sm:$0xff]  ;;  %v274_v16 = vld [vmem:[#allocation2 + $0xe0] sm:$0xff] }
 0x21b   :  { %1615 = vmatprep.subr.bf16.mxu0 %v1207_v15  ;;  %v1040_v15 = vld [vmem:[#allocation2 + $0x18d0] sm:$0xff] }
 0x21d   :  { %1862 = vmatpush1.bf16.msra.mxu1 %v952_v22  ;;  %v283_v22 = vld [vmem:[#allocation2 + $0x128] sm:$0xff] }
 0x21e   :  { %1616 = vmatpush1.bf16.msra.mxu0 %v1206_v21  ;;  %1863 = vmatprep.subr.bf16.mxu1 %v961_v27  ;;  %v1049_v21 = vld [vmem:[#allocation2 + $0x1918] sm:$0xff]  ;;  %v282_v27 = vld [vmem:[#allocation2 + $0x120] sm:$0xff] }
 0x21f   :  { %1617 = vmatprep.subr.bf16.mxu0 %v1215_v23  ;;  %v1048_v23 = vld [vmem:[#allocation2 + $0x1910] sm:$0xff] }
 0x221   :  { %1864 = vmatpush1.bf16.msra.mxu1 %v960_v33  ;;  %v291_v33 = vld [vmem:[#allocation2 + $0x168] sm:$0xff] }
 0x222   :  { %1618 = vmatpush1.bf16.msra.mxu0 %v1214_v32  ;;  %1865 = vmatprep.subr.bf16.mxu1 %v969_v35  ;;  %v1057_v32 = vld [vmem:[#allocation2 + $0x1958] sm:$0xff]  ;;  %v290_v35 = vld [vmem:[#allocation2 + $0x160] sm:$0xff] }
 0x223   :  { %1619 = vmatprep.subr.bf16.mxu0 %v1223_v34  ;;  %v1056_v34 = vld [vmem:[#allocation2 + $0x1950] sm:$0xff] }
 0x225   :  { %1866 = vmatpush1.bf16.msra.mxu1 %v968_v37  ;;  %v299_v37 = vld [vmem:[#allocation2 + $0x1a8] sm:$0xff] }
 0x226   :  { %1620 = vmatpush1.bf16.msra.mxu0 %v1222_v36  ;;  %1867 = vmatprep.subr.bf16.mxu1 %v977_v39  ;;  %v1065_v36 = vld [vmem:[#allocation2 + $0x1998] sm:$0xff]  ;;  %v298_v39 = vld [vmem:[#allocation2 + $0x1a0] sm:$0xff] }
 0x227   :  { %1621 = vmatprep.subr.bf16.mxu0 %v1231_v38  ;;  %v1064_v38 = vld [vmem:[#allocation2 + $0x1990] sm:$0xff] }
 0x229   :  { %1868 = vmatpush1.bf16.msra.mxu1 %v976_v41  ;;  %v307_v41 = vld [vmem:[#allocation2 + $0x1e8] sm:$0xff] }
 0x22a   :  { %1622 = vmatpush1.bf16.msra.mxu0 %v1230_v40  ;;  %1869 = vmatprep.subr.bf16.mxu1 %v985_v43  ;;  %v1073_v40 = vld [vmem:[#allocation2 + $0x19d8] sm:$0xff]  ;;  %v306_v43 = vld [vmem:[#allocation2 + $0x1e0] sm:$0xff] }
 0x22b   :  { %1623 = vmatprep.subr.bf16.mxu0 %v1239_v42  ;;  %v1072_v42 = vld [vmem:[#allocation2 + $0x19d0] sm:$0xff] }
 0x22d   :  { %1870 = vmatpush1.bf16.msra.mxu1 %v984_v45  ;;  %v315_v45 = vld [vmem:[#allocation2 + $0x228] sm:$0xff] }
 0x22e   :  { %1624 = vmatpush1.bf16.msra.mxu0 %v1238_v44  ;;  %1871 = vmatprep.subr.bf16.mxu1 %v993_v47  ;;  %v1081_v44 = vld [vmem:[#allocation2 + $0x1a18] sm:$0xff]  ;;  %v314_v47 = vld [vmem:[#allocation2 + $0x220] sm:$0xff] }
 0x22f   :  { %1625 = vmatprep.subr.bf16.mxu0 %v1247_v46  ;;  %v1080_v46 = vld [vmem:[#allocation2 + $0x1a10] sm:$0xff] }
 0x231   :  { %1872 = vmatpush1.bf16.msra.mxu1 %v992_v49  ;;  %v323_v49 = vld [vmem:[#allocation2 + $0x268] sm:$0xff] }
 0x232   :  { %1626 = vmatpush1.bf16.msra.mxu0 %v1246_v48  ;;  %1873 = vmatprep.subr.bf16.mxu1 %v1001_v51  ;;  %v1089_v48 = vld [vmem:[#allocation2 + $0x1a58] sm:$0xff]  ;;  %v322_v51 = vld [vmem:[#allocation2 + $0x260] sm:$0xff] }
 0x233   :  { %1627 = vmatprep.subr.bf16.mxu0 %v1255_v50  ;;  %v1088_v50 = vld [vmem:[#allocation2 + $0x1a50] sm:$0xff] }
 0x235   :  { %1874 = vmatpush1.bf16.msra.mxu1 %v1000_v53  ;;  %v331_v53 = vld [vmem:[#allocation2 + $0x2a8] sm:$0xff] }
 0x236   :  { %1628 = vmatpush1.bf16.msra.mxu0 %v1254_v52  ;;  %1875 = vmatprep.subr.bf16.mxu1 %v1009_v55  ;;  %v1097_v52 = vld [vmem:[#allocation2 + $0x1a98] sm:$0xff]  ;;  %v330_v55 = vld [vmem:[#allocation2 + $0x2a0] sm:$0xff] }
 0x237   :  { %1629 = vmatprep.subr.bf16.mxu0 %v1263_v54  ;;  %v1096_v54 = vld [vmem:[#allocation2 + $0x1a90] sm:$0xff] }
 0x239   :  { %1876 = vmatpush1.bf16.msra.mxu1 %v1008_v57  ;;  %v339_v57 = vld [vmem:[#allocation2 + $0x2e8] sm:$0xff] }
 0x23a   :  { %1630 = vmatpush1.bf16.msra.mxu0 %v1262_v56  ;;  %1886 = vmatprep.subr.bf16.mxu1 %v1017_v58  ;;  %v1105_v56 = vld [vmem:[#allocation2 + $0x1ad8] sm:$0xff]  ;;  %v1104_v58 = vld [vmem:[#allocation2 + $0x1ad0] sm:$0xff] }
 0x23b   :  { %1968 = vmatprep.subr.bf16.mxu0 %v251_v59  ;;  %v338_v59 = vld [vmem:[#allocation2 + $0x2e0] sm:$0xff] }
 0x23c   :  { %1878 = vmatmul.mubr.bf16.vlgmr.msra.gmra.mrb[4].mxu1 %v7574_v25 }
 0x23d   :  { %1632 = vmatmul.mubr.bf16.vlgmr.msra.gmra.mrb[0].mxu0 %v7582_v30  ;;  %1887 = vmatpush1.bf16.msra.mxu1 %v1016_v60  ;;  %v1113_v60 = vld [vmem:[#allocation2 + $0x1b18] sm:$0xff] }
 0x23e   :  { %1969 = vmatpush1.bf16.msra.mxu0 %v250_v61  ;;  %1888 = vmatprep.subr.bf16.mxu1 %v1025_v62  ;;  %v347_v61 = vld [vmem:[#allocation2 + $0x328] sm:$0xff]  ;;  %v1112_v62 = vld [vmem:[#allocation2 + $0x1b10] sm:$0xff] }
 0x23f   :  { %1970 = vmatprep.subr.bf16.mxu0 %v259_v63  ;;  %1918 = vmatprep.mubr.bf16.mxu1 %v7580_v29  ;;  %v346_v63 = vld [vmem:[#allocation2 + $0x320] sm:$0xff] }
 0x240   :  { %2000 = vmatprep.mubr.bf16.mxu0 %v7556_v7 }
 0x241   :  { %1889 = vmatpush1.bf16.msra.mxu1 %v1024_v0  ;;  %v1121_v0 = vld [vmem:[#allocation2 + $0x1b58] sm:$0xff] }
 0x242   :  { %1971 = vmatpush1.bf16.msra.mxu0 %v258_v1  ;;  %1890 = vmatprep.subr.bf16.mxu1 %v1033_v2  ;;  %v355_v1 = vld [vmem:[#allocation2 + $0x368] sm:$0xff]  ;;  %v1120_v2 = vld [vmem:[#allocation2 + $0x1b50] sm:$0xff] }
 0x243   :  { %1972 = vmatprep.subr.bf16.mxu0 %v267_v3  ;;  %v354_v3 = vld [vmem:[#allocation2 + $0x360] sm:$0xff] }
 0x245   :  { %1891 = vmatpush1.bf16.msra.mxu1 %v1032_v4  ;;  %v1129_v4 = vld [vmem:[#allocation2 + $0x1b98] sm:$0xff] }
 0x246   :  { %1973 = vmatpush1.bf16.msra.mxu0 %v266_v5  ;;  %1892 = vmatprep.subr.bf16.mxu1 %v1041_v9  ;;  %v363_v5 = vld [vmem:[#allocation2 + $0x3a8] sm:$0xff]  ;;  %v1128_v9 = vld [vmem:[#allocation2 + $0x1b90] sm:$0xff] }
 0x247   :  { %1974 = vmatprep.subr.bf16.mxu0 %v275_v10  ;;  %v362_v10 = vld [vmem:[#allocation2 + $0x3a0] sm:$0xff] }
 0x249   :  { %1893 = vmatpush1.bf16.msra.mxu1 %v1040_v15  ;;  %v1137_v15 = vld [vmem:[#allocation2 + $0x1bd8] sm:$0xff] }
 0x24a   :  { %1975 = vmatpush1.bf16.msra.mxu0 %v274_v16  ;;  %1894 = vmatprep.subr.bf16.mxu1 %v1049_v21  ;;  %v371_v16 = vld [vmem:[#allocation2 + $0x3e8] sm:$0xff]  ;;  %v1136_v21 = vld [vmem:[#allocation2 + $0x1bd0] sm:$0xff] }
 0x24b   :  { %1976 = vmatprep.subr.bf16.mxu0 %v283_v22  ;;  %v370_v22 = vld [vmem:[#allocation2 + $0x3e0] sm:$0xff] }
 0x24d   :  { %1895 = vmatpush1.bf16.msra.mxu1 %v1048_v23  ;;  %v1145_v23 = vld [vmem:[#allocation2 + $0x1c18] sm:$0xff] }
 0x24e   :  { %1977 = vmatpush1.bf16.msra.mxu0 %v282_v27  ;;  %1896 = vmatprep.subr.bf16.mxu1 %v1057_v32  ;;  %v379_v27 = vld [vmem:[#allocation2 + $0x428] sm:$0xff]  ;;  %v1144_v32 = vld [vmem:[#allocation2 + $0x1c10] sm:$0xff] }
 0x24f   :  { %1978 = vmatprep.subr.bf16.mxu0 %v291_v33  ;;  %v378_v33 = vld [vmem:[#allocation2 + $0x420] sm:$0xff] }
 0x251   :  { %1897 = vmatpush1.bf16.msra.mxu1 %v1056_v34  ;;  %v1153_v34 = vld [vmem:[#allocation2 + $0x1c58] sm:$0xff] }
 0x252   :  { %1979 = vmatpush1.bf16.msra.mxu0 %v290_v35  ;;  %1898 = vmatprep.subr.bf16.mxu1 %v1065_v36  ;;  %v387_v35 = vld [vmem:[#allocation2 + $0x468] sm:$0xff]  ;;  %v1152_v36 = vld [vmem:[#allocation2 + $0x1c50] sm:$0xff] }
 0x253   :  { %1980 = vmatprep.subr.bf16.mxu0 %v299_v37  ;;  %v386_v37 = vld [vmem:[#allocation2 + $0x460] sm:$0xff] }
 0x255   :  { %1899 = vmatpush1.bf16.msra.mxu1 %v1064_v38  ;;  %v1161_v38 = vld [vmem:[#allocation2 + $0x1c98] sm:$0xff] }
 0x256   :  { %1981 = vmatpush1.bf16.msra.mxu0 %v298_v39  ;;  %1900 = vmatprep.subr.bf16.mxu1 %v1073_v40  ;;  %v395_v39 = vld [vmem:[#allocation2 + $0x4a8] sm:$0xff]  ;;  %v1160_v40 = vld [vmem:[#allocation2 + $0x1c90] sm:$0xff] }
 0x257   :  { %1982 = vmatprep.subr.bf16.mxu0 %v307_v41  ;;  %v394_v41 = vld [vmem:[#allocation2 + $0x4a0] sm:$0xff] }
 0x259   :  { %1901 = vmatpush1.bf16.msra.mxu1 %v1072_v42  ;;  %v1169_v42 = vld [vmem:[#allocation2 + $0x1cd8] sm:$0xff] }
 0x25a   :  { %1983 = vmatpush1.bf16.msra.mxu0 %v306_v43  ;;  %1902 = vmatprep.subr.bf16.mxu1 %v1081_v44  ;;  %v403_v43 = vld [vmem:[#allocation2 + $0x4e8] sm:$0xff]  ;;  %v1168_v44 = vld [vmem:[#allocation2 + $0x1cd0] sm:$0xff] }
 0x25b   :  { %1984 = vmatprep.subr.bf16.mxu0 %v315_v45  ;;  %v402_v45 = vld [vmem:[#allocation2 + $0x4e0] sm:$0xff] }
 0x25d   :  { %1903 = vmatpush1.bf16.msra.mxu1 %v1080_v46  ;;  %v1177_v46 = vld [vmem:[#allocation2 + $0x1d18] sm:$0xff] }
 0x25e   :  { %1985 = vmatpush1.bf16.msra.mxu0 %v314_v47  ;;  %1904 = vmatprep.subr.bf16.mxu1 %v1089_v48  ;;  %v411_v47 = vld [vmem:[#allocation2 + $0x528] sm:$0xff]  ;;  %v1176_v48 = vld [vmem:[#allocation2 + $0x1d10] sm:$0xff] }
 0x25f   :  { %1986 = vmatprep.subr.bf16.mxu0 %v323_v49  ;;  %v410_v49 = vld [vmem:[#allocation2 + $0x520] sm:$0xff] }
 0x261   :  { %1905 = vmatpush1.bf16.msra.mxu1 %v1088_v50  ;;  %v1185_v50 = vld [vmem:[#allocation2 + $0x1d58] sm:$0xff] }
 0x262   :  { %1987 = vmatpush1.bf16.msra.mxu0 %v322_v51  ;;  %1906 = vmatprep.subr.bf16.mxu1 %v1097_v52  ;;  %v419_v51 = vld [vmem:[#allocation2 + $0x568] sm:$0xff]  ;;  %v1184_v52 = vld [vmem:[#allocation2 + $0x1d50] sm:$0xff] }
 0x263   :  { %1988 = vmatprep.subr.bf16.mxu0 %v331_v53  ;;  %v418_v53 = vld [vmem:[#allocation2 + $0x560] sm:$0xff] }
 0x265   :  { %1907 = vmatpush1.bf16.msra.mxu1 %v1096_v54  ;;  %v1193_v54 = vld [vmem:[#allocation2 + $0x1d98] sm:$0xff] }
 0x266   :  { %1989 = vmatpush1.bf16.msra.mxu0 %v330_v55  ;;  %1908 = vmatprep.subr.bf16.mxu1 %v1105_v56  ;;  %v427_v55 = vld [vmem:[#allocation2 + $0x5a8] sm:$0xff]  ;;  %v1192_v56 = vld [vmem:[#allocation2 + $0x1d90] sm:$0xff] }
 0x267   :  { %1990 = vmatprep.subr.bf16.mxu0 %v339_v57  ;;  %v426_v57 = vld [vmem:[#allocation2 + $0x5a0] sm:$0xff] }
 0x269   :  { %1909 = vmatpush1.bf16.msra.mxu1 %v1104_v58  ;;  %v1201_v58 = vld [vmem:[#allocation2 + $0x1dd8] sm:$0xff] }
 0x26a   :  { %1991 = vmatpush1.bf16.msra.mxu0 %v338_v59  ;;  %1910 = vmatprep.subr.bf16.mxu1 %v1113_v60  ;;  %v435_v59 = vld [vmem:[#allocation2 + $0x5e8] sm:$0xff]  ;;  %v1200_v60 = vld [vmem:[#allocation2 + $0x1dd0] sm:$0xff] }
 0x26b   :  { %1992 = vmatprep.subr.bf16.mxu0 %v347_v61  ;;  %v434_v61 = vld [vmem:[#allocation2 + $0x5e0] sm:$0xff] }
 0x26d   :  { %1911 = vmatpush1.bf16.msra.mxu1 %v1112_v62  ;;  %v1209_v62 = vld [vmem:[#allocation2 + $0x1e18] sm:$0xff] }
 0x26e   :  { %1993 = vmatpush1.bf16.msra.mxu0 %v346_v63  ;;  %1912 = vmatprep.subr.bf16.mxu1 %v1121_v0  ;;  %v443_v63 = vld [vmem:[#allocation2 + $0x628] sm:$0xff]  ;;  %v1208_v0 = vld [vmem:[#allocation2 + $0x1e10] sm:$0xff] }
 0x26f   :  { %1994 = vmatprep.subr.bf16.mxu0 %v355_v1  ;;  %v442_v1 = vld [vmem:[#allocation2 + $0x620] sm:$0xff] }
 0x271   :  { %1913 = vmatpush1.bf16.msra.mxu1 %v1120_v2  ;;  %v1217_v2 = vld [vmem:[#allocation2 + $0x1e58] sm:$0xff] }
 0x272   :  { %1995 = vmatpush1.bf16.msra.mxu0 %v354_v3  ;;  %1914 = vmatprep.subr.bf16.mxu1 %v1129_v4  ;;  %v451_v3 = vld [vmem:[#allocation2 + $0x668] sm:$0xff]  ;;  %v1216_v4 = vld [vmem:[#allocation2 + $0x1e50] sm:$0xff] }
 0x273   :  { %1996 = vmatprep.subr.bf16.mxu0 %v363_v5  ;;  %v450_v5 = vld [vmem:[#allocation2 + $0x660] sm:$0xff] }
 0x275   :  { %1915 = vmatpush1.bf16.msra.mxu1 %v1128_v9  ;;  %v1225_v9 = vld [vmem:[#allocation2 + $0x1e98] sm:$0xff] }
 0x276   :  { %1997 = vmatpush1.bf16.msra.mxu0 %v362_v10  ;;  %1916 = vmatprep.subr.bf16.mxu1 %v1137_v15  ;;  %v459_v10 = vld [vmem:[#allocation2 + $0x6a8] sm:$0xff]  ;;  %v1224_v15 = vld [vmem:[#allocation2 + $0x1e90] sm:$0xff] }
 0x277   :  { %1998 = vmatprep.subr.bf16.mxu0 %v371_v16  ;;  %v458_v16 = vld [vmem:[#allocation2 + $0x6a0] sm:$0xff] }
 0x279   :  { %1917 = vmatpush1.bf16.msra.mxu1 %v1136_v21  ;;  %v1233_v21 = vld [vmem:[#allocation2 + $0x1ed8] sm:$0xff] }
 0x27a   :  { %1999 = vmatpush1.bf16.msra.mxu0 %v370_v22  ;;  %1927 = vmatprep.subr.bf16.mxu1 %v1145_v23  ;;  %v467_v22 = vld [vmem:[#allocation2 + $0x6e8] sm:$0xff]  ;;  %v1232_v23 = vld [vmem:[#allocation2 + $0x1ed0] sm:$0xff] }
 0x27b   :  { %2009 = vmatprep.subr.bf16.mxu0 %v379_v27  ;;  %v466_v27 = vld [vmem:[#allocation2 + $0x6e0] sm:$0xff] }
 0x27c   :  { %1919 = vmatmul.mubr.bf16.vlgmr.msra.gmra.mrb[4].mxu1 %v7578_v28 }
 0x27d   :  { %2001 = vmatmul.mubr.bf16.vlgmr.msra.gmra.mrb[4].mxu0 %v7554_v6  ;;  %1928 = vmatpush1.bf16.msra.mxu1 %v1144_v32  ;;  %v1241_v32 = vld [vmem:[#allocation2 + $0x1f18] sm:$0xff] }
 0x27e   :  { %2010 = vmatpush1.bf16.msra.mxu0 %v378_v33  ;;  %1929 = vmatprep.subr.bf16.mxu1 %v1153_v34  ;;  %v475_v33 = vld [vmem:[#allocation2 + $0x728] sm:$0xff]  ;;  %v1240_v34 = vld [vmem:[#allocation2 + $0x1f10] sm:$0xff] }
 0x27f   :  { %2011 = vmatprep.subr.bf16.mxu0 %v387_v35  ;;  %1959 = vmatprep.mubr.bf16.mxu1 %v7584_v31  ;;  %v474_v35 = vld [vmem:[#allocation2 + $0x720] sm:$0xff] }
 0x280   :  { %2041 = vmatprep.mubr.bf16.mxu0 %v7560_v12 }
 0x281   :  { %1930 = vmatpush1.bf16.msra.mxu1 %v1152_v36  ;;  %v1249_v36 = vld [vmem:[#allocation2 + $0x1f58] sm:$0xff] }
 0x282   :  { %2012 = vmatpush1.bf16.msra.mxu0 %v386_v37  ;;  %1931 = vmatprep.subr.bf16.mxu1 %v1161_v38  ;;  %v483_v37 = vld [vmem:[#allocation2 + $0x768] sm:$0xff]  ;;  %v1248_v38 = vld [vmem:[#allocation2 + $0x1f50] sm:$0xff] }
 0x283   :  { %2013 = vmatprep.subr.bf16.mxu0 %v395_v39  ;;  %v482_v39 = vld [vmem:[#allocation2 + $0x760] sm:$0xff] }
 0x285   :  { %1932 = vmatpush1.bf16.msra.mxu1 %v1160_v40  ;;  %v1257_v40 = vld [vmem:[#allocation2 + $0x1f98] sm:$0xff] }
 0x286   :  { %2014 = vmatpush1.bf16.msra.mxu0 %v394_v41  ;;  %1933 = vmatprep.subr.bf16.mxu1 %v1169_v42  ;;  %v491_v41 = vld [vmem:[#allocation2 + $0x7a8] sm:$0xff]  ;;  %v1256_v42 = vld [vmem:[#allocation2 + $0x1f90] sm:$0xff] }
 0x287   :  { %2015 = vmatprep.subr.bf16.mxu0 %v403_v43  ;;  %v490_v43 = vld [vmem:[#allocation2 + $0x7a0] sm:$0xff] }
 0x289   :  { %1934 = vmatpush1.bf16.msra.mxu1 %v1168_v44  ;;  %v1265_v44 = vld [vmem:[#allocation2 + $0x1fd8] sm:$0xff] }
 0x28a   :  { %2016 = vmatpush1.bf16.msra.mxu0 %v402_v45  ;;  %1935 = vmatprep.subr.bf16.mxu1 %v1177_v46  ;;  %v499_v45 = vld [vmem:[#allocation2 + $0x7e8] sm:$0xff]  ;;  %v1264_v46 = vld [vmem:[#allocation2 + $0x1fd0] sm:$0xff] }
 0x28b   :  { %2017 = vmatprep.subr.bf16.mxu0 %v411_v47  ;;  %v498_v47 = vld [vmem:[#allocation2 + $0x7e0] sm:$0xff] }
 0x28d   :  { %1936 = vmatpush1.bf16.msra.mxu1 %v1176_v48  ;;  %v507_v48 = vld [vmem:[#allocation2 + $0x828] sm:$0xff] }
 0x28e   :  { %2018 = vmatpush1.bf16.msra.mxu0 %v410_v49  ;;  %1937 = vmatprep.subr.bf16.mxu1 %v1185_v50  ;;  %v253_v49 = vld [vmem:[#allocation2 + $0x38] sm:$0xff]  ;;  %v506_v50 = vld [vmem:[#allocation2 + $0x820] sm:$0xff] }
 0x28f   :  { %2019 = vmatprep.subr.bf16.mxu0 %v419_v51  ;;  %v252_v51 = vld [vmem:[#allocation2 + $0x30] sm:$0xff] }
 0x291   :  { %1938 = vmatpush1.bf16.msra.mxu1 %v1184_v52  ;;  %v515_v52 = vld [vmem:[#allocation2 + $0x868] sm:$0xff] }
 0x292   :  { %2020 = vmatpush1.bf16.msra.mxu0 %v418_v53  ;;  %1939 = vmatprep.subr.bf16.mxu1 %v1193_v54  ;;  %v261_v53 = vld [vmem:[#allocation2 + $0x78] sm:$0xff]  ;;  %v514_v54 = vld [vmem:[#allocation2 + $0x860] sm:$0xff] }
 0x293   :  { %2021 = vmatprep.subr.bf16.mxu0 %v427_v55  ;;  %v260_v55 = vld [vmem:[#allocation2 + $0x70] sm:$0xff] }
 0x295   :  { %1940 = vmatpush1.bf16.msra.mxu1 %v1192_v56  ;;  %v523_v56 = vld [vmem:[#allocation2 + $0x8a8] sm:$0xff] }
 0x296   :  { %2022 = vmatpush1.bf16.msra.mxu0 %v426_v57  ;;  %1941 = vmatprep.subr.bf16.mxu1 %v1201_v58  ;;  %v269_v57 = vld [vmem:[#allocation2 + $0xb8] sm:$0xff]  ;;  %v522_v58 = vld [vmem:[#allocation2 + $0x8a0] sm:$0xff] }
 0x297   :  { %2023 = vmatprep.subr.bf16.mxu0 %v435_v59  ;;  %v268_v59 = vld [vmem:[#allocation2 + $0xb0] sm:$0xff] }
 0x299   :  { %1942 = vmatpush1.bf16.msra.mxu1 %v1200_v60  ;;  %v531_v60 = vld [vmem:[#allocation2 + $0x8e8] sm:$0xff] }
 0x29a   :  { %2024 = vmatpush1.bf16.msra.mxu0 %v434_v61  ;;  %1943 = vmatprep.subr.bf16.mxu1 %v1209_v62  ;;  %v277_v61 = vld [vmem:[#allocation2 + $0xf8] sm:$0xff]  ;;  %v530_v62 = vld [vmem:[#allocation2 + $0x8e0] sm:$0xff] }
 0x29b   :  { %2025 = vmatprep.subr.bf16.mxu0 %v443_v63  ;;  %v276_v63 = vld [vmem:[#allocation2 + $0xf0] sm:$0xff] }
 0x29d   :  { %1944 = vmatpush1.bf16.msra.mxu1 %v1208_v0  ;;  %v539_v0 = vld [vmem:[#allocation2 + $0x928] sm:$0xff] }
 0x29e   :  { %2026 = vmatpush1.bf16.msra.mxu0 %v442_v1  ;;  %1945 = vmatprep.subr.bf16.mxu1 %v1217_v2  ;;  %v285_v1 = vld [vmem:[#allocation2 + $0x138] sm:$0xff]  ;;  %v284_v2 = vld [vmem:[#allocation2 + $0x130] sm:$0xff] }
 0x29f   :  { %2027 = vmatprep.subr.bf16.mxu0 %v451_v3  ;;  %v547_v3 = vld [vmem:[#allocation2 + $0x968] sm:$0xff] }
 0x2a1   :  { %1946 = vmatpush1.bf16.msra.mxu1 %v1216_v4  ;;  %v293_v4 = vld [vmem:[#allocation2 + $0x178] sm:$0xff] }
 0x2a2   :  { %2028 = vmatpush1.bf16.msra.mxu0 %v450_v5  ;;  %1947 = vmatprep.subr.bf16.mxu1 %v1225_v9  ;;  %v546_v5 = vld [vmem:[#allocation2 + $0x960] sm:$0xff]  ;;  %v292_v9 = vld [vmem:[#allocation2 + $0x170] sm:$0xff] }
 0x2a3   :  { %2029 = vmatprep.subr.bf16.mxu0 %v459_v10  ;;  %v555_v10 = vld [vmem:[#allocation2 + $0x9a8] sm:$0xff] }
 0x2a5   :  { %1948 = vmatpush1.bf16.msra.mxu1 %v1224_v15  ;;  %v301_v15 = vld [vmem:[#allocation2 + $0x1b8] sm:$0xff] }
 0x2a6   :  { %2030 = vmatpush1.bf16.msra.mxu0 %v458_v16  ;;  %1949 = vmatprep.subr.bf16.mxu1 %v1233_v21  ;;  %v554_v16 = vld [vmem:[#allocation2 + $0x9a0] sm:$0xff]  ;;  %v300_v21 = vld [vmem:[#allocation2 + $0x1b0] sm:$0xff] }
 0x2a7   :  { %2031 = vmatprep.subr.bf16.mxu0 %v467_v22  ;;  %v563_v22 = vld [vmem:[#allocation2 + $0x9e8] sm:$0xff] }
 0x2a9   :  { %1950 = vmatpush1.bf16.msra.mxu1 %v1232_v23  ;;  %v309_v23 = vld [vmem:[#allocation2 + $0x1f8] sm:$0xff] }
 0x2aa   :  { %2032 = vmatpush1.bf16.msra.mxu0 %v466_v27  ;;  %1951 = vmatprep.subr.bf16.mxu1 %v1241_v32  ;;  %v562_v27 = vld [vmem:[#allocation2 + $0x9e0] sm:$0xff]  ;;  %v308_v32 = vld [vmem:[#allocation2 + $0x1f0] sm:$0xff] }
 0x2ab   :  { %2033 = vmatprep.subr.bf16.mxu0 %v475_v33  ;;  %v571_v33 = vld [vmem:[#allocation2 + $0xa28] sm:$0xff] }
 0x2ad   :  { %1952 = vmatpush1.bf16.msra.mxu1 %v1240_v34  ;;  %v317_v34 = vld [vmem:[#allocation2 + $0x238] sm:$0xff] }
 0x2ae   :  { %2034 = vmatpush1.bf16.msra.mxu0 %v474_v35  ;;  %1953 = vmatprep.subr.bf16.mxu1 %v1249_v36  ;;  %v570_v35 = vld [vmem:[#allocation2 + $0xa20] sm:$0xff]  ;;  %v316_v36 = vld [vmem:[#allocation2 + $0x230] sm:$0xff] }
 0x2af   :  { %2035 = vmatprep.subr.bf16.mxu0 %v483_v37  ;;  %v579_v37 = vld [vmem:[#allocation2 + $0xa68] sm:$0xff] }
 0x2b1   :  { %1954 = vmatpush1.bf16.msra.mxu1 %v1248_v38  ;;  %v325_v38 = vld [vmem:[#allocation2 + $0x278] sm:$0xff] }
 0x2b2   :  { %2036 = vmatpush1.bf16.msra.mxu0 %v482_v39  ;;  %1955 = vmatprep.subr.bf16.mxu1 %v1257_v40  ;;  %v578_v39 = vld [vmem:[#allocation2 + $0xa60] sm:$0xff]  ;;  %v324_v40 = vld [vmem:[#allocation2 + $0x270] sm:$0xff] }
 0x2b3   :  { %2037 = vmatprep.subr.bf16.mxu0 %v491_v41  ;;  %v587_v41 = vld [vmem:[#allocation2 + $0xaa8] sm:$0xff] }
 0x2b5   :  { %1956 = vmatpush1.bf16.msra.mxu1 %v1256_v42  ;;  %v333_v42 = vld [vmem:[#allocation2 + $0x2b8] sm:$0xff] }
 0x2b6   :  { %2038 = vmatpush1.bf16.msra.mxu0 %v490_v43  ;;  %1957 = vmatprep.subr.bf16.mxu1 %v1265_v44  ;;  %v586_v43 = vld [vmem:[#allocation2 + $0xaa0] sm:$0xff]  ;;  %v332_v44 = vld [vmem:[#allocation2 + $0x2b0] sm:$0xff] }
 0x2b7   :  { %2039 = vmatprep.subr.bf16.mxu0 %v499_v45  ;;  %v595_v45 = vld [vmem:[#allocation2 + $0xae8] sm:$0xff] }
 0x2b9   :  { %1958 = vmatpush1.bf16.msra.mxu1 %v1264_v46  ;;  %v341_v46 = vld [vmem:[#allocation2 + $0x2f8] sm:$0xff] }
 0x2ba   :  { %2040 = vmatpush1.bf16.msra.mxu0 %v498_v47  ;;  %2296 = vmatprep.subr.bf16.mxu1 %v253_v49  ;;  %v594_v47 = vld [vmem:[#allocation2 + $0xae0] sm:$0xff]  ;;  %v603_v49 = vld [vmem:[#allocation2 + $0xb28] sm:$0xff] }
 0x2bb   :  { %2050 = vmatprep.subr.bf16.mxu0 %v507_v48  ;;  %v340_v48 = vld [vmem:[#allocation2 + $0x2f0] sm:$0xff] }
 0x2bc   :  { %1960 = vmatmul.mubr.bf16.vlgmr.msra.gmra.mrb[4].mxu1 %v7582_v30 }
 0x2bd   :  { %2042 = vmatmul.mubr.bf16.vlgmr.msra.gmra.mrb[4].mxu0 %v7558_v8  ;;  %2297 = vmatpush1.bf16.msra.mxu1 %v252_v51  ;;  %v602_v51 = vld [vmem:[#allocation2 + $0xb20] sm:$0xff] }
 0x2be   :  { %2051 = vmatpush1.bf16.msra.mxu0 %v506_v50  ;;  %2298 = vmatprep.subr.bf16.mxu1 %v261_v53  ;;  %v349_v50 = vld [vmem:[#allocation2 + $0x338] sm:$0xff]  ;;  %v611_v53 = vld [vmem:[#allocation2 + $0xb68] sm:$0xff] }
 0x2bf   :  { %2052 = vmatprep.subr.bf16.mxu0 %v515_v52  ;;  %2082 = vmatprep.mubr.bf16.mxu0 %v7564_v14  ;;  %v348_v52 = vld [vmem:[#allocation2 + $0x330] sm:$0xff] }
 0x2c0   :  { %2328 = vmatprep.mubr.bf16.mxu1 %v7556_v7  ;;  %v538_v7 = vld [vmem:[#allocation2 + $0x920] sm:$0xff] }
 0x2c1   :  { %2299 = vmatpush1.bf16.msra.mxu1 %v260_v55  ;;  %v610_v55 = vld [vmem:[#allocation2 + $0xb60] sm:$0xff] }
 0x2c2   :  { %2053 = vmatpush1.bf16.msra.mxu0 %v514_v54  ;;  %2300 = vmatprep.subr.bf16.mxu1 %v269_v57  ;;  %v357_v54 = vld [vmem:[#allocation2 + $0x378] sm:$0xff]  ;;  %v619_v57 = vld [vmem:[#allocation2 + $0xba8] sm:$0xff] }
 0x2c3   :  { %2054 = vmatprep.subr.bf16.mxu0 %v523_v56  ;;  %v356_v56 = vld [vmem:[#allocation2 + $0x370] sm:$0xff] }
 0x2c5   :  { %2301 = vmatpush1.bf16.msra.mxu1 %v268_v59  ;;  %v618_v59 = vld [vmem:[#allocation2 + $0xba0] sm:$0xff] }
 0x2c6   :  { %2055 = vmatpush1.bf16.msra.mxu0 %v522_v58  ;;  %2302 = vmatprep.subr.bf16.mxu1 %v277_v61  ;;  %v365_v58 = vld [vmem:[#allocation2 + $0x3b8] sm:$0xff]  ;;  %v627_v61 = vld [vmem:[#allocation2 + $0xbe8] sm:$0xff] }
 0x2c7   :  { %2056 = vmatprep.subr.bf16.mxu0 %v531_v60  ;;  %v364_v60 = vld [vmem:[#allocation2 + $0x3b0] sm:$0xff] }
 0x2c9   :  { %2303 = vmatpush1.bf16.msra.mxu1 %v276_v63  ;;  %v626_v63 = vld [vmem:[#allocation2 + $0xbe0] sm:$0xff] }
 0x2ca   :  { %2057 = vmatpush1.bf16.msra.mxu0 %v530_v62  ;;  %2304 = vmatprep.subr.bf16.mxu1 %v285_v1  ;;  %v373_v62 = vld [vmem:[#allocation2 + $0x3f8] sm:$0xff]  ;;  %v635_v1 = vld [vmem:[#allocation2 + $0xc28] sm:$0xff] }
 0x2cb   :  { %2058 = vmatprep.subr.bf16.mxu0 %v539_v0  ;;  %v372_v0 = vld [vmem:[#allocation2 + $0x3f0] sm:$0xff] }
 0x2cd   :  { %2305 = vmatpush1.bf16.msra.mxu1 %v284_v2  ;;  %v634_v2 = vld [vmem:[#allocation2 + $0xc20] sm:$0xff] }
 0x2ce   :  { %2059 = vmatpush1.bf16.msra.mxu0 %v538_v7  ;;  %2306 = vmatprep.subr.bf16.mxu1 %v293_v4  ;;  %v381_v7 = vld [vmem:[#allocation2 + $0x438] sm:$0xff]  ;;  %v643_v4 = vld [vmem:[#allocation2 + $0xc68] sm:$0xff] }
 0x2cf   :  { %2060 = vmatprep.subr.bf16.mxu0 %v547_v3  ;;  %v380_v3 = vld [vmem:[#allocation2 + $0x430] sm:$0xff] }
 0x2d1   :  { %2307 = vmatpush1.bf16.msra.mxu1 %v292_v9  ;;  %v1272_v9 = vlaneseq }
 0x2d2   :  { %2061 = vmatpush1.bf16.msra.mxu0 %v546_v5  ;;  %2308 = vmatprep.subr.bf16.mxu1 %v301_v15  ;;  %v389_v5 = vld [vmem:[#allocation2 + $0x478] sm:$0xff]  ;;  %v388_v15 = vld [vmem:[#allocation2 + $0x470] sm:$0xff] }
 0x2d3   :  { %2062 = vmatprep.subr.bf16.mxu0 %v555_v10  ;;  %v642_v10 = vld [vmem:[#allocation2 + $0xc60] sm:$0xff] }
 0x2d5   :  { %2309 = vmatpush1.bf16.msra.mxu1 %v300_v21  ;;  %v397_v21 = vld [vmem:[#allocation2 + $0x4b8] sm:$0xff] }
 0x2d6   :  { %2063 = vmatpush1.bf16.msra.mxu0 %v554_v16  ;;  %2310 = vmatprep.subr.bf16.mxu1 %v309_v23  ;;  %v651_v16 = vld [vmem:[#allocation2 + $0xca8] sm:$0xff]  ;;  %v396_v23 = vld [vmem:[#allocation2 + $0x4b0] sm:$0xff] }
 0x2d7   :  { %2064 = vmatprep.subr.bf16.mxu0 %v563_v22  ;;  %v7632_v22 = vshrl.u32 %v1272_v9, 7  ;;  %v706_v9 = vld [vmem:[#allocation2 + $0xe60] sm:$0xff] }
 0x2d9   :  { %2311 = vmatpush1.bf16.msra.mxu1 %v308_v32  ;;  %v405_v32 = vld [vmem:[#allocation2 + $0x4f8] sm:$0xff] }
 0x2da   :  { %2065 = vmatpush1.bf16.msra.mxu0 %v562_v27  ;;  %2312 = vmatprep.subr.bf16.mxu1 %v317_v34  ;;  %v659_v27 = vld [vmem:[#allocation2 + $0xce8] sm:$0xff]  ;;  %v658_v34 = vld [vmem:[#allocation2 + $0xce0] sm:$0xff] }
 0x2db   :  { %2066 = vmatprep.subr.bf16.mxu0 %v571_v33  ;;  %v7635_v33 = vsub.s32 0, %v7632_v22 }
 0x2dd   :  { %2313 = vmatpush1.bf16.msra.mxu1 %v316_v36  ;;  %v7640_v36 = vsub.s32 1, %v7632_v22 }
 0x2de   :  { %2067 = vmatpush1.bf16.msra.mxu0 %v570_v35  ;;  %2314 = vmatprep.subr.bf16.mxu1 %v325_v38  ;;  %v404_v35 = vld [vmem:[#allocation2 + $0x4f0] sm:$0xff]  ;;  %v413_v38 = vld [vmem:[#allocation2 + $0x538] sm:$0xff] }
 0x2df   :  { %2068 = vmatprep.subr.bf16.mxu0 %v579_v37  ;;  %v667_v37 = vld [vmem:[#allocation2 + $0xd28] sm:$0xff] }
 0x2e1   :  { %2315 = vmatpush1.bf16.msra.mxu1 %v324_v40  ;;  %v666_v40 = vld [vmem:[#allocation2 + $0xd20] sm:$0xff] }
 0x2e2   :  { %2069 = vmatpush1.bf16.msra.mxu0 %v578_v39  ;;  %2316 = vmatprep.subr.bf16.mxu1 %v333_v42 }
 0x2e3   :  { %2070 = vmatprep.subr.bf16.mxu0 %v587_v41  ;;  %v412_v41 = vld [vmem:[#allocation2 + $0x530] sm:$0xff] }
 0x2e5   :  { %2317 = vmatpush1.bf16.msra.mxu1 %v332_v44  ;;  %v421_v44 = vld [vmem:[#allocation2 + $0x578] sm:$0xff] }
 0x2e6   :  { %2071 = vmatpush1.bf16.msra.mxu0 %v586_v43  ;;  %2318 = vmatprep.subr.bf16.mxu1 %v341_v46  ;;  %v675_v43 = vld [vmem:[#allocation2 + $0xd68] sm:$0xff]  ;;  %v674_v46 = vld [vmem:[#allocation2 + $0xd60] sm:$0xff] }
 0x2e7   :  { %2072 = vmatprep.subr.bf16.mxu0 %v595_v45 }
 0x2e9   :  { %2319 = vmatpush1.bf16.msra.mxu1 %v340_v48 }
 0x2ea   :  { %2073 = vmatpush1.bf16.msra.mxu0 %v594_v47  ;;  %2320 = vmatprep.subr.bf16.mxu1 %v349_v50  ;;  %v420_v47 = vld [vmem:[#allocation2 + $0x570] sm:$0xff]  ;;  %v683_v50 = vld [vmem:[#allocation2 + $0xda8] sm:$0xff] }
 0x2eb   :  { %2074 = vmatprep.subr.bf16.mxu0 %v603_v49 }
 0x2ed   :  { %2321 = vmatpush1.bf16.msra.mxu1 %v348_v52 }
 0x2ee   :  { %2075 = vmatpush1.bf16.msra.mxu0 %v602_v51  ;;  %2322 = vmatprep.subr.bf16.mxu1 %v357_v54  ;;  %v429_v51 = vld [vmem:[#allocation2 + $0x5b8] sm:$0xff] }
 0x2ef   :  { %2076 = vmatprep.subr.bf16.mxu0 %v611_v53 }
 0x2f1   :  { %2323 = vmatpush1.bf16.msra.mxu1 %v356_v56 }
 0x2f2   :  { %2077 = vmatpush1.bf16.msra.mxu0 %v610_v55  ;;  %2324 = vmatprep.subr.bf16.mxu1 %v365_v58  ;;  %v428_v58 = vld [vmem:[#allocation2 + $0x5b0] sm:$0xff] }
 0x2f3   :  { %2078 = vmatprep.subr.bf16.mxu0 %v619_v57 }
 0x2f5   :  { %2325 = vmatpush1.bf16.msra.mxu1 %v364_v60  ;;  %v691_v60 = vld [vmem:[#allocation2 + $0xde8] sm:$0xff] }
 0x2f6   :  { %2079 = vmatpush1.bf16.msra.mxu0 %v618_v59  ;;  %2326 = vmatprep.subr.bf16.mxu1 %v373_v62 }
 0x2f7   :  { %2080 = vmatprep.subr.bf16.mxu0 %v627_v61  ;;  %v437_v61 = vld [vmem:[#allocation2 + $0x5f8] sm:$0xff] }
 0x2f9   :  { %2327 = vmatpush1.bf16.msra.mxu1 %v372_v0  ;;  %v436_v0 = vld [vmem:[#allocation2 + $0x5f0] sm:$0xff] }
 0x2fa   :  { %2081 = vmatpush1.bf16.msra.mxu0 %v626_v63  ;;  %2337 = vmatprep.subr.bf16.mxu1 %v381_v7  ;;  %v690_v63 = vld [vmem:[#allocation2 + $0xde0] sm:$0xff]  ;;  %v445_v7 = vld [vmem:[#allocation2 + $0x638] sm:$0xff] }
 0x2fb   :  { %2091 = vmatprep.subr.bf16.mxu0 %v635_v1  ;;  %v699_v1 = vld [vmem:[#allocation2 + $0xe28] sm:$0xff] }
 0x2fc   :  { %2329 = vmatmul.mubr.bf16.vlgmr.msra.gmra.mrb[8].mxu1 %v7554_v6  ;;  %v650_v6 = vld [vmem:[#allocation2 + $0xca0] sm:$0xff] }
 0x2fd   :  { %2083 = vmatmul.mubr.bf16.vlgmr.msra.gmra.mrb[4].mxu0 %v7562_v13  ;;  %2338 = vmatpush1.bf16.msra.mxu1 %v380_v3  ;;  %v444_v3 = vld [vmem:[#allocation2 + $0x630] sm:$0xff] }
 0x2fe   :  { %2092 = vmatpush1.bf16.msra.mxu0 %v634_v2  ;;  %2339 = vmatprep.subr.bf16.mxu1 %v389_v5  ;;  %v698_v2 = vld [vmem:[#allocation2 + $0xe20] sm:$0xff]  ;;  %v453_v5 = vld [vmem:[#allocation2 + $0x678] sm:$0xff] }
 0x2ff   :  { %2093 = vmatprep.subr.bf16.mxu0 %v643_v4  ;;  %2123 = vmatprep.mubr.bf16.mxu0 %v7568_v19  ;;  %v707_v4 = vld [vmem:[#allocation2 + $0xe68] sm:$0xff] }
 0x300   :  { %2369 = vmatprep.mubr.bf16.mxu1 %v7560_v12  ;;  %v7637_v12 = vld [vmem:[#allocation10] sm:$0xff] }
 0x301   :  { %2340 = vmatpush1.bf16.msra.mxu1 %v388_v15  ;;  %v1275_v39 = vrot.slane %v7637_v12, %v7635_v33  ;;  %v1279_v42 = vrot.slane %v7637_v12, %v7640_v36  ;;  %v715_v15 = vld [vmem:[#allocation2 + $0xea8] sm:$0xff] }
 0x302   :  { %2094 = vmatpush1.bf16.msra.mxu0 %v642_v10  ;;  %2341 = vmatprep.subr.bf16.mxu1 %v397_v21  ;;  %v452_v10 = vld [vmem:[#allocation2 + $0x670] sm:$0xff]  ;;  %v714_v21 = vld [vmem:[#allocation2 + $0xea0] sm:$0xff] }
 0x303   :  { %2095 = vmatprep.subr.bf16.mxu0 %v651_v16  ;;  %v1347_v45 = vadd.f32 %v7604_v11, %v1275_v39  ;;  %v1349_v48 = vadd.f32 %v7606_v17, %v1279_v42  ;;  %v682_v11 = vld [vmem:[#allocation2 + $0xda0] sm:$0xff]  ;;  %v461_v16 = vld [vmem:[#allocation2 + $0x6b8] sm:$0xff]  ;;  %v476_v39 = vld [vmem:[#allocation2 + $0x730] sm:$0xff] }
 0x304   :  { %v738_v42 = vld [vmem:[#allocation2 + $0xf60] sm:$0xff] }
 0x305   :  { %2342 = vmatpush1.bf16.msra.mxu1 %v396_v23  ;;  %v723_v23 = vld [vmem:[#allocation2 + $0xee8] sm:$0xff] }
 0x306   :  { %2096 = vmatpush1.bf16.msra.mxu0 %v650_v6  ;;  %2343 = vmatprep.subr.bf16.mxu1 %v405_v32  ;;  %v460_v6 = vld [vmem:[#allocation2 + $0x6b0] sm:$0xff]  ;;  %v722_v32 = vld [vmem:[#allocation2 + $0xee0] sm:$0xff] }
 0x307   :  { %2097 = vmatprep.subr.bf16.mxu0 %v659_v27  ;;  %v469_v27 = vld [vmem:[#allocation2 + $0x6f8] sm:$0xff] }
 0x309   :  { %2344 = vmatpush1.bf16.msra.mxu1 %v404_v35  ;;  %v731_v35 = vld [vmem:[#allocation2 + $0xf28] sm:$0xff] }
 0x30a   :  { %2098 = vmatpush1.bf16.msra.mxu0 %v658_v34  ;;  %2345 = vmatprep.subr.bf16.mxu1 %v413_v38  ;;  %v468_v34 = vld [vmem:[#allocation2 + $0x6f0] sm:$0xff]  ;;  %v730_v38 = vld [vmem:[#allocation2 + $0xf20] sm:$0xff] }
 0x30b   :  { %2099 = vmatprep.subr.bf16.mxu0 %v667_v37  ;;  %v477_v37 = vld [vmem:[#allocation2 + $0x738] sm:$0xff] }
 0x30d   :  { %2346 = vmatpush1.bf16.msra.mxu1 %v412_v41  ;;  %v485_v41 = vld [vmem:[#allocation2 + $0x778] sm:$0xff] }
 0x30e   :  { %2100 = vmatpush1.bf16.msra.mxu0 %v666_v40  ;;  %2347 = vmatprep.subr.bf16.mxu1 %v421_v44  ;;  %v739_v40 = vld [vmem:[#allocation2 + $0xf68] sm:$0xff] }
 0x30f   :  { %2101 = vmatprep.subr.bf16.mxu0 %v675_v43  ;;  %v484_v43 = vld [vmem:[#allocation2 + $0x770] sm:$0xff]  ;;  %v747_v44 = vld [vmem:[#allocation2 + $0xfa8] sm:$0xff] }
 0x310   :  { %v1633_v49 = vpop.f32.mrb[0].mxu0 }
 0x311   :  { %v6941_v52 = vadd.f32 %v1633_v49, %v1347_v45  ;;  %v1635_v53 = vpop.f32.mrb[1].mxu0  ;;  %2348 = vmatpush1.bf16.msra.mxu1 %v420_v47  ;;  %v493_v45 = vld [vmem:[#allocation2 + $0x7b8] sm:$0xff]  ;;  %v492_v47 = vld [vmem:[#allocation2 + $0x7b0] sm:$0xff] }
 0x312   :  { %v6943_v54 = vadd.f32 %v1635_v53, %v1349_v48  ;;  %v1637_v55 = vpop.f32.mrb[2].mxu0  ;;  %2102 = vmatpush1.bf16.msra.mxu0 %v674_v46  ;;  %2349 = vmatprep.subr.bf16.mxu1 %v429_v51  ;;  %v746_v46 = vld [vmem:[#allocation2 + $0xfa0] sm:$0xff]  ;;  %v755_v48 = vld [vmem:[#allocation2 + $0xfe8] sm:$0xff]  ;;  %v501_v49 = vld [vmem:[#allocation2 + $0x7f8] sm:$0xff] }
 0x313   :  { %v2624_v56 = vmax.f32 %v6941_v52, 0.0  ;;  %v1638_v57 = vpop.f32.mrb[3].mxu0  ;;  %2103 = vmatprep.subr.bf16.mxu0 %v683_v50  ;;  %v754_v50 = vld [vmem:[#allocation2 + $0xfe0] sm:$0xff]  ;;  %v500_v51 = vld [vmem:[#allocation2 + $0x7f0] sm:$0xff]  ;;  %v763_v52 = vld [vmem:[#allocation2 + $0x1028] sm:$0xff] }
 0x314   :  { %v2625_v59 = vmax.f32 %v6943_v54, 0.0  ;;  %v509_v53 = vld [vmem:[#allocation2 + $0x838] sm:$0xff]  ;;  %v762_v54 = vld [vmem:[#allocation2 + $0x1020] sm:$0xff]  ;;  %v508_v55 = vld [vmem:[#allocation2 + $0x830] sm:$0xff] }
 0x315   :  { %v7648_v62 = vpack.c.bf16 %v2624_v56, %v2624_v56  ;;  %2350 = vmatpush1.bf16.msra.mxu1 %v428_v58  ;;  %v771_v56 = vld [vmem:[#allocation2 + $0x1068] sm:$0xff]  ;;  %v517_v57 = vld [vmem:[#allocation2 + $0x878] sm:$0xff]  ;;  %v516_v58 = vld [vmem:[#allocation2 + $0x870] sm:$0xff] }
 0x316   :  { %v7650_v17 = vpack.c.bf16 %v2625_v59, %v2625_v59  ;;  %2104 = vmatpush1.bf16.msra.mxu0 %v682_v11  ;;  %2351 = vmatprep.subr.bf16.mxu1 %v437_v61  ;;  %v770_v11 = vld [vmem:[#allocation2 + $0x1060] sm:$0xff]  ;;  %v779_v59 = vld [vmem:[#allocation2 + $0x10a8] sm:$0xff] }
 0x317   :  { %2105 = vmatprep.subr.bf16.mxu0 %v691_v60  ;;  %v525_v60 = vld [vmem:[#allocation2 + $0x8b8] sm:$0xff]  ;;  %v778_v61 = vld [vmem:[#allocation2 + $0x10a0] sm:$0xff] }
 0x319   :  { %2352 = vmatpush1.bf16.msra.mxu1 %v436_v0  ;;  %v787_v0 = vld [vmem:[#allocation2 + $0x10e8] sm:$0xff] }
 0x31a   :  { %2106 = vmatpush1.bf16.msra.mxu0 %v690_v63  ;;  %2353 = vmatprep.subr.bf16.mxu1 %v445_v7  ;;  %v524_v63 = vld [vmem:[#allocation2 + $0x8b0] sm:$0xff] }
 0x31b   :  { %2107 = vmatprep.subr.bf16.mxu0 %v699_v1  ;;  %v786_v1 = vld [vmem:[#allocation2 + $0x10e0] sm:$0xff]  ;;  %v532_v7 = vld [vmem:[#allocation2 + $0x8f0] sm:$0xff] }
 0x31d   :  { %2354 = vmatpush1.bf16.msra.mxu1 %v444_v3  ;;  %v541_v3 = vld [vmem:[#allocation2 + $0x938] sm:$0xff] }
 0x31e   :  { %2108 = vmatpush1.bf16.msra.mxu0 %v698_v2  ;;  %2355 = vmatprep.subr.bf16.mxu1 %v453_v5  ;;  %v795_v2 = vld [vmem:[#allocation2 + $0x1128] sm:$0xff] }
 0x31f   :  { %2109 = vmatprep.subr.bf16.mxu0 %v707_v4  ;;  %v540_v4 = vld [vmem:[#allocation2 + $0x930] sm:$0xff]  ;;  %v803_v5 = vld [vmem:[#allocation2 + $0x1168] sm:$0xff] }
 0x321   :  { %2356 = vmatpush1.bf16.msra.mxu1 %v452_v10  ;;  %v802_v10 = vld [vmem:[#allocation2 + $0x1160] sm:$0xff] }
 0x322   :  { %2110 = vmatpush1.bf16.msra.mxu0 %v706_v9  ;;  %2357 = vmatprep.subr.bf16.mxu1 %v461_v16  ;;  %v549_v9 = vld [vmem:[#allocation2 + $0x978] sm:$0xff]  ;;  %v811_v16 = vld [vmem:[#allocation2 + $0x11a8] sm:$0xff] }
 0x323   :  { %2111 = vmatprep.subr.bf16.mxu0 %v715_v15  ;;  %v548_v15 = vld [vmem:[#allocation2 + $0x970] sm:$0xff] }
 0x325   :  { %2358 = vmatpush1.bf16.msra.mxu1 %v460_v6  ;;  %v810_v6 = vld [vmem:[#allocation2 + $0x11a0] sm:$0xff] }
 0x326   :  { %2112 = vmatpush1.bf16.msra.mxu0 %v714_v21  ;;  %2359 = vmatprep.subr.bf16.mxu1 %v469_v27  ;;  %v557_v21 = vld [vmem:[#allocation2 + $0x9b8] sm:$0xff]  ;;  %v819_v27 = vld [vmem:[#allocation2 + $0x11e8] sm:$0xff] }
 0x327   :  { %2113 = vmatprep.subr.bf16.mxu0 %v723_v23  ;;  %v556_v23 = vld [vmem:[#allocation2 + $0x9b0] sm:$0xff] }
 0x329   :  { %2360 = vmatpush1.bf16.msra.mxu1 %v468_v34  ;;  %v818_v34 = vld [vmem:[#allocation2 + $0x11e0] sm:$0xff] }
 0x32a   :  { %2114 = vmatpush1.bf16.msra.mxu0 %v722_v32  ;;  %2361 = vmatprep.subr.bf16.mxu1 %v477_v37  ;;  %v565_v32 = vld [vmem:[#allocation2 + $0x9f8] sm:$0xff]  ;;  %v827_v37 = vld [vmem:[#allocation2 + $0x1228] sm:$0xff] }
 0x32b   :  { %2115 = vmatprep.subr.bf16.mxu0 %v731_v35  ;;  %v564_v35 = vld [vmem:[#allocation2 + $0x9f0] sm:$0xff] }
 0x32d   :  { %2362 = vmatpush1.bf16.msra.mxu1 %v476_v39  ;;  %v826_v39 = vld [vmem:[#allocation2 + $0x1220] sm:$0xff] }
 0x32e   :  { %2116 = vmatpush1.bf16.msra.mxu0 %v730_v38  ;;  %2363 = vmatprep.subr.bf16.mxu1 %v485_v41  ;;  %v573_v38 = vld [vmem:[#allocation2 + $0xa38] sm:$0xff]  ;;  %v835_v41 = vld [vmem:[#allocation2 + $0x1268] sm:$0xff] }
 0x32f   :  { %2117 = vmatprep.subr.bf16.mxu0 %v739_v40  ;;  %v572_v40 = vld [vmem:[#allocation2 + $0xa30] sm:$0xff] }
 0x331   :  { %2364 = vmatpush1.bf16.msra.mxu1 %v484_v43  ;;  %v834_v43 = vld [vmem:[#allocation2 + $0x1260] sm:$0xff] }
 0x332   :  { %2118 = vmatpush1.bf16.msra.mxu0 %v738_v42  ;;  %2365 = vmatprep.subr.bf16.mxu1 %v493_v45  ;;  %v581_v42 = vld [vmem:[#allocation2 + $0xa78] sm:$0xff]  ;;  %v843_v45 = vld [vmem:[#allocation2 + $0x12a8] sm:$0xff] }
 0x333   :  { %2119 = vmatprep.subr.bf16.mxu0 %v747_v44  ;;  %v580_v44 = vld [vmem:[#allocation2 + $0xa70] sm:$0xff] }
 0x335   :  { %2366 = vmatpush1.bf16.msra.mxu1 %v492_v47  ;;  %v842_v47 = vld [vmem:[#allocation2 + $0x12a0] sm:$0xff] }
 0x336   :  { %2120 = vmatpush1.bf16.msra.mxu0 %v746_v46  ;;  %2367 = vmatprep.subr.bf16.mxu1 %v501_v49  ;;  %v589_v46 = vld [vmem:[#allocation2 + $0xab8] sm:$0xff]  ;;  %v851_v49 = vld [vmem:[#allocation2 + $0x12e8] sm:$0xff] }
 0x337   :  { %2121 = vmatprep.subr.bf16.mxu0 %v755_v48  ;;  %v588_v48 = vld [vmem:[#allocation2 + $0xab0] sm:$0xff] }
 0x339   :  { %2368 = vmatpush1.bf16.msra.mxu1 %v500_v51  ;;  %v850_v51 = vld [vmem:[#allocation2 + $0x12e0] sm:$0xff] }
 0x33a   :  { %2122 = vmatpush1.bf16.msra.mxu0 %v754_v50  ;;  %2378 = vmatprep.subr.bf16.mxu1 %v509_v53  ;;  %v597_v50 = vld [vmem:[#allocation2 + $0xaf8] sm:$0xff]  ;;  %v859_v53 = vld [vmem:[#allocation2 + $0x1328] sm:$0xff] }
 0x33b   :  { %2132 = vmatprep.subr.bf16.mxu0 %v763_v52  ;;  %v596_v52 = vld [vmem:[#allocation2 + $0xaf0] sm:$0xff] }
 0x33c   :  { %2370 = vmatmul.mubr.bf16.vlgmr.msra.gmra.mrb[8].mxu1 %v7558_v8  ;;  %v533_v8 = vld [vmem:[#allocation2 + $0x8f8] sm:$0xff] }
 0x33d   :  { %2124 = vmatmul.mubr.bf16.vlgmr.msra.gmra.mrb[4].mxu0 %v7566_v18  ;;  %2379 = vmatpush1.bf16.msra.mxu1 %v508_v55  ;;  %v858_v55 = vld [vmem:[#allocation2 + $0x1320] sm:$0xff] }
 0x33e   :  { %2133 = vmatpush1.bf16.msra.mxu0 %v762_v54  ;;  %2380 = vmatprep.subr.bf16.mxu1 %v517_v57  ;;  %v605_v54 = vld [vmem:[#allocation2 + $0xb38] sm:$0xff]  ;;  %v867_v57 = vld [vmem:[#allocation2 + $0x1368] sm:$0xff] }
 0x33f   :  { %2134 = vmatprep.subr.bf16.mxu0 %v771_v56  ;;  %2164 = vmatprep.mubr.bf16.mxu0 %v7572_v24  ;;  %v604_v56 = vld [vmem:[#allocation2 + $0xb30] sm:$0xff] }
 0x340   :  { %2410 = vmatprep.mubr.bf16.mxu1 %v7564_v14  ;;  %v794_v14 = vld [vmem:[#allocation2 + $0x1120] sm:$0xff] }
 0x341   :  { %2381 = vmatpush1.bf16.msra.mxu1 %v516_v58  ;;  %v866_v58 = vld [vmem:[#allocation2 + $0x1360] sm:$0xff] }
 0x342   :  { %2135 = vmatpush1.bf16.msra.mxu0 %v770_v11  ;;  %2382 = vmatprep.subr.bf16.mxu1 %v525_v60  ;;  %v613_v11 = vld [vmem:[#allocation2 + $0xb78] sm:$0xff]  ;;  %v875_v60 = vld [vmem:[#allocation2 + $0x13a8] sm:$0xff] }
 0x343   :  { %2136 = vmatprep.subr.bf16.mxu0 %v779_v59  ;;  %v612_v59 = vld [vmem:[#allocation2 + $0xb70] sm:$0xff] }
 0x345   :  { %2383 = vmatpush1.bf16.msra.mxu1 %v524_v63  ;;  %v874_v63 = vld [vmem:[#allocation2 + $0x13a0] sm:$0xff] }
 0x346   :  { %2137 = vmatpush1.bf16.msra.mxu0 %v778_v61  ;;  %2384 = vmatprep.subr.bf16.mxu1 %v533_v8  ;;  %v621_v61 = vld [vmem:[#allocation2 + $0xbb8] sm:$0xff]  ;;  %v883_v8 = vld [vmem:[#allocation2 + $0x13e8] sm:$0xff] }
 0x347   :  { %2138 = vmatprep.subr.bf16.mxu0 %v787_v0  ;;  %v620_v0 = vld [vmem:[#allocation2 + $0xbb0] sm:$0xff] }
 0x349   :  { %2385 = vmatpush1.bf16.msra.mxu1 %v532_v7  ;;  %v882_v7 = vld [vmem:[#allocation2 + $0x13e0] sm:$0xff] }
 0x34a   :  { %2139 = vmatpush1.bf16.msra.mxu0 %v786_v1  ;;  %2386 = vmatprep.subr.bf16.mxu1 %v541_v3  ;;  %v629_v1 = vld [vmem:[#allocation2 + $0xbf8] sm:$0xff]  ;;  %v891_v3 = vld [vmem:[#allocation2 + $0x1428] sm:$0xff] }
 0x34b   :  { %2140 = vmatprep.subr.bf16.mxu0 %v795_v2  ;;  %v628_v2 = vld [vmem:[#allocation2 + $0xbf0] sm:$0xff] }
 0x34d   :  { %2387 = vmatpush1.bf16.msra.mxu1 %v540_v4  ;;  %v890_v4 = vld [vmem:[#allocation2 + $0x1420] sm:$0xff] }
 0x34e   :  { %2141 = vmatpush1.bf16.msra.mxu0 %v794_v14  ;;  %2388 = vmatprep.subr.bf16.mxu1 %v549_v9  ;;  %v637_v14 = vld [vmem:[#allocation2 + $0xc38] sm:$0xff]  ;;  %v899_v9 = vld [vmem:[#allocation2 + $0x1468] sm:$0xff] }
 0x34f   :  { %2142 = vmatprep.subr.bf16.mxu0 %v803_v5  ;;  %v636_v5 = vld [vmem:[#allocation2 + $0xc30] sm:$0xff] }
 0x351   :  { %2389 = vmatpush1.bf16.msra.mxu1 %v548_v15  ;;  %v898_v15 = vld [vmem:[#allocation2 + $0x1460] sm:$0xff] }
 0x352   :  { %2143 = vmatpush1.bf16.msra.mxu0 %v802_v10  ;;  %2390 = vmatprep.subr.bf16.mxu1 %v557_v21  ;;  %v645_v10 = vld [vmem:[#allocation2 + $0xc78] sm:$0xff]  ;;  %v907_v21 = vld [vmem:[#allocation2 + $0x14a8] sm:$0xff] }
 0x353   :  { %2144 = vmatprep.subr.bf16.mxu0 %v811_v16  ;;  %v644_v16 = vld [vmem:[#allocation2 + $0xc70] sm:$0xff] }
 0x355   :  { %2391 = vmatpush1.bf16.msra.mxu1 %v556_v23  ;;  %v906_v23 = vld [vmem:[#allocation2 + $0x14a0] sm:$0xff] }
 0x356   :  { %2145 = vmatpush1.bf16.msra.mxu0 %v810_v6  ;;  %2392 = vmatprep.subr.bf16.mxu1 %v565_v32  ;;  %v653_v6 = vld [vmem:[#allocation2 + $0xcb8] sm:$0xff]  ;;  %v915_v32 = vld [vmem:[#allocation2 + $0x14e8] sm:$0xff] }
 0x357   :  { %2146 = vmatprep.subr.bf16.mxu0 %v819_v27  ;;  %v652_v27 = vld [vmem:[#allocation2 + $0xcb0] sm:$0xff] }
 0x359   :  { %2393 = vmatpush1.bf16.msra.mxu1 %v564_v35  ;;  %v660_v35 = vld [vmem:[#allocation2 + $0xcf0] sm:$0xff] }
 0x35a   :  { %2147 = vmatpush1.bf16.msra.mxu0 %v818_v34  ;;  %2394 = vmatprep.subr.bf16.mxu1 %v573_v38  ;;  %v914_v34 = vld [vmem:[#allocation2 + $0x14e0] sm:$0xff]  ;;  %v669_v38 = vld [vmem:[#allocation2 + $0xd38] sm:$0xff] }
 0x35b   :  { %2148 = vmatprep.subr.bf16.mxu0 %v827_v37  ;;  %v923_v37 = vld [vmem:[#allocation2 + $0x1528] sm:$0xff] }
 0x35d   :  { %2395 = vmatpush1.bf16.msra.mxu1 %v572_v40  ;;  %v922_v40 = vld [vmem:[#allocation2 + $0x1520] sm:$0xff] }
 0x35e   :  { %2149 = vmatpush1.bf16.msra.mxu0 %v826_v39  ;;  %2396 = vmatprep.subr.bf16.mxu1 %v581_v42  ;;  %v7661_v39 = vsub.s32 2, %v7632_v22  ;;  %v931_v42 = vld [vmem:[#allocation2 + $0x1568] sm:$0xff] }
 0x35f   :  { %2150 = vmatprep.subr.bf16.mxu0 %v835_v41  ;;  %v668_v41 = vld [vmem:[#allocation2 + $0xd30] sm:$0xff] }
 0x361   :  { %2397 = vmatpush1.bf16.msra.mxu1 %v580_v44  ;;  %v1283_v44 = vrot.slane %v7637_v12, %v7661_v39 }
 0x362   :  { %2151 = vmatpush1.bf16.msra.mxu0 %v834_v43  ;;  %2398 = vmatprep.subr.bf16.mxu1 %v589_v46  ;;  %v677_v43 = vld [vmem:[#allocation2 + $0xd78] sm:$0xff]  ;;  %v930_v46 = vld [vmem:[#allocation2 + $0x1560] sm:$0xff] }
 0x363   :  { %2152 = vmatprep.subr.bf16.mxu0 %v843_v45 }
 0x365   :  { %2399 = vmatpush1.bf16.msra.mxu1 %v588_v48 }
 0x366   :  { %2153 = vmatpush1.bf16.msra.mxu0 %v842_v47  ;;  %2400 = vmatprep.subr.bf16.mxu1 %v597_v50  ;;  %v676_v47 = vld [vmem:[#allocation2 + $0xd70] sm:$0xff]  ;;  %v685_v50 = vld [vmem:[#allocation2 + $0xdb8] sm:$0xff] }
 0x367   :  { %2154 = vmatprep.subr.bf16.mxu0 %v851_v49  ;;  %v939_v49 = vld [vmem:[#allocation2 + $0x15a8] sm:$0xff] }
 0x369   :  { %2401 = vmatpush1.bf16.msra.mxu1 %v596_v52 }
 0x36a   :  { %2155 = vmatpush1.bf16.msra.mxu0 %v850_v51  ;;  %2402 = vmatprep.subr.bf16.mxu1 %v605_v54 }
 0x36b   :  { %2156 = vmatprep.subr.bf16.mxu0 %v859_v53 }
 0x36d   :  { %2403 = vmatpush1.bf16.msra.mxu1 %v604_v56 }
 0x36e   :  { %2157 = vmatpush1.bf16.msra.mxu0 %v858_v55  ;;  %2404 = vmatprep.subr.bf16.mxu1 %v613_v11  ;;  %v684_v11 = vld [vmem:[#allocation2 + $0xdb0] sm:$0xff] }
 0x36f   :  { %2158 = vmatprep.subr.bf16.mxu0 %v867_v57  ;;  %v938_v57 = vld [vmem:[#allocation2 + $0x15a0] sm:$0xff] }
 0x371   :  { %2405 = vmatpush1.bf16.msra.mxu1 %v612_v59  ;;  %v693_v59 = vld [vmem:[#allocation2 + $0xdf8] sm:$0xff] }
 0x372   :  { %2159 = vmatpush1.bf16.msra.mxu0 %v866_v58  ;;  %2406 = vmatprep.subr.bf16.mxu1 %v621_v61  ;;  %v947_v58 = vld [vmem:[#allocation2 + $0x15e8] sm:$0xff] }
 0x373   :  { %2160 = vmatprep.subr.bf16.mxu0 %v875_v60 }
 0x375   :  { %2407 = vmatpush1.bf16.msra.mxu1 %v620_v0  ;;  %v692_v0 = vld [vmem:[#allocation2 + $0xdf0] sm:$0xff] }
 0x376   :  { %2161 = vmatpush1.bf16.msra.mxu0 %v874_v63  ;;  %2408 = vmatprep.subr.bf16.mxu1 %v629_v1  ;;  %v946_v63 = vld [vmem:[#allocation2 + $0x15e0] sm:$0xff]  ;;  %v701_v1 = vld [vmem:[#allocation2 + $0xe38] sm:$0xff] }
 0x377   :  { %2162 = vmatprep.subr.bf16.mxu0 %v883_v8  ;;  %v955_v8 = vld [vmem:[#allocation2 + $0x1628] sm:$0xff] }
 0x379   :  { %2409 = vmatpush1.bf16.msra.mxu1 %v628_v2  ;;  %v700_v2 = vld [vmem:[#allocation2 + $0xe30] sm:$0xff] }
 0x37a   :  { %2163 = vmatpush1.bf16.msra.mxu0 %v882_v7  ;;  %2419 = vmatprep.subr.bf16.mxu1 %v637_v14  ;;  %v954_v7 = vld [vmem:[#allocation2 + $0x1620] sm:$0xff]  ;;  %v709_v14 = vld [vmem:[#allocation2 + $0xe78] sm:$0xff] }
 0x37b   :  { %2173 = vmatprep.subr.bf16.mxu0 %v891_v3  ;;  %v963_v3 = vld [vmem:[#allocation2 + $0x1668] sm:$0xff] }
 0x37c   :  { %2411 = vmatmul.mubr.bf16.vlgmr.msra.gmra.mrb[8].mxu1 %v7562_v13  ;;  %v661_v13 = vld [vmem:[#allocation2 + $0xcf8] sm:$0xff] }
 0x37d   :  { %2165 = vmatmul.mubr.bf16.vlgmr.msra.gmra.mrb[4].mxu0 %v7570_v20  ;;  %2420 = vmatpush1.bf16.msra.mxu1 %v636_v5  ;;  %v708_v5 = vld [vmem:[#allocation2 + $0xe70] sm:$0xff] }
 0x37e   :  { %2174 = vmatpush1.bf16.msra.mxu0 %v890_v4  ;;  %2421 = vmatprep.subr.bf16.mxu1 %v645_v10  ;;  %v962_v4 = vld [vmem:[#allocation2 + $0x1660] sm:$0xff]  ;;  %v717_v10 = vld [vmem:[#allocation2 + $0xeb8] sm:$0xff] }
 0x37f   :  { %2175 = vmatprep.subr.bf16.mxu0 %v899_v9  ;;  %2205 = vmatprep.mubr.bf16.mxu0 %v7576_v26  ;;  %v971_v9 = vld [vmem:[#allocation2 + $0x16a8] sm:$0xff] }
 0x380   :  { %2451 = vmatprep.mubr.bf16.mxu1 %v7568_v19  ;;  %v7664_v19 = vsub.s32 3, %v7632_v22 }
 0x381   :  { %2422 = vmatpush1.bf16.msra.mxu1 %v644_v16  ;;  %v716_v16 = vld [vmem:[#allocation2 + $0xeb0] sm:$0xff] }
 0x382   :  { %2176 = vmatpush1.bf16.msra.mxu0 %v898_v15  ;;  %2423 = vmatprep.subr.bf16.mxu1 %v653_v6  ;;  %v1287_v45 = vrot.slane %v7637_v12, %v7664_v19  ;;  %v970_v15 = vld [vmem:[#allocation2 + $0x16a0] sm:$0xff]  ;;  %v725_v6 = vld [vmem:[#allocation2 + $0xef8] sm:$0xff] }
 0x383   :  { %2177 = vmatprep.subr.bf16.mxu0 %v907_v21  ;;  %v979_v21 = vld [vmem:[#allocation2 + $0x16e8] sm:$0xff] }
 0x385   :  { %2424 = vmatpush1.bf16.msra.mxu1 %v652_v27  ;;  %v724_v27 = vld [vmem:[#allocation2 + $0xef0] sm:$0xff] }
 0x386   :  { %2178 = vmatpush1.bf16.msra.mxu0 %v906_v23  ;;  %2425 = vmatprep.subr.bf16.mxu1 %v661_v13  ;;  %v978_v23 = vld [vmem:[#allocation2 + $0x16e0] sm:$0xff]  ;;  %v733_v13 = vld [vmem:[#allocation2 + $0xf38] sm:$0xff] }
 0x387   :  { %2179 = vmatprep.subr.bf16.mxu0 %v915_v32  ;;  %v987_v32 = vld [vmem:[#allocation2 + $0x1728] sm:$0xff] }
 0x389   :  { %2426 = vmatpush1.bf16.msra.mxu1 %v660_v35  ;;  %v732_v35 = vld [vmem:[#allocation2 + $0xf30] sm:$0xff] }
 0x38a   :  { %2180 = vmatpush1.bf16.msra.mxu0 %v914_v34  ;;  %2427 = vmatprep.subr.bf16.mxu1 %v669_v38  ;;  %v986_v34 = vld [vmem:[#allocation2 + $0x1720] sm:$0xff]  ;;  %v741_v38 = vld [vmem:[#allocation2 + $0xf78] sm:$0xff] }
 0x38b   :  { %2181 = vmatprep.subr.bf16.mxu0 %v923_v37  ;;  %v995_v37 = vld [vmem:[#allocation2 + $0x1768] sm:$0xff] }
 0x38d   :  { %2428 = vmatpush1.bf16.msra.mxu1 %v668_v41  ;;  %v740_v41 = vld [vmem:[#allocation2 + $0xf70] sm:$0xff] }
 0x38e   :  { %2182 = vmatpush1.bf16.msra.mxu0 %v922_v40  ;;  %2429 = vmatprep.subr.bf16.mxu1 %v677_v43  ;;  %v994_v40 = vld [vmem:[#allocation2 + $0x1760] sm:$0xff]  ;;  %v749_v43 = vld [vmem:[#allocation2 + $0xfb8] sm:$0xff] }
 0x38f   :  { %2183 = vmatprep.subr.bf16.mxu0 %v931_v42  ;;  %v1961_v48 = vpop.f32.mrb[4].mxu1  ;;  %v1003_v42 = vld [vmem:[#allocation2 + $0x17a8] sm:$0xff] }
 0x390   :  { %v6944_v51 = vadd.f32 %v1961_v48, %v1283_v44  ;;  %v1963_v52 = vpop.f32.mrb[5].mxu1  ;;  %v1002_v44 = vld [vmem:[#allocation2 + $0x17a0] sm:$0xff] }
 0x391   :  { %v6945_v53 = vadd.f32 %v1963_v52, %v1287_v45  ;;  %v1965_v54 = vpop.f32.mrb[6].mxu1  ;;  %2430 = vmatpush1.bf16.msra.mxu1 %v676_v47  ;;  %v748_v45 = vld [vmem:[#allocation2 + $0xfb0] sm:$0xff]  ;;  %v757_v47 = vld [vmem:[#allocation2 + $0xff8] sm:$0xff]  ;;  %v1010_v48 = vld [vmem:[#allocation2 + $0x17e0] sm:$0xff] }
 0x392   :  { %2184 = vmatpush1.bf16.msra.mxu0 %v930_v46  ;;  %v2626_v55 = vmax.f32 %v6944_v51, 0.0  ;;  %v1966_v56 = vpop.f32.mrb[7].mxu1  ;;  %2431 = vmatprep.subr.bf16.mxu1 %v685_v50  ;;  %v1011_v46 = vld [vmem:[#allocation2 + $0x17e8] sm:$0xff]  ;;  %v765_v51 = vld [vmem:[#allocation2 + $0x1038] sm:$0xff]  ;;  %v1018_v52 = vld [vmem:[#allocation2 + $0x1820] sm:$0xff] }
 0x393   :  { %2185 = vmatprep.subr.bf16.mxu0 %v939_v49  ;;  %v2627_v12 = vmax.f32 %v6945_v53, 0.0  ;;  %v756_v49 = vld [vmem:[#allocation2 + $0xff0] sm:$0xff]  ;;  %v1019_v50 = vld [vmem:[#allocation2 + $0x1828] sm:$0xff]  ;;  %v1026_v56 = vld [vmem:[#allocation2 + $0x1860] sm:$0xff] }
 0x394   :  { %v7670_v60 = vpack.c.bf16 %v2626_v55, %v2626_v55  ;;  %v764_v53 = vld [vmem:[#allocation2 + $0x1030] sm:$0xff]  ;;  %v1027_v54 = vld [vmem:[#allocation2 + $0x1868] sm:$0xff]  ;;  %v773_v55 = vld [vmem:[#allocation2 + $0x1078] sm:$0xff] }
 0x395   :  { %v7672_v61 = vpack.c.bf16 %v2627_v12, %v2627_v12  ;;  %2432 = vmatpush1.bf16.msra.mxu1 %v684_v11  ;;  %v1035_v11 = vld [vmem:[#allocation2 + $0x18a8] sm:$0xff]  ;;  %v781_v12 = vld [vmem:[#allocation2 + $0x10b8] sm:$0xff] }
 0x396   :  { %2186 = vmatpush1.bf16.msra.mxu0 %v938_v57  ;;  %2433 = vmatprep.subr.bf16.mxu1 %v693_v59  ;;  %v772_v57 = vld [vmem:[#allocation2 + $0x1070] sm:$0xff] }
 0x397   :  { %2187 = vmatprep.subr.bf16.mxu0 %v947_v58  ;;  %v1034_v58 = vld [vmem:[#allocation2 + $0x18a0] sm:$0xff]  ;;  %v780_v59 = vld [vmem:[#allocation2 + $0x10b0] sm:$0xff] }
 0x399   :  { %2434 = vmatpush1.bf16.msra.mxu1 %v692_v0  ;;  %v1042_v0 = vld [vmem:[#allocation2 + $0x18e0] sm:$0xff] }
 0x39a   :  { %2188 = vmatpush1.bf16.msra.mxu0 %v946_v63  ;;  %2435 = vmatprep.subr.bf16.mxu1 %v701_v1  ;;  %v1043_v63 = vld [vmem:[#allocation2 + $0x18e8] sm:$0xff] }
 0x39b   :  { %2189 = vmatprep.subr.bf16.mxu0 %v955_v8  ;;  %v788_v8 = vld [vmem:[#allocation2 + $0x10f0] sm:$0xff]  ;;  %v1051_v1 = vld [vmem:[#allocation2 + $0x1928] sm:$0xff] }
 0x39d   :  { %2436 = vmatpush1.bf16.msra.mxu1 %v700_v2  ;;  %v796_v2 = vld [vmem:[#allocation2 + $0x1130] sm:$0xff] }
 0x39e   :  { %2190 = vmatpush1.bf16.msra.mxu0 %v954_v7  ;;  %2437 = vmatprep.subr.bf16.mxu1 %v709_v14  ;;  %v797_v7 = vld [vmem:[#allocation2 + $0x1138] sm:$0xff] }
 0x39f   :  { %2191 = vmatprep.subr.bf16.mxu0 %v963_v3  ;;  %v1059_v3 = vld [vmem:[#allocation2 + $0x1968] sm:$0xff]  ;;  %v805_v14 = vld [vmem:[#allocation2 + $0x1178] sm:$0xff] }
 0x3a1   :  { %2438 = vmatpush1.bf16.msra.mxu1 %v708_v5  ;;  %v804_v5 = vld [vmem:[#allocation2 + $0x1170] sm:$0xff] }
 0x3a2   :  { %2192 = vmatpush1.bf16.msra.mxu0 %v962_v4  ;;  %2439 = vmatprep.subr.bf16.mxu1 %v717_v10  ;;  %v1058_v4 = vld [vmem:[#allocation2 + $0x1960] sm:$0xff]  ;;  %v813_v10 = vld [vmem:[#allocation2 + $0x11b8] sm:$0xff] }
 0x3a3   :  { %2193 = vmatprep.subr.bf16.mxu0 %v971_v9  ;;  %v1067_v9 = vld [vmem:[#allocation2 + $0x19a8] sm:$0xff] }
 0x3a5   :  { %2440 = vmatpush1.bf16.msra.mxu1 %v716_v16  ;;  %v812_v16 = vld [vmem:[#allocation2 + $0x11b0] sm:$0xff] }
 0x3a6   :  { %2194 = vmatpush1.bf16.msra.mxu0 %v970_v15  ;;  %2441 = vmatprep.subr.bf16.mxu1 %v725_v6  ;;  %v1066_v15 = vld [vmem:[#allocation2 + $0x19a0] sm:$0xff]  ;;  %v821_v6 = vld [vmem:[#allocation2 + $0x11f8] sm:$0xff] }
 0x3a7   :  { %2195 = vmatprep.subr.bf16.mxu0 %v979_v21  ;;  %v1075_v21 = vld [vmem:[#allocation2 + $0x19e8] sm:$0xff] }
 0x3a9   :  { %2442 = vmatpush1.bf16.msra.mxu1 %v724_v27  ;;  %v820_v27 = vld [vmem:[#allocation2 + $0x11f0] sm:$0xff] }
 0x3aa   :  { %2196 = vmatpush1.bf16.msra.mxu0 %v978_v23  ;;  %2443 = vmatprep.subr.bf16.mxu1 %v733_v13  ;;  %v1074_v23 = vld [vmem:[#allocation2 + $0x19e0] sm:$0xff]  ;;  %v829_v13 = vld [vmem:[#allocation2 + $0x1238] sm:$0xff] }
 0x3ab   :  { %2197 = vmatprep.subr.bf16.mxu0 %v987_v32  ;;  %v1083_v32 = vld [vmem:[#allocation2 + $0x1a28] sm:$0xff] }
 0x3ad   :  { %2444 = vmatpush1.bf16.msra.mxu1 %v732_v35  ;;  %v828_v35 = vld [vmem:[#allocation2 + $0x1230] sm:$0xff] }
 0x3ae   :  { %2198 = vmatpush1.bf16.msra.mxu0 %v986_v34  ;;  %2445 = vmatprep.subr.bf16.mxu1 %v741_v38  ;;  %v1082_v34 = vld [vmem:[#allocation2 + $0x1a20] sm:$0xff]  ;;  %v837_v38 = vld [vmem:[#allocation2 + $0x1278] sm:$0xff] }
 0x3af   :  { %2199 = vmatprep.subr.bf16.mxu0 %v995_v37  ;;  %v1091_v37 = vld [vmem:[#allocation2 + $0x1a68] sm:$0xff] }
 0x3b1   :  { %2446 = vmatpush1.bf16.msra.mxu1 %v740_v41  ;;  %v836_v41 = vld [vmem:[#allocation2 + $0x1270] sm:$0xff] }
 0x3b2   :  { %2200 = vmatpush1.bf16.msra.mxu0 %v994_v40  ;;  %2447 = vmatprep.subr.bf16.mxu1 %v749_v43  ;;  %v1090_v40 = vld [vmem:[#allocation2 + $0x1a60] sm:$0xff]  ;;  %v845_v43 = vld [vmem:[#allocation2 + $0x12b8] sm:$0xff] }
 0x3b3   :  { %2201 = vmatprep.subr.bf16.mxu0 %v1003_v42  ;;  %v1099_v42 = vld [vmem:[#allocation2 + $0x1aa8] sm:$0xff] }
 0x3b5   :  { %2448 = vmatpush1.bf16.msra.mxu1 %v748_v45  ;;  %v844_v45 = vld [vmem:[#allocation2 + $0x12b0] sm:$0xff] }
 0x3b6   :  { %2202 = vmatpush1.bf16.msra.mxu0 %v1002_v44  ;;  %2449 = vmatprep.subr.bf16.mxu1 %v757_v47  ;;  %v1098_v44 = vld [vmem:[#allocation2 + $0x1aa0] sm:$0xff]  ;;  %v853_v47 = vld [vmem:[#allocation2 + $0x12f8] sm:$0xff] }
 0x3b7   :  { %2203 = vmatprep.subr.bf16.mxu0 %v1011_v46  ;;  %v1107_v46 = vld [vmem:[#allocation2 + $0x1ae8] sm:$0xff] }
 0x3b9   :  { %2450 = vmatpush1.bf16.msra.mxu1 %v756_v49  ;;  %v852_v49 = vld [vmem:[#allocation2 + $0x12f0] sm:$0xff] }
 0x3ba   :  { %2204 = vmatpush1.bf16.msra.mxu0 %v1010_v48  ;;  %2460 = vmatprep.subr.bf16.mxu1 %v765_v51  ;;  %v1106_v48 = vld [vmem:[#allocation2 + $0x1ae0] sm:$0xff]  ;;  %v861_v51 = vld [vmem:[#allocation2 + $0x1338] sm:$0xff] }
 0x3bb   :  { %2214 = vmatprep.subr.bf16.mxu0 %v1019_v50  ;;  %v1115_v50 = vld [vmem:[#allocation2 + $0x1b28] sm:$0xff] }
 0x3bc   :  { %2452 = vmatmul.mubr.bf16.vlgmr.msra.gmra.mrb[8].mxu1 %v7566_v18  ;;  %v789_v18 = vld [vmem:[#allocation2 + $0x10f8] sm:$0xff] }
 0x3bd   :  { %2206 = vmatmul.mubr.bf16.vlgmr.msra.gmra.mrb[4].mxu0 %v7574_v25  ;;  %2461 = vmatpush1.bf16.msra.mxu1 %v764_v53  ;;  %v860_v53 = vld [vmem:[#allocation2 + $0x1330] sm:$0xff] }
 0x3be   :  { %2215 = vmatpush1.bf16.msra.mxu0 %v1018_v52  ;;  %2462 = vmatprep.subr.bf16.mxu1 %v773_v55  ;;  %v1114_v52 = vld [vmem:[#allocation2 + $0x1b20] sm:$0xff]  ;;  %v869_v55 = vld [vmem:[#allocation2 + $0x1378] sm:$0xff] }
 0x3bf   :  { %2216 = vmatprep.subr.bf16.mxu0 %v1027_v54  ;;  %2246 = vmatprep.mubr.bf16.mxu0 %v7580_v29  ;;  %v1123_v54 = vld [vmem:[#allocation2 + $0x1b68] sm:$0xff] }
 0x3c0   :  { %2492 = vmatprep.mubr.bf16.mxu1 %v7572_v24  ;;  %v1050_v24 = vld [vmem:[#allocation2 + $0x1920] sm:$0xff] }
 0x3c1   :  { %2463 = vmatpush1.bf16.msra.mxu1 %v772_v57  ;;  %v868_v57 = vld [vmem:[#allocation2 + $0x1370] sm:$0xff] }
 0x3c2   :  { %2217 = vmatpush1.bf16.msra.mxu0 %v1026_v56  ;;  %2464 = vmatprep.subr.bf16.mxu1 %v781_v12  ;;  %v1122_v56 = vld [vmem:[#allocation2 + $0x1b60] sm:$0xff]  ;;  %v877_v12 = vld [vmem:[#allocation2 + $0x13b8] sm:$0xff] }
 0x3c3   :  { %2218 = vmatprep.subr.bf16.mxu0 %v1035_v11  ;;  %v1131_v11 = vld [vmem:[#allocation2 + $0x1ba8] sm:$0xff] }
 0x3c5   :  { %2465 = vmatpush1.bf16.msra.mxu1 %v780_v59  ;;  %v876_v59 = vld [vmem:[#allocation2 + $0x13b0] sm:$0xff] }
 0x3c6   :  { %2219 = vmatpush1.bf16.msra.mxu0 %v1034_v58  ;;  %2466 = vmatprep.subr.bf16.mxu1 %v789_v18  ;;  %v1130_v58 = vld [vmem:[#allocation2 + $0x1ba0] sm:$0xff]  ;;  %v885_v18 = vld [vmem:[#allocation2 + $0x13f8] sm:$0xff] }
 0x3c7   :  { %2220 = vmatprep.subr.bf16.mxu0 %v1043_v63  ;;  %v1139_v63 = vld [vmem:[#allocation2 + $0x1be8] sm:$0xff] }
 0x3c9   :  { %2467 = vmatpush1.bf16.msra.mxu1 %v788_v8  ;;  %v884_v8 = vld [vmem:[#allocation2 + $0x13f0] sm:$0xff] }
 0x3ca   :  { %2221 = vmatpush1.bf16.msra.mxu0 %v1042_v0  ;;  %2468 = vmatprep.subr.bf16.mxu1 %v797_v7  ;;  %v1138_v0 = vld [vmem:[#allocation2 + $0x1be0] sm:$0xff]  ;;  %v893_v7 = vld [vmem:[#allocation2 + $0x1438] sm:$0xff] }
 0x3cb   :  { %2222 = vmatprep.subr.bf16.mxu0 %v1051_v1  ;;  %v1147_v1 = vld [vmem:[#allocation2 + $0x1c28] sm:$0xff] }
 0x3cd   :  { %2469 = vmatpush1.bf16.msra.mxu1 %v796_v2  ;;  %v892_v2 = vld [vmem:[#allocation2 + $0x1430] sm:$0xff] }
 0x3ce   :  { %2223 = vmatpush1.bf16.msra.mxu0 %v1050_v24  ;;  %2470 = vmatprep.subr.bf16.mxu1 %v805_v14  ;;  %v1146_v24 = vld [vmem:[#allocation2 + $0x1c20] sm:$0xff]  ;;  %v901_v14 = vld [vmem:[#allocation2 + $0x1478] sm:$0xff] }
 0x3cf   :  { %2224 = vmatprep.subr.bf16.mxu0 %v1059_v3  ;;  %v1155_v3 = vld [vmem:[#allocation2 + $0x1c68] sm:$0xff] }
 0x3d1   :  { %2471 = vmatpush1.bf16.msra.mxu1 %v804_v5  ;;  %v900_v5 = vld [vmem:[#allocation2 + $0x1470] sm:$0xff] }
 0x3d2   :  { %2225 = vmatpush1.bf16.msra.mxu0 %v1058_v4  ;;  %2472 = vmatprep.subr.bf16.mxu1 %v813_v10  ;;  %v1154_v4 = vld [vmem:[#allocation2 + $0x1c60] sm:$0xff]  ;;  %v909_v10 = vld [vmem:[#allocation2 + $0x14b8] sm:$0xff] }
 0x3d3   :  { %2226 = vmatprep.subr.bf16.mxu0 %v1067_v9  ;;  %v1163_v9 = vld [vmem:[#allocation2 + $0x1ca8] sm:$0xff] }
 0x3d5   :  { %2473 = vmatpush1.bf16.msra.mxu1 %v812_v16  ;;  %v908_v16 = vld [vmem:[#allocation2 + $0x14b0] sm:$0xff] }
 0x3d6   :  { %2227 = vmatpush1.bf16.msra.mxu0 %v1066_v15  ;;  %2474 = vmatprep.subr.bf16.mxu1 %v821_v6  ;;  %v1162_v15 = vld [vmem:[#allocation2 + $0x1ca0] sm:$0xff] }
 0x3d7   :  { %2228 = vmatprep.subr.bf16.mxu0 %v1075_v21  ;;  %v1171_v21 = vld [vmem:[#allocation2 + $0x1ce8] sm:$0xff]  ;;  %v1170_v6 = vld [vmem:[#allocation2 + $0x1ce0] sm:$0xff] }
 0x3d9   :  { %2475 = vmatpush1.bf16.msra.mxu1 %v820_v27  ;;  %v1179_v27 = vld [vmem:[#allocation2 + $0x1d28] sm:$0xff] }
 0x3da   :  { %2229 = vmatpush1.bf16.msra.mxu0 %v1074_v23  ;;  %2476 = vmatprep.subr.bf16.mxu1 %v829_v13  ;;  %v916_v23 = vld [vmem:[#allocation2 + $0x14f0] sm:$0xff] }
 0x3db   :  { %2230 = vmatprep.subr.bf16.mxu0 %v1083_v32  ;;  %v925_v32 = vld [vmem:[#allocation2 + $0x1538] sm:$0xff]  ;;  %v924_v13 = vld [vmem:[#allocation2 + $0x1530] sm:$0xff] }
 0x3dd   :  { %2477 = vmatpush1.bf16.msra.mxu1 %v828_v35  ;;  %v933_v35 = vld [vmem:[#allocation2 + $0x1578] sm:$0xff] }
 0x3de   :  { %2231 = vmatpush1.bf16.msra.mxu0 %v1082_v34  ;;  %2478 = vmatprep.subr.bf16.mxu1 %v837_v38  ;;  %v1187_v34 = vld [vmem:[#allocation2 + $0x1d68] sm:$0xff]  ;;  %v932_v38 = vld [vmem:[#allocation2 + $0x1570] sm:$0xff] }
 0x3df   :  { %2232 = vmatprep.subr.bf16.mxu0 %v1091_v37  ;;  %v1186_v37 = vld [vmem:[#allocation2 + $0x1d60] sm:$0xff] }
 0x3e1   :  { %2479 = vmatpush1.bf16.msra.mxu1 %v836_v41  ;;  %v941_v41 = vld [vmem:[#allocation2 + $0x15b8] sm:$0xff] }
 0x3e2   :  { %2233 = vmatpush1.bf16.msra.mxu0 %v1090_v40  ;;  %2480 = vmatprep.subr.bf16.mxu1 %v845_v43  ;;  %v1195_v40 = vld [vmem:[#allocation2 + $0x1da8] sm:$0xff]  ;;  %v940_v43 = vld [vmem:[#allocation2 + $0x15b0] sm:$0xff] }
 0x3e3   :  { %2234 = vmatprep.subr.bf16.mxu0 %v1099_v42  ;;  %v1194_v42 = vld [vmem:[#allocation2 + $0x1da0] sm:$0xff] }
 0x3e5   :  { %2481 = vmatpush1.bf16.msra.mxu1 %v844_v45  ;;  %v949_v45 = vld [vmem:[#allocation2 + $0x15f8] sm:$0xff] }
 0x3e6   :  { %2235 = vmatpush1.bf16.msra.mxu0 %v1098_v44  ;;  %2482 = vmatprep.subr.bf16.mxu1 %v853_v47  ;;  %v1203_v44 = vld [vmem:[#allocation2 + $0x1de8] sm:$0xff]  ;;  %v948_v47 = vld [vmem:[#allocation2 + $0x15f0] sm:$0xff] }
 0x3e7   :  { %2236 = vmatprep.subr.bf16.mxu0 %v1107_v46  ;;  %v1202_v46 = vld [vmem:[#allocation2 + $0x1de0] sm:$0xff] }
 0x3e9   :  { %2483 = vmatpush1.bf16.msra.mxu1 %v852_v49  ;;  %v957_v49 = vld [vmem:[#allocation2 + $0x1638] sm:$0xff] }
 0x3ea   :  { %2237 = vmatpush1.bf16.msra.mxu0 %v1106_v48  ;;  %2484 = vmatprep.subr.bf16.mxu1 %v861_v51  ;;  %v1211_v48 = vld [vmem:[#allocation2 + $0x1e28] sm:$0xff]  ;;  %v956_v51 = vld [vmem:[#allocation2 + $0x1630] sm:$0xff] }
 0x3eb   :  { %2238 = vmatprep.subr.bf16.mxu0 %v1115_v50  ;;  %v1210_v50 = vld [vmem:[#allocation2 + $0x1e20] sm:$0xff] }
 0x3ed   :  { %2485 = vmatpush1.bf16.msra.mxu1 %v860_v53  ;;  %v965_v53 = vld [vmem:[#allocation2 + $0x1678] sm:$0xff] }
 0x3ee   :  { %2239 = vmatpush1.bf16.msra.mxu0 %v1114_v52  ;;  %2486 = vmatprep.subr.bf16.mxu1 %v869_v55  ;;  %v1219_v52 = vld [vmem:[#allocation2 + $0x1e68] sm:$0xff]  ;;  %v964_v55 = vld [vmem:[#allocation2 + $0x1670] sm:$0xff] }
 0x3ef   :  { %2240 = vmatprep.subr.bf16.mxu0 %v1123_v54  ;;  %v1218_v54 = vld [vmem:[#allocation2 + $0x1e60] sm:$0xff] }
 0x3f1   :  { %2487 = vmatpush1.bf16.msra.mxu1 %v868_v57  ;;  %v973_v57 = vld [vmem:[#allocation2 + $0x16b8] sm:$0xff] }
 0x3f2   :  { %2241 = vmatpush1.bf16.msra.mxu0 %v1122_v56  ;;  %2488 = vmatprep.subr.bf16.mxu1 %v877_v12  ;;  %v1227_v56 = vld [vmem:[#allocation2 + $0x1ea8] sm:$0xff]  ;;  %v972_v12 = vld [vmem:[#allocation2 + $0x16b0] sm:$0xff] }
 0x3f3   :  { %2242 = vmatprep.subr.bf16.mxu0 %v1131_v11  ;;  %v1226_v11 = vld [vmem:[#allocation2 + $0x1ea0] sm:$0xff] }
 0x3f5   :  { %2489 = vmatpush1.bf16.msra.mxu1 %v876_v59  ;;  %v981_v59 = vld [vmem:[#allocation2 + $0x16f8] sm:$0xff] }
 0x3f6   :  { %2243 = vmatpush1.bf16.msra.mxu0 %v1130_v58  ;;  %2490 = vmatprep.subr.bf16.mxu1 %v885_v18  ;;  %v1235_v58 = vld [vmem:[#allocation2 + $0x1ee8] sm:$0xff]  ;;  %v980_v18 = vld [vmem:[#allocation2 + $0x16f0] sm:$0xff] }
 0x3f7   :  { %2244 = vmatprep.subr.bf16.mxu0 %v1139_v63  ;;  %v1234_v63 = vld [vmem:[#allocation2 + $0x1ee0] sm:$0xff] }
 0x3f9   :  { %2491 = vmatpush1.bf16.msra.mxu1 %v884_v8  ;;  %v989_v8 = vld [vmem:[#allocation2 + $0x1738] sm:$0xff] }
 0x3fa   :  { %2245 = vmatpush1.bf16.msra.mxu0 %v1138_v0  ;;  %2501 = vmatprep.subr.bf16.mxu1 %v893_v7  ;;  %v1243_v0 = vld [vmem:[#allocation2 + $0x1f28] sm:$0xff]  ;;  %v988_v7 = vld [vmem:[#allocation2 + $0x1730] sm:$0xff] }
 0x3fb   :  { %2255 = vmatprep.subr.bf16.mxu0 %v1147_v1  ;;  %v1242_v1 = vld [vmem:[#allocation2 + $0x1f20] sm:$0xff] }
 0x3fc   :  { %2493 = vmatmul.mubr.bf16.vlgmr.msra.gmra.mrb[8].mxu1 %v7570_v20  ;;  %v917_v20 = vld [vmem:[#allocation2 + $0x14f8] sm:$0xff] }
 0x3fd   :  { %2247 = vmatmul.mubr.bf16.vlgmr.msra.gmra.mrb[4].mxu0 %v7578_v28  ;;  %2502 = vmatpush1.bf16.msra.mxu1 %v892_v2  ;;  %v997_v2 = vld [vmem:[#allocation2 + $0x1778] sm:$0xff] }
 0x3fe   :  { %2256 = vmatpush1.bf16.msra.mxu0 %v1146_v24  ;;  %2503 = vmatprep.subr.bf16.mxu1 %v901_v14  ;;  %v1251_v24 = vld [vmem:[#allocation2 + $0x1f68] sm:$0xff]  ;;  %v996_v14 = vld [vmem:[#allocation2 + $0x1770] sm:$0xff] }
 0x3ff   :  { %2257 = vmatprep.subr.bf16.mxu0 %v1155_v3  ;;  %2287 = vmatprep.mubr.bf16.mxu0 %v7584_v31  ;;  %v1250_v3 = vld [vmem:[#allocation2 + $0x1f60] sm:$0xff] }
 0x400   :  { %2533 = vmatprep.mubr.bf16.mxu1 %v7576_v26  ;;  %v1178_v26 = vld [vmem:[#allocation2 + $0x1d20] sm:$0xff] }
 0x401   :  { %2504 = vmatpush1.bf16.msra.mxu1 %v900_v5  ;;  %v1005_v5 = vld [vmem:[#allocation2 + $0x17b8] sm:$0xff] }
 0x402   :  { %2258 = vmatpush1.bf16.msra.mxu0 %v1154_v4  ;;  %2505 = vmatprep.subr.bf16.mxu1 %v909_v10  ;;  %v1259_v4 = vld [vmem:[#allocation2 + $0x1fa8] sm:$0xff]  ;;  %v1004_v10 = vld [vmem:[#allocation2 + $0x17b0] sm:$0xff] }
 0x403   :  { %2259 = vmatprep.subr.bf16.mxu0 %v1163_v9  ;;  %v1258_v9 = vld [vmem:[#allocation2 + $0x1fa0] sm:$0xff] }
 0x405   :  { %2506 = vmatpush1.bf16.msra.mxu1 %v908_v16  ;;  %v1013_v16 = vld [vmem:[#allocation2 + $0x17f8] sm:$0xff] }
 0x406   :  { %2260 = vmatpush1.bf16.msra.mxu0 %v1162_v15  ;;  %2507 = vmatprep.subr.bf16.mxu1 %v917_v20  ;;  %v1267_v15 = vld [vmem:[#allocation2 + $0x1fe8] sm:$0xff]  ;;  %v1012_v20 = vld [vmem:[#allocation2 + $0x17f0] sm:$0xff] }
 0x407   :  { %2261 = vmatprep.subr.bf16.mxu0 %v1171_v21  ;;  %v1266_v21 = vld [vmem:[#allocation2 + $0x1fe0] sm:$0xff] }
 0x409   :  { %2508 = vmatpush1.bf16.msra.mxu1 %v916_v23  ;;  %v1020_v23 = vld [vmem:[#allocation2 + $0x1830] sm:$0xff] }
 0x40a   :  { %2262 = vmatpush1.bf16.msra.mxu0 %v1170_v6  ;;  %2509 = vmatprep.subr.bf16.mxu1 %v925_v32  ;;  %v1021_v6 = vld [vmem:[#allocation2 + $0x1838] sm:$0xff]  ;;  %v1028_v32 = vld [vmem:[#allocation2 + $0x1870] sm:$0xff] }
 0x40b   :  { %2263 = vmatprep.subr.bf16.mxu0 %v1179_v27  ;;  %v1029_v27 = vld [vmem:[#allocation2 + $0x1878] sm:$0xff] }
 0x40d   :  { %2510 = vmatpush1.bf16.msra.mxu1 %v924_v13  ;;  %v1036_v13 = vld [vmem:[#allocation2 + $0x18b0] sm:$0xff] }
 0x40e   :  { %2264 = vmatpush1.bf16.msra.mxu0 %v1178_v26  ;;  %2511 = vmatprep.subr.bf16.mxu1 %v933_v35  ;;  %v1037_v26 = vld [vmem:[#allocation2 + $0x18b8] sm:$0xff]  ;;  %v1044_v35 = vld [vmem:[#allocation2 + $0x18f0] sm:$0xff] }
 0x40f   :  { %2265 = vmatprep.subr.bf16.mxu0 %v1187_v34  ;;  %v1045_v34 = vld [vmem:[#allocation2 + $0x18f8] sm:$0xff] }
 0x411   :  { %2512 = vmatpush1.bf16.msra.mxu1 %v932_v38  ;;  %v1052_v38 = vld [vmem:[#allocation2 + $0x1930] sm:$0xff] }
 0x412   :  { %2266 = vmatpush1.bf16.msra.mxu0 %v1186_v37  ;;  %2513 = vmatprep.subr.bf16.mxu1 %v941_v41  ;;  %v1053_v37 = vld [vmem:[#allocation2 + $0x1938] sm:$0xff] }
 0x413   :  { %2267 = vmatprep.subr.bf16.mxu0 %v1195_v40  ;;  %v1061_v40 = vld [vmem:[#allocation2 + $0x1978] sm:$0xff] }
 0x414   :  { %v1069_v41 = vld [vmem:[#allocation2 + $0x19b8] sm:$0xff] }
 0x415   :  { %2514 = vmatpush1.bf16.msra.mxu1 %v940_v43  ;;  %v1076_v43 = vld [vmem:[#allocation2 + $0x19f0] sm:$0xff] }
 0x416   :  { %2268 = vmatpush1.bf16.msra.mxu0 %v1194_v42  ;;  %2515 = vmatprep.subr.bf16.mxu1 %v949_v45  ;;  %v1077_v42 = vld [vmem:[#allocation2 + $0x19f8] sm:$0xff]  ;;  %v1084_v45 = vld [vmem:[#allocation2 + $0x1a30] sm:$0xff] }
 0x417   :  { %2269 = vmatprep.subr.bf16.mxu0 %v1203_v44  ;;  %v1085_v44 = vld [vmem:[#allocation2 + $0x1a38] sm:$0xff] }
 0x419   :  { %2516 = vmatpush1.bf16.msra.mxu1 %v948_v47  ;;  %v1092_v47 = vld [vmem:[#allocation2 + $0x1a70] sm:$0xff] }
 0x41a   :  { %2270 = vmatpush1.bf16.msra.mxu0 %v1202_v46  ;;  %2517 = vmatprep.subr.bf16.mxu1 %v957_v49  ;;  %v1093_v46 = vld [vmem:[#allocation2 + $0x1a78] sm:$0xff]  ;;  %v1100_v49 = vld [vmem:[#allocation2 + $0x1ab0] sm:$0xff] }
 0x41b   :  { %2271 = vmatprep.subr.bf16.mxu0 %v1211_v48  ;;  %v1101_v48 = vld [vmem:[#allocation2 + $0x1ab8] sm:$0xff] }
 0x41d   :  { %2518 = vmatpush1.bf16.msra.mxu1 %v956_v51  ;;  %v1108_v51 = vld [vmem:[#allocation2 + $0x1af0] sm:$0xff] }
 0x41e   :  { %2272 = vmatpush1.bf16.msra.mxu0 %v1210_v50  ;;  %2519 = vmatprep.subr.bf16.mxu1 %v965_v53  ;;  %v1109_v50 = vld [vmem:[#allocation2 + $0x1af8] sm:$0xff]  ;;  %v1116_v53 = vld [vmem:[#allocation2 + $0x1b30] sm:$0xff] }
 0x41f   :  { %2273 = vmatprep.subr.bf16.mxu0 %v1219_v52  ;;  %v1117_v52 = vld [vmem:[#allocation2 + $0x1b38] sm:$0xff] }
 0x421   :  { %2520 = vmatpush1.bf16.msra.mxu1 %v964_v55  ;;  %v1124_v55 = vld [vmem:[#allocation2 + $0x1b70] sm:$0xff] }
 0x422   :  { %2274 = vmatpush1.bf16.msra.mxu0 %v1218_v54  ;;  %2521 = vmatprep.subr.bf16.mxu1 %v973_v57  ;;  %v1125_v54 = vld [vmem:[#allocation2 + $0x1b78] sm:$0xff]  ;;  %v1132_v57 = vld [vmem:[#allocation2 + $0x1bb0] sm:$0xff] }
 0x423   :  { %2275 = vmatprep.subr.bf16.mxu0 %v1227_v56  ;;  %v1133_v56 = vld [vmem:[#allocation2 + $0x1bb8] sm:$0xff] }
 0x425   :  { %2522 = vmatpush1.bf16.msra.mxu1 %v972_v12  ;;  %v1140_v12 = vld [vmem:[#allocation2 + $0x1bf0] sm:$0xff] }
 0x426   :  { %2276 = vmatpush1.bf16.msra.mxu0 %v1226_v11  ;;  %2523 = vmatprep.subr.bf16.mxu1 %v981_v59  ;;  %v1141_v11 = vld [vmem:[#allocation2 + $0x1bf8] sm:$0xff]  ;;  %v1148_v59 = vld [vmem:[#allocation2 + $0x1c30] sm:$0xff] }
 0x427   :  { %2277 = vmatprep.subr.bf16.mxu0 %v1235_v58  ;;  %v1149_v58 = vld [vmem:[#allocation2 + $0x1c38] sm:$0xff] }
 0x429   :  { %2524 = vmatpush1.bf16.msra.mxu1 %v980_v18  ;;  %v1156_v18 = vld [vmem:[#allocation2 + $0x1c70] sm:$0xff] }
 0x42a   :  { %2278 = vmatpush1.bf16.msra.mxu0 %v1234_v63  ;;  %2525 = vmatprep.subr.bf16.mxu1 %v989_v8  ;;  %v1157_v63 = vld [vmem:[#allocation2 + $0x1c78] sm:$0xff]  ;;  %v1164_v8 = vld [vmem:[#allocation2 + $0x1cb0] sm:$0xff] }
 0x42b   :  { %2279 = vmatprep.subr.bf16.mxu0 %v1243_v0  ;;  %v1165_v0 = vld [vmem:[#allocation2 + $0x1cb8] sm:$0xff] }
 0x42d   :  { %2526 = vmatpush1.bf16.msra.mxu1 %v988_v7  ;;  %v1172_v7 = vld [vmem:[#allocation2 + $0x1cf0] sm:$0xff] }
 0x42e   :  { %2280 = vmatpush1.bf16.msra.mxu0 %v1242_v1  ;;  %2527 = vmatprep.subr.bf16.mxu1 %v997_v2  ;;  %v1173_v1 = vld [vmem:[#allocation2 + $0x1cf8] sm:$0xff]  ;;  %v1180_v2 = vld [vmem:[#allocation2 + $0x1d30] sm:$0xff] }
 0x42f   :  { %2281 = vmatprep.subr.bf16.mxu0 %v1251_v24  ;;  %v1181_v24 = vld [vmem:[#allocation2 + $0x1d38] sm:$0xff] }
 0x431   :  { %2528 = vmatpush1.bf16.msra.mxu1 %v996_v14  ;;  %v1197_v14 = vld [vmem:[#allocation2 + $0x1db8] sm:$0xff] }
 0x432   :  { %2282 = vmatpush1.bf16.msra.mxu0 %v1250_v3  ;;  %2529 = vmatprep.subr.bf16.mxu1 %v1005_v5  ;;  %v1189_v3 = vld [vmem:[#allocation2 + $0x1d78] sm:$0xff]  ;;  %v1204_v5 = vld [vmem:[#allocation2 + $0x1df0] sm:$0xff] }
 0x433   :  { %2283 = vmatprep.subr.bf16.mxu0 %v1259_v4  ;;  %v1205_v4 = vld [vmem:[#allocation2 + $0x1df8] sm:$0xff] }
 0x435   :  { %2530 = vmatpush1.bf16.msra.mxu1 %v1004_v10  ;;  %v1212_v10 = vld [vmem:[#allocation2 + $0x1e30] sm:$0xff] }
 0x436   :  { %2284 = vmatpush1.bf16.msra.mxu0 %v1258_v9  ;;  %2531 = vmatprep.subr.bf16.mxu1 %v1013_v16  ;;  %v1213_v9 = vld [vmem:[#allocation2 + $0x1e38] sm:$0xff]  ;;  %v1220_v16 = vld [vmem:[#allocation2 + $0x1e70] sm:$0xff] }
 0x437   :  { %2285 = vmatprep.subr.bf16.mxu0 %v1267_v15  ;;  %v1221_v15 = vld [vmem:[#allocation2 + $0x1e78] sm:$0xff] }
 0x439   :  { %2532 = vmatpush1.bf16.msra.mxu1 %v1012_v20  ;;  %v1228_v20 = vld [vmem:[#allocation2 + $0x1eb0] sm:$0xff] }
 0x43a   :  { %2286 = vmatpush1.bf16.msra.mxu0 %v1266_v21  ;;  %2542 = vmatprep.subr.bf16.mxu1 %v1021_v6  ;;  %v1229_v21 = vld [vmem:[#allocation2 + $0x1eb8] sm:$0xff] }
 0x43b   :  { %v1237_v6 = vld [vmem:[#allocation2 + $0x1ef8] sm:$0xff] }
 0x43c   :  { %2534 = vmatmul.mubr.bf16.vlgmr.msra.gmra.mrb[8].mxu1 %v7574_v25  ;;  %v1060_v25 = vld [vmem:[#allocation2 + $0x1970] sm:$0xff] }
 0x43d   :  { %2288 = vmatmul.mubr.bf16.vlgmr.msra.gmra.mrb[4].mxu0 %v7582_v30  ;;  %2543 = vmatpush1.bf16.msra.mxu1 %v1020_v23  ;;  %v1236_v23 = vld [vmem:[#allocation2 + $0x1ef0] sm:$0xff] }
 0x43e   :  { %2574 = vmatprep.mubr.bf16.mxu1 %v7580_v29  ;;  %2544 = vmatprep.subr.bf16.mxu1 %v1029_v27  ;;  %v1068_v29 = vld [vmem:[#allocation2 + $0x19b0] sm:$0xff]  ;;  %v1245_v27 = vld [vmem:[#allocation2 + $0x1f38] sm:$0xff] }
 0x441   :  { %2545 = vmatpush1.bf16.msra.mxu1 %v1028_v32  ;;  %v1244_v32 = vld [vmem:[#allocation2 + $0x1f30] sm:$0xff] }
 0x442   :  { %2546 = vmatprep.subr.bf16.mxu1 %v1037_v26  ;;  %v1253_v26 = vld [vmem:[#allocation2 + $0x1f78] sm:$0xff] }
 0x445   :  { %2547 = vmatpush1.bf16.msra.mxu1 %v1036_v13  ;;  %v1252_v13 = vld [vmem:[#allocation2 + $0x1f70] sm:$0xff] }
 0x446   :  { %2548 = vmatprep.subr.bf16.mxu1 %v1045_v34  ;;  %v1261_v34 = vld [vmem:[#allocation2 + $0x1fb8] sm:$0xff] }
 0x449   :  { %2549 = vmatpush1.bf16.msra.mxu1 %v1044_v35  ;;  %v1260_v35 = vld [vmem:[#allocation2 + $0x1fb0] sm:$0xff] }
 0x44a   :  { %2550 = vmatprep.subr.bf16.mxu1 %v1053_v37  ;;  %v1269_v37 = vld [vmem:[#allocation2 + $0x1ff8] sm:$0xff] }
 0x44d   :  { %2551 = vmatpush1.bf16.msra.mxu1 %v1052_v38  ;;  %v1268_v38 = vld [vmem:[#allocation2 + $0x1ff0] sm:$0xff] }
 0x44e   :  { %2552 = vmatprep.subr.bf16.mxu1 %v1061_v40  ;;  %v7689_v40 = vsub.s32 4, %v7632_v22 }
 0x451   :  { %2553 = vmatpush1.bf16.msra.mxu1 %v1060_v25  ;;  %v7692_v25 = vsub.s32 5, %v7632_v22 }
 0x452   :  { %2554 = vmatprep.subr.bf16.mxu1 %v1069_v41  ;;  %v7257_v41 = vld [vmem:[#allocation10] sm:$0xff] }
 0x455   :  { %2555 = vmatpush1.bf16.msra.mxu1 %v1068_v29  ;;  %v1291_v29 = vrot.slane %v7257_v41, %v7689_v40 }
 0x456   :  { %2556 = vmatprep.subr.bf16.mxu1 %v1077_v42  ;;  %v1295_v42 = vrot.slane %v7257_v41, %v7692_v25 }
 0x459   :  { %2557 = vmatpush1.bf16.msra.mxu1 %v1076_v43 }
 0x45a   :  { %2558 = vmatprep.subr.bf16.mxu1 %v1085_v44 }
 0x45d   :  { %2559 = vmatpush1.bf16.msra.mxu1 %v1084_v45 }
 0x45e   :  { %2560 = vmatprep.subr.bf16.mxu1 %v1093_v46 }
 0x461   :  { %2561 = vmatpush1.bf16.msra.mxu1 %v1092_v47 }
 0x462   :  { %2562 = vmatprep.subr.bf16.mxu1 %v1101_v48 }
 0x465   :  { %2563 = vmatpush1.bf16.msra.mxu1 %v1100_v49 }
 0x466   :  { %2564 = vmatprep.subr.bf16.mxu1 %v1109_v50 }
 0x469   :  { %2565 = vmatpush1.bf16.msra.mxu1 %v1108_v51 }
 0x46a   :  { %2566 = vmatprep.subr.bf16.mxu1 %v1117_v52  ;;  %v7701_v52 = vsub.s32 6, %v7632_v22 }
 0x46d   :  { %2567 = vmatpush1.bf16.msra.mxu1 %v1116_v53  ;;  %v7704_v53 = vsub.s32 7, %v7632_v22 }
 0x46e   :  { %2568 = vmatprep.subr.bf16.mxu1 %v1125_v54  ;;  %v1299_v54 = vrot.slane %v7257_v41, %v7701_v52 }
 0x471   :  { %2569 = vmatpush1.bf16.msra.mxu1 %v1124_v55  ;;  %v1303_v55 = vrot.slane %v7257_v41, %v7704_v53 }
 0x472   :  { %2570 = vmatprep.subr.bf16.mxu1 %v1133_v56 }
 0x475   :  { %2571 = vmatpush1.bf16.msra.mxu1 %v1132_v57 }
 0x476   :  { %2572 = vmatprep.subr.bf16.mxu1 %v1141_v11 }
 0x479   :  { %2573 = vmatpush1.bf16.msra.mxu1 %v1140_v12 }
 0x47a   :  { %2583 = vmatprep.subr.bf16.mxu1 %v1149_v58 }
 0x47c   :  { %2575 = vmatmul.mubr.bf16.vlgmr.msra.gmra.mrb[8].mxu1 %v7578_v28  ;;  %v1188_v28 = vld [vmem:[#allocation2 + $0x1d70] sm:$0xff] }
 0x47d   :  { %2584 = vmatpush1.bf16.msra.mxu1 %v1148_v59  ;;  %2615 = vmatprep.mubr.bf16.mxu1 %v7584_v31  ;;  %v1196_v31 = vld [vmem:[#allocation2 + $0x1db0] sm:$0xff] }
 0x47e   :  { %2585 = vmatprep.subr.bf16.mxu1 %v1157_v63 }
 0x481   :  { %2586 = vmatpush1.bf16.msra.mxu1 %v1156_v18 }
 0x482   :  { %2587 = vmatprep.subr.bf16.mxu1 %v1165_v0 }
 0x485   :  { %2588 = vmatpush1.bf16.msra.mxu1 %v1164_v8 }
 0x486   :  { %2589 = vmatprep.subr.bf16.mxu1 %v1173_v1 }
 0x489   :  { %2590 = vmatpush1.bf16.msra.mxu1 %v1172_v7 }
 0x48a   :  { %2591 = vmatprep.subr.bf16.mxu1 %v1181_v24 }
 0x48d   :  { %2592 = vmatpush1.bf16.msra.mxu1 %v1180_v2 }
 0x48e   :  { %2593 = vmatprep.subr.bf16.mxu1 %v1189_v3 }
 0x491   :  { %2594 = vmatpush1.bf16.msra.mxu1 %v1188_v28 }
 0x492   :  { %2595 = vmatprep.subr.bf16.mxu1 %v1197_v14 }
 0x495   :  { %2596 = vmatpush1.bf16.msra.mxu1 %v1196_v31 }
 0x496   :  { %2597 = vmatprep.subr.bf16.mxu1 %v1205_v4 }
 0x499   :  { %2598 = vmatpush1.bf16.msra.mxu1 %v1204_v5 }
 0x49a   :  { %2599 = vmatprep.subr.bf16.mxu1 %v1213_v9 }
 0x49d   :  { %2600 = vmatpush1.bf16.msra.mxu1 %v1212_v10 }
 0x49e   :  { %2601 = vmatprep.subr.bf16.mxu1 %v1221_v15 }
 0x4a1   :  { %2602 = vmatpush1.bf16.msra.mxu1 %v1220_v16 }
 0x4a2   :  { %2603 = vmatprep.subr.bf16.mxu1 %v1229_v21 }
 0x4a5   :  { %2604 = vmatpush1.bf16.msra.mxu1 %v1228_v20 }
 0x4a6   :  { %2605 = vmatprep.subr.bf16.mxu1 %v1237_v6 }
 0x4a9   :  { %2606 = vmatpush1.bf16.msra.mxu1 %v1236_v23 }
 0x4aa   :  { %2607 = vmatprep.subr.bf16.mxu1 %v1245_v27 }
 0x4ad   :  { %2608 = vmatpush1.bf16.msra.mxu1 %v1244_v32 }
 0x4ae   :  { %2609 = vmatprep.subr.bf16.mxu1 %v1253_v26 }
 0x4b1   :  { %2610 = vmatpush1.bf16.msra.mxu1 %v1252_v13 }
 0x4b2   :  { %2611 = vmatprep.subr.bf16.mxu1 %v1261_v34 }
 0x4b5   :  { %2612 = vmatpush1.bf16.msra.mxu1 %v1260_v35 }
 0x4b6   :  { %2613 = vmatprep.subr.bf16.mxu1 %v1269_v37 }
 0x4b9   :  { %2614 = vmatpush1.bf16.msra.mxu1 %v1268_v38 }
 0x4bc   :  { %2616 = vmatmul.mubr.bf16.vlgmr.msra.gmra.mrb[8].mxu1 %v7582_v30 }
 0x510   :  { %v2289_v43 = vpop.f32.mrb[4].mxu0 }
 0x511   :  { %v6946_v44 = vadd.f32 %v2289_v43, %v1291_v29  ;;  %v2291_v45 = vpop.f32.mrb[5].mxu0 }
 0x512   :  { %v6947_v46 = vadd.f32 %v2291_v45, %v1295_v42  ;;  %v2293_v47 = vpop.f32.mrb[6].mxu0 }
 0x513   :  { %v2628_v48 = vmax.f32 %v6946_v44, 0.0  ;;  %v2294_v49 = vpop.f32.mrb[7].mxu0 }
 0x514   :  { %v2629_v50 = vmax.f32 %v6947_v46, 0.0 }
 0x515   :  { %v7696_v30 = vpack.c.bf16 %v2628_v48, %v2628_v48 }
 0x516   :  { %v7698_v51 = vpack.c.bf16 %v2629_v50, %v2629_v50 }
 0x58f   :  { %v2617_v56 = vpop.f32.mrb[8].mxu1 }
 0x590   :  { %v6948_v57 = vadd.f32 %v2617_v56, %v1299_v54  ;;  %v2619_v11 = vpop.f32.mrb[9].mxu1 }
 0x591   :  { %v6949_v12 = vadd.f32 %v2619_v11, %v1303_v55  ;;  %v2621_v58 = vpop.f32.mrb[10].mxu1 }
 0x592   :  { %v2630_v59 = vmax.f32 %v6948_v57, 0.0  ;;  %v2622_v63 = vpop.f32.mrb[11].mxu1 }
 0x593   :  { %v2631_v18 = vmax.f32 %v6949_v12, 0.0 }
 0x594   :  { %v7708_v0 = vpack.c.bf16 %v2630_v59, %v2630_v59 }
 0x595   :  { %v7710_v8 = vpack.c.bf16 %v2631_v18, %v2631_v18 }
 0x596   :  { %7376 = dma.done.wait [#allocation6 + $0x1], 65536 }
 0x597   :  { %7377 = vsyncadd [#allocation6 + $0x1], 4294901760  ;;  %3230 = vmatprep.mubr.bf16.mxu0 %v7650_v17  ;;  %3394 = vmatprep.mubr.bf16.mxu1 %v7650_v17  ;;  %v2645_v22 = vld [vmem:[#allocation3 + $0x8] sm:$0xff]  ;;  %v2647_v1 = vld [vmem:[#allocation3 + $0x18] sm:$0xff] }
 0x598   :  { %v2644_v7 = vld [vmem:[#allocation3] sm:$0xff]  ;;  %3198 = vmatprep.subr.bf16.mxu0 %v2645_v22  ;;  %3362 = vmatprep.subr.bf16.mxu1 %v2647_v1  ;;  %v2646_v24 = vld [vmem:[#allocation3 + $0x10] sm:$0xff]  ;;  %v2653_v2 = vld [vmem:[#allocation3 + $0x48] sm:$0xff] }
 0x599   :  { %v2655_v3 = vld [vmem:[#allocation3 + $0x58] sm:$0xff]  ;;  %3199 = vmatpush1.bf16.msra.mxu0 %v2644_v7  ;;  %3363 = vmatpush1.bf16.msra.mxu1 %v2646_v24  ;;  %v2652_v28 = vld [vmem:[#allocation3 + $0x40] sm:$0xff]  ;;  %v2654_v14 = vld [vmem:[#allocation3 + $0x50] sm:$0xff] }
 0x59a   :  { %3200 = vmatprep.subr.bf16.mxu0 %v2653_v2  ;;  %3364 = vmatprep.subr.bf16.mxu1 %v2655_v3  ;;  %v2661_v31 = vld [vmem:[#allocation3 + $0x88] sm:$0xff]  ;;  %v2663_v4 = vld [vmem:[#allocation3 + $0x98] sm:$0xff]  ;;  %v2660_v5 = vld [vmem:[#allocation3 + $0x80] sm:$0xff] }
 0x59b   :  { %v2662_v9 = vld [vmem:[#allocation3 + $0x90] sm:$0xff]  ;;  %v2669_v10 = vld [vmem:[#allocation3 + $0xc8] sm:$0xff]  ;;  %v2671_v15 = vld [vmem:[#allocation3 + $0xd8] sm:$0xff] }
 0x59c   :  { %v2668_v16 = vld [vmem:[#allocation3 + $0xc0] sm:$0xff]  ;;  %v2670_v21 = vld [vmem:[#allocation3 + $0xd0] sm:$0xff]  ;;  %v2677_v20 = vld [vmem:[#allocation3 + $0x108] sm:$0xff] }
 0x59d   :  { %3201 = vmatpush1.bf16.msra.mxu0 %v2652_v28  ;;  %3365 = vmatpush1.bf16.msra.mxu1 %v2654_v14  ;;  %v2679_v6 = vld [vmem:[#allocation3 + $0x118] sm:$0xff]  ;;  %v2676_v23 = vld [vmem:[#allocation3 + $0x100] sm:$0xff]  ;;  %v2678_v27 = vld [vmem:[#allocation3 + $0x110] sm:$0xff] }
 0x59e   :  { %3202 = vmatprep.subr.bf16.mxu0 %v2661_v31  ;;  %3366 = vmatprep.subr.bf16.mxu1 %v2663_v4  ;;  %v2685_v32 = vld [vmem:[#allocation3 + $0x148] sm:$0xff]  ;;  %v2687_v26 = vld [vmem:[#allocation3 + $0x158] sm:$0xff]  ;;  %v2684_v13 = vld [vmem:[#allocation3 + $0x140] sm:$0xff] }
 0x59f   :  { %v2686_v34 = vld [vmem:[#allocation3 + $0x150] sm:$0xff]  ;;  %v2693_v35 = vld [vmem:[#allocation3 + $0x188] sm:$0xff]  ;;  %v2695_v37 = vld [vmem:[#allocation3 + $0x198] sm:$0xff] }
 0x5a0   :  { %v2692_v38 = vld [vmem:[#allocation3 + $0x180] sm:$0xff]  ;;  %v2694_v41 = vld [vmem:[#allocation3 + $0x190] sm:$0xff]  ;;  %v2701_v29 = vld [vmem:[#allocation3 + $0x1c8] sm:$0xff] }
 0x5a1   :  { %3203 = vmatpush1.bf16.msra.mxu0 %v2660_v5  ;;  %3367 = vmatpush1.bf16.msra.mxu1 %v2662_v9  ;;  %v2703_v42 = vld [vmem:[#allocation3 + $0x1d8] sm:$0xff]  ;;  %v2700_v43 = vld [vmem:[#allocation3 + $0x1c0] sm:$0xff]  ;;  %v2702_v44 = vld [vmem:[#allocation3 + $0x1d0] sm:$0xff] }
 0x5a2   :  { %3204 = vmatprep.subr.bf16.mxu0 %v2669_v10  ;;  %3368 = vmatprep.subr.bf16.mxu1 %v2671_v15  ;;  %v2709_v45 = vld [vmem:[#allocation3 + $0x208] sm:$0xff]  ;;  %v2711_v46 = vld [vmem:[#allocation3 + $0x218] sm:$0xff]  ;;  %v2708_v47 = vld [vmem:[#allocation3 + $0x200] sm:$0xff] }
 0x5a3   :  { %v2710_v48 = vld [vmem:[#allocation3 + $0x210] sm:$0xff]  ;;  %v2717_v49 = vld [vmem:[#allocation3 + $0x248] sm:$0xff]  ;;  %v2719_v50 = vld [vmem:[#allocation3 + $0x258] sm:$0xff] }
 0x5a4   :  { %v2716_v54 = vld [vmem:[#allocation3 + $0x240] sm:$0xff]  ;;  %v2718_v55 = vld [vmem:[#allocation3 + $0x250] sm:$0xff]  ;;  %v2725_v56 = vld [vmem:[#allocation3 + $0x288] sm:$0xff] }
 0x5a5   :  { %3205 = vmatpush1.bf16.msra.mxu0 %v2668_v16  ;;  %3369 = vmatpush1.bf16.msra.mxu1 %v2670_v21  ;;  %v2727_v57 = vld [vmem:[#allocation3 + $0x298] sm:$0xff]  ;;  %v2724_v11 = vld [vmem:[#allocation3 + $0x280] sm:$0xff]  ;;  %v2726_v12 = vld [vmem:[#allocation3 + $0x290] sm:$0xff] }
 0x5a6   :  { %3206 = vmatprep.subr.bf16.mxu0 %v2677_v20  ;;  %3370 = vmatprep.subr.bf16.mxu1 %v2679_v6  ;;  %v2733_v58 = vld [vmem:[#allocation3 + $0x2c8] sm:$0xff]  ;;  %v2735_v59 = vld [vmem:[#allocation3 + $0x2d8] sm:$0xff]  ;;  %v2732_v63 = vld [vmem:[#allocation3 + $0x2c0] sm:$0xff] }
 0x5a7   :  { %v2734_v18 = vld [vmem:[#allocation3 + $0x2d0] sm:$0xff]  ;;  %v2741_v22 = vld [vmem:[#allocation3 + $0x308] sm:$0xff]  ;;  %v2743_v1 = vld [vmem:[#allocation3 + $0x318] sm:$0xff] }
 0x5a8   :  { %v2740_v7 = vld [vmem:[#allocation3 + $0x300] sm:$0xff]  ;;  %v2742_v24 = vld [vmem:[#allocation3 + $0x310] sm:$0xff]  ;;  %v2749_v2 = vld [vmem:[#allocation3 + $0x348] sm:$0xff] }
 0x5a9   :  { %3207 = vmatpush1.bf16.msra.mxu0 %v2676_v23  ;;  %3371 = vmatpush1.bf16.msra.mxu1 %v2678_v27  ;;  %v2751_v3 = vld [vmem:[#allocation3 + $0x358] sm:$0xff]  ;;  %v2748_v28 = vld [vmem:[#allocation3 + $0x340] sm:$0xff]  ;;  %v2750_v14 = vld [vmem:[#allocation3 + $0x350] sm:$0xff] }
 0x5aa   :  { %3208 = vmatprep.subr.bf16.mxu0 %v2685_v32  ;;  %3372 = vmatprep.subr.bf16.mxu1 %v2687_v26  ;;  %v2757_v31 = vld [vmem:[#allocation3 + $0x388] sm:$0xff]  ;;  %v2759_v4 = vld [vmem:[#allocation3 + $0x398] sm:$0xff]  ;;  %v2756_v5 = vld [vmem:[#allocation3 + $0x380] sm:$0xff] }
 0x5ab   :  { %v2758_v9 = vld [vmem:[#allocation3 + $0x390] sm:$0xff]  ;;  %v2765_v10 = vld [vmem:[#allocation3 + $0x3c8] sm:$0xff]  ;;  %v2767_v15 = vld [vmem:[#allocation3 + $0x3d8] sm:$0xff] }
 0x5ac   :  { %v2764_v16 = vld [vmem:[#allocation3 + $0x3c0] sm:$0xff]  ;;  %v2766_v21 = vld [vmem:[#allocation3 + $0x3d0] sm:$0xff]  ;;  %v2773_v20 = vld [vmem:[#allocation3 + $0x408] sm:$0xff] }
 0x5ad   :  { %3209 = vmatpush1.bf16.msra.mxu0 %v2684_v13  ;;  %3373 = vmatpush1.bf16.msra.mxu1 %v2686_v34  ;;  %v2775_v6 = vld [vmem:[#allocation3 + $0x418] sm:$0xff]  ;;  %v2772_v23 = vld [vmem:[#allocation3 + $0x400] sm:$0xff]  ;;  %v2774_v27 = vld [vmem:[#allocation3 + $0x410] sm:$0xff] }
 0x5ae   :  { %3210 = vmatprep.subr.bf16.mxu0 %v2693_v35  ;;  %3374 = vmatprep.subr.bf16.mxu1 %v2695_v37  ;;  %v2781_v32 = vld [vmem:[#allocation3 + $0x448] sm:$0xff]  ;;  %v2783_v26 = vld [vmem:[#allocation3 + $0x458] sm:$0xff]  ;;  %v2780_v13 = vld [vmem:[#allocation3 + $0x440] sm:$0xff] }
 0x5af   :  { %v2782_v34 = vld [vmem:[#allocation3 + $0x450] sm:$0xff]  ;;  %v2789_v35 = vld [vmem:[#allocation3 + $0x488] sm:$0xff]  ;;  %v2791_v37 = vld [vmem:[#allocation3 + $0x498] sm:$0xff] }
 0x5b1   :  { %3211 = vmatpush1.bf16.msra.mxu0 %v2692_v38  ;;  %3375 = vmatpush1.bf16.msra.mxu1 %v2694_v41  ;;  %v2788_v38 = vld [vmem:[#allocation3 + $0x480] sm:$0xff]  ;;  %v2790_v41 = vld [vmem:[#allocation3 + $0x490] sm:$0xff] }
 0x5b2   :  { %3212 = vmatprep.subr.bf16.mxu0 %v2701_v29  ;;  %3376 = vmatprep.subr.bf16.mxu1 %v2703_v42  ;;  %v2797_v29 = vld [vmem:[#allocation3 + $0x4c8] sm:$0xff]  ;;  %v2799_v42 = vld [vmem:[#allocation3 + $0x4d8] sm:$0xff] }
 0x5b5   :  { %3213 = vmatpush1.bf16.msra.mxu0 %v2700_v43  ;;  %3377 = vmatpush1.bf16.msra.mxu1 %v2702_v44  ;;  %v2796_v43 = vld [vmem:[#allocation3 + $0x4c0] sm:$0xff]  ;;  %v2798_v44 = vld [vmem:[#allocation3 + $0x4d0] sm:$0xff] }
 0x5b6   :  { %3214 = vmatprep.subr.bf16.mxu0 %v2709_v45  ;;  %3378 = vmatprep.subr.bf16.mxu1 %v2711_v46  ;;  %v2805_v45 = vld [vmem:[#allocation3 + $0x508] sm:$0xff]  ;;  %v2807_v46 = vld [vmem:[#allocation3 + $0x518] sm:$0xff] }
 0x5b9   :  { %3215 = vmatpush1.bf16.msra.mxu0 %v2708_v47  ;;  %3379 = vmatpush1.bf16.msra.mxu1 %v2710_v48  ;;  %v2804_v47 = vld [vmem:[#allocation3 + $0x500] sm:$0xff]  ;;  %v2806_v48 = vld [vmem:[#allocation3 + $0x510] sm:$0xff] }
 0x5ba   :  { %3216 = vmatprep.subr.bf16.mxu0 %v2717_v49  ;;  %3380 = vmatprep.subr.bf16.mxu1 %v2719_v50  ;;  %v2813_v49 = vld [vmem:[#allocation3 + $0x548] sm:$0xff]  ;;  %v2815_v50 = vld [vmem:[#allocation3 + $0x558] sm:$0xff] }
 0x5bd   :  { %3217 = vmatpush1.bf16.msra.mxu0 %v2716_v54  ;;  %3381 = vmatpush1.bf16.msra.mxu1 %v2718_v55  ;;  %v2812_v54 = vld [vmem:[#allocation3 + $0x540] sm:$0xff]  ;;  %v2814_v55 = vld [vmem:[#allocation3 + $0x550] sm:$0xff] }
 0x5be   :  { %3218 = vmatprep.subr.bf16.mxu0 %v2725_v56  ;;  %3382 = vmatprep.subr.bf16.mxu1 %v2727_v57  ;;  %v2821_v56 = vld [vmem:[#allocation3 + $0x588] sm:$0xff]  ;;  %v2823_v57 = vld [vmem:[#allocation3 + $0x598] sm:$0xff] }
 0x5c1   :  { %3219 = vmatpush1.bf16.msra.mxu0 %v2724_v11  ;;  %3383 = vmatpush1.bf16.msra.mxu1 %v2726_v12  ;;  %v2820_v11 = vld [vmem:[#allocation3 + $0x580] sm:$0xff]  ;;  %v2822_v12 = vld [vmem:[#allocation3 + $0x590] sm:$0xff] }
 0x5c2   :  { %3220 = vmatprep.subr.bf16.mxu0 %v2733_v58  ;;  %3384 = vmatprep.subr.bf16.mxu1 %v2735_v59  ;;  %v2829_v58 = vld [vmem:[#allocation3 + $0x5c8] sm:$0xff]  ;;  %v2831_v59 = vld [vmem:[#allocation3 + $0x5d8] sm:$0xff] }
 0x5c5   :  { %3221 = vmatpush1.bf16.msra.mxu0 %v2732_v63  ;;  %3385 = vmatpush1.bf16.msra.mxu1 %v2734_v18  ;;  %v2828_v63 = vld [vmem:[#allocation3 + $0x5c0] sm:$0xff]  ;;  %v2830_v18 = vld [vmem:[#allocation3 + $0x5d0] sm:$0xff] }
 0x5c6   :  { %3222 = vmatprep.subr.bf16.mxu0 %v2741_v22  ;;  %3386 = vmatprep.subr.bf16.mxu1 %v2743_v1  ;;  %v2837_v22 = vld [vmem:[#allocation3 + $0x608] sm:$0xff]  ;;  %v2839_v1 = vld [vmem:[#allocation3 + $0x618] sm:$0xff] }
 0x5c9   :  { %3223 = vmatpush1.bf16.msra.mxu0 %v2740_v7  ;;  %3387 = vmatpush1.bf16.msra.mxu1 %v2742_v24  ;;  %v2836_v7 = vld [vmem:[#allocation3 + $0x600] sm:$0xff]  ;;  %v2838_v24 = vld [vmem:[#allocation3 + $0x610] sm:$0xff] }
 0x5ca   :  { %3224 = vmatprep.subr.bf16.mxu0 %v2749_v2  ;;  %3388 = vmatprep.subr.bf16.mxu1 %v2751_v3  ;;  %v2845_v2 = vld [vmem:[#allocation3 + $0x648] sm:$0xff]  ;;  %v2847_v3 = vld [vmem:[#allocation3 + $0x658] sm:$0xff] }
 0x5cd   :  { %3225 = vmatpush1.bf16.msra.mxu0 %v2748_v28  ;;  %3389 = vmatpush1.bf16.msra.mxu1 %v2750_v14  ;;  %v2844_v28 = vld [vmem:[#allocation3 + $0x640] sm:$0xff]  ;;  %v2846_v14 = vld [vmem:[#allocation3 + $0x650] sm:$0xff] }
 0x5ce   :  { %3226 = vmatprep.subr.bf16.mxu0 %v2757_v31  ;;  %3390 = vmatprep.subr.bf16.mxu1 %v2759_v4  ;;  %v2853_v31 = vld [vmem:[#allocation3 + $0x688] sm:$0xff]  ;;  %v2855_v4 = vld [vmem:[#allocation3 + $0x698] sm:$0xff] }
 0x5d1   :  { %3227 = vmatpush1.bf16.msra.mxu0 %v2756_v5  ;;  %3391 = vmatpush1.bf16.msra.mxu1 %v2758_v9  ;;  %v2852_v5 = vld [vmem:[#allocation3 + $0x680] sm:$0xff]  ;;  %v2854_v9 = vld [vmem:[#allocation3 + $0x690] sm:$0xff] }
 0x5d2   :  { %3228 = vmatprep.subr.bf16.mxu0 %v2765_v10  ;;  %3392 = vmatprep.subr.bf16.mxu1 %v2767_v15  ;;  %v2861_v10 = vld [vmem:[#allocation3 + $0x6c8] sm:$0xff]  ;;  %v2863_v15 = vld [vmem:[#allocation3 + $0x6d8] sm:$0xff] }
 0x5d5   :  { %3229 = vmatpush1.bf16.msra.mxu0 %v2764_v16  ;;  %3393 = vmatpush1.bf16.msra.mxu1 %v2766_v21  ;;  %v2860_v16 = vld [vmem:[#allocation3 + $0x6c0] sm:$0xff]  ;;  %v2862_v21 = vld [vmem:[#allocation3 + $0x6d0] sm:$0xff] }
 0x5d6   :  { %3239 = vmatprep.subr.bf16.mxu0 %v2773_v20  ;;  %3403 = vmatprep.subr.bf16.mxu1 %v2775_v6  ;;  %v2869_v20 = vld [vmem:[#allocation3 + $0x708] sm:$0xff]  ;;  %v2871_v6 = vld [vmem:[#allocation3 + $0x718] sm:$0xff] }
 0x5d8   :  { %3231 = vmatmul.mubr.bf16.vlgmr.msra.gmra.mrb[8].mxu0 %v7648_v62  ;;  %3395 = vmatmul.mubr.bf16.vlgmr.msra.gmra.mrb[12].mxu1 %v7648_v62 }
 0x5d9   :  { %3240 = vmatpush1.bf16.msra.mxu0 %v2772_v23  ;;  %3404 = vmatpush1.bf16.msra.mxu1 %v2774_v27  ;;  %v2868_v23 = vld [vmem:[#allocation3 + $0x700] sm:$0xff]  ;;  %v2870_v27 = vld [vmem:[#allocation3 + $0x710] sm:$0xff] }
 0x5da   :  { %3241 = vmatprep.subr.bf16.mxu0 %v2781_v32  ;;  %3405 = vmatprep.subr.bf16.mxu1 %v2783_v26  ;;  %v2877_v32 = vld [vmem:[#allocation3 + $0x748] sm:$0xff]  ;;  %v2879_v26 = vld [vmem:[#allocation3 + $0x758] sm:$0xff] }
 0x5db   :  { %3271 = vmatprep.mubr.bf16.mxu0 %v7672_v61  ;;  %3435 = vmatprep.mubr.bf16.mxu1 %v7672_v61 }
 0x5dd   :  { %3242 = vmatpush1.bf16.msra.mxu0 %v2780_v13  ;;  %3406 = vmatpush1.bf16.msra.mxu1 %v2782_v34  ;;  %v2876_v13 = vld [vmem:[#allocation3 + $0x740] sm:$0xff]  ;;  %v2878_v34 = vld [vmem:[#allocation3 + $0x750] sm:$0xff] }
 0x5de   :  { %3243 = vmatprep.subr.bf16.mxu0 %v2789_v35  ;;  %3407 = vmatprep.subr.bf16.mxu1 %v2791_v37  ;;  %v2885_v35 = vld [vmem:[#allocation3 + $0x788] sm:$0xff]  ;;  %v2887_v37 = vld [vmem:[#allocation3 + $0x798] sm:$0xff] }
 0x5e1   :  { %3244 = vmatpush1.bf16.msra.mxu0 %v2788_v38  ;;  %3408 = vmatpush1.bf16.msra.mxu1 %v2790_v41  ;;  %v2884_v38 = vld [vmem:[#allocation3 + $0x780] sm:$0xff]  ;;  %v2886_v41 = vld [vmem:[#allocation3 + $0x790] sm:$0xff] }
 0x5e2   :  { %3245 = vmatprep.subr.bf16.mxu0 %v2797_v29  ;;  %3409 = vmatprep.subr.bf16.mxu1 %v2799_v42  ;;  %v2893_v29 = vld [vmem:[#allocation3 + $0x7c8] sm:$0xff]  ;;  %v2895_v42 = vld [vmem:[#allocation3 + $0x7d8] sm:$0xff] }
 0x5e5   :  { %3246 = vmatpush1.bf16.msra.mxu0 %v2796_v43  ;;  %3410 = vmatpush1.bf16.msra.mxu1 %v2798_v44  ;;  %v2892_v43 = vld [vmem:[#allocation3 + $0x7c0] sm:$0xff]  ;;  %v2894_v44 = vld [vmem:[#allocation3 + $0x7d0] sm:$0xff] }
 0x5e6   :  { %3247 = vmatprep.subr.bf16.mxu0 %v2805_v45  ;;  %3411 = vmatprep.subr.bf16.mxu1 %v2807_v46  ;;  %v2901_v45 = vld [vmem:[#allocation3 + $0x808] sm:$0xff]  ;;  %v2903_v46 = vld [vmem:[#allocation3 + $0x818] sm:$0xff] }
 0x5e9   :  { %3248 = vmatpush1.bf16.msra.mxu0 %v2804_v47  ;;  %3412 = vmatpush1.bf16.msra.mxu1 %v2806_v48  ;;  %v2900_v47 = vld [vmem:[#allocation3 + $0x800] sm:$0xff]  ;;  %v2902_v48 = vld [vmem:[#allocation3 + $0x810] sm:$0xff] }
 0x5ea   :  { %3249 = vmatprep.subr.bf16.mxu0 %v2813_v49  ;;  %3413 = vmatprep.subr.bf16.mxu1 %v2815_v50  ;;  %v2909_v49 = vld [vmem:[#allocation3 + $0x848] sm:$0xff]  ;;  %v2911_v50 = vld [vmem:[#allocation3 + $0x858] sm:$0xff] }
 0x5ed   :  { %3250 = vmatpush1.bf16.msra.mxu0 %v2812_v54  ;;  %3414 = vmatpush1.bf16.msra.mxu1 %v2814_v55  ;;  %v2908_v54 = vld [vmem:[#allocation3 + $0x840] sm:$0xff]  ;;  %v2910_v55 = vld [vmem:[#allocation3 + $0x850] sm:$0xff] }
 0x5ee   :  { %3251 = vmatprep.subr.bf16.mxu0 %v2821_v56  ;;  %3415 = vmatprep.subr.bf16.mxu1 %v2823_v57  ;;  %v2917_v56 = vld [vmem:[#allocation3 + $0x888] sm:$0xff]  ;;  %v2919_v57 = vld [vmem:[#allocation3 + $0x898] sm:$0xff] }
 0x5f1   :  { %3252 = vmatpush1.bf16.msra.mxu0 %v2820_v11  ;;  %3416 = vmatpush1.bf16.msra.mxu1 %v2822_v12  ;;  %v2916_v11 = vld [vmem:[#allocation3 + $0x880] sm:$0xff]  ;;  %v2918_v12 = vld [vmem:[#allocation3 + $0x890] sm:$0xff] }
 0x5f2   :  { %3253 = vmatprep.subr.bf16.mxu0 %v2829_v58  ;;  %3417 = vmatprep.subr.bf16.mxu1 %v2831_v59  ;;  %v2925_v58 = vld [vmem:[#allocation3 + $0x8c8] sm:$0xff]  ;;  %v2927_v59 = vld [vmem:[#allocation3 + $0x8d8] sm:$0xff] }
 0x5f5   :  { %3254 = vmatpush1.bf16.msra.mxu0 %v2828_v63  ;;  %3418 = vmatpush1.bf16.msra.mxu1 %v2830_v18  ;;  %v2924_v63 = vld [vmem:[#allocation3 + $0x8c0] sm:$0xff]  ;;  %v2926_v18 = vld [vmem:[#allocation3 + $0x8d0] sm:$0xff] }
 0x5f6   :  { %3255 = vmatprep.subr.bf16.mxu0 %v2837_v22  ;;  %3419 = vmatprep.subr.bf16.mxu1 %v2839_v1  ;;  %v2933_v22 = vld [vmem:[#allocation3 + $0x908] sm:$0xff]  ;;  %v2935_v1 = vld [vmem:[#allocation3 + $0x918] sm:$0xff] }
 0x5f9   :  { %3256 = vmatpush1.bf16.msra.mxu0 %v2836_v7  ;;  %3420 = vmatpush1.bf16.msra.mxu1 %v2838_v24  ;;  %v2932_v7 = vld [vmem:[#allocation3 + $0x900] sm:$0xff]  ;;  %v2934_v24 = vld [vmem:[#allocation3 + $0x910] sm:$0xff] }
 0x5fa   :  { %3257 = vmatprep.subr.bf16.mxu0 %v2845_v2  ;;  %3421 = vmatprep.subr.bf16.mxu1 %v2847_v3  ;;  %v2941_v2 = vld [vmem:[#allocation3 + $0x948] sm:$0xff]  ;;  %v2943_v3 = vld [vmem:[#allocation3 + $0x958] sm:$0xff] }
 0x5fd   :  { %3258 = vmatpush1.bf16.msra.mxu0 %v2844_v28  ;;  %3422 = vmatpush1.bf16.msra.mxu1 %v2846_v14  ;;  %v2940_v28 = vld [vmem:[#allocation3 + $0x940] sm:$0xff]  ;;  %v2942_v14 = vld [vmem:[#allocation3 + $0x950] sm:$0xff] }
 0x5fe   :  { %3259 = vmatprep.subr.bf16.mxu0 %v2853_v31  ;;  %3423 = vmatprep.subr.bf16.mxu1 %v2855_v4  ;;  %v2949_v31 = vld [vmem:[#allocation3 + $0x988] sm:$0xff]  ;;  %v2951_v4 = vld [vmem:[#allocation3 + $0x998] sm:$0xff] }
 0x601   :  { %3260 = vmatpush1.bf16.msra.mxu0 %v2852_v5  ;;  %3424 = vmatpush1.bf16.msra.mxu1 %v2854_v9  ;;  %v2948_v5 = vld [vmem:[#allocation3 + $0x980] sm:$0xff]  ;;  %v2950_v9 = vld [vmem:[#allocation3 + $0x990] sm:$0xff] }
 0x602   :  { %3261 = vmatprep.subr.bf16.mxu0 %v2861_v10  ;;  %3425 = vmatprep.subr.bf16.mxu1 %v2863_v15  ;;  %v2957_v10 = vld [vmem:[#allocation3 + $0x9c8] sm:$0xff]  ;;  %v2959_v15 = vld [vmem:[#allocation3 + $0x9d8] sm:$0xff] }
 0x605   :  { %3262 = vmatpush1.bf16.msra.mxu0 %v2860_v16  ;;  %3426 = vmatpush1.bf16.msra.mxu1 %v2862_v21  ;;  %v2956_v16 = vld [vmem:[#allocation3 + $0x9c0] sm:$0xff]  ;;  %v2958_v21 = vld [vmem:[#allocation3 + $0x9d0] sm:$0xff] }
 0x606   :  { %3263 = vmatprep.subr.bf16.mxu0 %v2869_v20  ;;  %3427 = vmatprep.subr.bf16.mxu1 %v2871_v6  ;;  %v2965_v20 = vld [vmem:[#allocation3 + $0xa08] sm:$0xff]  ;;  %v2967_v6 = vld [vmem:[#allocation3 + $0xa18] sm:$0xff] }
 0x609   :  { %3264 = vmatpush1.bf16.msra.mxu0 %v2868_v23  ;;  %3428 = vmatpush1.bf16.msra.mxu1 %v2870_v27  ;;  %v2964_v23 = vld [vmem:[#allocation3 + $0xa00] sm:$0xff]  ;;  %v2966_v27 = vld [vmem:[#allocation3 + $0xa10] sm:$0xff] }
 0x60a   :  { %3265 = vmatprep.subr.bf16.mxu0 %v2877_v32  ;;  %3429 = vmatprep.subr.bf16.mxu1 %v2879_v26  ;;  %v2973_v32 = vld [vmem:[#allocation3 + $0xa48] sm:$0xff]  ;;  %v2975_v26 = vld [vmem:[#allocation3 + $0xa58] sm:$0xff] }
 0x60d   :  { %3266 = vmatpush1.bf16.msra.mxu0 %v2876_v13  ;;  %3430 = vmatpush1.bf16.msra.mxu1 %v2878_v34  ;;  %v2972_v13 = vld [vmem:[#allocation3 + $0xa40] sm:$0xff]  ;;  %v2974_v34 = vld [vmem:[#allocation3 + $0xa50] sm:$0xff] }
 0x60e   :  { %3267 = vmatprep.subr.bf16.mxu0 %v2885_v35  ;;  %3431 = vmatprep.subr.bf16.mxu1 %v2887_v37  ;;  %v2981_v35 = vld [vmem:[#allocation3 + $0xa88] sm:$0xff]  ;;  %v2983_v37 = vld [vmem:[#allocation3 + $0xa98] sm:$0xff] }
 0x611   :  { %3268 = vmatpush1.bf16.msra.mxu0 %v2884_v38  ;;  %3432 = vmatpush1.bf16.msra.mxu1 %v2886_v41  ;;  %v2980_v38 = vld [vmem:[#allocation3 + $0xa80] sm:$0xff]  ;;  %v2982_v41 = vld [vmem:[#allocation3 + $0xa90] sm:$0xff] }
 0x612   :  { %3269 = vmatprep.subr.bf16.mxu0 %v2893_v29  ;;  %3433 = vmatprep.subr.bf16.mxu1 %v2895_v42  ;;  %v2989_v29 = vld [vmem:[#allocation3 + $0xac8] sm:$0xff]  ;;  %v2991_v42 = vld [vmem:[#allocation3 + $0xad8] sm:$0xff] }
 0x615   :  { %3270 = vmatpush1.bf16.msra.mxu0 %v2892_v43  ;;  %3434 = vmatpush1.bf16.msra.mxu1 %v2894_v44  ;;  %v2988_v43 = vld [vmem:[#allocation3 + $0xac0] sm:$0xff]  ;;  %v2990_v44 = vld [vmem:[#allocation3 + $0xad0] sm:$0xff] }
 0x616   :  { %3280 = vmatprep.subr.bf16.mxu0 %v2901_v45  ;;  %3444 = vmatprep.subr.bf16.mxu1 %v2903_v46  ;;  %v2997_v45 = vld [vmem:[#allocation3 + $0xb08] sm:$0xff]  ;;  %v2999_v46 = vld [vmem:[#allocation3 + $0xb18] sm:$0xff] }
 0x618   :  { %3272 = vmatmul.mubr.bf16.vlgmr.msra.gmra.mrb[8].mxu0 %v7670_v60  ;;  %3436 = vmatmul.mubr.bf16.vlgmr.msra.gmra.mrb[12].mxu1 %v7670_v60 }
 0x619   :  { %3281 = vmatpush1.bf16.msra.mxu0 %v2900_v47  ;;  %3445 = vmatpush1.bf16.msra.mxu1 %v2902_v48  ;;  %v2996_v47 = vld [vmem:[#allocation3 + $0xb00] sm:$0xff]  ;;  %v2998_v48 = vld [vmem:[#allocation3 + $0xb10] sm:$0xff] }
 0x61a   :  { %3282 = vmatprep.subr.bf16.mxu0 %v2909_v49  ;;  %3446 = vmatprep.subr.bf16.mxu1 %v2911_v50  ;;  %v3005_v49 = vld [vmem:[#allocation3 + $0xb48] sm:$0xff]  ;;  %v3007_v50 = vld [vmem:[#allocation3 + $0xb58] sm:$0xff] }
 0x61b   :  { %3312 = vmatprep.mubr.bf16.mxu0 %v7698_v51  ;;  %3476 = vmatprep.mubr.bf16.mxu1 %v7698_v51 }
 0x61d   :  { %3283 = vmatpush1.bf16.msra.mxu0 %v2908_v54  ;;  %3447 = vmatpush1.bf16.msra.mxu1 %v2910_v55  ;;  %v3004_v54 = vld [vmem:[#allocation3 + $0xb40] sm:$0xff]  ;;  %v3006_v55 = vld [vmem:[#allocation3 + $0xb50] sm:$0xff] }
 0x61e   :  { %3284 = vmatprep.subr.bf16.mxu0 %v2917_v56  ;;  %3448 = vmatprep.subr.bf16.mxu1 %v2919_v57  ;;  %v3013_v56 = vld [vmem:[#allocation3 + $0xb88] sm:$0xff]  ;;  %v3015_v57 = vld [vmem:[#allocation3 + $0xb98] sm:$0xff] }
 0x621   :  { %3285 = vmatpush1.bf16.msra.mxu0 %v2916_v11  ;;  %3449 = vmatpush1.bf16.msra.mxu1 %v2918_v12  ;;  %v3012_v11 = vld [vmem:[#allocation3 + $0xb80] sm:$0xff]  ;;  %v3014_v12 = vld [vmem:[#allocation3 + $0xb90] sm:$0xff] }
 0x622   :  { %3286 = vmatprep.subr.bf16.mxu0 %v2925_v58  ;;  %3450 = vmatprep.subr.bf16.mxu1 %v2927_v59  ;;  %v3021_v58 = vld [vmem:[#allocation3 + $0xbc8] sm:$0xff]  ;;  %v3023_v59 = vld [vmem:[#allocation3 + $0xbd8] sm:$0xff] }
 0x625   :  { %3287 = vmatpush1.bf16.msra.mxu0 %v2924_v63  ;;  %3451 = vmatpush1.bf16.msra.mxu1 %v2926_v18  ;;  %v3020_v63 = vld [vmem:[#allocation3 + $0xbc0] sm:$0xff]  ;;  %v3022_v18 = vld [vmem:[#allocation3 + $0xbd0] sm:$0xff] }
 0x626   :  { %3288 = vmatprep.subr.bf16.mxu0 %v2933_v22  ;;  %3452 = vmatprep.subr.bf16.mxu1 %v2935_v1  ;;  %v3029_v22 = vld [vmem:[#allocation3 + $0xc08] sm:$0xff]  ;;  %v3031_v1 = vld [vmem:[#allocation3 + $0xc18] sm:$0xff] }
 0x629   :  { %3289 = vmatpush1.bf16.msra.mxu0 %v2932_v7  ;;  %3453 = vmatpush1.bf16.msra.mxu1 %v2934_v24  ;;  %v3028_v7 = vld [vmem:[#allocation3 + $0xc00] sm:$0xff]  ;;  %v3030_v24 = vld [vmem:[#allocation3 + $0xc10] sm:$0xff] }
 0x62a   :  { %3290 = vmatprep.subr.bf16.mxu0 %v2941_v2  ;;  %3454 = vmatprep.subr.bf16.mxu1 %v2943_v3  ;;  %v3037_v2 = vld [vmem:[#allocation3 + $0xc48] sm:$0xff]  ;;  %v3039_v3 = vld [vmem:[#allocation3 + $0xc58] sm:$0xff] }
 0x62d   :  { %3291 = vmatpush1.bf16.msra.mxu0 %v2940_v28  ;;  %3455 = vmatpush1.bf16.msra.mxu1 %v2942_v14  ;;  %v3036_v28 = vld [vmem:[#allocation3 + $0xc40] sm:$0xff]  ;;  %v3038_v14 = vld [vmem:[#allocation3 + $0xc50] sm:$0xff] }
 0x62e   :  { %3292 = vmatprep.subr.bf16.mxu0 %v2949_v31  ;;  %3456 = vmatprep.subr.bf16.mxu1 %v2951_v4  ;;  %v3045_v31 = vld [vmem:[#allocation3 + $0xc88] sm:$0xff]  ;;  %v3047_v4 = vld [vmem:[#allocation3 + $0xc98] sm:$0xff] }
 0x631   :  { %3293 = vmatpush1.bf16.msra.mxu0 %v2948_v5  ;;  %3457 = vmatpush1.bf16.msra.mxu1 %v2950_v9  ;;  %v3044_v5 = vld [vmem:[#allocation3 + $0xc80] sm:$0xff]  ;;  %v3046_v9 = vld [vmem:[#allocation3 + $0xc90] sm:$0xff] }
 0x632   :  { %3294 = vmatprep.subr.bf16.mxu0 %v2957_v10  ;;  %3458 = vmatprep.subr.bf16.mxu1 %v2959_v15  ;;  %v3053_v10 = vld [vmem:[#allocation3 + $0xcc8] sm:$0xff]  ;;  %v3055_v15 = vld [vmem:[#allocation3 + $0xcd8] sm:$0xff] }
 0x635   :  { %3295 = vmatpush1.bf16.msra.mxu0 %v2956_v16  ;;  %3459 = vmatpush1.bf16.msra.mxu1 %v2958_v21  ;;  %v3052_v16 = vld [vmem:[#allocation3 + $0xcc0] sm:$0xff]  ;;  %v3054_v21 = vld [vmem:[#allocation3 + $0xcd0] sm:$0xff] }
 0x636   :  { %3296 = vmatprep.subr.bf16.mxu0 %v2965_v20  ;;  %3460 = vmatprep.subr.bf16.mxu1 %v2967_v6  ;;  %v3061_v20 = vld [vmem:[#allocation3 + $0xd08] sm:$0xff]  ;;  %v3063_v6 = vld [vmem:[#allocation3 + $0xd18] sm:$0xff] }
 0x639   :  { %3297 = vmatpush1.bf16.msra.mxu0 %v2964_v23  ;;  %3461 = vmatpush1.bf16.msra.mxu1 %v2966_v27  ;;  %v3060_v23 = vld [vmem:[#allocation3 + $0xd00] sm:$0xff]  ;;  %v3062_v27 = vld [vmem:[#allocation3 + $0xd10] sm:$0xff] }
 0x63a   :  { %3298 = vmatprep.subr.bf16.mxu0 %v2973_v32  ;;  %3462 = vmatprep.subr.bf16.mxu1 %v2975_v26  ;;  %v3069_v32 = vld [vmem:[#allocation3 + $0xd48] sm:$0xff]  ;;  %v3071_v26 = vld [vmem:[#allocation3 + $0xd58] sm:$0xff] }
 0x63d   :  { %3299 = vmatpush1.bf16.msra.mxu0 %v2972_v13  ;;  %3463 = vmatpush1.bf16.msra.mxu1 %v2974_v34  ;;  %v3068_v13 = vld [vmem:[#allocation3 + $0xd40] sm:$0xff]  ;;  %v3070_v34 = vld [vmem:[#allocation3 + $0xd50] sm:$0xff] }
 0x63e   :  { %3300 = vmatprep.subr.bf16.mxu0 %v2981_v35  ;;  %3464 = vmatprep.subr.bf16.mxu1 %v2983_v37  ;;  %v3077_v35 = vld [vmem:[#allocation3 + $0xd88] sm:$0xff]  ;;  %v3079_v37 = vld [vmem:[#allocation3 + $0xd98] sm:$0xff] }
 0x641   :  { %3301 = vmatpush1.bf16.msra.mxu0 %v2980_v38  ;;  %3465 = vmatpush1.bf16.msra.mxu1 %v2982_v41  ;;  %v3076_v38 = vld [vmem:[#allocation3 + $0xd80] sm:$0xff]  ;;  %v3078_v41 = vld [vmem:[#allocation3 + $0xd90] sm:$0xff] }
 0x642   :  { %3302 = vmatprep.subr.bf16.mxu0 %v2989_v29  ;;  %3466 = vmatprep.subr.bf16.mxu1 %v2991_v42  ;;  %v3085_v29 = vld [vmem:[#allocation3 + $0xdc8] sm:$0xff]  ;;  %v3087_v42 = vld [vmem:[#allocation3 + $0xdd8] sm:$0xff] }
 0x645   :  { %3303 = vmatpush1.bf16.msra.mxu0 %v2988_v43  ;;  %3467 = vmatpush1.bf16.msra.mxu1 %v2990_v44  ;;  %v3084_v43 = vld [vmem:[#allocation3 + $0xdc0] sm:$0xff]  ;;  %v3086_v44 = vld [vmem:[#allocation3 + $0xdd0] sm:$0xff] }
 0x646   :  { %3304 = vmatprep.subr.bf16.mxu0 %v2997_v45  ;;  %3468 = vmatprep.subr.bf16.mxu1 %v2999_v46  ;;  %v3093_v45 = vld [vmem:[#allocation3 + $0xe08] sm:$0xff]  ;;  %v3095_v46 = vld [vmem:[#allocation3 + $0xe18] sm:$0xff] }
 0x649   :  { %3305 = vmatpush1.bf16.msra.mxu0 %v2996_v47  ;;  %3469 = vmatpush1.bf16.msra.mxu1 %v2998_v48  ;;  %v3092_v47 = vld [vmem:[#allocation3 + $0xe00] sm:$0xff]  ;;  %v3094_v48 = vld [vmem:[#allocation3 + $0xe10] sm:$0xff] }
 0x64a   :  { %3306 = vmatprep.subr.bf16.mxu0 %v3005_v49  ;;  %3470 = vmatprep.subr.bf16.mxu1 %v3007_v50  ;;  %v3101_v49 = vld [vmem:[#allocation3 + $0xe48] sm:$0xff]  ;;  %v3103_v50 = vld [vmem:[#allocation3 + $0xe58] sm:$0xff] }
 0x64d   :  { %3307 = vmatpush1.bf16.msra.mxu0 %v3004_v54  ;;  %3471 = vmatpush1.bf16.msra.mxu1 %v3006_v55  ;;  %v3100_v54 = vld [vmem:[#allocation3 + $0xe40] sm:$0xff]  ;;  %v3102_v55 = vld [vmem:[#allocation3 + $0xe50] sm:$0xff] }
 0x64e   :  { %3308 = vmatprep.subr.bf16.mxu0 %v3013_v56  ;;  %3472 = vmatprep.subr.bf16.mxu1 %v3015_v57  ;;  %v3109_v56 = vld [vmem:[#allocation3 + $0xe88] sm:$0xff]  ;;  %v3111_v57 = vld [vmem:[#allocation3 + $0xe98] sm:$0xff] }
 0x651   :  { %3309 = vmatpush1.bf16.msra.mxu0 %v3012_v11  ;;  %3473 = vmatpush1.bf16.msra.mxu1 %v3014_v12  ;;  %v3108_v11 = vld [vmem:[#allocation3 + $0xe80] sm:$0xff]  ;;  %v3110_v12 = vld [vmem:[#allocation3 + $0xe90] sm:$0xff] }
 0x652   :  { %3310 = vmatprep.subr.bf16.mxu0 %v3021_v58  ;;  %3474 = vmatprep.subr.bf16.mxu1 %v3023_v59  ;;  %v3117_v58 = vld [vmem:[#allocation3 + $0xec8] sm:$0xff]  ;;  %v3119_v59 = vld [vmem:[#allocation3 + $0xed8] sm:$0xff] }
 0x655   :  { %3311 = vmatpush1.bf16.msra.mxu0 %v3020_v63  ;;  %3475 = vmatpush1.bf16.msra.mxu1 %v3022_v18  ;;  %v3116_v63 = vld [vmem:[#allocation3 + $0xec0] sm:$0xff]  ;;  %v3118_v18 = vld [vmem:[#allocation3 + $0xed0] sm:$0xff] }
 0x656   :  { %3321 = vmatprep.subr.bf16.mxu0 %v3029_v22  ;;  %3485 = vmatprep.subr.bf16.mxu1 %v3031_v1  ;;  %v3125_v22 = vld [vmem:[#allocation3 + $0xf08] sm:$0xff]  ;;  %v3127_v1 = vld [vmem:[#allocation3 + $0xf18] sm:$0xff] }
 0x658   :  { %3313 = vmatmul.mubr.bf16.vlgmr.msra.gmra.mrb[8].mxu0 %v7696_v30  ;;  %3477 = vmatmul.mubr.bf16.vlgmr.msra.gmra.mrb[12].mxu1 %v7696_v30 }
 0x659   :  { %3322 = vmatpush1.bf16.msra.mxu0 %v3028_v7  ;;  %3486 = vmatpush1.bf16.msra.mxu1 %v3030_v24  ;;  %v3124_v7 = vld [vmem:[#allocation3 + $0xf00] sm:$0xff]  ;;  %v3126_v24 = vld [vmem:[#allocation3 + $0xf10] sm:$0xff] }
 0x65a   :  { %3323 = vmatprep.subr.bf16.mxu0 %v3037_v2  ;;  %3487 = vmatprep.subr.bf16.mxu1 %v3039_v3  ;;  %v3133_v2 = vld [vmem:[#allocation3 + $0xf48] sm:$0xff]  ;;  %v3135_v3 = vld [vmem:[#allocation3 + $0xf58] sm:$0xff] }
 0x65b   :  { %3353 = vmatprep.mubr.bf16.mxu0 %v7710_v8  ;;  %3517 = vmatprep.mubr.bf16.mxu1 %v7710_v8 }
 0x65d   :  { %3324 = vmatpush1.bf16.msra.mxu0 %v3036_v28  ;;  %3488 = vmatpush1.bf16.msra.mxu1 %v3038_v14  ;;  %v3132_v28 = vld [vmem:[#allocation3 + $0xf40] sm:$0xff]  ;;  %v3134_v14 = vld [vmem:[#allocation3 + $0xf50] sm:$0xff] }
 0x65e   :  { %3325 = vmatprep.subr.bf16.mxu0 %v3045_v31  ;;  %3489 = vmatprep.subr.bf16.mxu1 %v3047_v4  ;;  %v3141_v31 = vld [vmem:[#allocation3 + $0xf88] sm:$0xff]  ;;  %v3143_v4 = vld [vmem:[#allocation3 + $0xf98] sm:$0xff] }
 0x661   :  { %3326 = vmatpush1.bf16.msra.mxu0 %v3044_v5  ;;  %3490 = vmatpush1.bf16.msra.mxu1 %v3046_v9  ;;  %v3140_v5 = vld [vmem:[#allocation3 + $0xf80] sm:$0xff]  ;;  %v3142_v9 = vld [vmem:[#allocation3 + $0xf90] sm:$0xff] }
 0x662   :  { %3327 = vmatprep.subr.bf16.mxu0 %v3053_v10  ;;  %3491 = vmatprep.subr.bf16.mxu1 %v3055_v15  ;;  %v3149_v10 = vld [vmem:[#allocation3 + $0xfc8] sm:$0xff]  ;;  %v3151_v15 = vld [vmem:[#allocation3 + $0xfd8] sm:$0xff] }
 0x665   :  { %3328 = vmatpush1.bf16.msra.mxu0 %v3052_v16  ;;  %3492 = vmatpush1.bf16.msra.mxu1 %v3054_v21  ;;  %v3148_v16 = vld [vmem:[#allocation3 + $0xfc0] sm:$0xff]  ;;  %v3150_v21 = vld [vmem:[#allocation3 + $0xfd0] sm:$0xff] }
 0x666   :  { %3329 = vmatprep.subr.bf16.mxu0 %v3061_v20  ;;  %3493 = vmatprep.subr.bf16.mxu1 %v3063_v6  ;;  %v2649_v20 = vld [vmem:[#allocation3 + $0x28] sm:$0xff]  ;;  %v2651_v6 = vld [vmem:[#allocation3 + $0x38] sm:$0xff] }
 0x669   :  { %3330 = vmatpush1.bf16.msra.mxu0 %v3060_v23  ;;  %3494 = vmatpush1.bf16.msra.mxu1 %v3062_v27  ;;  %v2648_v23 = vld [vmem:[#allocation3 + $0x20] sm:$0xff]  ;;  %v2650_v27 = vld [vmem:[#allocation3 + $0x30] sm:$0xff] }
 0x66a   :  { %3331 = vmatprep.subr.bf16.mxu0 %v3069_v32  ;;  %3495 = vmatprep.subr.bf16.mxu1 %v3071_v26  ;;  %v2657_v32 = vld [vmem:[#allocation3 + $0x68] sm:$0xff]  ;;  %v2659_v26 = vld [vmem:[#allocation3 + $0x78] sm:$0xff] }
 0x66d   :  { %3332 = vmatpush1.bf16.msra.mxu0 %v3068_v13  ;;  %3496 = vmatpush1.bf16.msra.mxu1 %v3070_v34  ;;  %v2656_v13 = vld [vmem:[#allocation3 + $0x60] sm:$0xff]  ;;  %v2658_v34 = vld [vmem:[#allocation3 + $0x70] sm:$0xff] }
 0x66e   :  { %3333 = vmatprep.subr.bf16.mxu0 %v3077_v35  ;;  %3497 = vmatprep.subr.bf16.mxu1 %v3079_v37  ;;  %v2665_v35 = vld [vmem:[#allocation3 + $0xa8] sm:$0xff]  ;;  %v2667_v37 = vld [vmem:[#allocation3 + $0xb8] sm:$0xff] }
 0x671   :  { %3334 = vmatpush1.bf16.msra.mxu0 %v3076_v38  ;;  %3498 = vmatpush1.bf16.msra.mxu1 %v3078_v41  ;;  %v2664_v38 = vld [vmem:[#allocation3 + $0xa0] sm:$0xff]  ;;  %v2666_v41 = vld [vmem:[#allocation3 + $0xb0] sm:$0xff] }
 0x672   :  { %3335 = vmatprep.subr.bf16.mxu0 %v3085_v29  ;;  %3499 = vmatprep.subr.bf16.mxu1 %v3087_v42  ;;  %v2673_v29 = vld [vmem:[#allocation3 + $0xe8] sm:$0xff]  ;;  %v2675_v42 = vld [vmem:[#allocation3 + $0xf8] sm:$0xff] }
 0x675   :  { %3336 = vmatpush1.bf16.msra.mxu0 %v3084_v43  ;;  %3500 = vmatpush1.bf16.msra.mxu1 %v3086_v44  ;;  %v2672_v43 = vld [vmem:[#allocation3 + $0xe0] sm:$0xff]  ;;  %v2674_v44 = vld [vmem:[#allocation3 + $0xf0] sm:$0xff] }
 0x676   :  { %3337 = vmatprep.subr.bf16.mxu0 %v3093_v45  ;;  %3501 = vmatprep.subr.bf16.mxu1 %v3095_v46  ;;  %v2681_v45 = vld [vmem:[#allocation3 + $0x128] sm:$0xff]  ;;  %v2683_v46 = vld [vmem:[#allocation3 + $0x138] sm:$0xff] }
 0x679   :  { %3338 = vmatpush1.bf16.msra.mxu0 %v3092_v47  ;;  %3502 = vmatpush1.bf16.msra.mxu1 %v3094_v48  ;;  %v2682_v47 = vld [vmem:[#allocation3 + $0x130] sm:$0xff]  ;;  %v2689_v48 = vld [vmem:[#allocation3 + $0x168] sm:$0xff] }
 0x67a   :  { %3339 = vmatprep.subr.bf16.mxu0 %v3101_v49  ;;  %3503 = vmatprep.subr.bf16.mxu1 %v3103_v50  ;;  %v2691_v49 = vld [vmem:[#allocation3 + $0x178] sm:$0xff]  ;;  %v2688_v50 = vld [vmem:[#allocation3 + $0x160] sm:$0xff] }
 0x67d   :  { %3340 = vmatpush1.bf16.msra.mxu0 %v3100_v54  ;;  %3504 = vmatpush1.bf16.msra.mxu1 %v3102_v55  ;;  %v2690_v54 = vld [vmem:[#allocation3 + $0x170] sm:$0xff]  ;;  %v2697_v55 = vld [vmem:[#allocation3 + $0x1a8] sm:$0xff] }
 0x67e   :  { %3341 = vmatprep.subr.bf16.mxu0 %v3109_v56  ;;  %3505 = vmatprep.subr.bf16.mxu1 %v3111_v57  ;;  %v2699_v56 = vld [vmem:[#allocation3 + $0x1b8] sm:$0xff]  ;;  %v2696_v57 = vld [vmem:[#allocation3 + $0x1a0] sm:$0xff] }
 0x681   :  { %3342 = vmatpush1.bf16.msra.mxu0 %v3108_v11  ;;  %3506 = vmatpush1.bf16.msra.mxu1 %v3110_v12  ;;  %v2698_v11 = vld [vmem:[#allocation3 + $0x1b0] sm:$0xff]  ;;  %v2705_v12 = vld [vmem:[#allocation3 + $0x1e8] sm:$0xff] }
 0x682   :  { %3343 = vmatprep.subr.bf16.mxu0 %v3117_v58  ;;  %3507 = vmatprep.subr.bf16.mxu1 %v3119_v59  ;;  %v2707_v58 = vld [vmem:[#allocation3 + $0x1f8] sm:$0xff]  ;;  %v2704_v59 = vld [vmem:[#allocation3 + $0x1e0] sm:$0xff] }
 0x685   :  { %3344 = vmatpush1.bf16.msra.mxu0 %v3116_v63  ;;  %3508 = vmatpush1.bf16.msra.mxu1 %v3118_v18  ;;  %v2706_v63 = vld [vmem:[#allocation3 + $0x1f0] sm:$0xff]  ;;  %v2713_v18 = vld [vmem:[#allocation3 + $0x228] sm:$0xff] }
 0x686   :  { %3345 = vmatprep.subr.bf16.mxu0 %v3125_v22  ;;  %3509 = vmatprep.subr.bf16.mxu1 %v3127_v1  ;;  %v2715_v22 = vld [vmem:[#allocation3 + $0x238] sm:$0xff]  ;;  %v2712_v1 = vld [vmem:[#allocation3 + $0x220] sm:$0xff] }
 0x689   :  { %3346 = vmatpush1.bf16.msra.mxu0 %v3124_v7  ;;  %3510 = vmatpush1.bf16.msra.mxu1 %v3126_v24  ;;  %v2714_v7 = vld [vmem:[#allocation3 + $0x230] sm:$0xff]  ;;  %v2721_v24 = vld [vmem:[#allocation3 + $0x268] sm:$0xff] }
 0x68a   :  { %3347 = vmatprep.subr.bf16.mxu0 %v3133_v2  ;;  %3511 = vmatprep.subr.bf16.mxu1 %v3135_v3  ;;  %v2723_v2 = vld [vmem:[#allocation3 + $0x278] sm:$0xff]  ;;  %v2720_v3 = vld [vmem:[#allocation3 + $0x260] sm:$0xff] }
 0x68d   :  { %3348 = vmatpush1.bf16.msra.mxu0 %v3132_v28  ;;  %3512 = vmatpush1.bf16.msra.mxu1 %v3134_v14  ;;  %v2722_v28 = vld [vmem:[#allocation3 + $0x270] sm:$0xff]  ;;  %v2729_v14 = vld [vmem:[#allocation3 + $0x2a8] sm:$0xff] }
 0x68e   :  { %3349 = vmatprep.subr.bf16.mxu0 %v3141_v31  ;;  %3513 = vmatprep.subr.bf16.mxu1 %v3143_v4  ;;  %v2731_v31 = vld [vmem:[#allocation3 + $0x2b8] sm:$0xff]  ;;  %v2728_v4 = vld [vmem:[#allocation3 + $0x2a0] sm:$0xff] }
 0x691   :  { %3350 = vmatpush1.bf16.msra.mxu0 %v3140_v5  ;;  %3514 = vmatpush1.bf16.msra.mxu1 %v3142_v9  ;;  %v2730_v5 = vld [vmem:[#allocation3 + $0x2b0] sm:$0xff]  ;;  %v2737_v9 = vld [vmem:[#allocation3 + $0x2e8] sm:$0xff] }
 0x692   :  { %3351 = vmatprep.subr.bf16.mxu0 %v3149_v10  ;;  %3515 = vmatprep.subr.bf16.mxu1 %v3151_v15  ;;  %v2739_v10 = vld [vmem:[#allocation3 + $0x2f8] sm:$0xff]  ;;  %v2736_v15 = vld [vmem:[#allocation3 + $0x2e0] sm:$0xff] }
 0x695   :  { %3352 = vmatpush1.bf16.msra.mxu0 %v3148_v16  ;;  %3516 = vmatpush1.bf16.msra.mxu1 %v3150_v21  ;;  %v2738_v16 = vld [vmem:[#allocation3 + $0x2f0] sm:$0xff]  ;;  %v2745_v21 = vld [vmem:[#allocation3 + $0x328] sm:$0xff] }
 0x696   :  { %3526 = vmatprep.subr.bf16.mxu0 %v2649_v20  ;;  %3690 = vmatprep.subr.bf16.mxu1 %v2651_v6  ;;  %v2747_v20 = vld [vmem:[#allocation3 + $0x338] sm:$0xff]  ;;  %v2744_v6 = vld [vmem:[#allocation3 + $0x320] sm:$0xff] }
 0x698   :  { %3354 = vmatmul.mubr.bf16.vlgmr.msra.gmra.mrb[8].mxu0 %v7708_v0  ;;  %3518 = vmatmul.mubr.bf16.vlgmr.msra.gmra.mrb[12].mxu1 %v7708_v0 }
 0x699   :  { %3527 = vmatpush1.bf16.msra.mxu0 %v2648_v23  ;;  %3691 = vmatpush1.bf16.msra.mxu1 %v2650_v27  ;;  %v2746_v23 = vld [vmem:[#allocation3 + $0x330] sm:$0xff]  ;;  %v2753_v27 = vld [vmem:[#allocation3 + $0x368] sm:$0xff] }
 0x69a   :  { %3528 = vmatprep.subr.bf16.mxu0 %v2657_v32  ;;  %3692 = vmatprep.subr.bf16.mxu1 %v2659_v26  ;;  %v2755_v32 = vld [vmem:[#allocation3 + $0x378] sm:$0xff]  ;;  %v2752_v26 = vld [vmem:[#allocation3 + $0x360] sm:$0xff] }
 0x69b   :  { %3558 = vmatprep.mubr.bf16.mxu0 %v7650_v17  ;;  %3722 = vmatprep.mubr.bf16.mxu1 %v7650_v17  ;;  %v2680_v17 = vld [vmem:[#allocation3 + $0x120] sm:$0xff] }
 0x69d   :  { %3529 = vmatpush1.bf16.msra.mxu0 %v2656_v13  ;;  %3693 = vmatpush1.bf16.msra.mxu1 %v2658_v34  ;;  %v2754_v13 = vld [vmem:[#allocation3 + $0x370] sm:$0xff]  ;;  %v2761_v34 = vld [vmem:[#allocation3 + $0x3a8] sm:$0xff] }
 0x69e   :  { %3530 = vmatprep.subr.bf16.mxu0 %v2665_v35  ;;  %3694 = vmatprep.subr.bf16.mxu1 %v2667_v37  ;;  %v2763_v35 = vld [vmem:[#allocation3 + $0x3b8] sm:$0xff]  ;;  %v2760_v37 = vld [vmem:[#allocation3 + $0x3a0] sm:$0xff] }
 0x6a1   :  { %3531 = vmatpush1.bf16.msra.mxu0 %v2664_v38  ;;  %3695 = vmatpush1.bf16.msra.mxu1 %v2666_v41  ;;  %v2762_v38 = vld [vmem:[#allocation3 + $0x3b0] sm:$0xff]  ;;  %v2769_v41 = vld [vmem:[#allocation3 + $0x3e8] sm:$0xff] }
 0x6a2   :  { %3532 = vmatprep.subr.bf16.mxu0 %v2673_v29  ;;  %3696 = vmatprep.subr.bf16.mxu1 %v2675_v42  ;;  %v2771_v29 = vld [vmem:[#allocation3 + $0x3f8] sm:$0xff]  ;;  %v2768_v42 = vld [vmem:[#allocation3 + $0x3e0] sm:$0xff] }
 0x6a5   :  { %3533 = vmatpush1.bf16.msra.mxu0 %v2672_v43  ;;  %3697 = vmatpush1.bf16.msra.mxu1 %v2674_v44  ;;  %v2770_v43 = vld [vmem:[#allocation3 + $0x3f0] sm:$0xff]  ;;  %v2777_v44 = vld [vmem:[#allocation3 + $0x428] sm:$0xff] }
 0x6a6   :  { %3534 = vmatprep.subr.bf16.mxu0 %v2681_v45  ;;  %3698 = vmatprep.subr.bf16.mxu1 %v2683_v46  ;;  %v2779_v45 = vld [vmem:[#allocation3 + $0x438] sm:$0xff]  ;;  %v2776_v46 = vld [vmem:[#allocation3 + $0x420] sm:$0xff] }
 0x6a9   :  { %3535 = vmatpush1.bf16.msra.mxu0 %v2680_v17  ;;  %3699 = vmatpush1.bf16.msra.mxu1 %v2682_v47  ;;  %v2778_v17 = vld [vmem:[#allocation3 + $0x430] sm:$0xff]  ;;  %v2785_v47 = vld [vmem:[#allocation3 + $0x468] sm:$0xff] }
 0x6aa   :  { %3536 = vmatprep.subr.bf16.mxu0 %v2689_v48  ;;  %3700 = vmatprep.subr.bf16.mxu1 %v2691_v49  ;;  %v2787_v48 = vld [vmem:[#allocation3 + $0x478] sm:$0xff]  ;;  %v2784_v49 = vld [vmem:[#allocation3 + $0x460] sm:$0xff] }
 0x6ad   :  { %3537 = vmatpush1.bf16.msra.mxu0 %v2688_v50  ;;  %3701 = vmatpush1.bf16.msra.mxu1 %v2690_v54  ;;  %v2786_v50 = vld [vmem:[#allocation3 + $0x470] sm:$0xff]  ;;  %v2793_v54 = vld [vmem:[#allocation3 + $0x4a8] sm:$0xff] }
 0x6ae   :  { %3538 = vmatprep.subr.bf16.mxu0 %v2697_v55  ;;  %3702 = vmatprep.subr.bf16.mxu1 %v2699_v56  ;;  %v2795_v55 = vld [vmem:[#allocation3 + $0x4b8] sm:$0xff]  ;;  %v2792_v56 = vld [vmem:[#allocation3 + $0x4a0] sm:$0xff] }
 0x6b1   :  { %3539 = vmatpush1.bf16.msra.mxu0 %v2696_v57  ;;  %3703 = vmatpush1.bf16.msra.mxu1 %v2698_v11  ;;  %v2794_v57 = vld [vmem:[#allocation3 + $0x4b0] sm:$0xff]  ;;  %v2801_v11 = vld [vmem:[#allocation3 + $0x4e8] sm:$0xff] }
 0x6b2   :  { %3540 = vmatprep.subr.bf16.mxu0 %v2705_v12  ;;  %3704 = vmatprep.subr.bf16.mxu1 %v2707_v58  ;;  %v2800_v12 = vld [vmem:[#allocation3 + $0x4e0] sm:$0xff]  ;;  %v2802_v58 = vld [vmem:[#allocation3 + $0x4f0] sm:$0xff] }
 0x6b5   :  { %3541 = vmatpush1.bf16.msra.mxu0 %v2704_v59  ;;  %3705 = vmatpush1.bf16.msra.mxu1 %v2706_v63  ;;  %v2809_v59 = vld [vmem:[#allocation3 + $0x528] sm:$0xff]  ;;  %v2811_v63 = vld [vmem:[#allocation3 + $0x538] sm:$0xff] }
 0x6b6   :  { %3542 = vmatprep.subr.bf16.mxu0 %v2713_v18  ;;  %3706 = vmatprep.subr.bf16.mxu1 %v2715_v22  ;;  %v2810_v18 = vld [vmem:[#allocation3 + $0x530] sm:$0xff]  ;;  %v2817_v22 = vld [vmem:[#allocation3 + $0x568] sm:$0xff] }
 0x6b9   :  { %3543 = vmatpush1.bf16.msra.mxu0 %v2712_v1  ;;  %3707 = vmatpush1.bf16.msra.mxu1 %v2714_v7  ;;  %v2819_v1 = vld [vmem:[#allocation3 + $0x578] sm:$0xff]  ;;  %v2816_v7 = vld [vmem:[#allocation3 + $0x560] sm:$0xff] }
 0x6ba   :  { %3544 = vmatprep.subr.bf16.mxu0 %v2721_v24  ;;  %3708 = vmatprep.subr.bf16.mxu1 %v2723_v2  ;;  %v2818_v24 = vld [vmem:[#allocation3 + $0x570] sm:$0xff]  ;;  %v2825_v2 = vld [vmem:[#allocation3 + $0x5a8] sm:$0xff] }
 0x6bd   :  { %3545 = vmatpush1.bf16.msra.mxu0 %v2720_v3  ;;  %3709 = vmatpush1.bf16.msra.mxu1 %v2722_v28  ;;  %v2827_v3 = vld [vmem:[#allocation3 + $0x5b8] sm:$0xff]  ;;  %v2824_v28 = vld [vmem:[#allocation3 + $0x5a0] sm:$0xff] }
 0x6be   :  { %3546 = vmatprep.subr.bf16.mxu0 %v2729_v14  ;;  %3710 = vmatprep.subr.bf16.mxu1 %v2731_v31  ;;  %v2826_v14 = vld [vmem:[#allocation3 + $0x5b0] sm:$0xff]  ;;  %v2833_v31 = vld [vmem:[#allocation3 + $0x5e8] sm:$0xff] }
 0x6c1   :  { %3547 = vmatpush1.bf16.msra.mxu0 %v2728_v4  ;;  %3711 = vmatpush1.bf16.msra.mxu1 %v2730_v5  ;;  %v2835_v4 = vld [vmem:[#allocation3 + $0x5f8] sm:$0xff]  ;;  %v2832_v5 = vld [vmem:[#allocation3 + $0x5e0] sm:$0xff] }
 0x6c2   :  { %3548 = vmatprep.subr.bf16.mxu0 %v2737_v9  ;;  %3712 = vmatprep.subr.bf16.mxu1 %v2739_v10  ;;  %v2834_v9 = vld [vmem:[#allocation3 + $0x5f0] sm:$0xff]  ;;  %v2841_v10 = vld [vmem:[#allocation3 + $0x628] sm:$0xff] }
 0x6c5   :  { %3549 = vmatpush1.bf16.msra.mxu0 %v2736_v15  ;;  %3713 = vmatpush1.bf16.msra.mxu1 %v2738_v16  ;;  %v2843_v15 = vld [vmem:[#allocation3 + $0x638] sm:$0xff]  ;;  %v2840_v16 = vld [vmem:[#allocation3 + $0x620] sm:$0xff] }
 0x6c6   :  { %3550 = vmatprep.subr.bf16.mxu0 %v2745_v21  ;;  %3714 = vmatprep.subr.bf16.mxu1 %v2747_v20  ;;  %v2842_v21 = vld [vmem:[#allocation3 + $0x630] sm:$0xff]  ;;  %v2849_v20 = vld [vmem:[#allocation3 + $0x668] sm:$0xff] }
 0x6c9   :  { %3551 = vmatpush1.bf16.msra.mxu0 %v2744_v6  ;;  %3715 = vmatpush1.bf16.msra.mxu1 %v2746_v23  ;;  %v2851_v6 = vld [vmem:[#allocation3 + $0x678] sm:$0xff]  ;;  %v2848_v23 = vld [vmem:[#allocation3 + $0x660] sm:$0xff] }
 0x6ca   :  { %3552 = vmatprep.subr.bf16.mxu0 %v2753_v27  ;;  %3716 = vmatprep.subr.bf16.mxu1 %v2755_v32  ;;  %v2850_v27 = vld [vmem:[#allocation3 + $0x670] sm:$0xff]  ;;  %v2857_v32 = vld [vmem:[#allocation3 + $0x6a8] sm:$0xff] }
 0x6cd   :  { %3553 = vmatpush1.bf16.msra.mxu0 %v2752_v26  ;;  %3717 = vmatpush1.bf16.msra.mxu1 %v2754_v13  ;;  %v2859_v26 = vld [vmem:[#allocation3 + $0x6b8] sm:$0xff]  ;;  %v2856_v13 = vld [vmem:[#allocation3 + $0x6a0] sm:$0xff] }
 0x6ce   :  { %3554 = vmatprep.subr.bf16.mxu0 %v2761_v34  ;;  %3718 = vmatprep.subr.bf16.mxu1 %v2763_v35  ;;  %v2858_v34 = vld [vmem:[#allocation3 + $0x6b0] sm:$0xff]  ;;  %v2865_v35 = vld [vmem:[#allocation3 + $0x6e8] sm:$0xff] }
 0x6d1   :  { %3555 = vmatpush1.bf16.msra.mxu0 %v2760_v37  ;;  %3719 = vmatpush1.bf16.msra.mxu1 %v2762_v38  ;;  %v2867_v37 = vld [vmem:[#allocation3 + $0x6f8] sm:$0xff]  ;;  %v2864_v38 = vld [vmem:[#allocation3 + $0x6e0] sm:$0xff] }
 0x6d2   :  { %3556 = vmatprep.subr.bf16.mxu0 %v2769_v41  ;;  %3720 = vmatprep.subr.bf16.mxu1 %v2771_v29  ;;  %v2866_v41 = vld [vmem:[#allocation3 + $0x6f0] sm:$0xff]  ;;  %v2873_v29 = vld [vmem:[#allocation3 + $0x728] sm:$0xff] }
 0x6d5   :  { %3557 = vmatpush1.bf16.msra.mxu0 %v2768_v42  ;;  %3721 = vmatpush1.bf16.msra.mxu1 %v2770_v43  ;;  %v2875_v42 = vld [vmem:[#allocation3 + $0x738] sm:$0xff]  ;;  %v2872_v43 = vld [vmem:[#allocation3 + $0x720] sm:$0xff] }
 0x6d6   :  { %3567 = vmatprep.subr.bf16.mxu0 %v2777_v44  ;;  %3731 = vmatprep.subr.bf16.mxu1 %v2779_v45  ;;  %v2874_v44 = vld [vmem:[#allocation3 + $0x730] sm:$0xff]  ;;  %v2881_v45 = vld [vmem:[#allocation3 + $0x768] sm:$0xff] }
 0x6d8   :  { %3559 = vmatmul.mubr.bf16.vlgmr.msra.gmra.mrb[12].mxu0 %v7648_v62  ;;  %3723 = vmatmul.mubr.bf16.vlgmr.msra.gmra.mrb[16].mxu1 %v7648_v62  ;;  %v2803_v62 = vld [vmem:[#allocation3 + $0x4f8] sm:$0xff] }
 0x6d9   :  { %3568 = vmatpush1.bf16.msra.mxu0 %v2776_v46  ;;  %3732 = vmatpush1.bf16.msra.mxu1 %v2778_v17  ;;  %v2883_v46 = vld [vmem:[#allocation3 + $0x778] sm:$0xff]  ;;  %v2880_v17 = vld [vmem:[#allocation3 + $0x760] sm:$0xff] }
 0x6da   :  { %3569 = vmatprep.subr.bf16.mxu0 %v2785_v47  ;;  %3733 = vmatprep.subr.bf16.mxu1 %v2787_v48  ;;  %v2882_v47 = vld [vmem:[#allocation3 + $0x770] sm:$0xff]  ;;  %v2889_v48 = vld [vmem:[#allocation3 + $0x7a8] sm:$0xff] }
 0x6db   :  { %3599 = vmatprep.mubr.bf16.mxu0 %v7672_v61  ;;  %3763 = vmatprep.mubr.bf16.mxu1 %v7672_v61  ;;  %v2808_v61 = vld [vmem:[#allocation3 + $0x520] sm:$0xff] }
 0x6dd   :  { %3570 = vmatpush1.bf16.msra.mxu0 %v2784_v49  ;;  %3734 = vmatpush1.bf16.msra.mxu1 %v2786_v50  ;;  %v2891_v49 = vld [vmem:[#allocation3 + $0x7b8] sm:$0xff]  ;;  %v2888_v50 = vld [vmem:[#allocation3 + $0x7a0] sm:$0xff] }
 0x6de   :  { %3571 = vmatprep.subr.bf16.mxu0 %v2793_v54  ;;  %3735 = vmatprep.subr.bf16.mxu1 %v2795_v55  ;;  %v2890_v54 = vld [vmem:[#allocation3 + $0x7b0] sm:$0xff]  ;;  %v2897_v55 = vld [vmem:[#allocation3 + $0x7e8] sm:$0xff] }
 0x6e1   :  { %3572 = vmatpush1.bf16.msra.mxu0 %v2792_v56  ;;  %3736 = vmatpush1.bf16.msra.mxu1 %v2794_v57  ;;  %v2899_v56 = vld [vmem:[#allocation3 + $0x7f8] sm:$0xff]  ;;  %v2896_v57 = vld [vmem:[#allocation3 + $0x7e0] sm:$0xff] }
 0x6e2   :  { %3573 = vmatprep.subr.bf16.mxu0 %v2801_v11  ;;  %3737 = vmatprep.subr.bf16.mxu1 %v2803_v62  ;;  %v2898_v11 = vld [vmem:[#allocation3 + $0x7f0] sm:$0xff]  ;;  %v2905_v62 = vld [vmem:[#allocation3 + $0x828] sm:$0xff] }
 0x6e5   :  { %3574 = vmatpush1.bf16.msra.mxu0 %v2800_v12  ;;  %3738 = vmatpush1.bf16.msra.mxu1 %v2802_v58  ;;  %v2907_v12 = vld [vmem:[#allocation3 + $0x838] sm:$0xff]  ;;  %v2904_v58 = vld [vmem:[#allocation3 + $0x820] sm:$0xff] }
 0x6e6   :  { %3575 = vmatprep.subr.bf16.mxu0 %v2809_v59  ;;  %3739 = vmatprep.subr.bf16.mxu1 %v2811_v63  ;;  %v2906_v59 = vld [vmem:[#allocation3 + $0x830] sm:$0xff]  ;;  %v2913_v63 = vld [vmem:[#allocation3 + $0x868] sm:$0xff] }
 0x6e9   :  { %3576 = vmatpush1.bf16.msra.mxu0 %v2808_v61  ;;  %3740 = vmatpush1.bf16.msra.mxu1 %v2810_v18  ;;  %v2915_v61 = vld [vmem:[#allocation3 + $0x878] sm:$0xff]  ;;  %v2912_v18 = vld [vmem:[#allocation3 + $0x860] sm:$0xff] }
 0x6ea   :  { %3577 = vmatprep.subr.bf16.mxu0 %v2817_v22  ;;  %3741 = vmatprep.subr.bf16.mxu1 %v2819_v1  ;;  %v2914_v22 = vld [vmem:[#allocation3 + $0x870] sm:$0xff]  ;;  %v2921_v1 = vld [vmem:[#allocation3 + $0x8a8] sm:$0xff] }
 0x6ed   :  { %3578 = vmatpush1.bf16.msra.mxu0 %v2816_v7  ;;  %3742 = vmatpush1.bf16.msra.mxu1 %v2818_v24  ;;  %v2923_v7 = vld [vmem:[#allocation3 + $0x8b8] sm:$0xff]  ;;  %v2920_v24 = vld [vmem:[#allocation3 + $0x8a0] sm:$0xff] }
 0x6ee   :  { %3579 = vmatprep.subr.bf16.mxu0 %v2825_v2  ;;  %3743 = vmatprep.subr.bf16.mxu1 %v2827_v3  ;;  %v2922_v2 = vld [vmem:[#allocation3 + $0x8b0] sm:$0xff]  ;;  %v2929_v3 = vld [vmem:[#allocation3 + $0x8e8] sm:$0xff] }
 0x6f1   :  { %3580 = vmatpush1.bf16.msra.mxu0 %v2824_v28  ;;  %3744 = vmatpush1.bf16.msra.mxu1 %v2826_v14  ;;  %v2928_v28 = vld [vmem:[#allocation3 + $0x8e0] sm:$0xff]  ;;  %v2930_v14 = vld [vmem:[#allocation3 + $0x8f0] sm:$0xff] }
 0x6f2   :  { %3581 = vmatprep.subr.bf16.mxu0 %v2833_v31  ;;  %3745 = vmatprep.subr.bf16.mxu1 %v2835_v4  ;;  %v2937_v31 = vld [vmem:[#allocation3 + $0x928] sm:$0xff]  ;;  %v2939_v4 = vld [vmem:[#allocation3 + $0x938] sm:$0xff] }
 0x6f5   :  { %3582 = vmatpush1.bf16.msra.mxu0 %v2832_v5  ;;  %3746 = vmatpush1.bf16.msra.mxu1 %v2834_v9  ;;  %v2938_v5 = vld [vmem:[#allocation3 + $0x930] sm:$0xff]  ;;  %v2945_v9 = vld [vmem:[#allocation3 + $0x968] sm:$0xff] }
 0x6f6   :  { %3583 = vmatprep.subr.bf16.mxu0 %v2841_v10  ;;  %3747 = vmatprep.subr.bf16.mxu1 %v2843_v15  ;;  %v2947_v10 = vld [vmem:[#allocation3 + $0x978] sm:$0xff]  ;;  %v2944_v15 = vld [vmem:[#allocation3 + $0x960] sm:$0xff] }
 0x6f9   :  { %3584 = vmatpush1.bf16.msra.mxu0 %v2840_v16  ;;  %3748 = vmatpush1.bf16.msra.mxu1 %v2842_v21  ;;  %v2946_v16 = vld [vmem:[#allocation3 + $0x970] sm:$0xff]  ;;  %v2953_v21 = vld [vmem:[#allocation3 + $0x9a8] sm:$0xff] }
 0x6fa   :  { %3585 = vmatprep.subr.bf16.mxu0 %v2849_v20  ;;  %3749 = vmatprep.subr.bf16.mxu1 %v2851_v6  ;;  %v2955_v20 = vld [vmem:[#allocation3 + $0x9b8] sm:$0xff]  ;;  %v2952_v6 = vld [vmem:[#allocation3 + $0x9a0] sm:$0xff] }
 0x6fd   :  { %3586 = vmatpush1.bf16.msra.mxu0 %v2848_v23  ;;  %3750 = vmatpush1.bf16.msra.mxu1 %v2850_v27  ;;  %v2954_v23 = vld [vmem:[#allocation3 + $0x9b0] sm:$0xff]  ;;  %v2961_v27 = vld [vmem:[#allocation3 + $0x9e8] sm:$0xff] }
 0x6fe   :  { %3587 = vmatprep.subr.bf16.mxu0 %v2857_v32  ;;  %3751 = vmatprep.subr.bf16.mxu1 %v2859_v26  ;;  %v2963_v32 = vld [vmem:[#allocation3 + $0x9f8] sm:$0xff]  ;;  %v2960_v26 = vld [vmem:[#allocation3 + $0x9e0] sm:$0xff] }
 0x701   :  { %3588 = vmatpush1.bf16.msra.mxu0 %v2856_v13  ;;  %3752 = vmatpush1.bf16.msra.mxu1 %v2858_v34  ;;  %v2962_v13 = vld [vmem:[#allocation3 + $0x9f0] sm:$0xff]  ;;  %v2969_v34 = vld [vmem:[#allocation3 + $0xa28] sm:$0xff] }
 0x702   :  { %3589 = vmatprep.subr.bf16.mxu0 %v2865_v35  ;;  %3753 = vmatprep.subr.bf16.mxu1 %v2867_v37  ;;  %v2971_v35 = vld [vmem:[#allocation3 + $0xa38] sm:$0xff]  ;;  %v2968_v37 = vld [vmem:[#allocation3 + $0xa20] sm:$0xff] }
 0x705   :  { %3590 = vmatpush1.bf16.msra.mxu0 %v2864_v38  ;;  %3754 = vmatpush1.bf16.msra.mxu1 %v2866_v41  ;;  %v2970_v38 = vld [vmem:[#allocation3 + $0xa30] sm:$0xff]  ;;  %v2977_v41 = vld [vmem:[#allocation3 + $0xa68] sm:$0xff] }
 0x706   :  { %3591 = vmatprep.subr.bf16.mxu0 %v2873_v29  ;;  %3755 = vmatprep.subr.bf16.mxu1 %v2875_v42  ;;  %v2979_v29 = vld [vmem:[#allocation3 + $0xa78] sm:$0xff]  ;;  %v2976_v42 = vld [vmem:[#allocation3 + $0xa60] sm:$0xff] }
 0x709   :  { %3592 = vmatpush1.bf16.msra.mxu0 %v2872_v43  ;;  %3756 = vmatpush1.bf16.msra.mxu1 %v2874_v44  ;;  %v2978_v43 = vld [vmem:[#allocation3 + $0xa70] sm:$0xff]  ;;  %v2985_v44 = vld [vmem:[#allocation3 + $0xaa8] sm:$0xff] }
 0x70a   :  { %3593 = vmatprep.subr.bf16.mxu0 %v2881_v45  ;;  %3757 = vmatprep.subr.bf16.mxu1 %v2883_v46  ;;  %v2987_v45 = vld [vmem:[#allocation3 + $0xab8] sm:$0xff]  ;;  %v2984_v46 = vld [vmem:[#allocation3 + $0xaa0] sm:$0xff] }
 0x70d   :  { %3594 = vmatpush1.bf16.msra.mxu0 %v2880_v17  ;;  %3758 = vmatpush1.bf16.msra.mxu1 %v2882_v47  ;;  %v2986_v17 = vld [vmem:[#allocation3 + $0xab0] sm:$0xff]  ;;  %v2993_v47 = vld [vmem:[#allocation3 + $0xae8] sm:$0xff] }
 0x70e   :  { %3595 = vmatprep.subr.bf16.mxu0 %v2889_v48  ;;  %3759 = vmatprep.subr.bf16.mxu1 %v2891_v49  ;;  %v2995_v48 = vld [vmem:[#allocation3 + $0xaf8] sm:$0xff]  ;;  %v2992_v49 = vld [vmem:[#allocation3 + $0xae0] sm:$0xff] }
 0x711   :  { %3596 = vmatpush1.bf16.msra.mxu0 %v2888_v50  ;;  %3760 = vmatpush1.bf16.msra.mxu1 %v2890_v54  ;;  %v2994_v50 = vld [vmem:[#allocation3 + $0xaf0] sm:$0xff]  ;;  %v3001_v54 = vld [vmem:[#allocation3 + $0xb28] sm:$0xff] }
 0x712   :  { %3597 = vmatprep.subr.bf16.mxu0 %v2897_v55  ;;  %3761 = vmatprep.subr.bf16.mxu1 %v2899_v56  ;;  %v3003_v55 = vld [vmem:[#allocation3 + $0xb38] sm:$0xff]  ;;  %v3000_v56 = vld [vmem:[#allocation3 + $0xb20] sm:$0xff] }
 0x715   :  { %3598 = vmatpush1.bf16.msra.mxu0 %v2896_v57  ;;  %3762 = vmatpush1.bf16.msra.mxu1 %v2898_v11  ;;  %v3002_v57 = vld [vmem:[#allocation3 + $0xb30] sm:$0xff]  ;;  %v3009_v11 = vld [vmem:[#allocation3 + $0xb68] sm:$0xff] }
 0x716   :  { %3608 = vmatprep.subr.bf16.mxu0 %v2905_v62  ;;  %3772 = vmatprep.subr.bf16.mxu1 %v2907_v12  ;;  %v3011_v62 = vld [vmem:[#allocation3 + $0xb78] sm:$0xff]  ;;  %v3008_v12 = vld [vmem:[#allocation3 + $0xb60] sm:$0xff] }
 0x718   :  { %3600 = vmatmul.mubr.bf16.vlgmr.msra.gmra.mrb[12].mxu0 %v7670_v60  ;;  %3764 = vmatmul.mubr.bf16.vlgmr.msra.gmra.mrb[16].mxu1 %v7670_v60  ;;  %v2931_v60 = vld [vmem:[#allocation3 + $0x8f8] sm:$0xff] }
 0x719   :  { %3609 = vmatpush1.bf16.msra.mxu0 %v2904_v58  ;;  %3773 = vmatpush1.bf16.msra.mxu1 %v2906_v59  ;;  %v3010_v58 = vld [vmem:[#allocation3 + $0xb70] sm:$0xff]  ;;  %v3017_v59 = vld [vmem:[#allocation3 + $0xba8] sm:$0xff] }
 0x71a   :  { %3610 = vmatprep.subr.bf16.mxu0 %v2913_v63  ;;  %3774 = vmatprep.subr.bf16.mxu1 %v2915_v61  ;;  %v3019_v63 = vld [vmem:[#allocation3 + $0xbb8] sm:$0xff]  ;;  %v3016_v61 = vld [vmem:[#allocation3 + $0xba0] sm:$0xff] }
 0x71b   :  { %3640 = vmatprep.mubr.bf16.mxu0 %v7698_v51  ;;  %3804 = vmatprep.mubr.bf16.mxu1 %v7698_v51  ;;  %v2936_v51 = vld [vmem:[#allocation3 + $0x920] sm:$0xff] }
 0x71d   :  { %3611 = vmatpush1.bf16.msra.mxu0 %v2912_v18  ;;  %3775 = vmatpush1.bf16.msra.mxu1 %v2914_v22  ;;  %v3018_v18 = vld [vmem:[#allocation3 + $0xbb0] sm:$0xff]  ;;  %v3025_v22 = vld [vmem:[#allocation3 + $0xbe8] sm:$0xff] }
 0x71e   :  { %3612 = vmatprep.subr.bf16.mxu0 %v2921_v1  ;;  %3776 = vmatprep.subr.bf16.mxu1 %v2923_v7  ;;  %v3027_v1 = vld [vmem:[#allocation3 + $0xbf8] sm:$0xff]  ;;  %v3024_v7 = vld [vmem:[#allocation3 + $0xbe0] sm:$0xff] }
 0x721   :  { %3613 = vmatpush1.bf16.msra.mxu0 %v2920_v24  ;;  %3777 = vmatpush1.bf16.msra.mxu1 %v2922_v2  ;;  %v3026_v24 = vld [vmem:[#allocation3 + $0xbf0] sm:$0xff]  ;;  %v3033_v2 = vld [vmem:[#allocation3 + $0xc28] sm:$0xff] }
 0x722   :  { %3614 = vmatprep.subr.bf16.mxu0 %v2929_v3  ;;  %3778 = vmatprep.subr.bf16.mxu1 %v2931_v60  ;;  %v3035_v3 = vld [vmem:[#allocation3 + $0xc38] sm:$0xff]  ;;  %v3032_v60 = vld [vmem:[#allocation3 + $0xc20] sm:$0xff] }
 0x725   :  { %3615 = vmatpush1.bf16.msra.mxu0 %v2928_v28  ;;  %3779 = vmatpush1.bf16.msra.mxu1 %v2930_v14  ;;  %v3034_v28 = vld [vmem:[#allocation3 + $0xc30] sm:$0xff]  ;;  %v3041_v14 = vld [vmem:[#allocation3 + $0xc68] sm:$0xff] }
 0x726   :  { %3616 = vmatprep.subr.bf16.mxu0 %v2937_v31  ;;  %3780 = vmatprep.subr.bf16.mxu1 %v2939_v4  ;;  %v3043_v31 = vld [vmem:[#allocation3 + $0xc78] sm:$0xff]  ;;  %v3040_v4 = vld [vmem:[#allocation3 + $0xc60] sm:$0xff] }
 0x729   :  { %3617 = vmatpush1.bf16.msra.mxu0 %v2936_v51  ;;  %3781 = vmatpush1.bf16.msra.mxu1 %v2938_v5  ;;  %v3042_v51 = vld [vmem:[#allocation3 + $0xc70] sm:$0xff]  ;;  %v3049_v5 = vld [vmem:[#allocation3 + $0xca8] sm:$0xff] }
 0x72a   :  { %3618 = vmatprep.subr.bf16.mxu0 %v2945_v9  ;;  %3782 = vmatprep.subr.bf16.mxu1 %v2947_v10  ;;  %v3051_v9 = vld [vmem:[#allocation3 + $0xcb8] sm:$0xff]  ;;  %v3048_v10 = vld [vmem:[#allocation3 + $0xca0] sm:$0xff] }
 0x72d   :  { %3619 = vmatpush1.bf16.msra.mxu0 %v2944_v15  ;;  %3783 = vmatpush1.bf16.msra.mxu1 %v2946_v16  ;;  %v3050_v15 = vld [vmem:[#allocation3 + $0xcb0] sm:$0xff]  ;;  %v3057_v16 = vld [vmem:[#allocation3 + $0xce8] sm:$0xff] }
 0x72e   :  { %3620 = vmatprep.subr.bf16.mxu0 %v2953_v21  ;;  %3784 = vmatprep.subr.bf16.mxu1 %v2955_v20  ;;  %v3056_v21 = vld [vmem:[#allocation3 + $0xce0] sm:$0xff]  ;;  %v3058_v20 = vld [vmem:[#allocation3 + $0xcf0] sm:$0xff] }
 0x731   :  { %3621 = vmatpush1.bf16.msra.mxu0 %v2952_v6  ;;  %3785 = vmatpush1.bf16.msra.mxu1 %v2954_v23  ;;  %v3065_v6 = vld [vmem:[#allocation3 + $0xd28] sm:$0xff]  ;;  %v3067_v23 = vld [vmem:[#allocation3 + $0xd38] sm:$0xff] }
 0x732   :  { %3622 = vmatprep.subr.bf16.mxu0 %v2961_v27  ;;  %3786 = vmatprep.subr.bf16.mxu1 %v2963_v32  ;;  %v7742_v27 = vld [vmem:[#allocation12] sm:$0xff]  ;;  %v3066_v32 = vld [vmem:[#allocation3 + $0xd30] sm:$0xff] }
 0x735   :  { %3623 = vmatpush1.bf16.msra.mxu0 %v2960_v26  ;;  %3787 = vmatpush1.bf16.msra.mxu1 %v2962_v13  ;;  %v3073_v26 = vld [vmem:[#allocation3 + $0xd68] sm:$0xff]  ;;  %v3075_v13 = vld [vmem:[#allocation3 + $0xd78] sm:$0xff] }
 0x736   :  { %3624 = vmatprep.subr.bf16.mxu0 %v2969_v34  ;;  %3788 = vmatprep.subr.bf16.mxu1 %v2971_v35  ;;  %v3161_v34 = vrot.slane %v7742_v27, %v7635_v33  ;;  %v3169_v35 = vrot.slane %v7742_v27, %v7661_v39 }
 0x739   :  { %3625 = vmatpush1.bf16.msra.mxu0 %v2968_v37  ;;  %3789 = vmatpush1.bf16.msra.mxu1 %v2970_v38  ;;  %v3165_v37 = vrot.slane %v7742_v27, %v7640_v36  ;;  %v3173_v38 = vrot.slane %v7742_v27, %v7664_v19 }
 0x73a   :  { %3626 = vmatprep.subr.bf16.mxu0 %v2977_v41  ;;  %3790 = vmatprep.subr.bf16.mxu1 %v2979_v29  ;;  %v3072_v41 = vld [vmem:[#allocation3 + $0xd60] sm:$0xff]  ;;  %v3074_v29 = vld [vmem:[#allocation3 + $0xd70] sm:$0xff] }
 0x73d   :  { %3627 = vmatpush1.bf16.msra.mxu0 %v2976_v42  ;;  %3791 = vmatpush1.bf16.msra.mxu1 %v2978_v43 }
 0x73e   :  { %3628 = vmatprep.subr.bf16.mxu0 %v2985_v44  ;;  %3792 = vmatprep.subr.bf16.mxu1 %v2987_v45  ;;  %v3081_v44 = vld [vmem:[#allocation3 + $0xda8] sm:$0xff]  ;;  %v3083_v45 = vld [vmem:[#allocation3 + $0xdb8] sm:$0xff] }
 0x741   :  { %3629 = vmatpush1.bf16.msra.mxu0 %v2984_v46  ;;  %3793 = vmatpush1.bf16.msra.mxu1 %v2986_v17 }
 0x742   :  { %3630 = vmatprep.subr.bf16.mxu0 %v2993_v47  ;;  %3794 = vmatprep.subr.bf16.mxu1 %v2995_v48 }
 0x745   :  { %3631 = vmatpush1.bf16.msra.mxu0 %v2992_v49  ;;  %3795 = vmatpush1.bf16.msra.mxu1 %v2994_v50 }
 0x746   :  { %3632 = vmatprep.subr.bf16.mxu0 %v3001_v54  ;;  %3796 = vmatprep.subr.bf16.mxu1 %v3003_v55 }
 0x749   :  { %3633 = vmatpush1.bf16.msra.mxu0 %v3000_v56  ;;  %3797 = vmatpush1.bf16.msra.mxu1 %v3002_v57 }
 0x74a   :  { %3634 = vmatprep.subr.bf16.mxu0 %v3009_v11  ;;  %3798 = vmatprep.subr.bf16.mxu1 %v3011_v62 }
 0x74d   :  { %3635 = vmatpush1.bf16.msra.mxu0 %v3008_v12  ;;  %3799 = vmatpush1.bf16.msra.mxu1 %v3010_v58  ;;  %v3080_v12 = vld [vmem:[#allocation3 + $0xda0] sm:$0xff]  ;;  %v3082_v58 = vld [vmem:[#allocation3 + $0xdb0] sm:$0xff] }
 0x74e   :  { %3636 = vmatprep.subr.bf16.mxu0 %v3017_v59  ;;  %3800 = vmatprep.subr.bf16.mxu1 %v3019_v63 }
 0x751   :  { %3637 = vmatpush1.bf16.msra.mxu0 %v3016_v61  ;;  %3801 = vmatpush1.bf16.msra.mxu1 %v3018_v18  ;;  %v3089_v61 = vld [vmem:[#allocation3 + $0xde8] sm:$0xff]  ;;  %v3091_v18 = vld [vmem:[#allocation3 + $0xdf8] sm:$0xff] }
 0x752   :  { %3638 = vmatprep.subr.bf16.mxu0 %v3025_v22  ;;  %3802 = vmatprep.subr.bf16.mxu1 %v3027_v1 }
 0x755   :  { %3639 = vmatpush1.bf16.msra.mxu0 %v3024_v7  ;;  %3803 = vmatpush1.bf16.msra.mxu1 %v3026_v24 }
 0x756   :  { %3649 = vmatprep.subr.bf16.mxu0 %v3033_v2  ;;  %3813 = vmatprep.subr.bf16.mxu1 %v3035_v3  ;;  %v3088_v2 = vld [vmem:[#allocation3 + $0xde0] sm:$0xff]  ;;  %v3090_v3 = vld [vmem:[#allocation3 + $0xdf0] sm:$0xff] }
 0x758   :  { %3641 = vmatmul.mubr.bf16.vlgmr.msra.gmra.mrb[12].mxu0 %v7696_v30  ;;  %3805 = vmatmul.mubr.bf16.vlgmr.msra.gmra.mrb[16].mxu1 %v7696_v30  ;;  %v3059_v30 = vld [vmem:[#allocation3 + $0xcf8] sm:$0xff] }
 0x759   :  { %3650 = vmatpush1.bf16.msra.mxu0 %v3032_v60  ;;  %3814 = vmatpush1.bf16.msra.mxu1 %v3034_v28  ;;  %v3097_v60 = vld [vmem:[#allocation3 + $0xe28] sm:$0xff]  ;;  %v3099_v28 = vld [vmem:[#allocation3 + $0xe38] sm:$0xff] }
 0x75a   :  { %3651 = vmatprep.subr.bf16.mxu0 %v3041_v14  ;;  %3815 = vmatprep.subr.bf16.mxu1 %v3043_v31  ;;  %v3096_v14 = vld [vmem:[#allocation3 + $0xe20] sm:$0xff]  ;;  %v3098_v31 = vld [vmem:[#allocation3 + $0xe30] sm:$0xff] }
 0x75b   :  { %3681 = vmatprep.mubr.bf16.mxu0 %v7710_v8  ;;  %3845 = vmatprep.mubr.bf16.mxu1 %v7710_v8  ;;  %v3064_v8 = vld [vmem:[#allocation3 + $0xd20] sm:$0xff] }
 0x75d   :  { %3652 = vmatpush1.bf16.msra.mxu0 %v3040_v4  ;;  %3816 = vmatpush1.bf16.msra.mxu1 %v3042_v51  ;;  %v3105_v4 = vld [vmem:[#allocation3 + $0xe68] sm:$0xff]  ;;  %v3107_v51 = vld [vmem:[#allocation3 + $0xe78] sm:$0xff] }
 0x75e   :  { %3653 = vmatprep.subr.bf16.mxu0 %v3049_v5  ;;  %3817 = vmatprep.subr.bf16.mxu1 %v3051_v9  ;;  %v3104_v5 = vld [vmem:[#allocation3 + $0xe60] sm:$0xff]  ;;  %v3106_v9 = vld [vmem:[#allocation3 + $0xe70] sm:$0xff] }
 0x761   :  { %3654 = vmatpush1.bf16.msra.mxu0 %v3048_v10  ;;  %3818 = vmatpush1.bf16.msra.mxu1 %v3050_v15  ;;  %v3113_v10 = vld [vmem:[#allocation3 + $0xea8] sm:$0xff]  ;;  %v3115_v15 = vld [vmem:[#allocation3 + $0xeb8] sm:$0xff] }
 0x762   :  { %3655 = vmatprep.subr.bf16.mxu0 %v3057_v16  ;;  %3819 = vmatprep.subr.bf16.mxu1 %v3059_v30  ;;  %v3112_v16 = vld [vmem:[#allocation3 + $0xea0] sm:$0xff]  ;;  %v3114_v30 = vld [vmem:[#allocation3 + $0xeb0] sm:$0xff] }
 0x765   :  { %3656 = vmatpush1.bf16.msra.mxu0 %v3056_v21  ;;  %3820 = vmatpush1.bf16.msra.mxu1 %v3058_v20  ;;  %v3121_v21 = vld [vmem:[#allocation3 + $0xee8] sm:$0xff]  ;;  %v3123_v20 = vld [vmem:[#allocation3 + $0xef8] sm:$0xff] }
 0x766   :  { %3657 = vmatprep.subr.bf16.mxu0 %v3065_v6  ;;  %3821 = vmatprep.subr.bf16.mxu1 %v3067_v23  ;;  %v3120_v6 = vld [vmem:[#allocation3 + $0xee0] sm:$0xff]  ;;  %v3122_v23 = vld [vmem:[#allocation3 + $0xef0] sm:$0xff] }
 0x769   :  { %3658 = vmatpush1.bf16.msra.mxu0 %v3064_v8  ;;  %3822 = vmatpush1.bf16.msra.mxu1 %v3066_v32  ;;  %v3129_v8 = vld [vmem:[#allocation3 + $0xf28] sm:$0xff]  ;;  %v3131_v32 = vld [vmem:[#allocation3 + $0xf38] sm:$0xff] }
 0x76a   :  { %3659 = vmatprep.subr.bf16.mxu0 %v3073_v26  ;;  %3823 = vmatprep.subr.bf16.mxu1 %v3075_v13  ;;  %v3128_v26 = vld [vmem:[#allocation3 + $0xf20] sm:$0xff]  ;;  %v3130_v13 = vld [vmem:[#allocation3 + $0xf30] sm:$0xff] }
 0x76b   :  { %v3355_v42 = vpop.f32.mrb[8].mxu0  ;;  %v3519_v43 = vpop.f32.mrb[12].mxu1 }
 0x76c   :  { %v6950_v46 = vadd.f32 %v3355_v42, %v3161_v34  ;;  %v6952_v17 = vadd.f32 %v3519_v43, %v3169_v35  ;;  %v3357_v47 = vpop.f32.mrb[9].mxu0  ;;  %v3521_v48 = vpop.f32.mrb[13].mxu1  ;;  %v3137_v34 = vld [vmem:[#allocation3 + $0xf68] sm:$0xff]  ;;  %v3139_v35 = vld [vmem:[#allocation3 + $0xf78] sm:$0xff]  ;;  %v3144_v42 = vld [vmem:[#allocation3 + $0xfa0] sm:$0xff] }
 0x76d   :  { %v6951_v49 = vadd.f32 %v3357_v47, %v3165_v37  ;;  %v6953_v50 = vadd.f32 %v3521_v48, %v3173_v38  ;;  %v3359_v54 = vpop.f32.mrb[10].mxu0  ;;  %v3523_v55 = vpop.f32.mrb[14].mxu1  ;;  %3660 = vmatpush1.bf16.msra.mxu0 %v3072_v41  ;;  %3824 = vmatpush1.bf16.msra.mxu1 %v3074_v29  ;;  %v3136_v37 = vld [vmem:[#allocation3 + $0xf60] sm:$0xff]  ;;  %v3138_v38 = vld [vmem:[#allocation3 + $0xf70] sm:$0xff]  ;;  %v3145_v41 = vld [vmem:[#allocation3 + $0xfa8] sm:$0xff]  ;;  %v3177_v47 = vrot.slane %v7742_v27, %v7689_v40 }
 0x76e   :  { %v3854_v56 = vmax.f32 %v6950_v46, 0.0  ;;  %v3856_v57 = vmax.f32 %v6952_v17, 0.0  ;;  %v3360_v11 = vpop.f32.mrb[11].mxu0  ;;  %v3524_v62 = vpop.f32.mrb[15].mxu1  ;;  %3661 = vmatprep.subr.bf16.mxu0 %v3081_v44  ;;  %3825 = vmatprep.subr.bf16.mxu1 %v3083_v45  ;;  %v3147_v29 = vld [vmem:[#allocation3 + $0xfb8] sm:$0xff]  ;;  %v3146_v43 = vld [vmem:[#allocation3 + $0xfb0] sm:$0xff]  ;;  %v3185_v48 = vrot.slane %v7742_v27, %v7701_v52 }
 0x76f   :  { %v3855_v59 = vmax.f32 %v6951_v49, 0.0  ;;  %v3857_v63 = vmax.f32 %v6953_v50, 0.0  ;;  %v3153_v44 = vld [vmem:[#allocation3 + $0xfe8] sm:$0xff]  ;;  %v3155_v45 = vld [vmem:[#allocation3 + $0xff8] sm:$0xff]  ;;  %v3152_v46 = vld [vmem:[#allocation3 + $0xfe0] sm:$0xff]  ;;  %v3181_v49 = vrot.slane %v7742_v27, %v7692_v25  ;;  %v3189_v50 = vrot.slane %v7742_v27, %v7704_v53 }
 0x770   :  { %v7752_v22 = vpack.c.bf16 %v3854_v56, %v3854_v56  ;;  %v7754_v1 = vpack.c.bf16 %v3856_v57, %v3856_v57  ;;  %v3154_v17 = vld [vmem:[#allocation3 + $0xff0] sm:$0xff] }
 0x771   :  { %v7756_v7 = vpack.c.bf16 %v3855_v59, %v3855_v59  ;;  %v7758_v24 = vpack.c.bf16 %v3857_v63, %v3857_v63  ;;  %3662 = vmatpush1.bf16.msra.mxu0 %v3080_v12  ;;  %3826 = vmatpush1.bf16.msra.mxu1 %v3082_v58 }
 0x772   :  { %3663 = vmatprep.subr.bf16.mxu0 %v3089_v61  ;;  %3827 = vmatprep.subr.bf16.mxu1 %v3091_v18 }
 0x775   :  { %3664 = vmatpush1.bf16.msra.mxu0 %v3088_v2  ;;  %3828 = vmatpush1.bf16.msra.mxu1 %v3090_v3 }
 0x776   :  { %3665 = vmatprep.subr.bf16.mxu0 %v3097_v60  ;;  %3829 = vmatprep.subr.bf16.mxu1 %v3099_v28 }
 0x779   :  { %3666 = vmatpush1.bf16.msra.mxu0 %v3096_v14  ;;  %3830 = vmatpush1.bf16.msra.mxu1 %v3098_v31 }
 0x77a   :  { %3667 = vmatprep.subr.bf16.mxu0 %v3105_v4  ;;  %3831 = vmatprep.subr.bf16.mxu1 %v3107_v51 }
 0x77d   :  { %3668 = vmatpush1.bf16.msra.mxu0 %v3104_v5  ;;  %3832 = vmatpush1.bf16.msra.mxu1 %v3106_v9 }
 0x77e   :  { %3669 = vmatprep.subr.bf16.mxu0 %v3113_v10  ;;  %3833 = vmatprep.subr.bf16.mxu1 %v3115_v15 }
 0x781   :  { %3670 = vmatpush1.bf16.msra.mxu0 %v3112_v16  ;;  %3834 = vmatpush1.bf16.msra.mxu1 %v3114_v30 }
 0x782   :  { %3671 = vmatprep.subr.bf16.mxu0 %v3121_v21  ;;  %3835 = vmatprep.subr.bf16.mxu1 %v3123_v20 }
 0x785   :  { %3672 = vmatpush1.bf16.msra.mxu0 %v3120_v6  ;;  %3836 = vmatpush1.bf16.msra.mxu1 %v3122_v23 }
 0x786   :  { %3673 = vmatprep.subr.bf16.mxu0 %v3129_v8  ;;  %3837 = vmatprep.subr.bf16.mxu1 %v3131_v32 }
 0x789   :  { %3674 = vmatpush1.bf16.msra.mxu0 %v3128_v26  ;;  %3838 = vmatpush1.bf16.msra.mxu1 %v3130_v13 }
 0x78a   :  { %3675 = vmatprep.subr.bf16.mxu0 %v3137_v34  ;;  %3839 = vmatprep.subr.bf16.mxu1 %v3139_v35 }
 0x78d   :  { %3676 = vmatpush1.bf16.msra.mxu0 %v3136_v37  ;;  %3840 = vmatpush1.bf16.msra.mxu1 %v3138_v38 }
 0x78e   :  { %3677 = vmatprep.subr.bf16.mxu0 %v3145_v41  ;;  %3841 = vmatprep.subr.bf16.mxu1 %v3147_v29 }
 0x791   :  { %3678 = vmatpush1.bf16.msra.mxu0 %v3144_v42  ;;  %3842 = vmatpush1.bf16.msra.mxu1 %v3146_v43 }
 0x792   :  { %3679 = vmatprep.subr.bf16.mxu0 %v3153_v44  ;;  %3843 = vmatprep.subr.bf16.mxu1 %v3155_v45 }
 0x795   :  { %3680 = vmatpush1.bf16.msra.mxu0 %v3152_v46  ;;  %3844 = vmatpush1.bf16.msra.mxu1 %v3154_v17 }
 0x798   :  { %3682 = vmatmul.mubr.bf16.vlgmr.msra.gmra.mrb[12].mxu0 %v7708_v0  ;;  %3846 = vmatmul.mubr.bf16.vlgmr.msra.gmra.mrb[16].mxu1 %v7708_v0 }
 0x86b   :  { %v3683_v54 = vpop.f32.mrb[12].mxu0  ;;  %v3847_v55 = vpop.f32.mrb[16].mxu1 }
 0x86c   :  { %v6954_v56 = vadd.f32 %v3683_v54, %v3177_v47  ;;  %v6956_v57 = vadd.f32 %v3847_v55, %v3185_v48  ;;  %v3685_v11 = vpop.f32.mrb[13].mxu0  ;;  %v3849_v62 = vpop.f32.mrb[17].mxu1 }
 0x86d   :  { %v6955_v12 = vadd.f32 %v3685_v11, %v3181_v49  ;;  %v6957_v0 = vadd.f32 %v3849_v62, %v3189_v50  ;;  %v3687_v58 = vpop.f32.mrb[14].mxu0  ;;  %v3851_v59 = vpop.f32.mrb[18].mxu1 }
 0x86e   :  { %v3858_v63 = vmax.f32 %v6954_v56, 0.0  ;;  %v3860_v61 = vmax.f32 %v6956_v57, 0.0  ;;  %v3688_v18 = vpop.f32.mrb[15].mxu0  ;;  %v3852_v2 = vpop.f32.mrb[19].mxu1 }
 0x86f   :  { %v3859_v3 = vmax.f32 %v6955_v12, 0.0  ;;  %v3861_v60 = vmax.f32 %v6957_v0, 0.0 }
 0x870   :  { %v7770_v28 = vpack.c.bf16 %v3858_v63, %v3858_v63  ;;  %v7772_v14 = vpack.c.bf16 %v3860_v61, %v3860_v61 }
 0x871   :  { %v7774_v27 = vpack.c.bf16 %v3859_v3, %v3859_v3  ;;  %v7776_v31 = vpack.c.bf16 %v3861_v60, %v3861_v60 }
 0x872   :  { %7378 = dma.done.wait [#allocation6 + $0x2], 65536 }
 0x873   :  { %7379 = vsyncadd [#allocation6 + $0x2], 4294901760  ;;  %4458 = vmatprep.mubr.bf16.mxu0 %v7756_v7  ;;  %4622 = vmatprep.mubr.bf16.mxu1 %v7756_v7  ;;  %v3873_v4 = vld [vmem:[#allocation4 + $0x8] sm:$0xff]  ;;  %v3875_v51 = vld [vmem:[#allocation4 + $0x18] sm:$0xff] }
 0x874   :  { %v3872_v5 = vld [vmem:[#allocation4] sm:$0xff]  ;;  %4426 = vmatprep.subr.bf16.mxu0 %v3873_v4  ;;  %4590 = vmatprep.subr.bf16.mxu1 %v3875_v51  ;;  %v3874_v9 = vld [vmem:[#allocation4 + $0x10] sm:$0xff]  ;;  %v3881_v10 = vld [vmem:[#allocation4 + $0x48] sm:$0xff] }
 0x875   :  { %v3883_v15 = vld [vmem:[#allocation4 + $0x58] sm:$0xff]  ;;  %4427 = vmatpush1.bf16.msra.mxu0 %v3872_v5  ;;  %4591 = vmatpush1.bf16.msra.mxu1 %v3874_v9  ;;  %v3880_v16 = vld [vmem:[#allocation4 + $0x40] sm:$0xff]  ;;  %v3882_v30 = vld [vmem:[#allocation4 + $0x50] sm:$0xff] }
 0x876   :  { %4428 = vmatprep.subr.bf16.mxu0 %v3881_v10  ;;  %4592 = vmatprep.subr.bf16.mxu1 %v3883_v15  ;;  %v3889_v21 = vld [vmem:[#allocation4 + $0x88] sm:$0xff]  ;;  %v3891_v20 = vld [vmem:[#allocation4 + $0x98] sm:$0xff]  ;;  %v3888_v6 = vld [vmem:[#allocation4 + $0x80] sm:$0xff] }
 0x877   :  { %v3890_v23 = vld [vmem:[#allocation4 + $0x90] sm:$0xff]  ;;  %v3897_v8 = vld [vmem:[#allocation4 + $0xc8] sm:$0xff]  ;;  %v3899_v32 = vld [vmem:[#allocation4 + $0xd8] sm:$0xff] }
 0x878   :  { %v3896_v26 = vld [vmem:[#allocation4 + $0xc0] sm:$0xff]  ;;  %v3898_v13 = vld [vmem:[#allocation4 + $0xd0] sm:$0xff]  ;;  %v3905_v34 = vld [vmem:[#allocation4 + $0x108] sm:$0xff] }
 0x879   :  { %4429 = vmatpush1.bf16.msra.mxu0 %v3880_v16  ;;  %4593 = vmatpush1.bf16.msra.mxu1 %v3882_v30  ;;  %v3907_v35 = vld [vmem:[#allocation4 + $0x118] sm:$0xff]  ;;  %v3904_v37 = vld [vmem:[#allocation4 + $0x100] sm:$0xff]  ;;  %v3906_v38 = vld [vmem:[#allocation4 + $0x110] sm:$0xff] }
 0x87a   :  { %4430 = vmatprep.subr.bf16.mxu0 %v3889_v21  ;;  %4594 = vmatprep.subr.bf16.mxu1 %v3891_v20  ;;  %v3913_v41 = vld [vmem:[#allocation4 + $0x148] sm:$0xff]  ;;  %v3915_v29 = vld [vmem:[#allocation4 + $0x158] sm:$0xff]  ;;  %v3912_v42 = vld [vmem:[#allocation4 + $0x140] sm:$0xff] }
 0x87b   :  { %v3914_v43 = vld [vmem:[#allocation4 + $0x150] sm:$0xff]  ;;  %v3921_v44 = vld [vmem:[#allocation4 + $0x188] sm:$0xff]  ;;  %v3923_v45 = vld [vmem:[#allocation4 + $0x198] sm:$0xff] }
 0x87c   :  { %v3920_v46 = vld [vmem:[#allocation4 + $0x180] sm:$0xff]  ;;  %v3922_v17 = vld [vmem:[#allocation4 + $0x190] sm:$0xff]  ;;  %v3929_v47 = vld [vmem:[#allocation4 + $0x1c8] sm:$0xff] }
 0x87d   :  { %4431 = vmatpush1.bf16.msra.mxu0 %v3888_v6  ;;  %4595 = vmatpush1.bf16.msra.mxu1 %v3890_v23  ;;  %v3931_v48 = vld [vmem:[#allocation4 + $0x1d8] sm:$0xff]  ;;  %v3928_v49 = vld [vmem:[#allocation4 + $0x1c0] sm:$0xff]  ;;  %v3930_v50 = vld [vmem:[#allocation4 + $0x1d0] sm:$0xff] }
 0x87e   :  { %4432 = vmatprep.subr.bf16.mxu0 %v3897_v8  ;;  %4596 = vmatprep.subr.bf16.mxu1 %v3899_v32  ;;  %v3937_v54 = vld [vmem:[#allocation4 + $0x208] sm:$0xff]  ;;  %v3939_v55 = vld [vmem:[#allocation4 + $0x218] sm:$0xff]  ;;  %v3936_v56 = vld [vmem:[#allocation4 + $0x200] sm:$0xff] }
 0x87f   :  { %v3938_v57 = vld [vmem:[#allocation4 + $0x210] sm:$0xff]  ;;  %v3945_v11 = vld [vmem:[#allocation4 + $0x248] sm:$0xff]  ;;  %v3947_v62 = vld [vmem:[#allocation4 + $0x258] sm:$0xff] }
 0x880   :  { %v3944_v12 = vld [vmem:[#allocation4 + $0x240] sm:$0xff]  ;;  %v3946_v0 = vld [vmem:[#allocation4 + $0x250] sm:$0xff]  ;;  %v3953_v58 = vld [vmem:[#allocation4 + $0x288] sm:$0xff] }
 0x881   :  { %4433 = vmatpush1.bf16.msra.mxu0 %v3896_v26  ;;  %4597 = vmatpush1.bf16.msra.mxu1 %v3898_v13  ;;  %v3955_v59 = vld [vmem:[#allocation4 + $0x298] sm:$0xff]  ;;  %v3952_v63 = vld [vmem:[#allocation4 + $0x280] sm:$0xff]  ;;  %v3954_v61 = vld [vmem:[#allocation4 + $0x290] sm:$0xff] }
 0x882   :  { %4434 = vmatprep.subr.bf16.mxu0 %v3905_v34  ;;  %4598 = vmatprep.subr.bf16.mxu1 %v3907_v35  ;;  %v3961_v18 = vld [vmem:[#allocation4 + $0x2c8] sm:$0xff]  ;;  %v3963_v2 = vld [vmem:[#allocation4 + $0x2d8] sm:$0xff]  ;;  %v3960_v3 = vld [vmem:[#allocation4 + $0x2c0] sm:$0xff] }
 0x883   :  { %v3962_v60 = vld [vmem:[#allocation4 + $0x2d0] sm:$0xff]  ;;  %v3969_v4 = vld [vmem:[#allocation4 + $0x308] sm:$0xff]  ;;  %v3971_v51 = vld [vmem:[#allocation4 + $0x318] sm:$0xff] }
 0x884   :  { %v3968_v5 = vld [vmem:[#allocation4 + $0x300] sm:$0xff]  ;;  %v3970_v9 = vld [vmem:[#allocation4 + $0x310] sm:$0xff]  ;;  %v3977_v10 = vld [vmem:[#allocation4 + $0x348] sm:$0xff] }
 0x885   :  { %4435 = vmatpush1.bf16.msra.mxu0 %v3904_v37  ;;  %4599 = vmatpush1.bf16.msra.mxu1 %v3906_v38  ;;  %v3979_v15 = vld [vmem:[#allocation4 + $0x358] sm:$0xff]  ;;  %v3976_v16 = vld [vmem:[#allocation4 + $0x340] sm:$0xff]  ;;  %v3978_v30 = vld [vmem:[#allocation4 + $0x350] sm:$0xff] }
 0x886   :  { %4436 = vmatprep.subr.bf16.mxu0 %v3913_v41  ;;  %4600 = vmatprep.subr.bf16.mxu1 %v3915_v29  ;;  %v3985_v21 = vld [vmem:[#allocation4 + $0x388] sm:$0xff]  ;;  %v3987_v20 = vld [vmem:[#allocation4 + $0x398] sm:$0xff]  ;;  %v3984_v6 = vld [vmem:[#allocation4 + $0x380] sm:$0xff] }
 0x887   :  { %v3986_v23 = vld [vmem:[#allocation4 + $0x390] sm:$0xff]  ;;  %v3993_v8 = vld [vmem:[#allocation4 + $0x3c8] sm:$0xff]  ;;  %v3995_v32 = vld [vmem:[#allocation4 + $0x3d8] sm:$0xff] }
 0x888   :  { %v3992_v26 = vld [vmem:[#allocation4 + $0x3c0] sm:$0xff]  ;;  %v3994_v13 = vld [vmem:[#allocation4 + $0x3d0] sm:$0xff]  ;;  %v4001_v34 = vld [vmem:[#allocation4 + $0x408] sm:$0xff] }
 0x889   :  { %4437 = vmatpush1.bf16.msra.mxu0 %v3912_v42  ;;  %4601 = vmatpush1.bf16.msra.mxu1 %v3914_v43  ;;  %v4003_v35 = vld [vmem:[#allocation4 + $0x418] sm:$0xff]  ;;  %v4000_v37 = vld [vmem:[#allocation4 + $0x400] sm:$0xff]  ;;  %v4002_v38 = vld [vmem:[#allocation4 + $0x410] sm:$0xff] }
 0x88a   :  { %4438 = vmatprep.subr.bf16.mxu0 %v3921_v44  ;;  %4602 = vmatprep.subr.bf16.mxu1 %v3923_v45  ;;  %v4009_v41 = vld [vmem:[#allocation4 + $0x448] sm:$0xff]  ;;  %v4011_v29 = vld [vmem:[#allocation4 + $0x458] sm:$0xff]  ;;  %v4008_v42 = vld [vmem:[#allocation4 + $0x440] sm:$0xff] }
 0x88b   :  { %v4010_v43 = vld [vmem:[#allocation4 + $0x450] sm:$0xff]  ;;  %v4017_v44 = vld [vmem:[#allocation4 + $0x488] sm:$0xff]  ;;  %v4019_v45 = vld [vmem:[#allocation4 + $0x498] sm:$0xff] }
 0x88d   :  { %4439 = vmatpush1.bf16.msra.mxu0 %v3920_v46  ;;  %4603 = vmatpush1.bf16.msra.mxu1 %v3922_v17  ;;  %v4016_v46 = vld [vmem:[#allocation4 + $0x480] sm:$0xff]  ;;  %v4018_v17 = vld [vmem:[#allocation4 + $0x490] sm:$0xff] }
 0x88e   :  { %4440 = vmatprep.subr.bf16.mxu0 %v3929_v47  ;;  %4604 = vmatprep.subr.bf16.mxu1 %v3931_v48  ;;  %v4025_v47 = vld [vmem:[#allocation4 + $0x4c8] sm:$0xff]  ;;  %v4027_v48 = vld [vmem:[#allocation4 + $0x4d8] sm:$0xff] }
 0x891   :  { %4441 = vmatpush1.bf16.msra.mxu0 %v3928_v49  ;;  %4605 = vmatpush1.bf16.msra.mxu1 %v3930_v50  ;;  %v4024_v49 = vld [vmem:[#allocation4 + $0x4c0] sm:$0xff]  ;;  %v4026_v50 = vld [vmem:[#allocation4 + $0x4d0] sm:$0xff] }
 0x892   :  { %4442 = vmatprep.subr.bf16.mxu0 %v3937_v54  ;;  %4606 = vmatprep.subr.bf16.mxu1 %v3939_v55  ;;  %v4033_v54 = vld [vmem:[#allocation4 + $0x508] sm:$0xff]  ;;  %v4035_v55 = vld [vmem:[#allocation4 + $0x518] sm:$0xff] }
 0x895   :  { %4443 = vmatpush1.bf16.msra.mxu0 %v3936_v56  ;;  %4607 = vmatpush1.bf16.msra.mxu1 %v3938_v57  ;;  %v4032_v56 = vld [vmem:[#allocation4 + $0x500] sm:$0xff]  ;;  %v4034_v57 = vld [vmem:[#allocation4 + $0x510] sm:$0xff] }
 0x896   :  { %4444 = vmatprep.subr.bf16.mxu0 %v3945_v11  ;;  %4608 = vmatprep.subr.bf16.mxu1 %v3947_v62  ;;  %v4041_v11 = vld [vmem:[#allocation4 + $0x548] sm:$0xff]  ;;  %v4043_v62 = vld [vmem:[#allocation4 + $0x558] sm:$0xff] }
 0x899   :  { %4445 = vmatpush1.bf16.msra.mxu0 %v3944_v12  ;;  %4609 = vmatpush1.bf16.msra.mxu1 %v3946_v0  ;;  %v4040_v12 = vld [vmem:[#allocation4 + $0x540] sm:$0xff]  ;;  %v4042_v0 = vld [vmem:[#allocation4 + $0x550] sm:$0xff] }
 0x89a   :  { %4446 = vmatprep.subr.bf16.mxu0 %v3953_v58  ;;  %4610 = vmatprep.subr.bf16.mxu1 %v3955_v59  ;;  %v4049_v58 = vld [vmem:[#allocation4 + $0x588] sm:$0xff]  ;;  %v4051_v59 = vld [vmem:[#allocation4 + $0x598] sm:$0xff] }
 0x89d   :  { %4447 = vmatpush1.bf16.msra.mxu0 %v3952_v63  ;;  %4611 = vmatpush1.bf16.msra.mxu1 %v3954_v61  ;;  %v4048_v63 = vld [vmem:[#allocation4 + $0x580] sm:$0xff]  ;;  %v4050_v61 = vld [vmem:[#allocation4 + $0x590] sm:$0xff] }
 0x89e   :  { %4448 = vmatprep.subr.bf16.mxu0 %v3961_v18  ;;  %4612 = vmatprep.subr.bf16.mxu1 %v3963_v2  ;;  %v4057_v18 = vld [vmem:[#allocation4 + $0x5c8] sm:$0xff]  ;;  %v4059_v2 = vld [vmem:[#allocation4 + $0x5d8] sm:$0xff] }
 0x8a1   :  { %4449 = vmatpush1.bf16.msra.mxu0 %v3960_v3  ;;  %4613 = vmatpush1.bf16.msra.mxu1 %v3962_v60  ;;  %v4056_v3 = vld [vmem:[#allocation4 + $0x5c0] sm:$0xff]  ;;  %v4058_v60 = vld [vmem:[#allocation4 + $0x5d0] sm:$0xff] }
 0x8a2   :  { %4450 = vmatprep.subr.bf16.mxu0 %v3969_v4  ;;  %4614 = vmatprep.subr.bf16.mxu1 %v3971_v51  ;;  %v4065_v4 = vld [vmem:[#allocation4 + $0x608] sm:$0xff]  ;;  %v4067_v51 = vld [vmem:[#allocation4 + $0x618] sm:$0xff] }
 0x8a5   :  { %4451 = vmatpush1.bf16.msra.mxu0 %v3968_v5  ;;  %4615 = vmatpush1.bf16.msra.mxu1 %v3970_v9  ;;  %v4064_v5 = vld [vmem:[#allocation4 + $0x600] sm:$0xff]  ;;  %v4066_v9 = vld [vmem:[#allocation4 + $0x610] sm:$0xff] }
 0x8a6   :  { %4452 = vmatprep.subr.bf16.mxu0 %v3977_v10  ;;  %4616 = vmatprep.subr.bf16.mxu1 %v3979_v15  ;;  %v4073_v10 = vld [vmem:[#allocation4 + $0x648] sm:$0xff]  ;;  %v4075_v15 = vld [vmem:[#allocation4 + $0x658] sm:$0xff] }
 0x8a9   :  { %4453 = vmatpush1.bf16.msra.mxu0 %v3976_v16  ;;  %4617 = vmatpush1.bf16.msra.mxu1 %v3978_v30  ;;  %v4072_v16 = vld [vmem:[#allocation4 + $0x640] sm:$0xff]  ;;  %v4074_v30 = vld [vmem:[#allocation4 + $0x650] sm:$0xff] }
 0x8aa   :  { %4454 = vmatprep.subr.bf16.mxu0 %v3985_v21  ;;  %4618 = vmatprep.subr.bf16.mxu1 %v3987_v20  ;;  %v4081_v21 = vld [vmem:[#allocation4 + $0x688] sm:$0xff]  ;;  %v4083_v20 = vld [vmem:[#allocation4 + $0x698] sm:$0xff] }
 0x8ad   :  { %4455 = vmatpush1.bf16.msra.mxu0 %v3984_v6  ;;  %4619 = vmatpush1.bf16.msra.mxu1 %v3986_v23  ;;  %v4080_v6 = vld [vmem:[#allocation4 + $0x680] sm:$0xff]  ;;  %v4082_v23 = vld [vmem:[#allocation4 + $0x690] sm:$0xff] }
 0x8ae   :  { %4456 = vmatprep.subr.bf16.mxu0 %v3993_v8  ;;  %4620 = vmatprep.subr.bf16.mxu1 %v3995_v32  ;;  %v4089_v8 = vld [vmem:[#allocation4 + $0x6c8] sm:$0xff]  ;;  %v4091_v32 = vld [vmem:[#allocation4 + $0x6d8] sm:$0xff] }
 0x8b1   :  { %4457 = vmatpush1.bf16.msra.mxu0 %v3992_v26  ;;  %4621 = vmatpush1.bf16.msra.mxu1 %v3994_v13  ;;  %v4088_v26 = vld [vmem:[#allocation4 + $0x6c0] sm:$0xff]  ;;  %v4090_v13 = vld [vmem:[#allocation4 + $0x6d0] sm:$0xff] }
 0x8b2   :  { %4467 = vmatprep.subr.bf16.mxu0 %v4001_v34  ;;  %4631 = vmatprep.subr.bf16.mxu1 %v4003_v35  ;;  %v4097_v34 = vld [vmem:[#allocation4 + $0x708] sm:$0xff]  ;;  %v4099_v35 = vld [vmem:[#allocation4 + $0x718] sm:$0xff] }
 0x8b4   :  { %4459 = vmatmul.mubr.bf16.vlgmr.msra.gmra.mrb[16].mxu0 %v7752_v22  ;;  %4623 = vmatmul.mubr.bf16.vlgmr.msra.gmra.mrb[20].mxu1 %v7752_v22 }
 0x8b5   :  { %4468 = vmatpush1.bf16.msra.mxu0 %v4000_v37  ;;  %4632 = vmatpush1.bf16.msra.mxu1 %v4002_v38  ;;  %v4096_v37 = vld [vmem:[#allocation4 + $0x700] sm:$0xff]  ;;  %v4098_v38 = vld [vmem:[#allocation4 + $0x710] sm:$0xff] }
 0x8b6   :  { %4469 = vmatprep.subr.bf16.mxu0 %v4009_v41  ;;  %4633 = vmatprep.subr.bf16.mxu1 %v4011_v29  ;;  %v4105_v41 = vld [vmem:[#allocation4 + $0x748] sm:$0xff]  ;;  %v4107_v29 = vld [vmem:[#allocation4 + $0x758] sm:$0xff] }
 0x8b7   :  { %4499 = vmatprep.mubr.bf16.mxu0 %v7758_v24  ;;  %4663 = vmatprep.mubr.bf16.mxu1 %v7758_v24 }
 0x8b9   :  { %4470 = vmatpush1.bf16.msra.mxu0 %v4008_v42  ;;  %4634 = vmatpush1.bf16.msra.mxu1 %v4010_v43  ;;  %v4104_v42 = vld [vmem:[#allocation4 + $0x740] sm:$0xff]  ;;  %v4106_v43 = vld [vmem:[#allocation4 + $0x750] sm:$0xff] }
 0x8ba   :  { %4471 = vmatprep.subr.bf16.mxu0 %v4017_v44  ;;  %4635 = vmatprep.subr.bf16.mxu1 %v4019_v45  ;;  %v4113_v44 = vld [vmem:[#allocation4 + $0x788] sm:$0xff]  ;;  %v4115_v45 = vld [vmem:[#allocation4 + $0x798] sm:$0xff] }
 0x8bd   :  { %4472 = vmatpush1.bf16.msra.mxu0 %v4016_v46  ;;  %4636 = vmatpush1.bf16.msra.mxu1 %v4018_v17  ;;  %v4112_v46 = vld [vmem:[#allocation4 + $0x780] sm:$0xff]  ;;  %v4114_v17 = vld [vmem:[#allocation4 + $0x790] sm:$0xff] }
 0x8be   :  { %4473 = vmatprep.subr.bf16.mxu0 %v4025_v47  ;;  %4637 = vmatprep.subr.bf16.mxu1 %v4027_v48  ;;  %v4121_v47 = vld [vmem:[#allocation4 + $0x7c8] sm:$0xff]  ;;  %v4123_v48 = vld [vmem:[#allocation4 + $0x7d8] sm:$0xff] }
 0x8c1   :  { %4474 = vmatpush1.bf16.msra.mxu0 %v4024_v49  ;;  %4638 = vmatpush1.bf16.msra.mxu1 %v4026_v50  ;;  %v4120_v49 = vld [vmem:[#allocation4 + $0x7c0] sm:$0xff]  ;;  %v4122_v50 = vld [vmem:[#allocation4 + $0x7d0] sm:$0xff] }
 0x8c2   :  { %4475 = vmatprep.subr.bf16.mxu0 %v4033_v54  ;;  %4639 = vmatprep.subr.bf16.mxu1 %v4035_v55  ;;  %v4129_v54 = vld [vmem:[#allocation4 + $0x808] sm:$0xff]  ;;  %v4131_v55 = vld [vmem:[#allocation4 + $0x818] sm:$0xff] }
 0x8c5   :  { %4476 = vmatpush1.bf16.msra.mxu0 %v4032_v56  ;;  %4640 = vmatpush1.bf16.msra.mxu1 %v4034_v57  ;;  %v4128_v56 = vld [vmem:[#allocation4 + $0x800] sm:$0xff]  ;;  %v4130_v57 = vld [vmem:[#allocation4 + $0x810] sm:$0xff] }
 0x8c6   :  { %4477 = vmatprep.subr.bf16.mxu0 %v4041_v11  ;;  %4641 = vmatprep.subr.bf16.mxu1 %v4043_v62  ;;  %v4137_v11 = vld [vmem:[#allocation4 + $0x848] sm:$0xff]  ;;  %v4139_v62 = vld [vmem:[#allocation4 + $0x858] sm:$0xff] }
 0x8c9   :  { %4478 = vmatpush1.bf16.msra.mxu0 %v4040_v12  ;;  %4642 = vmatpush1.bf16.msra.mxu1 %v4042_v0  ;;  %v4136_v12 = vld [vmem:[#allocation4 + $0x840] sm:$0xff]  ;;  %v4138_v0 = vld [vmem:[#allocation4 + $0x850] sm:$0xff] }
 0x8ca   :  { %4479 = vmatprep.subr.bf16.mxu0 %v4049_v58  ;;  %4643 = vmatprep.subr.bf16.mxu1 %v4051_v59  ;;  %v4145_v58 = vld [vmem:[#allocation4 + $0x888] sm:$0xff]  ;;  %v4147_v59 = vld [vmem:[#allocation4 + $0x898] sm:$0xff] }
 0x8cd   :  { %4480 = vmatpush1.bf16.msra.mxu0 %v4048_v63  ;;  %4644 = vmatpush1.bf16.msra.mxu1 %v4050_v61  ;;  %v4144_v63 = vld [vmem:[#allocation4 + $0x880] sm:$0xff]  ;;  %v4146_v61 = vld [vmem:[#allocation4 + $0x890] sm:$0xff] }
 0x8ce   :  { %4481 = vmatprep.subr.bf16.mxu0 %v4057_v18  ;;  %4645 = vmatprep.subr.bf16.mxu1 %v4059_v2  ;;  %v4153_v18 = vld [vmem:[#allocation4 + $0x8c8] sm:$0xff]  ;;  %v4155_v2 = vld [vmem:[#allocation4 + $0x8d8] sm:$0xff] }
 0x8d1   :  { %4482 = vmatpush1.bf16.msra.mxu0 %v4056_v3  ;;  %4646 = vmatpush1.bf16.msra.mxu1 %v4058_v60  ;;  %v4152_v3 = vld [vmem:[#allocation4 + $0x8c0] sm:$0xff]  ;;  %v4154_v60 = vld [vmem:[#allocation4 + $0x8d0] sm:$0xff] }
 0x8d2   :  { %4483 = vmatprep.subr.bf16.mxu0 %v4065_v4  ;;  %4647 = vmatprep.subr.bf16.mxu1 %v4067_v51  ;;  %v4161_v4 = vld [vmem:[#allocation4 + $0x908] sm:$0xff]  ;;  %v4163_v51 = vld [vmem:[#allocation4 + $0x918] sm:$0xff] }
 0x8d5   :  { %4484 = vmatpush1.bf16.msra.mxu0 %v4064_v5  ;;  %4648 = vmatpush1.bf16.msra.mxu1 %v4066_v9  ;;  %v4160_v5 = vld [vmem:[#allocation4 + $0x900] sm:$0xff]  ;;  %v4162_v9 = vld [vmem:[#allocation4 + $0x910] sm:$0xff] }
 0x8d6   :  { %4485 = vmatprep.subr.bf16.mxu0 %v4073_v10  ;;  %4649 = vmatprep.subr.bf16.mxu1 %v4075_v15  ;;  %v4169_v10 = vld [vmem:[#allocation4 + $0x948] sm:$0xff]  ;;  %v4171_v15 = vld [vmem:[#allocation4 + $0x958] sm:$0xff] }
 0x8d9   :  { %4486 = vmatpush1.bf16.msra.mxu0 %v4072_v16  ;;  %4650 = vmatpush1.bf16.msra.mxu1 %v4074_v30  ;;  %v4168_v16 = vld [vmem:[#allocation4 + $0x940] sm:$0xff]  ;;  %v4170_v30 = vld [vmem:[#allocation4 + $0x950] sm:$0xff] }
 0x8da   :  { %4487 = vmatprep.subr.bf16.mxu0 %v4081_v21  ;;  %4651 = vmatprep.subr.bf16.mxu1 %v4083_v20  ;;  %v4177_v21 = vld [vmem:[#allocation4 + $0x988] sm:$0xff]  ;;  %v4179_v20 = vld [vmem:[#allocation4 + $0x998] sm:$0xff] }
 0x8dd   :  { %4488 = vmatpush1.bf16.msra.mxu0 %v4080_v6  ;;  %4652 = vmatpush1.bf16.msra.mxu1 %v4082_v23  ;;  %v4176_v6 = vld [vmem:[#allocation4 + $0x980] sm:$0xff]  ;;  %v4178_v23 = vld [vmem:[#allocation4 + $0x990] sm:$0xff] }
 0x8de   :  { %4489 = vmatprep.subr.bf16.mxu0 %v4089_v8  ;;  %4653 = vmatprep.subr.bf16.mxu1 %v4091_v32  ;;  %v4185_v8 = vld [vmem:[#allocation4 + $0x9c8] sm:$0xff]  ;;  %v4187_v32 = vld [vmem:[#allocation4 + $0x9d8] sm:$0xff] }
 0x8e1   :  { %4490 = vmatpush1.bf16.msra.mxu0 %v4088_v26  ;;  %4654 = vmatpush1.bf16.msra.mxu1 %v4090_v13  ;;  %v4184_v26 = vld [vmem:[#allocation4 + $0x9c0] sm:$0xff]  ;;  %v4186_v13 = vld [vmem:[#allocation4 + $0x9d0] sm:$0xff] }
 0x8e2   :  { %4491 = vmatprep.subr.bf16.mxu0 %v4097_v34  ;;  %4655 = vmatprep.subr.bf16.mxu1 %v4099_v35  ;;  %v4193_v34 = vld [vmem:[#allocation4 + $0xa08] sm:$0xff]  ;;  %v4195_v35 = vld [vmem:[#allocation4 + $0xa18] sm:$0xff] }
 0x8e5   :  { %4492 = vmatpush1.bf16.msra.mxu0 %v4096_v37  ;;  %4656 = vmatpush1.bf16.msra.mxu1 %v4098_v38  ;;  %v4192_v37 = vld [vmem:[#allocation4 + $0xa00] sm:$0xff]  ;;  %v4194_v38 = vld [vmem:[#allocation4 + $0xa10] sm:$0xff] }
 0x8e6   :  { %4493 = vmatprep.subr.bf16.mxu0 %v4105_v41  ;;  %4657 = vmatprep.subr.bf16.mxu1 %v4107_v29  ;;  %v4201_v41 = vld [vmem:[#allocation4 + $0xa48] sm:$0xff]  ;;  %v4203_v29 = vld [vmem:[#allocation4 + $0xa58] sm:$0xff] }
 0x8e9   :  { %4494 = vmatpush1.bf16.msra.mxu0 %v4104_v42  ;;  %4658 = vmatpush1.bf16.msra.mxu1 %v4106_v43  ;;  %v4200_v42 = vld [vmem:[#allocation4 + $0xa40] sm:$0xff]  ;;  %v4202_v43 = vld [vmem:[#allocation4 + $0xa50] sm:$0xff] }
 0x8ea   :  { %4495 = vmatprep.subr.bf16.mxu0 %v4113_v44  ;;  %4659 = vmatprep.subr.bf16.mxu1 %v4115_v45  ;;  %v4209_v44 = vld [vmem:[#allocation4 + $0xa88] sm:$0xff]  ;;  %v4211_v45 = vld [vmem:[#allocation4 + $0xa98] sm:$0xff] }
 0x8ed   :  { %4496 = vmatpush1.bf16.msra.mxu0 %v4112_v46  ;;  %4660 = vmatpush1.bf16.msra.mxu1 %v4114_v17  ;;  %v4208_v46 = vld [vmem:[#allocation4 + $0xa80] sm:$0xff]  ;;  %v4210_v17 = vld [vmem:[#allocation4 + $0xa90] sm:$0xff] }
 0x8ee   :  { %4497 = vmatprep.subr.bf16.mxu0 %v4121_v47  ;;  %4661 = vmatprep.subr.bf16.mxu1 %v4123_v48  ;;  %v4217_v47 = vld [vmem:[#allocation4 + $0xac8] sm:$0xff]  ;;  %v4219_v48 = vld [vmem:[#allocation4 + $0xad8] sm:$0xff] }
 0x8f1   :  { %4498 = vmatpush1.bf16.msra.mxu0 %v4120_v49  ;;  %4662 = vmatpush1.bf16.msra.mxu1 %v4122_v50  ;;  %v4216_v49 = vld [vmem:[#allocation4 + $0xac0] sm:$0xff]  ;;  %v4218_v50 = vld [vmem:[#allocation4 + $0xad0] sm:$0xff] }
 0x8f2   :  { %4508 = vmatprep.subr.bf16.mxu0 %v4129_v54  ;;  %4672 = vmatprep.subr.bf16.mxu1 %v4131_v55  ;;  %v4225_v54 = vld [vmem:[#allocation4 + $0xb08] sm:$0xff]  ;;  %v4227_v55 = vld [vmem:[#allocation4 + $0xb18] sm:$0xff] }
 0x8f4   :  { %4500 = vmatmul.mubr.bf16.vlgmr.msra.gmra.mrb[16].mxu0 %v7754_v1  ;;  %4664 = vmatmul.mubr.bf16.vlgmr.msra.gmra.mrb[20].mxu1 %v7754_v1 }
 0x8f5   :  { %4509 = vmatpush1.bf16.msra.mxu0 %v4128_v56  ;;  %4673 = vmatpush1.bf16.msra.mxu1 %v4130_v57  ;;  %v4224_v56 = vld [vmem:[#allocation4 + $0xb00] sm:$0xff]  ;;  %v4226_v57 = vld [vmem:[#allocation4 + $0xb10] sm:$0xff] }
 0x8f6   :  { %4510 = vmatprep.subr.bf16.mxu0 %v4137_v11  ;;  %4674 = vmatprep.subr.bf16.mxu1 %v4139_v62  ;;  %v4233_v11 = vld [vmem:[#allocation4 + $0xb48] sm:$0xff]  ;;  %v4235_v62 = vld [vmem:[#allocation4 + $0xb58] sm:$0xff] }
 0x8f7   :  { %4540 = vmatprep.mubr.bf16.mxu0 %v7774_v27  ;;  %4704 = vmatprep.mubr.bf16.mxu1 %v7774_v27 }
 0x8f9   :  { %4511 = vmatpush1.bf16.msra.mxu0 %v4136_v12  ;;  %4675 = vmatpush1.bf16.msra.mxu1 %v4138_v0  ;;  %v4232_v12 = vld [vmem:[#allocation4 + $0xb40] sm:$0xff]  ;;  %v4234_v0 = vld [vmem:[#allocation4 + $0xb50] sm:$0xff] }
 0x8fa   :  { %4512 = vmatprep.subr.bf16.mxu0 %v4145_v58  ;;  %4676 = vmatprep.subr.bf16.mxu1 %v4147_v59  ;;  %v4241_v58 = vld [vmem:[#allocation4 + $0xb88] sm:$0xff]  ;;  %v4243_v59 = vld [vmem:[#allocation4 + $0xb98] sm:$0xff] }
 0x8fd   :  { %4513 = vmatpush1.bf16.msra.mxu0 %v4144_v63  ;;  %4677 = vmatpush1.bf16.msra.mxu1 %v4146_v61  ;;  %v4240_v63 = vld [vmem:[#allocation4 + $0xb80] sm:$0xff]  ;;  %v4242_v61 = vld [vmem:[#allocation4 + $0xb90] sm:$0xff] }
 0x8fe   :  { %4514 = vmatprep.subr.bf16.mxu0 %v4153_v18  ;;  %4678 = vmatprep.subr.bf16.mxu1 %v4155_v2  ;;  %v4249_v18 = vld [vmem:[#allocation4 + $0xbc8] sm:$0xff]  ;;  %v4251_v2 = vld [vmem:[#allocation4 + $0xbd8] sm:$0xff] }
 0x901   :  { %4515 = vmatpush1.bf16.msra.mxu0 %v4152_v3  ;;  %4679 = vmatpush1.bf16.msra.mxu1 %v4154_v60  ;;  %v4248_v3 = vld [vmem:[#allocation4 + $0xbc0] sm:$0xff]  ;;  %v4250_v60 = vld [vmem:[#allocation4 + $0xbd0] sm:$0xff] }
 0x902   :  { %4516 = vmatprep.subr.bf16.mxu0 %v4161_v4  ;;  %4680 = vmatprep.subr.bf16.mxu1 %v4163_v51  ;;  %v4257_v4 = vld [vmem:[#allocation4 + $0xc08] sm:$0xff]  ;;  %v4259_v51 = vld [vmem:[#allocation4 + $0xc18] sm:$0xff] }
 0x905   :  { %4517 = vmatpush1.bf16.msra.mxu0 %v4160_v5  ;;  %4681 = vmatpush1.bf16.msra.mxu1 %v4162_v9  ;;  %v4256_v5 = vld [vmem:[#allocation4 + $0xc00] sm:$0xff]  ;;  %v4258_v9 = vld [vmem:[#allocation4 + $0xc10] sm:$0xff] }
 0x906   :  { %4518 = vmatprep.subr.bf16.mxu0 %v4169_v10  ;;  %4682 = vmatprep.subr.bf16.mxu1 %v4171_v15  ;;  %v4265_v10 = vld [vmem:[#allocation4 + $0xc48] sm:$0xff]  ;;  %v4267_v15 = vld [vmem:[#allocation4 + $0xc58] sm:$0xff] }
 0x909   :  { %4519 = vmatpush1.bf16.msra.mxu0 %v4168_v16  ;;  %4683 = vmatpush1.bf16.msra.mxu1 %v4170_v30  ;;  %v4264_v16 = vld [vmem:[#allocation4 + $0xc40] sm:$0xff]  ;;  %v4266_v30 = vld [vmem:[#allocation4 + $0xc50] sm:$0xff] }
 0x90a   :  { %4520 = vmatprep.subr.bf16.mxu0 %v4177_v21  ;;  %4684 = vmatprep.subr.bf16.mxu1 %v4179_v20  ;;  %v4273_v21 = vld [vmem:[#allocation4 + $0xc88] sm:$0xff]  ;;  %v4275_v20 = vld [vmem:[#allocation4 + $0xc98] sm:$0xff] }
 0x90d   :  { %4521 = vmatpush1.bf16.msra.mxu0 %v4176_v6  ;;  %4685 = vmatpush1.bf16.msra.mxu1 %v4178_v23  ;;  %v4272_v6 = vld [vmem:[#allocation4 + $0xc80] sm:$0xff]  ;;  %v4274_v23 = vld [vmem:[#allocation4 + $0xc90] sm:$0xff] }
 0x90e   :  { %4522 = vmatprep.subr.bf16.mxu0 %v4185_v8  ;;  %4686 = vmatprep.subr.bf16.mxu1 %v4187_v32  ;;  %v4281_v8 = vld [vmem:[#allocation4 + $0xcc8] sm:$0xff]  ;;  %v4283_v32 = vld [vmem:[#allocation4 + $0xcd8] sm:$0xff] }
 0x911   :  { %4523 = vmatpush1.bf16.msra.mxu0 %v4184_v26  ;;  %4687 = vmatpush1.bf16.msra.mxu1 %v4186_v13  ;;  %v4280_v26 = vld [vmem:[#allocation4 + $0xcc0] sm:$0xff]  ;;  %v4282_v13 = vld [vmem:[#allocation4 + $0xcd0] sm:$0xff] }
 0x912   :  { %4524 = vmatprep.subr.bf16.mxu0 %v4193_v34  ;;  %4688 = vmatprep.subr.bf16.mxu1 %v4195_v35  ;;  %v4289_v34 = vld [vmem:[#allocation4 + $0xd08] sm:$0xff]  ;;  %v4291_v35 = vld [vmem:[#allocation4 + $0xd18] sm:$0xff] }
 0x915   :  { %4525 = vmatpush1.bf16.msra.mxu0 %v4192_v37  ;;  %4689 = vmatpush1.bf16.msra.mxu1 %v4194_v38  ;;  %v4288_v37 = vld [vmem:[#allocation4 + $0xd00] sm:$0xff]  ;;  %v4290_v38 = vld [vmem:[#allocation4 + $0xd10] sm:$0xff] }
 0x916   :  { %4526 = vmatprep.subr.bf16.mxu0 %v4201_v41  ;;  %4690 = vmatprep.subr.bf16.mxu1 %v4203_v29  ;;  %v4297_v41 = vld [vmem:[#allocation4 + $0xd48] sm:$0xff]  ;;  %v4299_v29 = vld [vmem:[#allocation4 + $0xd58] sm:$0xff] }
 0x919   :  { %4527 = vmatpush1.bf16.msra.mxu0 %v4200_v42  ;;  %4691 = vmatpush1.bf16.msra.mxu1 %v4202_v43  ;;  %v4296_v42 = vld [vmem:[#allocation4 + $0xd40] sm:$0xff]  ;;  %v4298_v43 = vld [vmem:[#allocation4 + $0xd50] sm:$0xff] }
 0x91a   :  { %4528 = vmatprep.subr.bf16.mxu0 %v4209_v44  ;;  %4692 = vmatprep.subr.bf16.mxu1 %v4211_v45  ;;  %v4305_v44 = vld [vmem:[#allocation4 + $0xd88] sm:$0xff]  ;;  %v4307_v45 = vld [vmem:[#allocation4 + $0xd98] sm:$0xff] }
 0x91d   :  { %4529 = vmatpush1.bf16.msra.mxu0 %v4208_v46  ;;  %4693 = vmatpush1.bf16.msra.mxu1 %v4210_v17  ;;  %v4304_v46 = vld [vmem:[#allocation4 + $0xd80] sm:$0xff]  ;;  %v4306_v17 = vld [vmem:[#allocation4 + $0xd90] sm:$0xff] }
 0x91e   :  { %4530 = vmatprep.subr.bf16.mxu0 %v4217_v47  ;;  %4694 = vmatprep.subr.bf16.mxu1 %v4219_v48  ;;  %v4313_v47 = vld [vmem:[#allocation4 + $0xdc8] sm:$0xff]  ;;  %v4315_v48 = vld [vmem:[#allocation4 + $0xdd8] sm:$0xff] }
 0x921   :  { %4531 = vmatpush1.bf16.msra.mxu0 %v4216_v49  ;;  %4695 = vmatpush1.bf16.msra.mxu1 %v4218_v50  ;;  %v4312_v49 = vld [vmem:[#allocation4 + $0xdc0] sm:$0xff]  ;;  %v4314_v50 = vld [vmem:[#allocation4 + $0xdd0] sm:$0xff] }
 0x922   :  { %4532 = vmatprep.subr.bf16.mxu0 %v4225_v54  ;;  %4696 = vmatprep.subr.bf16.mxu1 %v4227_v55  ;;  %v4321_v54 = vld [vmem:[#allocation4 + $0xe08] sm:$0xff]  ;;  %v4323_v55 = vld [vmem:[#allocation4 + $0xe18] sm:$0xff] }
 0x925   :  { %4533 = vmatpush1.bf16.msra.mxu0 %v4224_v56  ;;  %4697 = vmatpush1.bf16.msra.mxu1 %v4226_v57  ;;  %v4320_v56 = vld [vmem:[#allocation4 + $0xe00] sm:$0xff]  ;;  %v4322_v57 = vld [vmem:[#allocation4 + $0xe10] sm:$0xff] }
 0x926   :  { %4534 = vmatprep.subr.bf16.mxu0 %v4233_v11  ;;  %4698 = vmatprep.subr.bf16.mxu1 %v4235_v62  ;;  %v4329_v11 = vld [vmem:[#allocation4 + $0xe48] sm:$0xff]  ;;  %v4331_v62 = vld [vmem:[#allocation4 + $0xe58] sm:$0xff] }
 0x929   :  { %4535 = vmatpush1.bf16.msra.mxu0 %v4232_v12  ;;  %4699 = vmatpush1.bf16.msra.mxu1 %v4234_v0  ;;  %v4328_v12 = vld [vmem:[#allocation4 + $0xe40] sm:$0xff]  ;;  %v4330_v0 = vld [vmem:[#allocation4 + $0xe50] sm:$0xff] }
 0x92a   :  { %4536 = vmatprep.subr.bf16.mxu0 %v4241_v58  ;;  %4700 = vmatprep.subr.bf16.mxu1 %v4243_v59  ;;  %v4337_v58 = vld [vmem:[#allocation4 + $0xe88] sm:$0xff]  ;;  %v4339_v59 = vld [vmem:[#allocation4 + $0xe98] sm:$0xff] }
 0x92d   :  { %4537 = vmatpush1.bf16.msra.mxu0 %v4240_v63  ;;  %4701 = vmatpush1.bf16.msra.mxu1 %v4242_v61  ;;  %v4336_v63 = vld [vmem:[#allocation4 + $0xe80] sm:$0xff]  ;;  %v4338_v61 = vld [vmem:[#allocation4 + $0xe90] sm:$0xff] }
 0x92e   :  { %4538 = vmatprep.subr.bf16.mxu0 %v4249_v18  ;;  %4702 = vmatprep.subr.bf16.mxu1 %v4251_v2  ;;  %v4345_v18 = vld [vmem:[#allocation4 + $0xec8] sm:$0xff]  ;;  %v4347_v2 = vld [vmem:[#allocation4 + $0xed8] sm:$0xff] }
 0x931   :  { %4539 = vmatpush1.bf16.msra.mxu0 %v4248_v3  ;;  %4703 = vmatpush1.bf16.msra.mxu1 %v4250_v60  ;;  %v4344_v3 = vld [vmem:[#allocation4 + $0xec0] sm:$0xff]  ;;  %v4346_v60 = vld [vmem:[#allocation4 + $0xed0] sm:$0xff] }
 0x932   :  { %4549 = vmatprep.subr.bf16.mxu0 %v4257_v4  ;;  %4713 = vmatprep.subr.bf16.mxu1 %v4259_v51  ;;  %v4353_v4 = vld [vmem:[#allocation4 + $0xf08] sm:$0xff]  ;;  %v4355_v51 = vld [vmem:[#allocation4 + $0xf18] sm:$0xff] }
 0x934   :  { %4541 = vmatmul.mubr.bf16.vlgmr.msra.gmra.mrb[16].mxu0 %v7770_v28  ;;  %4705 = vmatmul.mubr.bf16.vlgmr.msra.gmra.mrb[20].mxu1 %v7770_v28 }
 0x935   :  { %4550 = vmatpush1.bf16.msra.mxu0 %v4256_v5  ;;  %4714 = vmatpush1.bf16.msra.mxu1 %v4258_v9  ;;  %v4352_v5 = vld [vmem:[#allocation4 + $0xf00] sm:$0xff]  ;;  %v4354_v9 = vld [vmem:[#allocation4 + $0xf10] sm:$0xff] }
 0x936   :  { %4551 = vmatprep.subr.bf16.mxu0 %v4265_v10  ;;  %4715 = vmatprep.subr.bf16.mxu1 %v4267_v15  ;;  %v4361_v10 = vld [vmem:[#allocation4 + $0xf48] sm:$0xff]  ;;  %v4363_v15 = vld [vmem:[#allocation4 + $0xf58] sm:$0xff] }
 0x937   :  { %4581 = vmatprep.mubr.bf16.mxu0 %v7776_v31  ;;  %4745 = vmatprep.mubr.bf16.mxu1 %v7776_v31 }
 0x939   :  { %4552 = vmatpush1.bf16.msra.mxu0 %v4264_v16  ;;  %4716 = vmatpush1.bf16.msra.mxu1 %v4266_v30  ;;  %v4360_v16 = vld [vmem:[#allocation4 + $0xf40] sm:$0xff]  ;;  %v4362_v30 = vld [vmem:[#allocation4 + $0xf50] sm:$0xff] }
 0x93a   :  { %4553 = vmatprep.subr.bf16.mxu0 %v4273_v21  ;;  %4717 = vmatprep.subr.bf16.mxu1 %v4275_v20  ;;  %v4369_v21 = vld [vmem:[#allocation4 + $0xf88] sm:$0xff]  ;;  %v4371_v20 = vld [vmem:[#allocation4 + $0xf98] sm:$0xff] }
 0x93d   :  { %4554 = vmatpush1.bf16.msra.mxu0 %v4272_v6  ;;  %4718 = vmatpush1.bf16.msra.mxu1 %v4274_v23  ;;  %v4368_v6 = vld [vmem:[#allocation4 + $0xf80] sm:$0xff]  ;;  %v4370_v23 = vld [vmem:[#allocation4 + $0xf90] sm:$0xff] }
 0x93e   :  { %4555 = vmatprep.subr.bf16.mxu0 %v4281_v8  ;;  %4719 = vmatprep.subr.bf16.mxu1 %v4283_v32  ;;  %v4377_v8 = vld [vmem:[#allocation4 + $0xfc8] sm:$0xff]  ;;  %v4379_v32 = vld [vmem:[#allocation4 + $0xfd8] sm:$0xff] }
 0x941   :  { %4556 = vmatpush1.bf16.msra.mxu0 %v4280_v26  ;;  %4720 = vmatpush1.bf16.msra.mxu1 %v4282_v13  ;;  %v4376_v26 = vld [vmem:[#allocation4 + $0xfc0] sm:$0xff]  ;;  %v4378_v13 = vld [vmem:[#allocation4 + $0xfd0] sm:$0xff] }
 0x942   :  { %4557 = vmatprep.subr.bf16.mxu0 %v4289_v34  ;;  %4721 = vmatprep.subr.bf16.mxu1 %v4291_v35  ;;  %v3877_v34 = vld [vmem:[#allocation4 + $0x28] sm:$0xff]  ;;  %v3879_v35 = vld [vmem:[#allocation4 + $0x38] sm:$0xff] }
 0x945   :  { %4558 = vmatpush1.bf16.msra.mxu0 %v4288_v37  ;;  %4722 = vmatpush1.bf16.msra.mxu1 %v4290_v38  ;;  %v3876_v37 = vld [vmem:[#allocation4 + $0x20] sm:$0xff]  ;;  %v3878_v38 = vld [vmem:[#allocation4 + $0x30] sm:$0xff] }
 0x946   :  { %4559 = vmatprep.subr.bf16.mxu0 %v4297_v41  ;;  %4723 = vmatprep.subr.bf16.mxu1 %v4299_v29  ;;  %v3885_v41 = vld [vmem:[#allocation4 + $0x68] sm:$0xff]  ;;  %v3887_v29 = vld [vmem:[#allocation4 + $0x78] sm:$0xff] }
 0x949   :  { %4560 = vmatpush1.bf16.msra.mxu0 %v4296_v42  ;;  %4724 = vmatpush1.bf16.msra.mxu1 %v4298_v43  ;;  %v3884_v42 = vld [vmem:[#allocation4 + $0x60] sm:$0xff]  ;;  %v3886_v43 = vld [vmem:[#allocation4 + $0x70] sm:$0xff] }
 0x94a   :  { %4561 = vmatprep.subr.bf16.mxu0 %v4305_v44  ;;  %4725 = vmatprep.subr.bf16.mxu1 %v4307_v45  ;;  %v3893_v44 = vld [vmem:[#allocation4 + $0xa8] sm:$0xff]  ;;  %v3895_v45 = vld [vmem:[#allocation4 + $0xb8] sm:$0xff] }
 0x94d   :  { %4562 = vmatpush1.bf16.msra.mxu0 %v4304_v46  ;;  %4726 = vmatpush1.bf16.msra.mxu1 %v4306_v17  ;;  %v3892_v46 = vld [vmem:[#allocation4 + $0xa0] sm:$0xff]  ;;  %v3894_v17 = vld [vmem:[#allocation4 + $0xb0] sm:$0xff] }
 0x94e   :  { %4563 = vmatprep.subr.bf16.mxu0 %v4313_v47  ;;  %4727 = vmatprep.subr.bf16.mxu1 %v4315_v48  ;;  %v3901_v47 = vld [vmem:[#allocation4 + $0xe8] sm:$0xff]  ;;  %v3903_v48 = vld [vmem:[#allocation4 + $0xf8] sm:$0xff] }
 0x951   :  { %4564 = vmatpush1.bf16.msra.mxu0 %v4312_v49  ;;  %4728 = vmatpush1.bf16.msra.mxu1 %v4314_v50  ;;  %v3900_v49 = vld [vmem:[#allocation4 + $0xe0] sm:$0xff]  ;;  %v3902_v50 = vld [vmem:[#allocation4 + $0xf0] sm:$0xff] }
 0x952   :  { %4565 = vmatprep.subr.bf16.mxu0 %v4321_v54  ;;  %4729 = vmatprep.subr.bf16.mxu1 %v4323_v55  ;;  %v3909_v54 = vld [vmem:[#allocation4 + $0x128] sm:$0xff]  ;;  %v3911_v55 = vld [vmem:[#allocation4 + $0x138] sm:$0xff] }
 0x955   :  { %4566 = vmatpush1.bf16.msra.mxu0 %v4320_v56  ;;  %4730 = vmatpush1.bf16.msra.mxu1 %v4322_v57  ;;  %v3910_v56 = vld [vmem:[#allocation4 + $0x130] sm:$0xff]  ;;  %v3917_v57 = vld [vmem:[#allocation4 + $0x168] sm:$0xff] }
 0x956   :  { %4567 = vmatprep.subr.bf16.mxu0 %v4329_v11  ;;  %4731 = vmatprep.subr.bf16.mxu1 %v4331_v62  ;;  %v3919_v11 = vld [vmem:[#allocation4 + $0x178] sm:$0xff]  ;;  %v3916_v62 = vld [vmem:[#allocation4 + $0x160] sm:$0xff] }
 0x959   :  { %4568 = vmatpush1.bf16.msra.mxu0 %v4328_v12  ;;  %4732 = vmatpush1.bf16.msra.mxu1 %v4330_v0  ;;  %v3918_v12 = vld [vmem:[#allocation4 + $0x170] sm:$0xff]  ;;  %v3925_v0 = vld [vmem:[#allocation4 + $0x1a8] sm:$0xff] }
 0x95a   :  { %4569 = vmatprep.subr.bf16.mxu0 %v4337_v58  ;;  %4733 = vmatprep.subr.bf16.mxu1 %v4339_v59  ;;  %v3927_v58 = vld [vmem:[#allocation4 + $0x1b8] sm:$0xff]  ;;  %v3924_v59 = vld [vmem:[#allocation4 + $0x1a0] sm:$0xff] }
 0x95d   :  { %4570 = vmatpush1.bf16.msra.mxu0 %v4336_v63  ;;  %4734 = vmatpush1.bf16.msra.mxu1 %v4338_v61  ;;  %v3926_v63 = vld [vmem:[#allocation4 + $0x1b0] sm:$0xff]  ;;  %v3933_v61 = vld [vmem:[#allocation4 + $0x1e8] sm:$0xff] }
 0x95e   :  { %4571 = vmatprep.subr.bf16.mxu0 %v4345_v18  ;;  %4735 = vmatprep.subr.bf16.mxu1 %v4347_v2  ;;  %v3935_v18 = vld [vmem:[#allocation4 + $0x1f8] sm:$0xff]  ;;  %v3932_v2 = vld [vmem:[#allocation4 + $0x1e0] sm:$0xff] }
 0x961   :  { %4572 = vmatpush1.bf16.msra.mxu0 %v4344_v3  ;;  %4736 = vmatpush1.bf16.msra.mxu1 %v4346_v60  ;;  %v3934_v3 = vld [vmem:[#allocation4 + $0x1f0] sm:$0xff]  ;;  %v3941_v60 = vld [vmem:[#allocation4 + $0x228] sm:$0xff] }
 0x962   :  { %4573 = vmatprep.subr.bf16.mxu0 %v4353_v4  ;;  %4737 = vmatprep.subr.bf16.mxu1 %v4355_v51  ;;  %v3943_v4 = vld [vmem:[#allocation4 + $0x238] sm:$0xff]  ;;  %v3940_v51 = vld [vmem:[#allocation4 + $0x220] sm:$0xff] }
 0x965   :  { %4574 = vmatpush1.bf16.msra.mxu0 %v4352_v5  ;;  %4738 = vmatpush1.bf16.msra.mxu1 %v4354_v9  ;;  %v3942_v5 = vld [vmem:[#allocation4 + $0x230] sm:$0xff]  ;;  %v3949_v9 = vld [vmem:[#allocation4 + $0x268] sm:$0xff] }
 0x966   :  { %4575 = vmatprep.subr.bf16.mxu0 %v4361_v10  ;;  %4739 = vmatprep.subr.bf16.mxu1 %v4363_v15  ;;  %v3951_v10 = vld [vmem:[#allocation4 + $0x278] sm:$0xff]  ;;  %v3948_v15 = vld [vmem:[#allocation4 + $0x260] sm:$0xff] }
 0x969   :  { %4576 = vmatpush1.bf16.msra.mxu0 %v4360_v16  ;;  %4740 = vmatpush1.bf16.msra.mxu1 %v4362_v30  ;;  %v3950_v16 = vld [vmem:[#allocation4 + $0x270] sm:$0xff]  ;;  %v3957_v30 = vld [vmem:[#allocation4 + $0x2a8] sm:$0xff] }
 0x96a   :  { %4577 = vmatprep.subr.bf16.mxu0 %v4369_v21  ;;  %4741 = vmatprep.subr.bf16.mxu1 %v4371_v20  ;;  %v3959_v21 = vld [vmem:[#allocation4 + $0x2b8] sm:$0xff]  ;;  %v3956_v20 = vld [vmem:[#allocation4 + $0x2a0] sm:$0xff] }
 0x96d   :  { %4578 = vmatpush1.bf16.msra.mxu0 %v4368_v6  ;;  %4742 = vmatpush1.bf16.msra.mxu1 %v4370_v23  ;;  %v3958_v6 = vld [vmem:[#allocation4 + $0x2b0] sm:$0xff]  ;;  %v3965_v23 = vld [vmem:[#allocation4 + $0x2e8] sm:$0xff] }
 0x96e   :  { %4579 = vmatprep.subr.bf16.mxu0 %v4377_v8  ;;  %4743 = vmatprep.subr.bf16.mxu1 %v4379_v32  ;;  %v3967_v8 = vld [vmem:[#allocation4 + $0x2f8] sm:$0xff]  ;;  %v3964_v32 = vld [vmem:[#allocation4 + $0x2e0] sm:$0xff] }
 0x971   :  { %4580 = vmatpush1.bf16.msra.mxu0 %v4376_v26  ;;  %4744 = vmatpush1.bf16.msra.mxu1 %v4378_v13  ;;  %v3966_v26 = vld [vmem:[#allocation4 + $0x2f0] sm:$0xff]  ;;  %v3973_v13 = vld [vmem:[#allocation4 + $0x328] sm:$0xff] }
 0x972   :  { %4754 = vmatprep.subr.bf16.mxu0 %v3877_v34  ;;  %4918 = vmatprep.subr.bf16.mxu1 %v3879_v35  ;;  %v3975_v34 = vld [vmem:[#allocation4 + $0x338] sm:$0xff]  ;;  %v3972_v35 = vld [vmem:[#allocation4 + $0x320] sm:$0xff] }
 0x974   :  { %4582 = vmatmul.mubr.bf16.vlgmr.msra.gmra.mrb[16].mxu0 %v7772_v14  ;;  %4746 = vmatmul.mubr.bf16.vlgmr.msra.gmra.mrb[20].mxu1 %v7772_v14 }
 0x975   :  { %4755 = vmatpush1.bf16.msra.mxu0 %v3876_v37  ;;  %4919 = vmatpush1.bf16.msra.mxu1 %v3878_v38  ;;  %v3974_v37 = vld [vmem:[#allocation4 + $0x330] sm:$0xff]  ;;  %v3981_v38 = vld [vmem:[#allocation4 + $0x368] sm:$0xff] }
 0x976   :  { %4756 = vmatprep.subr.bf16.mxu0 %v3885_v41  ;;  %4920 = vmatprep.subr.bf16.mxu1 %v3887_v29  ;;  %v3983_v41 = vld [vmem:[#allocation4 + $0x378] sm:$0xff]  ;;  %v3980_v29 = vld [vmem:[#allocation4 + $0x360] sm:$0xff] }
 0x977   :  { %4786 = vmatprep.mubr.bf16.mxu0 %v7756_v7  ;;  %4950 = vmatprep.mubr.bf16.mxu1 %v7756_v7  ;;  %v3908_v7 = vld [vmem:[#allocation4 + $0x120] sm:$0xff] }
 0x979   :  { %4757 = vmatpush1.bf16.msra.mxu0 %v3884_v42  ;;  %4921 = vmatpush1.bf16.msra.mxu1 %v3886_v43  ;;  %v3982_v42 = vld [vmem:[#allocation4 + $0x370] sm:$0xff]  ;;  %v3989_v43 = vld [vmem:[#allocation4 + $0x3a8] sm:$0xff] }
 0x97a   :  { %4758 = vmatprep.subr.bf16.mxu0 %v3893_v44  ;;  %4922 = vmatprep.subr.bf16.mxu1 %v3895_v45  ;;  %v3991_v44 = vld [vmem:[#allocation4 + $0x3b8] sm:$0xff]  ;;  %v3988_v45 = vld [vmem:[#allocation4 + $0x3a0] sm:$0xff] }
 0x97d   :  { %4759 = vmatpush1.bf16.msra.mxu0 %v3892_v46  ;;  %4923 = vmatpush1.bf16.msra.mxu1 %v3894_v17  ;;  %v3990_v46 = vld [vmem:[#allocation4 + $0x3b0] sm:$0xff]  ;;  %v3997_v17 = vld [vmem:[#allocation4 + $0x3e8] sm:$0xff] }
 0x97e   :  { %4760 = vmatprep.subr.bf16.mxu0 %v3901_v47  ;;  %4924 = vmatprep.subr.bf16.mxu1 %v3903_v48  ;;  %v3999_v47 = vld [vmem:[#allocation4 + $0x3f8] sm:$0xff]  ;;  %v3996_v48 = vld [vmem:[#allocation4 + $0x3e0] sm:$0xff] }
 0x981   :  { %4761 = vmatpush1.bf16.msra.mxu0 %v3900_v49  ;;  %4925 = vmatpush1.bf16.msra.mxu1 %v3902_v50  ;;  %v3998_v49 = vld [vmem:[#allocation4 + $0x3f0] sm:$0xff]  ;;  %v4005_v50 = vld [vmem:[#allocation4 + $0x428] sm:$0xff] }
 0x982   :  { %4762 = vmatprep.subr.bf16.mxu0 %v3909_v54  ;;  %4926 = vmatprep.subr.bf16.mxu1 %v3911_v55  ;;  %v4007_v54 = vld [vmem:[#allocation4 + $0x438] sm:$0xff]  ;;  %v4004_v55 = vld [vmem:[#allocation4 + $0x420] sm:$0xff] }
 0x985   :  { %4763 = vmatpush1.bf16.msra.mxu0 %v3908_v7  ;;  %4927 = vmatpush1.bf16.msra.mxu1 %v3910_v56  ;;  %v4006_v7 = vld [vmem:[#allocation4 + $0x430] sm:$0xff]  ;;  %v4013_v56 = vld [vmem:[#allocation4 + $0x468] sm:$0xff] }
 0x986   :  { %4764 = vmatprep.subr.bf16.mxu0 %v3917_v57  ;;  %4928 = vmatprep.subr.bf16.mxu1 %v3919_v11  ;;  %v4015_v57 = vld [vmem:[#allocation4 + $0x478] sm:$0xff]  ;;  %v4012_v11 = vld [vmem:[#allocation4 + $0x460] sm:$0xff] }
 0x989   :  { %4765 = vmatpush1.bf16.msra.mxu0 %v3916_v62  ;;  %4929 = vmatpush1.bf16.msra.mxu1 %v3918_v12  ;;  %v4014_v62 = vld [vmem:[#allocation4 + $0x470] sm:$0xff]  ;;  %v4021_v12 = vld [vmem:[#allocation4 + $0x4a8] sm:$0xff] }
 0x98a   :  { %4766 = vmatprep.subr.bf16.mxu0 %v3925_v0  ;;  %4930 = vmatprep.subr.bf16.mxu1 %v3927_v58  ;;  %v4023_v0 = vld [vmem:[#allocation4 + $0x4b8] sm:$0xff]  ;;  %v4020_v58 = vld [vmem:[#allocation4 + $0x4a0] sm:$0xff] }
 0x98d   :  { %4767 = vmatpush1.bf16.msra.mxu0 %v3924_v59  ;;  %4931 = vmatpush1.bf16.msra.mxu1 %v3926_v63  ;;  %v4022_v59 = vld [vmem:[#allocation4 + $0x4b0] sm:$0xff]  ;;  %v4029_v63 = vld [vmem:[#allocation4 + $0x4e8] sm:$0xff] }
 0x98e   :  { %4768 = vmatprep.subr.bf16.mxu0 %v3933_v61  ;;  %4932 = vmatprep.subr.bf16.mxu1 %v3935_v18  ;;  %v4028_v61 = vld [vmem:[#allocation4 + $0x4e0] sm:$0xff]  ;;  %v4030_v18 = vld [vmem:[#allocation4 + $0x4f0] sm:$0xff] }
 0x991   :  { %4769 = vmatpush1.bf16.msra.mxu0 %v3932_v2  ;;  %4933 = vmatpush1.bf16.msra.mxu1 %v3934_v3  ;;  %v4037_v2 = vld [vmem:[#allocation4 + $0x528] sm:$0xff]  ;;  %v4039_v3 = vld [vmem:[#allocation4 + $0x538] sm:$0xff] }
 0x992   :  { %4770 = vmatprep.subr.bf16.mxu0 %v3941_v60  ;;  %4934 = vmatprep.subr.bf16.mxu1 %v3943_v4  ;;  %v4038_v60 = vld [vmem:[#allocation4 + $0x530] sm:$0xff]  ;;  %v4045_v4 = vld [vmem:[#allocation4 + $0x568] sm:$0xff] }
 0x995   :  { %4771 = vmatpush1.bf16.msra.mxu0 %v3940_v51  ;;  %4935 = vmatpush1.bf16.msra.mxu1 %v3942_v5  ;;  %v4047_v51 = vld [vmem:[#allocation4 + $0x578] sm:$0xff]  ;;  %v4044_v5 = vld [vmem:[#allocation4 + $0x560] sm:$0xff] }
 0x996   :  { %4772 = vmatprep.subr.bf16.mxu0 %v3949_v9  ;;  %4936 = vmatprep.subr.bf16.mxu1 %v3951_v10  ;;  %v4046_v9 = vld [vmem:[#allocation4 + $0x570] sm:$0xff]  ;;  %v4053_v10 = vld [vmem:[#allocation4 + $0x5a8] sm:$0xff] }
 0x999   :  { %4773 = vmatpush1.bf16.msra.mxu0 %v3948_v15  ;;  %4937 = vmatpush1.bf16.msra.mxu1 %v3950_v16  ;;  %v4055_v15 = vld [vmem:[#allocation4 + $0x5b8] sm:$0xff]  ;;  %v4052_v16 = vld [vmem:[#allocation4 + $0x5a0] sm:$0xff] }
 0x99a   :  { %4774 = vmatprep.subr.bf16.mxu0 %v3957_v30  ;;  %4938 = vmatprep.subr.bf16.mxu1 %v3959_v21  ;;  %v4054_v30 = vld [vmem:[#allocation4 + $0x5b0] sm:$0xff]  ;;  %v4061_v21 = vld [vmem:[#allocation4 + $0x5e8] sm:$0xff] }
 0x99d   :  { %4775 = vmatpush1.bf16.msra.mxu0 %v3956_v20  ;;  %4939 = vmatpush1.bf16.msra.mxu1 %v3958_v6  ;;  %v4063_v20 = vld [vmem:[#allocation4 + $0x5f8] sm:$0xff]  ;;  %v4060_v6 = vld [vmem:[#allocation4 + $0x5e0] sm:$0xff] }
 0x99e   :  { %4776 = vmatprep.subr.bf16.mxu0 %v3965_v23  ;;  %4940 = vmatprep.subr.bf16.mxu1 %v3967_v8  ;;  %v4062_v23 = vld [vmem:[#allocation4 + $0x5f0] sm:$0xff]  ;;  %v4069_v8 = vld [vmem:[#allocation4 + $0x628] sm:$0xff] }
 0x9a1   :  { %4777 = vmatpush1.bf16.msra.mxu0 %v3964_v32  ;;  %4941 = vmatpush1.bf16.msra.mxu1 %v3966_v26  ;;  %v4071_v32 = vld [vmem:[#allocation4 + $0x638] sm:$0xff]  ;;  %v4068_v26 = vld [vmem:[#allocation4 + $0x620] sm:$0xff] }
 0x9a2   :  { %4778 = vmatprep.subr.bf16.mxu0 %v3973_v13  ;;  %4942 = vmatprep.subr.bf16.mxu1 %v3975_v34  ;;  %v4070_v13 = vld [vmem:[#allocation4 + $0x630] sm:$0xff]  ;;  %v4077_v34 = vld [vmem:[#allocation4 + $0x668] sm:$0xff] }
 0x9a5   :  { %4779 = vmatpush1.bf16.msra.mxu0 %v3972_v35  ;;  %4943 = vmatpush1.bf16.msra.mxu1 %v3974_v37  ;;  %v4079_v35 = vld [vmem:[#allocation4 + $0x678] sm:$0xff]  ;;  %v4076_v37 = vld [vmem:[#allocation4 + $0x660] sm:$0xff] }
 0x9a6   :  { %4780 = vmatprep.subr.bf16.mxu0 %v3981_v38  ;;  %4944 = vmatprep.subr.bf16.mxu1 %v3983_v41  ;;  %v4078_v38 = vld [vmem:[#allocation4 + $0x670] sm:$0xff]  ;;  %v4085_v41 = vld [vmem:[#allocation4 + $0x6a8] sm:$0xff] }
 0x9a9   :  { %4781 = vmatpush1.bf16.msra.mxu0 %v3980_v29  ;;  %4945 = vmatpush1.bf16.msra.mxu1 %v3982_v42  ;;  %v4087_v29 = vld [vmem:[#allocation4 + $0x6b8] sm:$0xff]  ;;  %v4084_v42 = vld [vmem:[#allocation4 + $0x6a0] sm:$0xff] }
 0x9aa   :  { %4782 = vmatprep.subr.bf16.mxu0 %v3989_v43  ;;  %4946 = vmatprep.subr.bf16.mxu1 %v3991_v44  ;;  %v4086_v43 = vld [vmem:[#allocation4 + $0x6b0] sm:$0xff]  ;;  %v4093_v44 = vld [vmem:[#allocation4 + $0x6e8] sm:$0xff] }
 0x9ad   :  { %4783 = vmatpush1.bf16.msra.mxu0 %v3988_v45  ;;  %4947 = vmatpush1.bf16.msra.mxu1 %v3990_v46  ;;  %v4095_v45 = vld [vmem:[#allocation4 + $0x6f8] sm:$0xff]  ;;  %v4092_v46 = vld [vmem:[#allocation4 + $0x6e0] sm:$0xff] }
 0x9ae   :  { %4784 = vmatprep.subr.bf16.mxu0 %v3997_v17  ;;  %4948 = vmatprep.subr.bf16.mxu1 %v3999_v47  ;;  %v4094_v17 = vld [vmem:[#allocation4 + $0x6f0] sm:$0xff]  ;;  %v4101_v47 = vld [vmem:[#allocation4 + $0x728] sm:$0xff] }
 0x9b1   :  { %4785 = vmatpush1.bf16.msra.mxu0 %v3996_v48  ;;  %4949 = vmatpush1.bf16.msra.mxu1 %v3998_v49  ;;  %v4103_v48 = vld [vmem:[#allocation4 + $0x738] sm:$0xff]  ;;  %v4100_v49 = vld [vmem:[#allocation4 + $0x720] sm:$0xff] }
 0x9b2   :  { %4795 = vmatprep.subr.bf16.mxu0 %v4005_v50  ;;  %4959 = vmatprep.subr.bf16.mxu1 %v4007_v54  ;;  %v4102_v50 = vld [vmem:[#allocation4 + $0x730] sm:$0xff]  ;;  %v4109_v54 = vld [vmem:[#allocation4 + $0x768] sm:$0xff] }
 0x9b4   :  { %4787 = vmatmul.mubr.bf16.vlgmr.msra.gmra.mrb[20].mxu0 %v7752_v22  ;;  %4951 = vmatmul.mubr.bf16.vlgmr.msra.gmra.mrb[24].mxu1 %v7752_v22  ;;  %v4031_v22 = vld [vmem:[#allocation4 + $0x4f8] sm:$0xff] }
 0x9b5   :  { %4796 = vmatpush1.bf16.msra.mxu0 %v4004_v55  ;;  %4960 = vmatpush1.bf16.msra.mxu1 %v4006_v7  ;;  %v4111_v55 = vld [vmem:[#allocation4 + $0x778] sm:$0xff]  ;;  %v4108_v7 = vld [vmem:[#allocation4 + $0x760] sm:$0xff] }
 0x9b6   :  { %4797 = vmatprep.subr.bf16.mxu0 %v4013_v56  ;;  %4961 = vmatprep.subr.bf16.mxu1 %v4015_v57  ;;  %v4110_v56 = vld [vmem:[#allocation4 + $0x770] sm:$0xff]  ;;  %v4117_v57 = vld [vmem:[#allocation4 + $0x7a8] sm:$0xff] }
 0x9b7   :  { %4827 = vmatprep.mubr.bf16.mxu0 %v7758_v24  ;;  %4991 = vmatprep.mubr.bf16.mxu1 %v7758_v24  ;;  %v4036_v24 = vld [vmem:[#allocation4 + $0x520] sm:$0xff] }
 0x9b9   :  { %4798 = vmatpush1.bf16.msra.mxu0 %v4012_v11  ;;  %4962 = vmatpush1.bf16.msra.mxu1 %v4014_v62  ;;  %v4119_v11 = vld [vmem:[#allocation4 + $0x7b8] sm:$0xff]  ;;  %v4116_v62 = vld [vmem:[#allocation4 + $0x7a0] sm:$0xff] }
 0x9ba   :  { %4799 = vmatprep.subr.bf16.mxu0 %v4021_v12  ;;  %4963 = vmatprep.subr.bf16.mxu1 %v4023_v0  ;;  %v4118_v12 = vld [vmem:[#allocation4 + $0x7b0] sm:$0xff]  ;;  %v4125_v0 = vld [vmem:[#allocation4 + $0x7e8] sm:$0xff] }
 0x9bd   :  { %4800 = vmatpush1.bf16.msra.mxu0 %v4020_v58  ;;  %4964 = vmatpush1.bf16.msra.mxu1 %v4022_v59  ;;  %v4127_v58 = vld [vmem:[#allocation4 + $0x7f8] sm:$0xff]  ;;  %v4124_v59 = vld [vmem:[#allocation4 + $0x7e0] sm:$0xff] }
 0x9be   :  { %4801 = vmatprep.subr.bf16.mxu0 %v4029_v63  ;;  %4965 = vmatprep.subr.bf16.mxu1 %v4031_v22  ;;  %v4126_v63 = vld [vmem:[#allocation4 + $0x7f0] sm:$0xff]  ;;  %v4133_v22 = vld [vmem:[#allocation4 + $0x828] sm:$0xff] }
 0x9c1   :  { %4802 = vmatpush1.bf16.msra.mxu0 %v4028_v61  ;;  %4966 = vmatpush1.bf16.msra.mxu1 %v4030_v18  ;;  %v4135_v61 = vld [vmem:[#allocation4 + $0x838] sm:$0xff]  ;;  %v4132_v18 = vld [vmem:[#allocation4 + $0x820] sm:$0xff] }
 0x9c2   :  { %4803 = vmatprep.subr.bf16.mxu0 %v4037_v2  ;;  %4967 = vmatprep.subr.bf16.mxu1 %v4039_v3  ;;  %v4134_v2 = vld [vmem:[#allocation4 + $0x830] sm:$0xff]  ;;  %v4141_v3 = vld [vmem:[#allocation4 + $0x868] sm:$0xff] }
 0x9c5   :  { %4804 = vmatpush1.bf16.msra.mxu0 %v4036_v24  ;;  %4968 = vmatpush1.bf16.msra.mxu1 %v4038_v60  ;;  %v4143_v24 = vld [vmem:[#allocation4 + $0x878] sm:$0xff]  ;;  %v4140_v60 = vld [vmem:[#allocation4 + $0x860] sm:$0xff] }
 0x9c6   :  { %4805 = vmatprep.subr.bf16.mxu0 %v4045_v4  ;;  %4969 = vmatprep.subr.bf16.mxu1 %v4047_v51  ;;  %v4142_v4 = vld [vmem:[#allocation4 + $0x870] sm:$0xff]  ;;  %v4149_v51 = vld [vmem:[#allocation4 + $0x8a8] sm:$0xff] }
 0x9c9   :  { %4806 = vmatpush1.bf16.msra.mxu0 %v4044_v5  ;;  %4970 = vmatpush1.bf16.msra.mxu1 %v4046_v9  ;;  %v4151_v5 = vld [vmem:[#allocation4 + $0x8b8] sm:$0xff]  ;;  %v4148_v9 = vld [vmem:[#allocation4 + $0x8a0] sm:$0xff] }
 0x9ca   :  { %4807 = vmatprep.subr.bf16.mxu0 %v4053_v10  ;;  %4971 = vmatprep.subr.bf16.mxu1 %v4055_v15  ;;  %v4150_v10 = vld [vmem:[#allocation4 + $0x8b0] sm:$0xff]  ;;  %v4157_v15 = vld [vmem:[#allocation4 + $0x8e8] sm:$0xff] }
 0x9cd   :  { %4808 = vmatpush1.bf16.msra.mxu0 %v4052_v16  ;;  %4972 = vmatpush1.bf16.msra.mxu1 %v4054_v30  ;;  %v4156_v16 = vld [vmem:[#allocation4 + $0x8e0] sm:$0xff]  ;;  %v4158_v30 = vld [vmem:[#allocation4 + $0x8f0] sm:$0xff] }
 0x9ce   :  { %4809 = vmatprep.subr.bf16.mxu0 %v4061_v21  ;;  %4973 = vmatprep.subr.bf16.mxu1 %v4063_v20  ;;  %v4165_v21 = vld [vmem:[#allocation4 + $0x928] sm:$0xff]  ;;  %v4167_v20 = vld [vmem:[#allocation4 + $0x938] sm:$0xff] }
 0x9d1   :  { %4810 = vmatpush1.bf16.msra.mxu0 %v4060_v6  ;;  %4974 = vmatpush1.bf16.msra.mxu1 %v4062_v23  ;;  %v4166_v6 = vld [vmem:[#allocation4 + $0x930] sm:$0xff]  ;;  %v4173_v23 = vld [vmem:[#allocation4 + $0x968] sm:$0xff] }
 0x9d2   :  { %4811 = vmatprep.subr.bf16.mxu0 %v4069_v8  ;;  %4975 = vmatprep.subr.bf16.mxu1 %v4071_v32  ;;  %v4175_v8 = vld [vmem:[#allocation4 + $0x978] sm:$0xff]  ;;  %v4172_v32 = vld [vmem:[#allocation4 + $0x960] sm:$0xff] }
 0x9d5   :  { %4812 = vmatpush1.bf16.msra.mxu0 %v4068_v26  ;;  %4976 = vmatpush1.bf16.msra.mxu1 %v4070_v13  ;;  %v4174_v26 = vld [vmem:[#allocation4 + $0x970] sm:$0xff]  ;;  %v4181_v13 = vld [vmem:[#allocation4 + $0x9a8] sm:$0xff] }
 0x9d6   :  { %4813 = vmatprep.subr.bf16.mxu0 %v4077_v34  ;;  %4977 = vmatprep.subr.bf16.mxu1 %v4079_v35  ;;  %v4183_v34 = vld [vmem:[#allocation4 + $0x9b8] sm:$0xff]  ;;  %v4180_v35 = vld [vmem:[#allocation4 + $0x9a0] sm:$0xff] }
 0x9d9   :  { %4814 = vmatpush1.bf16.msra.mxu0 %v4076_v37  ;;  %4978 = vmatpush1.bf16.msra.mxu1 %v4078_v38  ;;  %v4182_v37 = vld [vmem:[#allocation4 + $0x9b0] sm:$0xff]  ;;  %v4189_v38 = vld [vmem:[#allocation4 + $0x9e8] sm:$0xff] }
 0x9da   :  { %4815 = vmatprep.subr.bf16.mxu0 %v4085_v41  ;;  %4979 = vmatprep.subr.bf16.mxu1 %v4087_v29  ;;  %v4191_v41 = vld [vmem:[#allocation4 + $0x9f8] sm:$0xff]  ;;  %v4188_v29 = vld [vmem:[#allocation4 + $0x9e0] sm:$0xff] }
 0x9dd   :  { %4816 = vmatpush1.bf16.msra.mxu0 %v4084_v42  ;;  %4980 = vmatpush1.bf16.msra.mxu1 %v4086_v43  ;;  %v4190_v42 = vld [vmem:[#allocation4 + $0x9f0] sm:$0xff]  ;;  %v4197_v43 = vld [vmem:[#allocation4 + $0xa28] sm:$0xff] }
 0x9de   :  { %4817 = vmatprep.subr.bf16.mxu0 %v4093_v44  ;;  %4981 = vmatprep.subr.bf16.mxu1 %v4095_v45  ;;  %v4199_v44 = vld [vmem:[#allocation4 + $0xa38] sm:$0xff]  ;;  %v4196_v45 = vld [vmem:[#allocation4 + $0xa20] sm:$0xff] }
 0x9e1   :  { %4818 = vmatpush1.bf16.msra.mxu0 %v4092_v46  ;;  %4982 = vmatpush1.bf16.msra.mxu1 %v4094_v17  ;;  %v4198_v46 = vld [vmem:[#allocation4 + $0xa30] sm:$0xff]  ;;  %v4205_v17 = vld [vmem:[#allocation4 + $0xa68] sm:$0xff] }
 0x9e2   :  { %4819 = vmatprep.subr.bf16.mxu0 %v4101_v47  ;;  %4983 = vmatprep.subr.bf16.mxu1 %v4103_v48  ;;  %v4207_v47 = vld [vmem:[#allocation4 + $0xa78] sm:$0xff]  ;;  %v4204_v48 = vld [vmem:[#allocation4 + $0xa60] sm:$0xff] }
 0x9e5   :  { %4820 = vmatpush1.bf16.msra.mxu0 %v4100_v49  ;;  %4984 = vmatpush1.bf16.msra.mxu1 %v4102_v50  ;;  %v4206_v49 = vld [vmem:[#allocation4 + $0xa70] sm:$0xff]  ;;  %v4213_v50 = vld [vmem:[#allocation4 + $0xaa8] sm:$0xff] }
 0x9e6   :  { %4821 = vmatprep.subr.bf16.mxu0 %v4109_v54  ;;  %4985 = vmatprep.subr.bf16.mxu1 %v4111_v55  ;;  %v4215_v54 = vld [vmem:[#allocation4 + $0xab8] sm:$0xff]  ;;  %v4212_v55 = vld [vmem:[#allocation4 + $0xaa0] sm:$0xff] }
 0x9e9   :  { %4822 = vmatpush1.bf16.msra.mxu0 %v4108_v7  ;;  %4986 = vmatpush1.bf16.msra.mxu1 %v4110_v56  ;;  %v4214_v7 = vld [vmem:[#allocation4 + $0xab0] sm:$0xff]  ;;  %v4221_v56 = vld [vmem:[#allocation4 + $0xae8] sm:$0xff] }
 0x9ea   :  { %4823 = vmatprep.subr.bf16.mxu0 %v4117_v57  ;;  %4987 = vmatprep.subr.bf16.mxu1 %v4119_v11  ;;  %v4223_v57 = vld [vmem:[#allocation4 + $0xaf8] sm:$0xff]  ;;  %v4220_v11 = vld [vmem:[#allocation4 + $0xae0] sm:$0xff] }
 0x9ed   :  { %4824 = vmatpush1.bf16.msra.mxu0 %v4116_v62  ;;  %4988 = vmatpush1.bf16.msra.mxu1 %v4118_v12  ;;  %v4222_v62 = vld [vmem:[#allocation4 + $0xaf0] sm:$0xff]  ;;  %v4229_v12 = vld [vmem:[#allocation4 + $0xb28] sm:$0xff] }
 0x9ee   :  { %4825 = vmatprep.subr.bf16.mxu0 %v4125_v0  ;;  %4989 = vmatprep.subr.bf16.mxu1 %v4127_v58  ;;  %v4231_v0 = vld [vmem:[#allocation4 + $0xb38] sm:$0xff]  ;;  %v4228_v58 = vld [vmem:[#allocation4 + $0xb20] sm:$0xff] }
 0x9f1   :  { %4826 = vmatpush1.bf16.msra.mxu0 %v4124_v59  ;;  %4990 = vmatpush1.bf16.msra.mxu1 %v4126_v63  ;;  %v4230_v59 = vld [vmem:[#allocation4 + $0xb30] sm:$0xff]  ;;  %v4237_v63 = vld [vmem:[#allocation4 + $0xb68] sm:$0xff] }
 0x9f2   :  { %4836 = vmatprep.subr.bf16.mxu0 %v4133_v22  ;;  %5000 = vmatprep.subr.bf16.mxu1 %v4135_v61  ;;  %v4239_v22 = vld [vmem:[#allocation4 + $0xb78] sm:$0xff]  ;;  %v4236_v61 = vld [vmem:[#allocation4 + $0xb60] sm:$0xff] }
 0x9f4   :  { %4828 = vmatmul.mubr.bf16.vlgmr.msra.gmra.mrb[20].mxu0 %v7754_v1  ;;  %4992 = vmatmul.mubr.bf16.vlgmr.msra.gmra.mrb[24].mxu1 %v7754_v1  ;;  %v4159_v1 = vld [vmem:[#allocation4 + $0x8f8] sm:$0xff] }
 0x9f5   :  { %4837 = vmatpush1.bf16.msra.mxu0 %v4132_v18  ;;  %5001 = vmatpush1.bf16.msra.mxu1 %v4134_v2  ;;  %v4238_v18 = vld [vmem:[#allocation4 + $0xb70] sm:$0xff]  ;;  %v4245_v2 = vld [vmem:[#allocation4 + $0xba8] sm:$0xff] }
 0x9f6   :  { %4838 = vmatprep.subr.bf16.mxu0 %v4141_v3  ;;  %5002 = vmatprep.subr.bf16.mxu1 %v4143_v24  ;;  %v4247_v3 = vld [vmem:[#allocation4 + $0xbb8] sm:$0xff]  ;;  %v4244_v24 = vld [vmem:[#allocation4 + $0xba0] sm:$0xff] }
 0x9f7   :  { %4868 = vmatprep.mubr.bf16.mxu0 %v7774_v27  ;;  %5032 = vmatprep.mubr.bf16.mxu1 %v7774_v27  ;;  %v4164_v27 = vld [vmem:[#allocation4 + $0x920] sm:$0xff] }
 0x9f9   :  { %4839 = vmatpush1.bf16.msra.mxu0 %v4140_v60  ;;  %5003 = vmatpush1.bf16.msra.mxu1 %v4142_v4  ;;  %v4246_v60 = vld [vmem:[#allocation4 + $0xbb0] sm:$0xff]  ;;  %v4253_v4 = vld [vmem:[#allocation4 + $0xbe8] sm:$0xff] }
 0x9fa   :  { %4840 = vmatprep.subr.bf16.mxu0 %v4149_v51  ;;  %5004 = vmatprep.subr.bf16.mxu1 %v4151_v5  ;;  %v4255_v51 = vld [vmem:[#allocation4 + $0xbf8] sm:$0xff]  ;;  %v4252_v5 = vld [vmem:[#allocation4 + $0xbe0] sm:$0xff] }
 0x9fd   :  { %4841 = vmatpush1.bf16.msra.mxu0 %v4148_v9  ;;  %5005 = vmatpush1.bf16.msra.mxu1 %v4150_v10  ;;  %v4254_v9 = vld [vmem:[#allocation4 + $0xbf0] sm:$0xff]  ;;  %v4261_v10 = vld [vmem:[#allocation4 + $0xc28] sm:$0xff] }
 0x9fe   :  { %4842 = vmatprep.subr.bf16.mxu0 %v4157_v15  ;;  %5006 = vmatprep.subr.bf16.mxu1 %v4159_v1  ;;  %v4263_v15 = vld [vmem:[#allocation4 + $0xc38] sm:$0xff]  ;;  %v4260_v1 = vld [vmem:[#allocation4 + $0xc20] sm:$0xff] }
 0xa01   :  { %4843 = vmatpush1.bf16.msra.mxu0 %v4156_v16  ;;  %5007 = vmatpush1.bf16.msra.mxu1 %v4158_v30  ;;  %v4262_v16 = vld [vmem:[#allocation4 + $0xc30] sm:$0xff]  ;;  %v4269_v30 = vld [vmem:[#allocation4 + $0xc68] sm:$0xff] }
 0xa02   :  { %4844 = vmatprep.subr.bf16.mxu0 %v4165_v21  ;;  %5008 = vmatprep.subr.bf16.mxu1 %v4167_v20  ;;  %v4271_v21 = vld [vmem:[#allocation4 + $0xc78] sm:$0xff]  ;;  %v4268_v20 = vld [vmem:[#allocation4 + $0xc60] sm:$0xff] }
 0xa05   :  { %4845 = vmatpush1.bf16.msra.mxu0 %v4164_v27  ;;  %5009 = vmatpush1.bf16.msra.mxu1 %v4166_v6  ;;  %v4270_v27 = vld [vmem:[#allocation4 + $0xc70] sm:$0xff]  ;;  %v4277_v6 = vld [vmem:[#allocation4 + $0xca8] sm:$0xff] }
 0xa06   :  { %4846 = vmatprep.subr.bf16.mxu0 %v4173_v23  ;;  %5010 = vmatprep.subr.bf16.mxu1 %v4175_v8  ;;  %v4279_v23 = vld [vmem:[#allocation4 + $0xcb8] sm:$0xff]  ;;  %v4276_v8 = vld [vmem:[#allocation4 + $0xca0] sm:$0xff] }
 0xa09   :  { %4847 = vmatpush1.bf16.msra.mxu0 %v4172_v32  ;;  %5011 = vmatpush1.bf16.msra.mxu1 %v4174_v26  ;;  %v4278_v32 = vld [vmem:[#allocation4 + $0xcb0] sm:$0xff]  ;;  %v4285_v26 = vld [vmem:[#allocation4 + $0xce8] sm:$0xff] }
 0xa0a   :  { %4848 = vmatprep.subr.bf16.mxu0 %v4181_v13  ;;  %5012 = vmatprep.subr.bf16.mxu1 %v4183_v34  ;;  %v4284_v13 = vld [vmem:[#allocation4 + $0xce0] sm:$0xff]  ;;  %v4286_v34 = vld [vmem:[#allocation4 + $0xcf0] sm:$0xff] }
 0xa0d   :  { %4849 = vmatpush1.bf16.msra.mxu0 %v4180_v35  ;;  %5013 = vmatpush1.bf16.msra.mxu1 %v4182_v37  ;;  %v4293_v35 = vld [vmem:[#allocation4 + $0xd28] sm:$0xff]  ;;  %v4295_v37 = vld [vmem:[#allocation4 + $0xd38] sm:$0xff] }
 0xa0e   :  { %4850 = vmatprep.subr.bf16.mxu0 %v4189_v38  ;;  %5014 = vmatprep.subr.bf16.mxu1 %v4191_v41  ;;  %v7808_v38 = vld [vmem:[#allocation13] sm:$0xff] }
 0xa0f   :  { %v4294_v41 = vld [vmem:[#allocation4 + $0xd30] sm:$0xff] }
 0xa11   :  { %4851 = vmatpush1.bf16.msra.mxu0 %v4188_v29  ;;  %5015 = vmatpush1.bf16.msra.mxu1 %v4190_v42  ;;  %v4301_v29 = vld [vmem:[#allocation4 + $0xd68] sm:$0xff]  ;;  %v4303_v42 = vld [vmem:[#allocation4 + $0xd78] sm:$0xff] }
 0xa12   :  { %4852 = vmatprep.subr.bf16.mxu0 %v4197_v43  ;;  %5016 = vmatprep.subr.bf16.mxu1 %v4199_v44  ;;  %v4389_v43 = vrot.slane %v7808_v38, %v7635_v33  ;;  %v4397_v44 = vrot.slane %v7808_v38, %v7661_v39 }
 0xa15   :  { %4853 = vmatpush1.bf16.msra.mxu0 %v4196_v45  ;;  %5017 = vmatpush1.bf16.msra.mxu1 %v4198_v46  ;;  %v4393_v45 = vrot.slane %v7808_v38, %v7640_v36  ;;  %v4401_v46 = vrot.slane %v7808_v38, %v7664_v19 }
 0xa16   :  { %4854 = vmatprep.subr.bf16.mxu0 %v4205_v17  ;;  %5018 = vmatprep.subr.bf16.mxu1 %v4207_v47  ;;  %v4300_v17 = vld [vmem:[#allocation4 + $0xd60] sm:$0xff]  ;;  %v4302_v47 = vld [vmem:[#allocation4 + $0xd70] sm:$0xff] }
 0xa19   :  { %4855 = vmatpush1.bf16.msra.mxu0 %v4204_v48  ;;  %5019 = vmatpush1.bf16.msra.mxu1 %v4206_v49 }
 0xa1a   :  { %4856 = vmatprep.subr.bf16.mxu0 %v4213_v50  ;;  %5020 = vmatprep.subr.bf16.mxu1 %v4215_v54  ;;  %v4309_v50 = vld [vmem:[#allocation4 + $0xda8] sm:$0xff]  ;;  %v4311_v54 = vld [vmem:[#allocation4 + $0xdb8] sm:$0xff] }
 0xa1d   :  { %4857 = vmatpush1.bf16.msra.mxu0 %v4212_v55  ;;  %5021 = vmatpush1.bf16.msra.mxu1 %v4214_v7 }
 0xa1e   :  { %4858 = vmatprep.subr.bf16.mxu0 %v4221_v56  ;;  %5022 = vmatprep.subr.bf16.mxu1 %v4223_v57 }
 0xa21   :  { %4859 = vmatpush1.bf16.msra.mxu0 %v4220_v11  ;;  %5023 = vmatpush1.bf16.msra.mxu1 %v4222_v62 }
 0xa22   :  { %4860 = vmatprep.subr.bf16.mxu0 %v4229_v12  ;;  %5024 = vmatprep.subr.bf16.mxu1 %v4231_v0 }
 0xa25   :  { %4861 = vmatpush1.bf16.msra.mxu0 %v4228_v58  ;;  %5025 = vmatpush1.bf16.msra.mxu1 %v4230_v59  ;;  %v4308_v58 = vld [vmem:[#allocation4 + $0xda0] sm:$0xff]  ;;  %v4310_v59 = vld [vmem:[#allocation4 + $0xdb0] sm:$0xff] }
 0xa26   :  { %4862 = vmatprep.subr.bf16.mxu0 %v4237_v63  ;;  %5026 = vmatprep.subr.bf16.mxu1 %v4239_v22 }
 0xa29   :  { %4863 = vmatpush1.bf16.msra.mxu0 %v4236_v61  ;;  %5027 = vmatpush1.bf16.msra.mxu1 %v4238_v18  ;;  %v4317_v61 = vld [vmem:[#allocation4 + $0xde8] sm:$0xff]  ;;  %v4319_v18 = vld [vmem:[#allocation4 + $0xdf8] sm:$0xff] }
 0xa2a   :  { %4864 = vmatprep.subr.bf16.mxu0 %v4245_v2  ;;  %5028 = vmatprep.subr.bf16.mxu1 %v4247_v3 }
 0xa2d   :  { %4865 = vmatpush1.bf16.msra.mxu0 %v4244_v24  ;;  %5029 = vmatpush1.bf16.msra.mxu1 %v4246_v60 }
 0xa2e   :  { %4866 = vmatprep.subr.bf16.mxu0 %v4253_v4  ;;  %5030 = vmatprep.subr.bf16.mxu1 %v4255_v51  ;;  %v4316_v4 = vld [vmem:[#allocation4 + $0xde0] sm:$0xff]  ;;  %v4318_v51 = vld [vmem:[#allocation4 + $0xdf0] sm:$0xff] }
 0xa31   :  { %4867 = vmatpush1.bf16.msra.mxu0 %v4252_v5  ;;  %5031 = vmatpush1.bf16.msra.mxu1 %v4254_v9  ;;  %v4325_v5 = vld [vmem:[#allocation4 + $0xe28] sm:$0xff]  ;;  %v4327_v9 = vld [vmem:[#allocation4 + $0xe38] sm:$0xff] }
 0xa32   :  { %4877 = vmatprep.subr.bf16.mxu0 %v4261_v10  ;;  %5041 = vmatprep.subr.bf16.mxu1 %v4263_v15  ;;  %v4324_v10 = vld [vmem:[#allocation4 + $0xe20] sm:$0xff]  ;;  %v4326_v15 = vld [vmem:[#allocation4 + $0xe30] sm:$0xff] }
 0xa34   :  { %4869 = vmatmul.mubr.bf16.vlgmr.msra.gmra.mrb[20].mxu0 %v7770_v28  ;;  %5033 = vmatmul.mubr.bf16.vlgmr.msra.gmra.mrb[24].mxu1 %v7770_v28  ;;  %v4287_v28 = vld [vmem:[#allocation4 + $0xcf8] sm:$0xff] }
 0xa35   :  { %4878 = vmatpush1.bf16.msra.mxu0 %v4260_v1  ;;  %5042 = vmatpush1.bf16.msra.mxu1 %v4262_v16  ;;  %v4333_v1 = vld [vmem:[#allocation4 + $0xe68] sm:$0xff]  ;;  %v4335_v16 = vld [vmem:[#allocation4 + $0xe78] sm:$0xff] }
 0xa36   :  { %4879 = vmatprep.subr.bf16.mxu0 %v4269_v30  ;;  %5043 = vmatprep.subr.bf16.mxu1 %v4271_v21  ;;  %v4332_v30 = vld [vmem:[#allocation4 + $0xe60] sm:$0xff]  ;;  %v4334_v21 = vld [vmem:[#allocation4 + $0xe70] sm:$0xff] }
 0xa37   :  { %4909 = vmatprep.mubr.bf16.mxu0 %v7776_v31  ;;  %5073 = vmatprep.mubr.bf16.mxu1 %v7776_v31  ;;  %v4292_v31 = vld [vmem:[#allocation4 + $0xd20] sm:$0xff] }
 0xa39   :  { %4880 = vmatpush1.bf16.msra.mxu0 %v4268_v20  ;;  %5044 = vmatpush1.bf16.msra.mxu1 %v4270_v27  ;;  %v4341_v20 = vld [vmem:[#allocation4 + $0xea8] sm:$0xff]  ;;  %v4343_v27 = vld [vmem:[#allocation4 + $0xeb8] sm:$0xff] }
 0xa3a   :  { %4881 = vmatprep.subr.bf16.mxu0 %v4277_v6  ;;  %5045 = vmatprep.subr.bf16.mxu1 %v4279_v23  ;;  %v4340_v6 = vld [vmem:[#allocation4 + $0xea0] sm:$0xff]  ;;  %v4342_v23 = vld [vmem:[#allocation4 + $0xeb0] sm:$0xff] }
 0xa3d   :  { %4882 = vmatpush1.bf16.msra.mxu0 %v4276_v8  ;;  %5046 = vmatpush1.bf16.msra.mxu1 %v4278_v32  ;;  %v4349_v8 = vld [vmem:[#allocation4 + $0xee8] sm:$0xff]  ;;  %v4351_v32 = vld [vmem:[#allocation4 + $0xef8] sm:$0xff] }
 0xa3e   :  { %4883 = vmatprep.subr.bf16.mxu0 %v4285_v26  ;;  %5047 = vmatprep.subr.bf16.mxu1 %v4287_v28  ;;  %v4348_v26 = vld [vmem:[#allocation4 + $0xee0] sm:$0xff]  ;;  %v4350_v28 = vld [vmem:[#allocation4 + $0xef0] sm:$0xff] }
 0xa41   :  { %4884 = vmatpush1.bf16.msra.mxu0 %v4284_v13  ;;  %5048 = vmatpush1.bf16.msra.mxu1 %v4286_v34  ;;  %v4357_v13 = vld [vmem:[#allocation4 + $0xf28] sm:$0xff]  ;;  %v4359_v34 = vld [vmem:[#allocation4 + $0xf38] sm:$0xff] }
 0xa42   :  { %4885 = vmatprep.subr.bf16.mxu0 %v4293_v35  ;;  %5049 = vmatprep.subr.bf16.mxu1 %v4295_v37  ;;  %v4356_v35 = vld [vmem:[#allocation4 + $0xf20] sm:$0xff]  ;;  %v4358_v37 = vld [vmem:[#allocation4 + $0xf30] sm:$0xff] }
 0xa45   :  { %4886 = vmatpush1.bf16.msra.mxu0 %v4292_v31  ;;  %5050 = vmatpush1.bf16.msra.mxu1 %v4294_v41  ;;  %v4365_v31 = vld [vmem:[#allocation4 + $0xf68] sm:$0xff]  ;;  %v4367_v41 = vld [vmem:[#allocation4 + $0xf78] sm:$0xff] }
 0xa46   :  { %4887 = vmatprep.subr.bf16.mxu0 %v4301_v29  ;;  %5051 = vmatprep.subr.bf16.mxu1 %v4303_v42  ;;  %v4364_v29 = vld [vmem:[#allocation4 + $0xf60] sm:$0xff]  ;;  %v4366_v42 = vld [vmem:[#allocation4 + $0xf70] sm:$0xff] }
 0xa47   :  { %v4583_v48 = vpop.f32.mrb[16].mxu0  ;;  %v4747_v49 = vpop.f32.mrb[20].mxu1 }
 0xa48   :  { %v6958_v33 = vadd.f32 %v4583_v48, %v4389_v43  ;;  %v6960_v55 = vadd.f32 %v4747_v49, %v4397_v44  ;;  %v4585_v7 = vpop.f32.mrb[17].mxu0  ;;  %v4749_v39 = vpop.f32.mrb[21].mxu1  ;;  %v4373_v43 = vld [vmem:[#allocation4 + $0xfa8] sm:$0xff]  ;;  %v4375_v44 = vld [vmem:[#allocation4 + $0xfb8] sm:$0xff]  ;;  %v4380_v48 = vld [vmem:[#allocation4 + $0xfe0] sm:$0xff] }
 0xa49   :  { %v6959_v56 = vadd.f32 %v4585_v7, %v4393_v45  ;;  %v6961_v57 = vadd.f32 %v4749_v39, %v4401_v46  ;;  %v4587_v11 = vpop.f32.mrb[18].mxu0  ;;  %v4751_v62 = vpop.f32.mrb[22].mxu1  ;;  %4888 = vmatpush1.bf16.msra.mxu0 %v4300_v17  ;;  %5052 = vmatpush1.bf16.msra.mxu1 %v4302_v47  ;;  %v4372_v45 = vld [vmem:[#allocation4 + $0xfa0] sm:$0xff]  ;;  %v4374_v46 = vld [vmem:[#allocation4 + $0xfb0] sm:$0xff]  ;;  %v4381_v17 = vld [vmem:[#allocation4 + $0xfe8] sm:$0xff] }
 0xa4a   :  { %v5082_v36 = vmax.f32 %v6958_v33, 0.0  ;;  %v5084_v19 = vmax.f32 %v6960_v55, 0.0  ;;  %v4588_v12 = vpop.f32.mrb[19].mxu0  ;;  %v4752_v0 = vpop.f32.mrb[23].mxu1  ;;  %4889 = vmatprep.subr.bf16.mxu0 %v4309_v50  ;;  %5053 = vmatprep.subr.bf16.mxu1 %v4311_v54  ;;  %v4383_v47 = vld [vmem:[#allocation4 + $0xff8] sm:$0xff]  ;;  %v4382_v49 = vld [vmem:[#allocation4 + $0xff0] sm:$0xff]  ;;  %v4405_v50 = vrot.slane %v7808_v38, %v7689_v40  ;;  %v4413_v54 = vrot.slane %v7808_v38, %v7701_v52 }
 0xa4b   :  { %v5083_v63 = vmax.f32 %v6959_v56, 0.0  ;;  %v5085_v22 = vmax.f32 %v6961_v57, 0.0  ;;  %v4409_v33 = vrot.slane %v7808_v38, %v7692_v25  ;;  %v4417_v55 = vrot.slane %v7808_v38, %v7704_v53 }
 0xa4c   :  { %v7818_v2 = vpack.c.bf16 %v5082_v36, %v5082_v36  ;;  %v7820_v3 = vpack.c.bf16 %v5084_v19, %v5084_v19 }
 0xa4d   :  { %v7822_v24 = vpack.c.bf16 %v5083_v63, %v5083_v63  ;;  %v7824_v60 = vpack.c.bf16 %v5085_v22, %v5085_v22  ;;  %4890 = vmatpush1.bf16.msra.mxu0 %v4308_v58  ;;  %5054 = vmatpush1.bf16.msra.mxu1 %v4310_v59 }
 0xa4e   :  { %4891 = vmatprep.subr.bf16.mxu0 %v4317_v61  ;;  %5055 = vmatprep.subr.bf16.mxu1 %v4319_v18 }
 0xa51   :  { %4892 = vmatpush1.bf16.msra.mxu0 %v4316_v4  ;;  %5056 = vmatpush1.bf16.msra.mxu1 %v4318_v51 }
 0xa52   :  { %4893 = vmatprep.subr.bf16.mxu0 %v4325_v5  ;;  %5057 = vmatprep.subr.bf16.mxu1 %v4327_v9 }
 0xa55   :  { %4894 = vmatpush1.bf16.msra.mxu0 %v4324_v10  ;;  %5058 = vmatpush1.bf16.msra.mxu1 %v4326_v15 }
 0xa56   :  { %4895 = vmatprep.subr.bf16.mxu0 %v4333_v1  ;;  %5059 = vmatprep.subr.bf16.mxu1 %v4335_v16 }
 0xa59   :  { %4896 = vmatpush1.bf16.msra.mxu0 %v4332_v30  ;;  %5060 = vmatpush1.bf16.msra.mxu1 %v4334_v21 }
 0xa5a   :  { %4897 = vmatprep.subr.bf16.mxu0 %v4341_v20  ;;  %5061 = vmatprep.subr.bf16.mxu1 %v4343_v27 }
 0xa5d   :  { %4898 = vmatpush1.bf16.msra.mxu0 %v4340_v6  ;;  %5062 = vmatpush1.bf16.msra.mxu1 %v4342_v23 }
 0xa5e   :  { %4899 = vmatprep.subr.bf16.mxu0 %v4349_v8  ;;  %5063 = vmatprep.subr.bf16.mxu1 %v4351_v32 }
 0xa61   :  { %4900 = vmatpush1.bf16.msra.mxu0 %v4348_v26  ;;  %5064 = vmatpush1.bf16.msra.mxu1 %v4350_v28 }
 0xa62   :  { %4901 = vmatprep.subr.bf16.mxu0 %v4357_v13  ;;  %5065 = vmatprep.subr.bf16.mxu1 %v4359_v34 }
 0xa65   :  { %4902 = vmatpush1.bf16.msra.mxu0 %v4356_v35  ;;  %5066 = vmatpush1.bf16.msra.mxu1 %v4358_v37 }
 0xa66   :  { %4903 = vmatprep.subr.bf16.mxu0 %v4365_v31  ;;  %5067 = vmatprep.subr.bf16.mxu1 %v4367_v41 }
 0xa69   :  { %4904 = vmatpush1.bf16.msra.mxu0 %v4364_v29  ;;  %5068 = vmatpush1.bf16.msra.mxu1 %v4366_v42 }
 0xa6a   :  { %4905 = vmatprep.subr.bf16.mxu0 %v4373_v43  ;;  %5069 = vmatprep.subr.bf16.mxu1 %v4375_v44 }
 0xa6d   :  { %4906 = vmatpush1.bf16.msra.mxu0 %v4372_v45  ;;  %5070 = vmatpush1.bf16.msra.mxu1 %v4374_v46 }
 0xa6e   :  { %4907 = vmatprep.subr.bf16.mxu0 %v4381_v17  ;;  %5071 = vmatprep.subr.bf16.mxu1 %v4383_v47 }
 0xa71   :  { %4908 = vmatpush1.bf16.msra.mxu0 %v4380_v48  ;;  %5072 = vmatpush1.bf16.msra.mxu1 %v4382_v49 }
 0xa74   :  { %4910 = vmatmul.mubr.bf16.vlgmr.msra.gmra.mrb[20].mxu0 %v7772_v14  ;;  %5074 = vmatmul.mubr.bf16.vlgmr.msra.gmra.mrb[24].mxu1 %v7772_v14 }
 0xb47   :  { %v4911_v7 = vpop.f32.mrb[20].mxu0  ;;  %v5075_v39 = vpop.f32.mrb[24].mxu1 }
 0xb48   :  { %v6962_v56 = vadd.f32 %v4911_v7, %v4405_v50  ;;  %v6964_v57 = vadd.f32 %v5075_v39, %v4413_v54  ;;  %v4913_v11 = vpop.f32.mrb[21].mxu0  ;;  %v5077_v62 = vpop.f32.mrb[25].mxu1 }
 0xb49   :  { %v6963_v36 = vadd.f32 %v4913_v11, %v4409_v33  ;;  %v6965_v14 = vadd.f32 %v5077_v62, %v4417_v55  ;;  %v4915_v19 = vpop.f32.mrb[22].mxu0  ;;  %v5079_v12 = vpop.f32.mrb[26].mxu1 }
 0xb4a   :  { %v5086_v40 = vmax.f32 %v6962_v56, 0.0  ;;  %v5088_v0 = vmax.f32 %v6964_v57, 0.0  ;;  %v4916_v58 = vpop.f32.mrb[23].mxu0  ;;  %v5080_v52 = vpop.f32.mrb[27].mxu1 }
 0xb4b   :  { %v5087_v59 = vmax.f32 %v6963_v36, 0.0  ;;  %v5089_v63 = vmax.f32 %v6965_v14, 0.0 }
 0xb4c   :  { %v7836_v25 = vpack.c.bf16 %v5086_v40, %v5086_v40  ;;  %v7838_v22 = vpack.c.bf16 %v5088_v0, %v5088_v0 }
 0xb4d   :  { %v7840_v53 = vpack.c.bf16 %v5087_v59, %v5087_v59  ;;  %v7842_v38 = vpack.c.bf16 %v5089_v63, %v5089_v63 }
 0xb4e   :  { %7380 = dma.done.wait [#allocation6 + $0x3], 90112 }
 0xb4f   :  { %7381 = vsyncadd [#allocation6 + $0x3], 4294877184  ;;  %5837 = vmatprep.mubr.bf16.mxu0 %v7822_v24  ;;  %6001 = vmatprep.mubr.bf16.mxu1 %v7822_v24  ;;  %v5102_v61 = vld [vmem:[#allocation5 + $0x8] sm:$0xff]  ;;  %v5104_v18 = vld [vmem:[#allocation5 + $0x18] sm:$0xff]  ;;  %s7410_s7 = smov [#allocation15]  }
 0xb50   :  { %v5101_v4 = vld [vmem:[#allocation5] sm:$0xff]  ;;  %5805 = vmatprep.subr.bf16.mxu0 %v5102_v61  ;;  %5969 = vmatprep.subr.bf16.mxu1 %v5104_v18  ;;  %v5103_v51 = vld [vmem:[#allocation5 + $0x10] sm:$0xff]  ;;  %v5112_v10 = vld [vmem:[#allocation5 + $0x58] sm:$0xff]  ;;  %s6802_s29 = sshll.u32 %s7410_s7, 4  ;;  %s6803_s29 = int_to_ptr.vmem [resolvable:$true] %s6802_s29 }
 0xb51   :  { %v5113_v5 = vld [vmem:[#allocation5 + $0x60] sm:$0xff]  ;;  %v5115_v9 = vld [vmem:[#allocation5 + $0x70] sm:$0xff]  ;;  %5806 = vmatpush1.bf16.msra.mxu0 %v5101_v4  ;;  %5970 = vmatpush1.bf16.msra.mxu1 %v5103_v51  ;;  %v5114_v15 = vld [vmem:[#allocation5 + $0x68] sm:$0xff]  ;;  %s7346_s12 = scalar_lea.vmem %s6803_s29, 1408  ;;  %p7351_p5 = scmp.lt.s32.totalorder %s6803_s29, %s6803_s29 }
 0xb52   :  { %5807 = vmatprep.subr.bf16.mxu0 %v5113_v5  ;;  %5971 = vmatprep.subr.bf16.mxu1 %v5115_v9  ;;  %v5124_v1 = vld [vmem:[#allocation5 + $0xb8] sm:$0xff]  ;;  %v5126_v16 = vld [vmem:[#allocation5 + $0xc8] sm:$0xff]  ;;  %v5123_v30 = vld [vmem:[#allocation5 + $0xb0] sm:$0xff]  ;;  %p7347_p4 = scmp.ne.s32.totalorder %s6803_s29, %s7346_s12  ;;  %p7352_p6 = scmp.lt.s32.totalorder %s7346_s12, %s7346_s12 }
 0xb53   :  { %v5125_v21 = vld [vmem:[#allocation5 + $0xc0] sm:$0xff]  ;;  %v5135_v20 = vld [vmem:[#allocation5 + $0x110] sm:$0xff]  ;;  %v5134_v6 = vld [vmem:[#allocation5 + $0x108] sm:$0xff] }
 0xb54   :  { %v5137_v27 = vld [vmem:[#allocation5 + $0x120] sm:$0xff]  ;;  %v5136_v23 = vld [vmem:[#allocation5 + $0x118] sm:$0xff]  ;;  %v5146_v8 = vld [vmem:[#allocation5 + $0x168] sm:$0xff]  ;;  %p7353_p7 = por %p7352_p6, %p7351_p5 }
 0xb55   :  { %5808 = vmatpush1.bf16.msra.mxu0 %v5112_v10  ;;  %5972 = vmatpush1.bf16.msra.mxu1 %v5114_v15  ;;  %v5148_v32 = vld [vmem:[#allocation5 + $0x178] sm:$0xff]  ;;  %v5145_v26 = vld [vmem:[#allocation5 + $0x160] sm:$0xff]  ;;  %v5147_v28 = vld [vmem:[#allocation5 + $0x170] sm:$0xff] }
 0xb56   :  { %5809 = vmatprep.subr.bf16.mxu0 %v5124_v1  ;;  %5973 = vmatprep.subr.bf16.mxu1 %v5126_v16  ;;  %v5157_v13 = vld [vmem:[#allocation5 + $0x1c0] sm:$0xff]  ;;  %v5159_v34 = vld [vmem:[#allocation5 + $0x1d0] sm:$0xff]  ;;  %v5156_v35 = vld [vmem:[#allocation5 + $0x1b8] sm:$0xff]  ;;  %p7354_p8 = pnand %p7353_p7, %p7347_p4 }
 0xb57   :  { %v5158_v37 = vld [vmem:[#allocation5 + $0x1c8] sm:$0xff]  ;;  %v5168_v31 = vld [vmem:[#allocation5 + $0x218] sm:$0xff]  ;;  %v5167_v29 = vld [vmem:[#allocation5 + $0x210] sm:$0xff] }
 0xb58   :  { %v5170_v41 = vld [vmem:[#allocation5 + $0x228] sm:$0xff]  ;;  %v5169_v42 = vld [vmem:[#allocation5 + $0x220] sm:$0xff]  ;;  %v5179_v43 = vld [vmem:[#allocation5 + $0x270] sm:$0xff] }
 0xb59   :  { %5810 = vmatpush1.bf16.msra.mxu0 %v5123_v30  ;;  %5974 = vmatpush1.bf16.msra.mxu1 %v5125_v21  ;;  %v5181_v44 = vld [vmem:[#allocation5 + $0x280] sm:$0xff]  ;;  %v5178_v45 = vld [vmem:[#allocation5 + $0x268] sm:$0xff]  ;;  %v5180_v46 = vld [vmem:[#allocation5 + $0x278] sm:$0xff] }
 0xb5a   :  { %5811 = vmatprep.subr.bf16.mxu0 %v5135_v20  ;;  %5975 = vmatprep.subr.bf16.mxu1 %v5137_v27  ;;  %v5190_v17 = vld [vmem:[#allocation5 + $0x2c8] sm:$0xff]  ;;  %v5192_v47 = vld [vmem:[#allocation5 + $0x2d8] sm:$0xff]  ;;  %v5189_v48 = vld [vmem:[#allocation5 + $0x2c0] sm:$0xff] }
 0xb5b   :  { %v5191_v49 = vld [vmem:[#allocation5 + $0x2d0] sm:$0xff]  ;;  %v5201_v50 = vld [vmem:[#allocation5 + $0x320] sm:$0xff]  ;;  %v5200_v33 = vld [vmem:[#allocation5 + $0x318] sm:$0xff] }
 0xb5c   :  { %v5203_v54 = vld [vmem:[#allocation5 + $0x330] sm:$0xff]  ;;  %v5202_v55 = vld [vmem:[#allocation5 + $0x328] sm:$0xff]  ;;  %v5212_v7 = vld [vmem:[#allocation5 + $0x378] sm:$0xff] }
 0xb5d   :  { %5812 = vmatpush1.bf16.msra.mxu0 %v5134_v6  ;;  %5976 = vmatpush1.bf16.msra.mxu1 %v5136_v23  ;;  %v5214_v39 = vld [vmem:[#allocation5 + $0x388] sm:$0xff]  ;;  %v5211_v56 = vld [vmem:[#allocation5 + $0x370] sm:$0xff]  ;;  %v5213_v57 = vld [vmem:[#allocation5 + $0x380] sm:$0xff] }
 0xb5e   :  { %5813 = vmatprep.subr.bf16.mxu0 %v5146_v8  ;;  %5977 = vmatprep.subr.bf16.mxu1 %v5148_v32  ;;  %v5223_v11 = vld [vmem:[#allocation5 + $0x3d0] sm:$0xff]  ;;  %v5225_v62 = vld [vmem:[#allocation5 + $0x3e0] sm:$0xff]  ;;  %v5222_v36 = vld [vmem:[#allocation5 + $0x3c8] sm:$0xff] }
 0xb5f   :  { %v5224_v14 = vld [vmem:[#allocation5 + $0x3d8] sm:$0xff]  ;;  %v5234_v19 = vld [vmem:[#allocation5 + $0x428] sm:$0xff]  ;;  %v5233_v40 = vld [vmem:[#allocation5 + $0x420] sm:$0xff] }
 0xb60   :  { %v5236_v12 = vld [vmem:[#allocation5 + $0x438] sm:$0xff]  ;;  %v5235_v0 = vld [vmem:[#allocation5 + $0x430] sm:$0xff]  ;;  %v5245_v58 = vld [vmem:[#allocation5 + $0x480] sm:$0xff] }
 0xb61   :  { %5814 = vmatpush1.bf16.msra.mxu0 %v5145_v26  ;;  %5978 = vmatpush1.bf16.msra.mxu1 %v5147_v28  ;;  %v5247_v52 = vld [vmem:[#allocation5 + $0x490] sm:$0xff]  ;;  %v5244_v59 = vld [vmem:[#allocation5 + $0x478] sm:$0xff]  ;;  %v5246_v63 = vld [vmem:[#allocation5 + $0x488] sm:$0xff] }
 0xb62   :  { %5815 = vmatprep.subr.bf16.mxu0 %v5157_v13  ;;  %5979 = vmatprep.subr.bf16.mxu1 %v5159_v34  ;;  %v5256_v61 = vld [vmem:[#allocation5 + $0x4d8] sm:$0xff]  ;;  %v5258_v18 = vld [vmem:[#allocation5 + $0x4e8] sm:$0xff]  ;;  %v5255_v4 = vld [vmem:[#allocation5 + $0x4d0] sm:$0xff] }
 0xb63   :  { %v5257_v51 = vld [vmem:[#allocation5 + $0x4e0] sm:$0xff]  ;;  %v5267_v5 = vld [vmem:[#allocation5 + $0x530] sm:$0xff]  ;;  %v5266_v10 = vld [vmem:[#allocation5 + $0x528] sm:$0xff] }
 0xb64   :  { %v5269_v9 = vld [vmem:[#allocation5 + $0x540] sm:$0xff]  ;;  %v5268_v15 = vld [vmem:[#allocation5 + $0x538] sm:$0xff]  ;;  %v5278_v1 = vld [vmem:[#allocation5 + $0x588] sm:$0xff] }
 0xb65   :  { %5816 = vmatpush1.bf16.msra.mxu0 %v5156_v35  ;;  %5980 = vmatpush1.bf16.msra.mxu1 %v5158_v37  ;;  %v5280_v16 = vld [vmem:[#allocation5 + $0x598] sm:$0xff]  ;;  %v5277_v30 = vld [vmem:[#allocation5 + $0x580] sm:$0xff]  ;;  %v5279_v21 = vld [vmem:[#allocation5 + $0x590] sm:$0xff] }
 0xb66   :  { %5817 = vmatprep.subr.bf16.mxu0 %v5168_v31  ;;  %5981 = vmatprep.subr.bf16.mxu1 %v5170_v41  ;;  %v5289_v20 = vld [vmem:[#allocation5 + $0x5e0] sm:$0xff]  ;;  %v5291_v27 = vld [vmem:[#allocation5 + $0x5f0] sm:$0xff]  ;;  %v5288_v6 = vld [vmem:[#allocation5 + $0x5d8] sm:$0xff] }
 0xb67   :  { %v5290_v23 = vld [vmem:[#allocation5 + $0x5e8] sm:$0xff]  ;;  %v5300_v8 = vld [vmem:[#allocation5 + $0x638] sm:$0xff]  ;;  %v5299_v26 = vld [vmem:[#allocation5 + $0x630] sm:$0xff] }
 0xb68   :  { %v5302_v32 = vld [vmem:[#allocation5 + $0x648] sm:$0xff]  ;;  %v5301_v28 = vld [vmem:[#allocation5 + $0x640] sm:$0xff]  ;;  %v5311_v13 = vld [vmem:[#allocation5 + $0x690] sm:$0xff] }
 0xb69   :  { %5818 = vmatpush1.bf16.msra.mxu0 %v5167_v29  ;;  %5982 = vmatpush1.bf16.msra.mxu1 %v5169_v42  ;;  %v5313_v34 = vld [vmem:[#allocation5 + $0x6a0] sm:$0xff]  ;;  %v5310_v35 = vld [vmem:[#allocation5 + $0x688] sm:$0xff]  ;;  %v5312_v37 = vld [vmem:[#allocation5 + $0x698] sm:$0xff] }
 0xb6a   :  { %5819 = vmatprep.subr.bf16.mxu0 %v5179_v43  ;;  %5983 = vmatprep.subr.bf16.mxu1 %v5181_v44  ;;  %v5322_v31 = vld [vmem:[#allocation5 + $0x6e8] sm:$0xff]  ;;  %v5324_v41 = vld [vmem:[#allocation5 + $0x6f8] sm:$0xff]  ;;  %v5321_v29 = vld [vmem:[#allocation5 + $0x6e0] sm:$0xff] }
 0xb6b   :  { %v5323_v42 = vld [vmem:[#allocation5 + $0x6f0] sm:$0xff]  ;;  %v5333_v43 = vld [vmem:[#allocation5 + $0x740] sm:$0xff] }
 0xb6c   :  { %v5335_v44 = vld [vmem:[#allocation5 + $0x750] sm:$0xff] }
 0xb6d   :  { %5820 = vmatpush1.bf16.msra.mxu0 %v5178_v45  ;;  %5984 = vmatpush1.bf16.msra.mxu1 %v5180_v46  ;;  %v5332_v45 = vld [vmem:[#allocation5 + $0x738] sm:$0xff]  ;;  %v5334_v46 = vld [vmem:[#allocation5 + $0x748] sm:$0xff] }
 0xb6e   :  { %5821 = vmatprep.subr.bf16.mxu0 %v5190_v17  ;;  %5985 = vmatprep.subr.bf16.mxu1 %v5192_v47  ;;  %v5344_v17 = vld [vmem:[#allocation5 + $0x798] sm:$0xff]  ;;  %v5346_v47 = vld [vmem:[#allocation5 + $0x7a8] sm:$0xff] }
 0xb71   :  { %5822 = vmatpush1.bf16.msra.mxu0 %v5189_v48  ;;  %5986 = vmatpush1.bf16.msra.mxu1 %v5191_v49  ;;  %v5343_v48 = vld [vmem:[#allocation5 + $0x790] sm:$0xff]  ;;  %v5345_v49 = vld [vmem:[#allocation5 + $0x7a0] sm:$0xff] }
 0xb72   :  { %5823 = vmatprep.subr.bf16.mxu0 %v5201_v50  ;;  %5987 = vmatprep.subr.bf16.mxu1 %v5203_v54  ;;  %v5355_v50 = vld [vmem:[#allocation5 + $0x7f0] sm:$0xff]  ;;  %v5357_v54 = vld [vmem:[#allocation5 + $0x800] sm:$0xff] }
 0xb75   :  { %5824 = vmatpush1.bf16.msra.mxu0 %v5200_v33  ;;  %5988 = vmatpush1.bf16.msra.mxu1 %v5202_v55  ;;  %v5354_v33 = vld [vmem:[#allocation5 + $0x7e8] sm:$0xff]  ;;  %v5356_v55 = vld [vmem:[#allocation5 + $0x7f8] sm:$0xff] }
 0xb76   :  { %5825 = vmatprep.subr.bf16.mxu0 %v5212_v7  ;;  %5989 = vmatprep.subr.bf16.mxu1 %v5214_v39  ;;  %v5366_v7 = vld [vmem:[#allocation5 + $0x848] sm:$0xff]  ;;  %v5368_v39 = vld [vmem:[#allocation5 + $0x858] sm:$0xff] }
 0xb79   :  { %5826 = vmatpush1.bf16.msra.mxu0 %v5211_v56  ;;  %5990 = vmatpush1.bf16.msra.mxu1 %v5213_v57  ;;  %v5365_v56 = vld [vmem:[#allocation5 + $0x840] sm:$0xff]  ;;  %v5367_v57 = vld [vmem:[#allocation5 + $0x850] sm:$0xff] }
 0xb7a   :  { %5827 = vmatprep.subr.bf16.mxu0 %v5223_v11  ;;  %5991 = vmatprep.subr.bf16.mxu1 %v5225_v62  ;;  %v5377_v11 = vld [vmem:[#allocation5 + $0x8a0] sm:$0xff]  ;;  %v5379_v62 = vld [vmem:[#allocation5 + $0x8b0] sm:$0xff] }
 0xb7d   :  { %5828 = vmatpush1.bf16.msra.mxu0 %v5222_v36  ;;  %5992 = vmatpush1.bf16.msra.mxu1 %v5224_v14  ;;  %v5376_v36 = vld [vmem:[#allocation5 + $0x898] sm:$0xff]  ;;  %v5378_v14 = vld [vmem:[#allocation5 + $0x8a8] sm:$0xff] }
 0xb7e   :  { %5829 = vmatprep.subr.bf16.mxu0 %v5234_v19  ;;  %5993 = vmatprep.subr.bf16.mxu1 %v5236_v12  ;;  %v5388_v19 = vld [vmem:[#allocation5 + $0x8f8] sm:$0xff]  ;;  %v5390_v12 = vld [vmem:[#allocation5 + $0x908] sm:$0xff] }
 0xb81   :  { %5830 = vmatpush1.bf16.msra.mxu0 %v5233_v40  ;;  %5994 = vmatpush1.bf16.msra.mxu1 %v5235_v0  ;;  %v5387_v40 = vld [vmem:[#allocation5 + $0x8f0] sm:$0xff]  ;;  %v5389_v0 = vld [vmem:[#allocation5 + $0x900] sm:$0xff] }
 0xb82   :  { %5831 = vmatprep.subr.bf16.mxu0 %v5245_v58  ;;  %5995 = vmatprep.subr.bf16.mxu1 %v5247_v52  ;;  %v5399_v58 = vld [vmem:[#allocation5 + $0x950] sm:$0xff]  ;;  %v5401_v52 = vld [vmem:[#allocation5 + $0x960] sm:$0xff] }
 0xb85   :  { %5832 = vmatpush1.bf16.msra.mxu0 %v5244_v59  ;;  %5996 = vmatpush1.bf16.msra.mxu1 %v5246_v63  ;;  %v5398_v59 = vld [vmem:[#allocation5 + $0x948] sm:$0xff]  ;;  %v5400_v63 = vld [vmem:[#allocation5 + $0x958] sm:$0xff] }
 0xb86   :  { %5833 = vmatprep.subr.bf16.mxu0 %v5256_v61  ;;  %5997 = vmatprep.subr.bf16.mxu1 %v5258_v18  ;;  %v5410_v61 = vld [vmem:[#allocation5 + $0x9a8] sm:$0xff]  ;;  %v5412_v18 = vld [vmem:[#allocation5 + $0x9b8] sm:$0xff] }
 0xb89   :  { %5834 = vmatpush1.bf16.msra.mxu0 %v5255_v4  ;;  %5998 = vmatpush1.bf16.msra.mxu1 %v5257_v51  ;;  %v5409_v4 = vld [vmem:[#allocation5 + $0x9a0] sm:$0xff]  ;;  %v5411_v51 = vld [vmem:[#allocation5 + $0x9b0] sm:$0xff] }
 0xb8a   :  { %5835 = vmatprep.subr.bf16.mxu0 %v5267_v5  ;;  %5999 = vmatprep.subr.bf16.mxu1 %v5269_v9  ;;  %v5421_v5 = vld [vmem:[#allocation5 + $0xa00] sm:$0xff]  ;;  %v5423_v9 = vld [vmem:[#allocation5 + $0xa10] sm:$0xff] }
 0xb8d   :  { %5836 = vmatpush1.bf16.msra.mxu0 %v5266_v10  ;;  %6000 = vmatpush1.bf16.msra.mxu1 %v5268_v15  ;;  %v5420_v10 = vld [vmem:[#allocation5 + $0x9f8] sm:$0xff]  ;;  %v5422_v15 = vld [vmem:[#allocation5 + $0xa08] sm:$0xff] }
 0xb8e   :  { %5846 = vmatprep.subr.bf16.mxu0 %v5278_v1  ;;  %6010 = vmatprep.subr.bf16.mxu1 %v5280_v16  ;;  %v5432_v1 = vld [vmem:[#allocation5 + $0xa58] sm:$0xff]  ;;  %v5434_v16 = vld [vmem:[#allocation5 + $0xa68] sm:$0xff] }
 0xb90   :  { %5838 = vmatmul.mubr.bf16.vlgmr.msra.gmra.mrb[24].mxu0 %v7818_v2  ;;  %6002 = vmatmul.mubr.bf16.vlgmr.msra.gmra.mrb[28].mxu1 %v7818_v2 }
 0xb91   :  { %5847 = vmatpush1.bf16.msra.mxu0 %v5277_v30  ;;  %6011 = vmatpush1.bf16.msra.mxu1 %v5279_v21  ;;  %v5431_v30 = vld [vmem:[#allocation5 + $0xa50] sm:$0xff]  ;;  %v5433_v21 = vld [vmem:[#allocation5 + $0xa60] sm:$0xff] }
 0xb92   :  { %5848 = vmatprep.subr.bf16.mxu0 %v5289_v20  ;;  %6012 = vmatprep.subr.bf16.mxu1 %v5291_v27  ;;  %v5443_v20 = vld [vmem:[#allocation5 + $0xab0] sm:$0xff]  ;;  %v5445_v27 = vld [vmem:[#allocation5 + $0xac0] sm:$0xff] }
 0xb93   :  { %5878 = vmatprep.mubr.bf16.mxu0 %v7824_v60  ;;  %6042 = vmatprep.mubr.bf16.mxu1 %v7824_v60 }
 0xb95   :  { %5849 = vmatpush1.bf16.msra.mxu0 %v5288_v6  ;;  %6013 = vmatpush1.bf16.msra.mxu1 %v5290_v23  ;;  %v5442_v6 = vld [vmem:[#allocation5 + $0xaa8] sm:$0xff]  ;;  %v5444_v23 = vld [vmem:[#allocation5 + $0xab8] sm:$0xff] }
 0xb96   :  { %5850 = vmatprep.subr.bf16.mxu0 %v5300_v8  ;;  %6014 = vmatprep.subr.bf16.mxu1 %v5302_v32  ;;  %v5454_v8 = vld [vmem:[#allocation5 + $0xb08] sm:$0xff]  ;;  %v5456_v32 = vld [vmem:[#allocation5 + $0xb18] sm:$0xff] }
 0xb99   :  { %5851 = vmatpush1.bf16.msra.mxu0 %v5299_v26  ;;  %6015 = vmatpush1.bf16.msra.mxu1 %v5301_v28  ;;  %v5453_v26 = vld [vmem:[#allocation5 + $0xb00] sm:$0xff]  ;;  %v5455_v28 = vld [vmem:[#allocation5 + $0xb10] sm:$0xff] }
 0xb9a   :  { %5852 = vmatprep.subr.bf16.mxu0 %v5311_v13  ;;  %6016 = vmatprep.subr.bf16.mxu1 %v5313_v34  ;;  %v5465_v13 = vld [vmem:[#allocation5 + $0xb60] sm:$0xff]  ;;  %v5467_v34 = vld [vmem:[#allocation5 + $0xb70] sm:$0xff] }
 0xb9d   :  { %5853 = vmatpush1.bf16.msra.mxu0 %v5310_v35  ;;  %6017 = vmatpush1.bf16.msra.mxu1 %v5312_v37  ;;  %v5464_v35 = vld [vmem:[#allocation5 + $0xb58] sm:$0xff]  ;;  %v5466_v37 = vld [vmem:[#allocation5 + $0xb68] sm:$0xff] }
 0xb9e   :  { %5854 = vmatprep.subr.bf16.mxu0 %v5322_v31  ;;  %6018 = vmatprep.subr.bf16.mxu1 %v5324_v41  ;;  %v5476_v31 = vld [vmem:[#allocation5 + $0xbb8] sm:$0xff]  ;;  %v5478_v41 = vld [vmem:[#allocation5 + $0xbc8] sm:$0xff] }
 0xba1   :  { %5855 = vmatpush1.bf16.msra.mxu0 %v5321_v29  ;;  %6019 = vmatpush1.bf16.msra.mxu1 %v5323_v42  ;;  %v5475_v29 = vld [vmem:[#allocation5 + $0xbb0] sm:$0xff]  ;;  %v5477_v42 = vld [vmem:[#allocation5 + $0xbc0] sm:$0xff] }
 0xba2   :  { %5856 = vmatprep.subr.bf16.mxu0 %v5333_v43  ;;  %6020 = vmatprep.subr.bf16.mxu1 %v5335_v44  ;;  %v5487_v43 = vld [vmem:[#allocation5 + $0xc10] sm:$0xff]  ;;  %v5489_v44 = vld [vmem:[#allocation5 + $0xc20] sm:$0xff] }
 0xba5   :  { %5857 = vmatpush1.bf16.msra.mxu0 %v5332_v45  ;;  %6021 = vmatpush1.bf16.msra.mxu1 %v5334_v46  ;;  %v5486_v45 = vld [vmem:[#allocation5 + $0xc08] sm:$0xff]  ;;  %v5488_v46 = vld [vmem:[#allocation5 + $0xc18] sm:$0xff] }
 0xba6   :  { %5858 = vmatprep.subr.bf16.mxu0 %v5344_v17  ;;  %6022 = vmatprep.subr.bf16.mxu1 %v5346_v47  ;;  %v5498_v17 = vld [vmem:[#allocation5 + $0xc68] sm:$0xff]  ;;  %v5500_v47 = vld [vmem:[#allocation5 + $0xc78] sm:$0xff] }
 0xba9   :  { %5859 = vmatpush1.bf16.msra.mxu0 %v5343_v48  ;;  %6023 = vmatpush1.bf16.msra.mxu1 %v5345_v49  ;;  %v5497_v48 = vld [vmem:[#allocation5 + $0xc60] sm:$0xff]  ;;  %v5499_v49 = vld [vmem:[#allocation5 + $0xc70] sm:$0xff] }
 0xbaa   :  { %5860 = vmatprep.subr.bf16.mxu0 %v5355_v50  ;;  %6024 = vmatprep.subr.bf16.mxu1 %v5357_v54  ;;  %v5509_v50 = vld [vmem:[#allocation5 + $0xcc0] sm:$0xff]  ;;  %v5511_v54 = vld [vmem:[#allocation5 + $0xcd0] sm:$0xff] }
 0xbad   :  { %5861 = vmatpush1.bf16.msra.mxu0 %v5354_v33  ;;  %6025 = vmatpush1.bf16.msra.mxu1 %v5356_v55  ;;  %v5508_v33 = vld [vmem:[#allocation5 + $0xcb8] sm:$0xff]  ;;  %v5510_v55 = vld [vmem:[#allocation5 + $0xcc8] sm:$0xff] }
 0xbae   :  { %5862 = vmatprep.subr.bf16.mxu0 %v5366_v7  ;;  %6026 = vmatprep.subr.bf16.mxu1 %v5368_v39  ;;  %v5520_v7 = vld [vmem:[#allocation5 + $0xd18] sm:$0xff]  ;;  %v5522_v39 = vld [vmem:[#allocation5 + $0xd28] sm:$0xff] }
 0xbb1   :  { %5863 = vmatpush1.bf16.msra.mxu0 %v5365_v56  ;;  %6027 = vmatpush1.bf16.msra.mxu1 %v5367_v57  ;;  %v5519_v56 = vld [vmem:[#allocation5 + $0xd10] sm:$0xff]  ;;  %v5521_v57 = vld [vmem:[#allocation5 + $0xd20] sm:$0xff] }
 0xbb2   :  { %5864 = vmatprep.subr.bf16.mxu0 %v5377_v11  ;;  %6028 = vmatprep.subr.bf16.mxu1 %v5379_v62  ;;  %v5531_v11 = vld [vmem:[#allocation5 + $0xd70] sm:$0xff]  ;;  %v5533_v62 = vld [vmem:[#allocation5 + $0xd80] sm:$0xff] }
 0xbb5   :  { %5865 = vmatpush1.bf16.msra.mxu0 %v5376_v36  ;;  %6029 = vmatpush1.bf16.msra.mxu1 %v5378_v14  ;;  %v5530_v36 = vld [vmem:[#allocation5 + $0xd68] sm:$0xff]  ;;  %v5532_v14 = vld [vmem:[#allocation5 + $0xd78] sm:$0xff] }
 0xbb6   :  { %5866 = vmatprep.subr.bf16.mxu0 %v5388_v19  ;;  %6030 = vmatprep.subr.bf16.mxu1 %v5390_v12  ;;  %v5542_v19 = vld [vmem:[#allocation5 + $0xdc8] sm:$0xff]  ;;  %v5544_v12 = vld [vmem:[#allocation5 + $0xdd8] sm:$0xff] }
 0xbb9   :  { %5867 = vmatpush1.bf16.msra.mxu0 %v5387_v40  ;;  %6031 = vmatpush1.bf16.msra.mxu1 %v5389_v0  ;;  %v5541_v40 = vld [vmem:[#allocation5 + $0xdc0] sm:$0xff]  ;;  %v5543_v0 = vld [vmem:[#allocation5 + $0xdd0] sm:$0xff] }
 0xbba   :  { %5868 = vmatprep.subr.bf16.mxu0 %v5399_v58  ;;  %6032 = vmatprep.subr.bf16.mxu1 %v5401_v52  ;;  %v5553_v58 = vld [vmem:[#allocation5 + $0xe20] sm:$0xff]  ;;  %v5555_v52 = vld [vmem:[#allocation5 + $0xe30] sm:$0xff] }
 0xbbd   :  { %5869 = vmatpush1.bf16.msra.mxu0 %v5398_v59  ;;  %6033 = vmatpush1.bf16.msra.mxu1 %v5400_v63  ;;  %v5552_v59 = vld [vmem:[#allocation5 + $0xe18] sm:$0xff]  ;;  %v5554_v63 = vld [vmem:[#allocation5 + $0xe28] sm:$0xff] }
 0xbbe   :  { %5870 = vmatprep.subr.bf16.mxu0 %v5410_v61  ;;  %6034 = vmatprep.subr.bf16.mxu1 %v5412_v18  ;;  %v5564_v61 = vld [vmem:[#allocation5 + $0xe78] sm:$0xff]  ;;  %v5566_v18 = vld [vmem:[#allocation5 + $0xe88] sm:$0xff] }
 0xbc1   :  { %5871 = vmatpush1.bf16.msra.mxu0 %v5409_v4  ;;  %6035 = vmatpush1.bf16.msra.mxu1 %v5411_v51  ;;  %v5563_v4 = vld [vmem:[#allocation5 + $0xe70] sm:$0xff]  ;;  %v5565_v51 = vld [vmem:[#allocation5 + $0xe80] sm:$0xff] }
 0xbc2   :  { %5872 = vmatprep.subr.bf16.mxu0 %v5421_v5  ;;  %6036 = vmatprep.subr.bf16.mxu1 %v5423_v9  ;;  %v5575_v5 = vld [vmem:[#allocation5 + $0xed0] sm:$0xff]  ;;  %v5577_v9 = vld [vmem:[#allocation5 + $0xee0] sm:$0xff] }
 0xbc5   :  { %5873 = vmatpush1.bf16.msra.mxu0 %v5420_v10  ;;  %6037 = vmatpush1.bf16.msra.mxu1 %v5422_v15  ;;  %v5574_v10 = vld [vmem:[#allocation5 + $0xec8] sm:$0xff]  ;;  %v5576_v15 = vld [vmem:[#allocation5 + $0xed8] sm:$0xff] }
 0xbc6   :  { %5874 = vmatprep.subr.bf16.mxu0 %v5432_v1  ;;  %6038 = vmatprep.subr.bf16.mxu1 %v5434_v16  ;;  %v5586_v1 = vld [vmem:[#allocation5 + $0xf28] sm:$0xff]  ;;  %v5588_v16 = vld [vmem:[#allocation5 + $0xf38] sm:$0xff] }
 0xbc9   :  { %5875 = vmatpush1.bf16.msra.mxu0 %v5431_v30  ;;  %6039 = vmatpush1.bf16.msra.mxu1 %v5433_v21  ;;  %v5585_v30 = vld [vmem:[#allocation5 + $0xf20] sm:$0xff]  ;;  %v5587_v21 = vld [vmem:[#allocation5 + $0xf30] sm:$0xff] }
 0xbca   :  { %5876 = vmatprep.subr.bf16.mxu0 %v5443_v20  ;;  %6040 = vmatprep.subr.bf16.mxu1 %v5445_v27  ;;  %v5597_v20 = vld [vmem:[#allocation5 + $0xf80] sm:$0xff]  ;;  %v5599_v27 = vld [vmem:[#allocation5 + $0xf90] sm:$0xff] }
 0xbcd   :  { %5877 = vmatpush1.bf16.msra.mxu0 %v5442_v6  ;;  %6041 = vmatpush1.bf16.msra.mxu1 %v5444_v23  ;;  %v5596_v6 = vld [vmem:[#allocation5 + $0xf78] sm:$0xff]  ;;  %v5598_v23 = vld [vmem:[#allocation5 + $0xf88] sm:$0xff] }
 0xbce   :  { %5887 = vmatprep.subr.bf16.mxu0 %v5454_v8  ;;  %6051 = vmatprep.subr.bf16.mxu1 %v5456_v32  ;;  %v5608_v8 = vld [vmem:[#allocation5 + $0xfd8] sm:$0xff]  ;;  %v5610_v32 = vld [vmem:[#allocation5 + $0xfe8] sm:$0xff] }
 0xbd0   :  { %5879 = vmatmul.mubr.bf16.vlgmr.msra.gmra.mrb[24].mxu0 %v7820_v3  ;;  %6043 = vmatmul.mubr.bf16.vlgmr.msra.gmra.mrb[28].mxu1 %v7820_v3 }
 0xbd1   :  { %5888 = vmatpush1.bf16.msra.mxu0 %v5453_v26  ;;  %6052 = vmatpush1.bf16.msra.mxu1 %v5455_v28  ;;  %v5607_v26 = vld [vmem:[#allocation5 + $0xfd0] sm:$0xff]  ;;  %v5609_v28 = vld [vmem:[#allocation5 + $0xfe0] sm:$0xff] }
 0xbd2   :  { %5889 = vmatprep.subr.bf16.mxu0 %v5465_v13  ;;  %6053 = vmatprep.subr.bf16.mxu1 %v5467_v34  ;;  %v5619_v13 = vld [vmem:[#allocation5 + $0x1030] sm:$0xff]  ;;  %v5621_v34 = vld [vmem:[#allocation5 + $0x1040] sm:$0xff] }
 0xbd3   :  { %5919 = vmatprep.mubr.bf16.mxu0 %v7840_v53  ;;  %6083 = vmatprep.mubr.bf16.mxu1 %v7840_v53 }
 0xbd5   :  { %5890 = vmatpush1.bf16.msra.mxu0 %v5464_v35  ;;  %6054 = vmatpush1.bf16.msra.mxu1 %v5466_v37  ;;  %v5618_v35 = vld [vmem:[#allocation5 + $0x1028] sm:$0xff]  ;;  %v5620_v37 = vld [vmem:[#allocation5 + $0x1038] sm:$0xff] }
 0xbd6   :  { %5891 = vmatprep.subr.bf16.mxu0 %v5476_v31  ;;  %6055 = vmatprep.subr.bf16.mxu1 %v5478_v41  ;;  %v5630_v31 = vld [vmem:[#allocation5 + $0x1088] sm:$0xff]  ;;  %v5632_v41 = vld [vmem:[#allocation5 + $0x1098] sm:$0xff] }
 0xbd9   :  { %5892 = vmatpush1.bf16.msra.mxu0 %v5475_v29  ;;  %6056 = vmatpush1.bf16.msra.mxu1 %v5477_v42  ;;  %v5629_v29 = vld [vmem:[#allocation5 + $0x1080] sm:$0xff]  ;;  %v5631_v42 = vld [vmem:[#allocation5 + $0x1090] sm:$0xff] }
 0xbda   :  { %5893 = vmatprep.subr.bf16.mxu0 %v5487_v43  ;;  %6057 = vmatprep.subr.bf16.mxu1 %v5489_v44  ;;  %v5641_v43 = vld [vmem:[#allocation5 + $0x10e0] sm:$0xff]  ;;  %v5643_v44 = vld [vmem:[#allocation5 + $0x10f0] sm:$0xff] }
 0xbdd   :  { %5894 = vmatpush1.bf16.msra.mxu0 %v5486_v45  ;;  %6058 = vmatpush1.bf16.msra.mxu1 %v5488_v46  ;;  %v5640_v45 = vld [vmem:[#allocation5 + $0x10d8] sm:$0xff]  ;;  %v5642_v46 = vld [vmem:[#allocation5 + $0x10e8] sm:$0xff] }
 0xbde   :  { %5895 = vmatprep.subr.bf16.mxu0 %v5498_v17  ;;  %6059 = vmatprep.subr.bf16.mxu1 %v5500_v47  ;;  %v5652_v17 = vld [vmem:[#allocation5 + $0x1138] sm:$0xff]  ;;  %v5654_v47 = vld [vmem:[#allocation5 + $0x1148] sm:$0xff] }
 0xbe1   :  { %5896 = vmatpush1.bf16.msra.mxu0 %v5497_v48  ;;  %6060 = vmatpush1.bf16.msra.mxu1 %v5499_v49  ;;  %v5651_v48 = vld [vmem:[#allocation5 + $0x1130] sm:$0xff]  ;;  %v5653_v49 = vld [vmem:[#allocation5 + $0x1140] sm:$0xff] }
 0xbe2   :  { %5897 = vmatprep.subr.bf16.mxu0 %v5509_v50  ;;  %6061 = vmatprep.subr.bf16.mxu1 %v5511_v54  ;;  %v5663_v50 = vld [vmem:[#allocation5 + $0x1190] sm:$0xff]  ;;  %v5665_v54 = vld [vmem:[#allocation5 + $0x11a0] sm:$0xff] }
 0xbe5   :  { %5898 = vmatpush1.bf16.msra.mxu0 %v5508_v33  ;;  %6062 = vmatpush1.bf16.msra.mxu1 %v5510_v55  ;;  %v5662_v33 = vld [vmem:[#allocation5 + $0x1188] sm:$0xff]  ;;  %v5664_v55 = vld [vmem:[#allocation5 + $0x1198] sm:$0xff] }
 0xbe6   :  { %5899 = vmatprep.subr.bf16.mxu0 %v5520_v7  ;;  %6063 = vmatprep.subr.bf16.mxu1 %v5522_v39  ;;  %v5674_v7 = vld [vmem:[#allocation5 + $0x11e8] sm:$0xff]  ;;  %v5676_v39 = vld [vmem:[#allocation5 + $0x11f8] sm:$0xff] }
 0xbe9   :  { %5900 = vmatpush1.bf16.msra.mxu0 %v5519_v56  ;;  %6064 = vmatpush1.bf16.msra.mxu1 %v5521_v57  ;;  %v5673_v56 = vld [vmem:[#allocation5 + $0x11e0] sm:$0xff]  ;;  %v5675_v57 = vld [vmem:[#allocation5 + $0x11f0] sm:$0xff] }
 0xbea   :  { %5901 = vmatprep.subr.bf16.mxu0 %v5531_v11  ;;  %6065 = vmatprep.subr.bf16.mxu1 %v5533_v62  ;;  %v5685_v11 = vld [vmem:[#allocation5 + $0x1240] sm:$0xff]  ;;  %v5687_v62 = vld [vmem:[#allocation5 + $0x1250] sm:$0xff] }
 0xbed   :  { %5902 = vmatpush1.bf16.msra.mxu0 %v5530_v36  ;;  %6066 = vmatpush1.bf16.msra.mxu1 %v5532_v14  ;;  %v5684_v36 = vld [vmem:[#allocation5 + $0x1238] sm:$0xff]  ;;  %v5686_v14 = vld [vmem:[#allocation5 + $0x1248] sm:$0xff] }
 0xbee   :  { %5903 = vmatprep.subr.bf16.mxu0 %v5542_v19  ;;  %6067 = vmatprep.subr.bf16.mxu1 %v5544_v12  ;;  %v5696_v19 = vld [vmem:[#allocation5 + $0x1298] sm:$0xff]  ;;  %v5698_v12 = vld [vmem:[#allocation5 + $0x12a8] sm:$0xff] }
 0xbf1   :  { %5904 = vmatpush1.bf16.msra.mxu0 %v5541_v40  ;;  %6068 = vmatpush1.bf16.msra.mxu1 %v5543_v0  ;;  %v5695_v40 = vld [vmem:[#allocation5 + $0x1290] sm:$0xff]  ;;  %v5697_v0 = vld [vmem:[#allocation5 + $0x12a0] sm:$0xff] }
 0xbf2   :  { %5905 = vmatprep.subr.bf16.mxu0 %v5553_v58  ;;  %6069 = vmatprep.subr.bf16.mxu1 %v5555_v52  ;;  %v5707_v58 = vld [vmem:[#allocation5 + $0x12f0] sm:$0xff]  ;;  %v5709_v52 = vld [vmem:[#allocation5 + $0x1300] sm:$0xff] }
 0xbf5   :  { %5906 = vmatpush1.bf16.msra.mxu0 %v5552_v59  ;;  %6070 = vmatpush1.bf16.msra.mxu1 %v5554_v63  ;;  %v5706_v59 = vld [vmem:[#allocation5 + $0x12e8] sm:$0xff]  ;;  %v5708_v63 = vld [vmem:[#allocation5 + $0x12f8] sm:$0xff] }
 0xbf6   :  { %5907 = vmatprep.subr.bf16.mxu0 %v5564_v61  ;;  %6071 = vmatprep.subr.bf16.mxu1 %v5566_v18  ;;  %v5718_v61 = vld [vmem:[#allocation5 + $0x1348] sm:$0xff]  ;;  %v5720_v18 = vld [vmem:[#allocation5 + $0x1358] sm:$0xff] }
 0xbf9   :  { %5908 = vmatpush1.bf16.msra.mxu0 %v5563_v4  ;;  %6072 = vmatpush1.bf16.msra.mxu1 %v5565_v51  ;;  %v5717_v4 = vld [vmem:[#allocation5 + $0x1340] sm:$0xff]  ;;  %v5719_v51 = vld [vmem:[#allocation5 + $0x1350] sm:$0xff] }
 0xbfa   :  { %5909 = vmatprep.subr.bf16.mxu0 %v5575_v5  ;;  %6073 = vmatprep.subr.bf16.mxu1 %v5577_v9  ;;  %v5729_v5 = vld [vmem:[#allocation5 + $0x13a0] sm:$0xff]  ;;  %v5731_v9 = vld [vmem:[#allocation5 + $0x13b0] sm:$0xff] }
 0xbfd   :  { %5910 = vmatpush1.bf16.msra.mxu0 %v5574_v10  ;;  %6074 = vmatpush1.bf16.msra.mxu1 %v5576_v15  ;;  %v5728_v10 = vld [vmem:[#allocation5 + $0x1398] sm:$0xff]  ;;  %v5730_v15 = vld [vmem:[#allocation5 + $0x13a8] sm:$0xff] }
 0xbfe   :  { %5911 = vmatprep.subr.bf16.mxu0 %v5586_v1  ;;  %6075 = vmatprep.subr.bf16.mxu1 %v5588_v16  ;;  %v5740_v1 = vld [vmem:[#allocation5 + $0x13f8] sm:$0xff]  ;;  %v5742_v16 = vld [vmem:[#allocation5 + $0x1408] sm:$0xff] }
 0xc01   :  { %5912 = vmatpush1.bf16.msra.mxu0 %v5585_v30  ;;  %6076 = vmatpush1.bf16.msra.mxu1 %v5587_v21  ;;  %v5739_v30 = vld [vmem:[#allocation5 + $0x13f0] sm:$0xff]  ;;  %v5741_v21 = vld [vmem:[#allocation5 + $0x1400] sm:$0xff] }
 0xc02   :  { %5913 = vmatprep.subr.bf16.mxu0 %v5597_v20  ;;  %6077 = vmatprep.subr.bf16.mxu1 %v5599_v27  ;;  %v5751_v20 = vld [vmem:[#allocation5 + $0x1450] sm:$0xff]  ;;  %v5753_v27 = vld [vmem:[#allocation5 + $0x1460] sm:$0xff] }
 0xc05   :  { %5914 = vmatpush1.bf16.msra.mxu0 %v5596_v6  ;;  %6078 = vmatpush1.bf16.msra.mxu1 %v5598_v23  ;;  %v5750_v6 = vld [vmem:[#allocation5 + $0x1448] sm:$0xff]  ;;  %v5752_v23 = vld [vmem:[#allocation5 + $0x1458] sm:$0xff] }
 0xc06   :  { %5915 = vmatprep.subr.bf16.mxu0 %v5608_v8  ;;  %6079 = vmatprep.subr.bf16.mxu1 %v5610_v32  ;;  %v5762_v8 = vld [vmem:[#allocation5 + $0x14a8] sm:$0xff]  ;;  %v5764_v32 = vld [vmem:[#allocation5 + $0x14b8] sm:$0xff] }
 0xc09   :  { %5916 = vmatpush1.bf16.msra.mxu0 %v5607_v26  ;;  %6080 = vmatpush1.bf16.msra.mxu1 %v5609_v28  ;;  %v5761_v26 = vld [vmem:[#allocation5 + $0x14a0] sm:$0xff]  ;;  %v5763_v28 = vld [vmem:[#allocation5 + $0x14b0] sm:$0xff] }
 0xc0a   :  { %5917 = vmatprep.subr.bf16.mxu0 %v5619_v13  ;;  %6081 = vmatprep.subr.bf16.mxu1 %v5621_v34  ;;  %v5773_v13 = vld [vmem:[#allocation5 + $0x1500] sm:$0xff]  ;;  %v5775_v34 = vld [vmem:[#allocation5 + $0x1510] sm:$0xff] }
 0xc0d   :  { %5918 = vmatpush1.bf16.msra.mxu0 %v5618_v35  ;;  %6082 = vmatpush1.bf16.msra.mxu1 %v5620_v37  ;;  %v5772_v35 = vld [vmem:[#allocation5 + $0x14f8] sm:$0xff]  ;;  %v5774_v37 = vld [vmem:[#allocation5 + $0x1508] sm:$0xff] }
 0xc0e   :  { %5928 = vmatprep.subr.bf16.mxu0 %v5630_v31  ;;  %6092 = vmatprep.subr.bf16.mxu1 %v5632_v41  ;;  %v5784_v31 = vld [vmem:[#allocation5 + $0x1558] sm:$0xff]  ;;  %v5786_v41 = vld [vmem:[#allocation5 + $0x1568] sm:$0xff] }
 0xc10   :  { %5920 = vmatmul.mubr.bf16.vlgmr.msra.gmra.mrb[24].mxu0 %v7836_v25  ;;  %6084 = vmatmul.mubr.bf16.vlgmr.msra.gmra.mrb[28].mxu1 %v7836_v25 }
 0xc11   :  { %5929 = vmatpush1.bf16.msra.mxu0 %v5629_v29  ;;  %6093 = vmatpush1.bf16.msra.mxu1 %v5631_v42  ;;  %v5783_v29 = vld [vmem:[#allocation5 + $0x1550] sm:$0xff]  ;;  %v5785_v42 = vld [vmem:[#allocation5 + $0x1560] sm:$0xff] }
 0xc12   :  { %5930 = vmatprep.subr.bf16.mxu0 %v5641_v43  ;;  %6094 = vmatprep.subr.bf16.mxu1 %v5643_v44  ;;  %v5795_v43 = vld [vmem:[#allocation5 + $0x15b0] sm:$0xff]  ;;  %v5797_v44 = vld [vmem:[#allocation5 + $0x15c0] sm:$0xff] }
 0xc13   :  { %5960 = vmatprep.mubr.bf16.mxu0 %v7842_v38  ;;  %6124 = vmatprep.mubr.bf16.mxu1 %v7842_v38 }
 0xc15   :  { %5931 = vmatpush1.bf16.msra.mxu0 %v5640_v45  ;;  %6095 = vmatpush1.bf16.msra.mxu1 %v5642_v46  ;;  %v5794_v45 = vld [vmem:[#allocation5 + $0x15a8] sm:$0xff]  ;;  %v5796_v46 = vld [vmem:[#allocation5 + $0x15b8] sm:$0xff] }
 0xc16   :  { %5932 = vmatprep.subr.bf16.mxu0 %v5652_v17  ;;  %6096 = vmatprep.subr.bf16.mxu1 %v5654_v47  ;;  %v5106_v17 = vld [vmem:[#allocation5 + $0x28] sm:$0xff]  ;;  %v5108_v47 = vld [vmem:[#allocation5 + $0x38] sm:$0xff] }
 0xc19   :  { %5933 = vmatpush1.bf16.msra.mxu0 %v5651_v48  ;;  %6097 = vmatpush1.bf16.msra.mxu1 %v5653_v49  ;;  %v5105_v48 = vld [vmem:[#allocation5 + $0x20] sm:$0xff]  ;;  %v5107_v49 = vld [vmem:[#allocation5 + $0x30] sm:$0xff] }
 0xc1a   :  { %5934 = vmatprep.subr.bf16.mxu0 %v5663_v50  ;;  %6098 = vmatprep.subr.bf16.mxu1 %v5665_v54  ;;  %v5117_v50 = vld [vmem:[#allocation5 + $0x80] sm:$0xff]  ;;  %v5119_v54 = vld [vmem:[#allocation5 + $0x90] sm:$0xff] }
 0xc1d   :  { %5935 = vmatpush1.bf16.msra.mxu0 %v5662_v33  ;;  %6099 = vmatpush1.bf16.msra.mxu1 %v5664_v55  ;;  %v5116_v33 = vld [vmem:[#allocation5 + $0x78] sm:$0xff]  ;;  %v5118_v55 = vld [vmem:[#allocation5 + $0x88] sm:$0xff] }
 0xc1e   :  { %5936 = vmatprep.subr.bf16.mxu0 %v5674_v7  ;;  %6100 = vmatprep.subr.bf16.mxu1 %v5676_v39  ;;  %v5128_v7 = vld [vmem:[#allocation5 + $0xd8] sm:$0xff]  ;;  %v5130_v39 = vld [vmem:[#allocation5 + $0xe8] sm:$0xff] }
 0xc21   :  { %5937 = vmatpush1.bf16.msra.mxu0 %v5673_v56  ;;  %6101 = vmatpush1.bf16.msra.mxu1 %v5675_v57  ;;  %v5127_v56 = vld [vmem:[#allocation5 + $0xd0] sm:$0xff]  ;;  %v5129_v57 = vld [vmem:[#allocation5 + $0xe0] sm:$0xff] }
 0xc22   :  { %5938 = vmatprep.subr.bf16.mxu0 %v5685_v11  ;;  %6102 = vmatprep.subr.bf16.mxu1 %v5687_v62  ;;  %v5139_v11 = vld [vmem:[#allocation5 + $0x130] sm:$0xff]  ;;  %v5141_v62 = vld [vmem:[#allocation5 + $0x140] sm:$0xff] }
 0xc25   :  { %5939 = vmatpush1.bf16.msra.mxu0 %v5684_v36  ;;  %6103 = vmatpush1.bf16.msra.mxu1 %v5686_v14  ;;  %v5138_v36 = vld [vmem:[#allocation5 + $0x128] sm:$0xff]  ;;  %v5140_v14 = vld [vmem:[#allocation5 + $0x138] sm:$0xff] }
 0xc26   :  { %5940 = vmatprep.subr.bf16.mxu0 %v5696_v19  ;;  %6104 = vmatprep.subr.bf16.mxu1 %v5698_v12  ;;  %v5150_v19 = vld [vmem:[#allocation5 + $0x188] sm:$0xff]  ;;  %v5152_v12 = vld [vmem:[#allocation5 + $0x198] sm:$0xff] }
 0xc29   :  { %5941 = vmatpush1.bf16.msra.mxu0 %v5695_v40  ;;  %6105 = vmatpush1.bf16.msra.mxu1 %v5697_v0  ;;  %v5149_v40 = vld [vmem:[#allocation5 + $0x180] sm:$0xff]  ;;  %v5151_v0 = vld [vmem:[#allocation5 + $0x190] sm:$0xff] }
 0xc2a   :  { %5942 = vmatprep.subr.bf16.mxu0 %v5707_v58  ;;  %6106 = vmatprep.subr.bf16.mxu1 %v5709_v52  ;;  %v5161_v58 = vld [vmem:[#allocation5 + $0x1e0] sm:$0xff]  ;;  %v5163_v52 = vld [vmem:[#allocation5 + $0x1f0] sm:$0xff] }
 0xc2d   :  { %5943 = vmatpush1.bf16.msra.mxu0 %v5706_v59  ;;  %6107 = vmatpush1.bf16.msra.mxu1 %v5708_v63  ;;  %v5160_v59 = vld [vmem:[#allocation5 + $0x1d8] sm:$0xff]  ;;  %v5162_v63 = vld [vmem:[#allocation5 + $0x1e8] sm:$0xff] }
 0xc2e   :  { %5944 = vmatprep.subr.bf16.mxu0 %v5718_v61  ;;  %6108 = vmatprep.subr.bf16.mxu1 %v5720_v18  ;;  %v5172_v61 = vld [vmem:[#allocation5 + $0x238] sm:$0xff]  ;;  %v5174_v18 = vld [vmem:[#allocation5 + $0x248] sm:$0xff] }
 0xc31   :  { %5945 = vmatpush1.bf16.msra.mxu0 %v5717_v4  ;;  %6109 = vmatpush1.bf16.msra.mxu1 %v5719_v51  ;;  %v5171_v4 = vld [vmem:[#allocation5 + $0x230] sm:$0xff]  ;;  %v5173_v51 = vld [vmem:[#allocation5 + $0x240] sm:$0xff] }
 0xc32   :  { %5946 = vmatprep.subr.bf16.mxu0 %v5729_v5  ;;  %6110 = vmatprep.subr.bf16.mxu1 %v5731_v9  ;;  %v5183_v5 = vld [vmem:[#allocation5 + $0x290] sm:$0xff]  ;;  %v5185_v9 = vld [vmem:[#allocation5 + $0x2a0] sm:$0xff] }
 0xc35   :  { %5947 = vmatpush1.bf16.msra.mxu0 %v5728_v10  ;;  %6111 = vmatpush1.bf16.msra.mxu1 %v5730_v15  ;;  %v5182_v10 = vld [vmem:[#allocation5 + $0x288] sm:$0xff]  ;;  %v5184_v15 = vld [vmem:[#allocation5 + $0x298] sm:$0xff] }
 0xc36   :  { %5948 = vmatprep.subr.bf16.mxu0 %v5740_v1  ;;  %6112 = vmatprep.subr.bf16.mxu1 %v5742_v16  ;;  %v5194_v1 = vld [vmem:[#allocation5 + $0x2e8] sm:$0xff]  ;;  %v5196_v16 = vld [vmem:[#allocation5 + $0x2f8] sm:$0xff] }
 0xc39   :  { %5949 = vmatpush1.bf16.msra.mxu0 %v5739_v30  ;;  %6113 = vmatpush1.bf16.msra.mxu1 %v5741_v21  ;;  %v5193_v30 = vld [vmem:[#allocation5 + $0x2e0] sm:$0xff]  ;;  %v5195_v21 = vld [vmem:[#allocation5 + $0x2f0] sm:$0xff] }
 0xc3a   :  { %5950 = vmatprep.subr.bf16.mxu0 %v5751_v20  ;;  %6114 = vmatprep.subr.bf16.mxu1 %v5753_v27  ;;  %v5205_v20 = vld [vmem:[#allocation5 + $0x340] sm:$0xff]  ;;  %v5207_v27 = vld [vmem:[#allocation5 + $0x350] sm:$0xff] }
 0xc3d   :  { %5951 = vmatpush1.bf16.msra.mxu0 %v5750_v6  ;;  %6115 = vmatpush1.bf16.msra.mxu1 %v5752_v23  ;;  %v5204_v6 = vld [vmem:[#allocation5 + $0x338] sm:$0xff]  ;;  %v5206_v23 = vld [vmem:[#allocation5 + $0x348] sm:$0xff] }
 0xc3e   :  { %5952 = vmatprep.subr.bf16.mxu0 %v5762_v8  ;;  %6116 = vmatprep.subr.bf16.mxu1 %v5764_v32  ;;  %v5216_v8 = vld [vmem:[#allocation5 + $0x398] sm:$0xff]  ;;  %v5218_v32 = vld [vmem:[#allocation5 + $0x3a8] sm:$0xff] }
 0xc41   :  { %5953 = vmatpush1.bf16.msra.mxu0 %v5761_v26  ;;  %6117 = vmatpush1.bf16.msra.mxu1 %v5763_v28  ;;  %v5215_v26 = vld [vmem:[#allocation5 + $0x390] sm:$0xff]  ;;  %v5217_v28 = vld [vmem:[#allocation5 + $0x3a0] sm:$0xff] }
 0xc42   :  { %5954 = vmatprep.subr.bf16.mxu0 %v5773_v13  ;;  %6118 = vmatprep.subr.bf16.mxu1 %v5775_v34  ;;  %v5227_v13 = vld [vmem:[#allocation5 + $0x3f0] sm:$0xff]  ;;  %v5229_v34 = vld [vmem:[#allocation5 + $0x400] sm:$0xff] }
 0xc45   :  { %5955 = vmatpush1.bf16.msra.mxu0 %v5772_v35  ;;  %6119 = vmatpush1.bf16.msra.mxu1 %v5774_v37  ;;  %v5226_v35 = vld [vmem:[#allocation5 + $0x3e8] sm:$0xff]  ;;  %v5228_v37 = vld [vmem:[#allocation5 + $0x3f8] sm:$0xff] }
 0xc46   :  { %5956 = vmatprep.subr.bf16.mxu0 %v5784_v31  ;;  %6120 = vmatprep.subr.bf16.mxu1 %v5786_v41  ;;  %v5238_v31 = vld [vmem:[#allocation5 + $0x448] sm:$0xff]  ;;  %v5240_v41 = vld [vmem:[#allocation5 + $0x458] sm:$0xff] }
 0xc49   :  { %5957 = vmatpush1.bf16.msra.mxu0 %v5783_v29  ;;  %6121 = vmatpush1.bf16.msra.mxu1 %v5785_v42  ;;  %v5237_v29 = vld [vmem:[#allocation5 + $0x440] sm:$0xff]  ;;  %v5239_v42 = vld [vmem:[#allocation5 + $0x450] sm:$0xff] }
 0xc4a   :  { %5958 = vmatprep.subr.bf16.mxu0 %v5795_v43  ;;  %6122 = vmatprep.subr.bf16.mxu1 %v5797_v44  ;;  %v5249_v43 = vld [vmem:[#allocation5 + $0x4a0] sm:$0xff]  ;;  %v5251_v44 = vld [vmem:[#allocation5 + $0x4b0] sm:$0xff] }
 0xc4d   :  { %5959 = vmatpush1.bf16.msra.mxu0 %v5794_v45  ;;  %6123 = vmatpush1.bf16.msra.mxu1 %v5796_v46  ;;  %v5248_v45 = vld [vmem:[#allocation5 + $0x498] sm:$0xff]  ;;  %v5250_v46 = vld [vmem:[#allocation5 + $0x4a8] sm:$0xff] }
 0xc4e   :  { %6133 = vmatprep.subr.bf16.mxu0 %v5106_v17  ;;  %6297 = vmatprep.subr.bf16.mxu1 %v5108_v47  ;;  %v5260_v17 = vld [vmem:[#allocation5 + $0x4f8] sm:$0xff]  ;;  %v5262_v47 = vld [vmem:[#allocation5 + $0x508] sm:$0xff] }
 0xc50   :  { %5961 = vmatmul.mubr.bf16.vlgmr.msra.gmra.mrb[24].mxu0 %v7838_v22  ;;  %6125 = vmatmul.mubr.bf16.vlgmr.msra.gmra.mrb[28].mxu1 %v7838_v22 }
 0xc51   :  { %6134 = vmatpush1.bf16.msra.mxu0 %v5105_v48  ;;  %6298 = vmatpush1.bf16.msra.mxu1 %v5107_v49  ;;  %v5259_v48 = vld [vmem:[#allocation5 + $0x4f0] sm:$0xff]  ;;  %v5261_v49 = vld [vmem:[#allocation5 + $0x500] sm:$0xff] }
 0xc52   :  { %6135 = vmatprep.subr.bf16.mxu0 %v5117_v50  ;;  %6299 = vmatprep.subr.bf16.mxu1 %v5119_v54  ;;  %v5271_v50 = vld [vmem:[#allocation5 + $0x550] sm:$0xff]  ;;  %v5273_v54 = vld [vmem:[#allocation5 + $0x560] sm:$0xff] }
 0xc53   :  { %6165 = vmatprep.mubr.bf16.mxu0 %v7822_v24  ;;  %6329 = vmatprep.mubr.bf16.mxu1 %v7822_v24 }
 0xc55   :  { %6136 = vmatpush1.bf16.msra.mxu0 %v5116_v33  ;;  %6300 = vmatpush1.bf16.msra.mxu1 %v5118_v55  ;;  %v5270_v33 = vld [vmem:[#allocation5 + $0x548] sm:$0xff]  ;;  %v5272_v55 = vld [vmem:[#allocation5 + $0x558] sm:$0xff] }
 0xc56   :  { %6137 = vmatprep.subr.bf16.mxu0 %v5128_v7  ;;  %6301 = vmatprep.subr.bf16.mxu1 %v5130_v39  ;;  %v5282_v7 = vld [vmem:[#allocation5 + $0x5a8] sm:$0xff]  ;;  %v5284_v39 = vld [vmem:[#allocation5 + $0x5b8] sm:$0xff] }
 0xc59   :  { %6138 = vmatpush1.bf16.msra.mxu0 %v5127_v56  ;;  %6302 = vmatpush1.bf16.msra.mxu1 %v5129_v57  ;;  %v5281_v56 = vld [vmem:[#allocation5 + $0x5a0] sm:$0xff]  ;;  %v5283_v57 = vld [vmem:[#allocation5 + $0x5b0] sm:$0xff] }
 0xc5a   :  { %6139 = vmatprep.subr.bf16.mxu0 %v5139_v11  ;;  %6303 = vmatprep.subr.bf16.mxu1 %v5141_v62  ;;  %v5293_v11 = vld [vmem:[#allocation5 + $0x600] sm:$0xff]  ;;  %v5295_v62 = vld [vmem:[#allocation5 + $0x610] sm:$0xff] }
 0xc5d   :  { %6140 = vmatpush1.bf16.msra.mxu0 %v5138_v36  ;;  %6304 = vmatpush1.bf16.msra.mxu1 %v5140_v14  ;;  %v5292_v36 = vld [vmem:[#allocation5 + $0x5f8] sm:$0xff]  ;;  %v5294_v14 = vld [vmem:[#allocation5 + $0x608] sm:$0xff] }
 0xc5e   :  { %6141 = vmatprep.subr.bf16.mxu0 %v5150_v19  ;;  %6305 = vmatprep.subr.bf16.mxu1 %v5152_v12  ;;  %v5304_v19 = vld [vmem:[#allocation5 + $0x658] sm:$0xff]  ;;  %v5306_v12 = vld [vmem:[#allocation5 + $0x668] sm:$0xff] }
 0xc61   :  { %6142 = vmatpush1.bf16.msra.mxu0 %v5149_v40  ;;  %6306 = vmatpush1.bf16.msra.mxu1 %v5151_v0  ;;  %v5303_v40 = vld [vmem:[#allocation5 + $0x650] sm:$0xff]  ;;  %v5305_v0 = vld [vmem:[#allocation5 + $0x660] sm:$0xff] }
 0xc62   :  { %6143 = vmatprep.subr.bf16.mxu0 %v5161_v58  ;;  %6307 = vmatprep.subr.bf16.mxu1 %v5163_v52  ;;  %v5315_v58 = vld [vmem:[#allocation5 + $0x6b0] sm:$0xff]  ;;  %v5317_v52 = vld [vmem:[#allocation5 + $0x6c0] sm:$0xff] }
 0xc65   :  { %6144 = vmatpush1.bf16.msra.mxu0 %v5160_v59  ;;  %6308 = vmatpush1.bf16.msra.mxu1 %v5162_v63  ;;  %v5314_v59 = vld [vmem:[#allocation5 + $0x6a8] sm:$0xff]  ;;  %v5316_v63 = vld [vmem:[#allocation5 + $0x6b8] sm:$0xff] }
 0xc66   :  { %6145 = vmatprep.subr.bf16.mxu0 %v5172_v61  ;;  %6309 = vmatprep.subr.bf16.mxu1 %v5174_v18  ;;  %v5326_v61 = vld [vmem:[#allocation5 + $0x708] sm:$0xff]  ;;  %v5328_v18 = vld [vmem:[#allocation5 + $0x718] sm:$0xff] }
 0xc69   :  { %6146 = vmatpush1.bf16.msra.mxu0 %v5171_v4  ;;  %6310 = vmatpush1.bf16.msra.mxu1 %v5173_v51  ;;  %v5325_v4 = vld [vmem:[#allocation5 + $0x700] sm:$0xff]  ;;  %v5327_v51 = vld [vmem:[#allocation5 + $0x710] sm:$0xff] }
 0xc6a   :  { %6147 = vmatprep.subr.bf16.mxu0 %v5183_v5  ;;  %6311 = vmatprep.subr.bf16.mxu1 %v5185_v9  ;;  %v5337_v5 = vld [vmem:[#allocation5 + $0x760] sm:$0xff]  ;;  %v5339_v9 = vld [vmem:[#allocation5 + $0x770] sm:$0xff] }
 0xc6d   :  { %6148 = vmatpush1.bf16.msra.mxu0 %v5182_v10  ;;  %6312 = vmatpush1.bf16.msra.mxu1 %v5184_v15  ;;  %v5336_v10 = vld [vmem:[#allocation5 + $0x758] sm:$0xff]  ;;  %v5338_v15 = vld [vmem:[#allocation5 + $0x768] sm:$0xff] }
 0xc6e   :  { %6149 = vmatprep.subr.bf16.mxu0 %v5194_v1  ;;  %6313 = vmatprep.subr.bf16.mxu1 %v5196_v16  ;;  %v5348_v1 = vld [vmem:[#allocation5 + $0x7b8] sm:$0xff]  ;;  %v5350_v16 = vld [vmem:[#allocation5 + $0x7c8] sm:$0xff] }
 0xc71   :  { %6150 = vmatpush1.bf16.msra.mxu0 %v5193_v30  ;;  %6314 = vmatpush1.bf16.msra.mxu1 %v5195_v21  ;;  %v5347_v30 = vld [vmem:[#allocation5 + $0x7b0] sm:$0xff]  ;;  %v5349_v21 = vld [vmem:[#allocation5 + $0x7c0] sm:$0xff] }
 0xc72   :  { %6151 = vmatprep.subr.bf16.mxu0 %v5205_v20  ;;  %6315 = vmatprep.subr.bf16.mxu1 %v5207_v27  ;;  %v5359_v20 = vld [vmem:[#allocation5 + $0x810] sm:$0xff]  ;;  %v5361_v27 = vld [vmem:[#allocation5 + $0x820] sm:$0xff] }
 0xc75   :  { %6152 = vmatpush1.bf16.msra.mxu0 %v5204_v6  ;;  %6316 = vmatpush1.bf16.msra.mxu1 %v5206_v23  ;;  %v5358_v6 = vld [vmem:[#allocation5 + $0x808] sm:$0xff]  ;;  %v5360_v23 = vld [vmem:[#allocation5 + $0x818] sm:$0xff] }
 0xc76   :  { %6153 = vmatprep.subr.bf16.mxu0 %v5216_v8  ;;  %6317 = vmatprep.subr.bf16.mxu1 %v5218_v32  ;;  %v5370_v8 = vld [vmem:[#allocation5 + $0x868] sm:$0xff]  ;;  %v5372_v32 = vld [vmem:[#allocation5 + $0x878] sm:$0xff] }
 0xc79   :  { %6154 = vmatpush1.bf16.msra.mxu0 %v5215_v26  ;;  %6318 = vmatpush1.bf16.msra.mxu1 %v5217_v28  ;;  %v5369_v26 = vld [vmem:[#allocation5 + $0x860] sm:$0xff]  ;;  %v5371_v28 = vld [vmem:[#allocation5 + $0x870] sm:$0xff] }
 0xc7a   :  { %6155 = vmatprep.subr.bf16.mxu0 %v5227_v13  ;;  %6319 = vmatprep.subr.bf16.mxu1 %v5229_v34  ;;  %v5381_v13 = vld [vmem:[#allocation5 + $0x8c0] sm:$0xff]  ;;  %v5383_v34 = vld [vmem:[#allocation5 + $0x8d0] sm:$0xff] }
 0xc7d   :  { %6156 = vmatpush1.bf16.msra.mxu0 %v5226_v35  ;;  %6320 = vmatpush1.bf16.msra.mxu1 %v5228_v37  ;;  %v5380_v35 = vld [vmem:[#allocation5 + $0x8b8] sm:$0xff]  ;;  %v5382_v37 = vld [vmem:[#allocation5 + $0x8c8] sm:$0xff] }
 0xc7e   :  { %6157 = vmatprep.subr.bf16.mxu0 %v5238_v31  ;;  %6321 = vmatprep.subr.bf16.mxu1 %v5240_v41  ;;  %v5392_v31 = vld [vmem:[#allocation5 + $0x918] sm:$0xff]  ;;  %v5394_v41 = vld [vmem:[#allocation5 + $0x928] sm:$0xff] }
 0xc81   :  { %6158 = vmatpush1.bf16.msra.mxu0 %v5237_v29  ;;  %6322 = vmatpush1.bf16.msra.mxu1 %v5239_v42  ;;  %v5391_v29 = vld [vmem:[#allocation5 + $0x910] sm:$0xff]  ;;  %v5393_v42 = vld [vmem:[#allocation5 + $0x920] sm:$0xff] }
 0xc82   :  { %6159 = vmatprep.subr.bf16.mxu0 %v5249_v43  ;;  %6323 = vmatprep.subr.bf16.mxu1 %v5251_v44  ;;  %v5403_v43 = vld [vmem:[#allocation5 + $0x970] sm:$0xff]  ;;  %v5405_v44 = vld [vmem:[#allocation5 + $0x980] sm:$0xff] }
 0xc85   :  { %6160 = vmatpush1.bf16.msra.mxu0 %v5248_v45  ;;  %6324 = vmatpush1.bf16.msra.mxu1 %v5250_v46  ;;  %v5402_v45 = vld [vmem:[#allocation5 + $0x968] sm:$0xff]  ;;  %v5404_v46 = vld [vmem:[#allocation5 + $0x978] sm:$0xff] }
 0xc86   :  { %6161 = vmatprep.subr.bf16.mxu0 %v5260_v17  ;;  %6325 = vmatprep.subr.bf16.mxu1 %v5262_v47  ;;  %v5414_v17 = vld [vmem:[#allocation5 + $0x9c8] sm:$0xff]  ;;  %v5416_v47 = vld [vmem:[#allocation5 + $0x9d8] sm:$0xff] }
 0xc89   :  { %6162 = vmatpush1.bf16.msra.mxu0 %v5259_v48  ;;  %6326 = vmatpush1.bf16.msra.mxu1 %v5261_v49  ;;  %v5413_v48 = vld [vmem:[#allocation5 + $0x9c0] sm:$0xff]  ;;  %v5415_v49 = vld [vmem:[#allocation5 + $0x9d0] sm:$0xff] }
 0xc8a   :  { %6163 = vmatprep.subr.bf16.mxu0 %v5271_v50  ;;  %6327 = vmatprep.subr.bf16.mxu1 %v5273_v54  ;;  %v5425_v50 = vld [vmem:[#allocation5 + $0xa20] sm:$0xff]  ;;  %v5427_v54 = vld [vmem:[#allocation5 + $0xa30] sm:$0xff] }
 0xc8d   :  { %6164 = vmatpush1.bf16.msra.mxu0 %v5270_v33  ;;  %6328 = vmatpush1.bf16.msra.mxu1 %v5272_v55  ;;  %v5424_v33 = vld [vmem:[#allocation5 + $0xa18] sm:$0xff]  ;;  %v5426_v55 = vld [vmem:[#allocation5 + $0xa28] sm:$0xff] }
 0xc8e   :  { %6174 = vmatprep.subr.bf16.mxu0 %v5282_v7  ;;  %6338 = vmatprep.subr.bf16.mxu1 %v5284_v39  ;;  %v5436_v7 = vld [vmem:[#allocation5 + $0xa78] sm:$0xff]  ;;  %v5438_v39 = vld [vmem:[#allocation5 + $0xa88] sm:$0xff] }
 0xc90   :  { %6166 = vmatmul.mubr.bf16.vlgmr.msra.gmra.mrb[28].mxu0 %v7818_v2  ;;  %6330 = vmatmul.mubr.bf16.vlgmr.msra.gmra.mrb[32].mxu1 %v7818_v2 }
 0xc91   :  { %6175 = vmatpush1.bf16.msra.mxu0 %v5281_v56  ;;  %6339 = vmatpush1.bf16.msra.mxu1 %v5283_v57  ;;  %v5435_v56 = vld [vmem:[#allocation5 + $0xa70] sm:$0xff]  ;;  %v5437_v57 = vld [vmem:[#allocation5 + $0xa80] sm:$0xff] }
 0xc92   :  { %6176 = vmatprep.subr.bf16.mxu0 %v5293_v11  ;;  %6340 = vmatprep.subr.bf16.mxu1 %v5295_v62  ;;  %v5447_v11 = vld [vmem:[#allocation5 + $0xad0] sm:$0xff]  ;;  %v5449_v62 = vld [vmem:[#allocation5 + $0xae0] sm:$0xff] }
 0xc93   :  { %6206 = vmatprep.mubr.bf16.mxu0 %v7824_v60  ;;  %6370 = vmatprep.mubr.bf16.mxu1 %v7824_v60 }
 0xc95   :  { %6177 = vmatpush1.bf16.msra.mxu0 %v5292_v36  ;;  %6341 = vmatpush1.bf16.msra.mxu1 %v5294_v14  ;;  %v5446_v36 = vld [vmem:[#allocation5 + $0xac8] sm:$0xff]  ;;  %v5448_v14 = vld [vmem:[#allocation5 + $0xad8] sm:$0xff] }
 0xc96   :  { %6178 = vmatprep.subr.bf16.mxu0 %v5304_v19  ;;  %6342 = vmatprep.subr.bf16.mxu1 %v5306_v12  ;;  %v5458_v19 = vld [vmem:[#allocation5 + $0xb28] sm:$0xff]  ;;  %v5460_v12 = vld [vmem:[#allocation5 + $0xb38] sm:$0xff] }
 0xc99   :  { %6179 = vmatpush1.bf16.msra.mxu0 %v5303_v40  ;;  %6343 = vmatpush1.bf16.msra.mxu1 %v5305_v0  ;;  %v5457_v40 = vld [vmem:[#allocation5 + $0xb20] sm:$0xff]  ;;  %v5459_v0 = vld [vmem:[#allocation5 + $0xb30] sm:$0xff] }
 0xc9a   :  { %6180 = vmatprep.subr.bf16.mxu0 %v5315_v58  ;;  %6344 = vmatprep.subr.bf16.mxu1 %v5317_v52  ;;  %v5469_v58 = vld [vmem:[#allocation5 + $0xb80] sm:$0xff]  ;;  %v5471_v52 = vld [vmem:[#allocation5 + $0xb90] sm:$0xff] }
 0xc9d   :  { %6181 = vmatpush1.bf16.msra.mxu0 %v5314_v59  ;;  %6345 = vmatpush1.bf16.msra.mxu1 %v5316_v63  ;;  %v5468_v59 = vld [vmem:[#allocation5 + $0xb78] sm:$0xff]  ;;  %v5470_v63 = vld [vmem:[#allocation5 + $0xb88] sm:$0xff] }
 0xc9e   :  { %6182 = vmatprep.subr.bf16.mxu0 %v5326_v61  ;;  %6346 = vmatprep.subr.bf16.mxu1 %v5328_v18  ;;  %v5480_v61 = vld [vmem:[#allocation5 + $0xbd8] sm:$0xff]  ;;  %v5482_v18 = vld [vmem:[#allocation5 + $0xbe8] sm:$0xff] }
 0xca1   :  { %6183 = vmatpush1.bf16.msra.mxu0 %v5325_v4  ;;  %6347 = vmatpush1.bf16.msra.mxu1 %v5327_v51  ;;  %v5479_v4 = vld [vmem:[#allocation5 + $0xbd0] sm:$0xff]  ;;  %v5481_v51 = vld [vmem:[#allocation5 + $0xbe0] sm:$0xff] }
 0xca2   :  { %6184 = vmatprep.subr.bf16.mxu0 %v5337_v5  ;;  %6348 = vmatprep.subr.bf16.mxu1 %v5339_v9  ;;  %v5491_v5 = vld [vmem:[#allocation5 + $0xc30] sm:$0xff]  ;;  %v5493_v9 = vld [vmem:[#allocation5 + $0xc40] sm:$0xff] }
 0xca5   :  { %6185 = vmatpush1.bf16.msra.mxu0 %v5336_v10  ;;  %6349 = vmatpush1.bf16.msra.mxu1 %v5338_v15  ;;  %v5490_v10 = vld [vmem:[#allocation5 + $0xc28] sm:$0xff]  ;;  %v5492_v15 = vld [vmem:[#allocation5 + $0xc38] sm:$0xff] }
 0xca6   :  { %6186 = vmatprep.subr.bf16.mxu0 %v5348_v1  ;;  %6350 = vmatprep.subr.bf16.mxu1 %v5350_v16  ;;  %v5502_v1 = vld [vmem:[#allocation5 + $0xc88] sm:$0xff]  ;;  %v5504_v16 = vld [vmem:[#allocation5 + $0xc98] sm:$0xff] }
 0xca9   :  { %6187 = vmatpush1.bf16.msra.mxu0 %v5347_v30  ;;  %6351 = vmatpush1.bf16.msra.mxu1 %v5349_v21  ;;  %v5501_v30 = vld [vmem:[#allocation5 + $0xc80] sm:$0xff]  ;;  %v5503_v21 = vld [vmem:[#allocation5 + $0xc90] sm:$0xff] }
 0xcaa   :  { %6188 = vmatprep.subr.bf16.mxu0 %v5359_v20  ;;  %6352 = vmatprep.subr.bf16.mxu1 %v5361_v27  ;;  %v5513_v20 = vld [vmem:[#allocation5 + $0xce0] sm:$0xff]  ;;  %v5515_v27 = vld [vmem:[#allocation5 + $0xcf0] sm:$0xff] }
 0xcad   :  { %6189 = vmatpush1.bf16.msra.mxu0 %v5358_v6  ;;  %6353 = vmatpush1.bf16.msra.mxu1 %v5360_v23  ;;  %v5512_v6 = vld [vmem:[#allocation5 + $0xcd8] sm:$0xff]  ;;  %v5514_v23 = vld [vmem:[#allocation5 + $0xce8] sm:$0xff] }
 0xcae   :  { %6190 = vmatprep.subr.bf16.mxu0 %v5370_v8  ;;  %6354 = vmatprep.subr.bf16.mxu1 %v5372_v32  ;;  %v5524_v8 = vld [vmem:[#allocation5 + $0xd38] sm:$0xff]  ;;  %v5526_v32 = vld [vmem:[#allocation5 + $0xd48] sm:$0xff] }
 0xcb1   :  { %6191 = vmatpush1.bf16.msra.mxu0 %v5369_v26  ;;  %6355 = vmatpush1.bf16.msra.mxu1 %v5371_v28  ;;  %v5523_v26 = vld [vmem:[#allocation5 + $0xd30] sm:$0xff]  ;;  %v5525_v28 = vld [vmem:[#allocation5 + $0xd40] sm:$0xff] }
 0xcb2   :  { %6192 = vmatprep.subr.bf16.mxu0 %v5381_v13  ;;  %6356 = vmatprep.subr.bf16.mxu1 %v5383_v34  ;;  %v5535_v13 = vld [vmem:[#allocation5 + $0xd90] sm:$0xff]  ;;  %v5537_v34 = vld [vmem:[#allocation5 + $0xda0] sm:$0xff] }
 0xcb5   :  { %6193 = vmatpush1.bf16.msra.mxu0 %v5380_v35  ;;  %6357 = vmatpush1.bf16.msra.mxu1 %v5382_v37  ;;  %v5534_v35 = vld [vmem:[#allocation5 + $0xd88] sm:$0xff]  ;;  %v5536_v37 = vld [vmem:[#allocation5 + $0xd98] sm:$0xff] }
 0xcb6   :  { %6194 = vmatprep.subr.bf16.mxu0 %v5392_v31  ;;  %6358 = vmatprep.subr.bf16.mxu1 %v5394_v41  ;;  %v5546_v31 = vld [vmem:[#allocation5 + $0xde8] sm:$0xff]  ;;  %v5548_v41 = vld [vmem:[#allocation5 + $0xdf8] sm:$0xff] }
 0xcb9   :  { %6195 = vmatpush1.bf16.msra.mxu0 %v5391_v29  ;;  %6359 = vmatpush1.bf16.msra.mxu1 %v5393_v42  ;;  %v5545_v29 = vld [vmem:[#allocation5 + $0xde0] sm:$0xff]  ;;  %v5547_v42 = vld [vmem:[#allocation5 + $0xdf0] sm:$0xff] }
 0xcba   :  { %6196 = vmatprep.subr.bf16.mxu0 %v5403_v43  ;;  %6360 = vmatprep.subr.bf16.mxu1 %v5405_v44  ;;  %v5557_v43 = vld [vmem:[#allocation5 + $0xe40] sm:$0xff]  ;;  %v5559_v44 = vld [vmem:[#allocation5 + $0xe50] sm:$0xff] }
 0xcbd   :  { %6197 = vmatpush1.bf16.msra.mxu0 %v5402_v45  ;;  %6361 = vmatpush1.bf16.msra.mxu1 %v5404_v46  ;;  %v5556_v45 = vld [vmem:[#allocation5 + $0xe38] sm:$0xff]  ;;  %v5558_v46 = vld [vmem:[#allocation5 + $0xe48] sm:$0xff] }
 0xcbe   :  { %6198 = vmatprep.subr.bf16.mxu0 %v5414_v17  ;;  %6362 = vmatprep.subr.bf16.mxu1 %v5416_v47  ;;  %v5568_v17 = vld [vmem:[#allocation5 + $0xe98] sm:$0xff]  ;;  %v5570_v47 = vld [vmem:[#allocation5 + $0xea8] sm:$0xff] }
 0xcc1   :  { %6199 = vmatpush1.bf16.msra.mxu0 %v5413_v48  ;;  %6363 = vmatpush1.bf16.msra.mxu1 %v5415_v49  ;;  %v5567_v48 = vld [vmem:[#allocation5 + $0xe90] sm:$0xff]  ;;  %v5569_v49 = vld [vmem:[#allocation5 + $0xea0] sm:$0xff] }
 0xcc2   :  { %6200 = vmatprep.subr.bf16.mxu0 %v5425_v50  ;;  %6364 = vmatprep.subr.bf16.mxu1 %v5427_v54  ;;  %v5579_v50 = vld [vmem:[#allocation5 + $0xef0] sm:$0xff]  ;;  %v5581_v54 = vld [vmem:[#allocation5 + $0xf00] sm:$0xff] }
 0xcc5   :  { %6201 = vmatpush1.bf16.msra.mxu0 %v5424_v33  ;;  %6365 = vmatpush1.bf16.msra.mxu1 %v5426_v55  ;;  %v5578_v33 = vld [vmem:[#allocation5 + $0xee8] sm:$0xff]  ;;  %v5580_v55 = vld [vmem:[#allocation5 + $0xef8] sm:$0xff] }
 0xcc6   :  { %6202 = vmatprep.subr.bf16.mxu0 %v5436_v7  ;;  %6366 = vmatprep.subr.bf16.mxu1 %v5438_v39  ;;  %v5590_v7 = vld [vmem:[#allocation5 + $0xf48] sm:$0xff]  ;;  %v5592_v39 = vld [vmem:[#allocation5 + $0xf58] sm:$0xff] }
 0xcc9   :  { %6203 = vmatpush1.bf16.msra.mxu0 %v5435_v56  ;;  %6367 = vmatpush1.bf16.msra.mxu1 %v5437_v57  ;;  %v5589_v56 = vld [vmem:[#allocation5 + $0xf40] sm:$0xff]  ;;  %v5591_v57 = vld [vmem:[#allocation5 + $0xf50] sm:$0xff] }
 0xcca   :  { %6204 = vmatprep.subr.bf16.mxu0 %v5447_v11  ;;  %6368 = vmatprep.subr.bf16.mxu1 %v5449_v62  ;;  %v5601_v11 = vld [vmem:[#allocation5 + $0xfa0] sm:$0xff]  ;;  %v5603_v62 = vld [vmem:[#allocation5 + $0xfb0] sm:$0xff] }
 0xccd   :  { %6205 = vmatpush1.bf16.msra.mxu0 %v5446_v36  ;;  %6369 = vmatpush1.bf16.msra.mxu1 %v5448_v14  ;;  %v5600_v36 = vld [vmem:[#allocation5 + $0xf98] sm:$0xff]  ;;  %v5602_v14 = vld [vmem:[#allocation5 + $0xfa8] sm:$0xff] }
 0xcce   :  { %6215 = vmatprep.subr.bf16.mxu0 %v5458_v19  ;;  %6379 = vmatprep.subr.bf16.mxu1 %v5460_v12  ;;  %v5612_v19 = vld [vmem:[#allocation5 + $0xff8] sm:$0xff]  ;;  %v5614_v12 = vld [vmem:[#allocation5 + $0x1008] sm:$0xff] }
 0xcd0   :  { %6207 = vmatmul.mubr.bf16.vlgmr.msra.gmra.mrb[28].mxu0 %v7820_v3  ;;  %6371 = vmatmul.mubr.bf16.vlgmr.msra.gmra.mrb[32].mxu1 %v7820_v3 }
 0xcd1   :  { %6216 = vmatpush1.bf16.msra.mxu0 %v5457_v40  ;;  %6380 = vmatpush1.bf16.msra.mxu1 %v5459_v0  ;;  %v5611_v40 = vld [vmem:[#allocation5 + $0xff0] sm:$0xff]  ;;  %v5613_v0 = vld [vmem:[#allocation5 + $0x1000] sm:$0xff] }
 0xcd2   :  { %6217 = vmatprep.subr.bf16.mxu0 %v5469_v58  ;;  %6381 = vmatprep.subr.bf16.mxu1 %v5471_v52  ;;  %v5623_v58 = vld [vmem:[#allocation5 + $0x1050] sm:$0xff]  ;;  %v5625_v52 = vld [vmem:[#allocation5 + $0x1060] sm:$0xff] }
 0xcd3   :  { %6247 = vmatprep.mubr.bf16.mxu0 %v7840_v53  ;;  %6411 = vmatprep.mubr.bf16.mxu1 %v7840_v53 }
 0xcd5   :  { %6218 = vmatpush1.bf16.msra.mxu0 %v5468_v59  ;;  %6382 = vmatpush1.bf16.msra.mxu1 %v5470_v63  ;;  %v5622_v59 = vld [vmem:[#allocation5 + $0x1048] sm:$0xff]  ;;  %v5624_v63 = vld [vmem:[#allocation5 + $0x1058] sm:$0xff] }
 0xcd6   :  { %6219 = vmatprep.subr.bf16.mxu0 %v5480_v61  ;;  %6383 = vmatprep.subr.bf16.mxu1 %v5482_v18  ;;  %v5634_v61 = vld [vmem:[#allocation5 + $0x10a8] sm:$0xff]  ;;  %v5636_v18 = vld [vmem:[#allocation5 + $0x10b8] sm:$0xff] }
 0xcd9   :  { %6220 = vmatpush1.bf16.msra.mxu0 %v5479_v4  ;;  %6384 = vmatpush1.bf16.msra.mxu1 %v5481_v51  ;;  %v5633_v4 = vld [vmem:[#allocation5 + $0x10a0] sm:$0xff]  ;;  %v5635_v51 = vld [vmem:[#allocation5 + $0x10b0] sm:$0xff] }
 0xcda   :  { %6221 = vmatprep.subr.bf16.mxu0 %v5491_v5  ;;  %6385 = vmatprep.subr.bf16.mxu1 %v5493_v9  ;;  %v5645_v5 = vld [vmem:[#allocation5 + $0x1100] sm:$0xff]  ;;  %v5647_v9 = vld [vmem:[#allocation5 + $0x1110] sm:$0xff] }
 0xcdd   :  { %6222 = vmatpush1.bf16.msra.mxu0 %v5490_v10  ;;  %6386 = vmatpush1.bf16.msra.mxu1 %v5492_v15  ;;  %v5644_v10 = vld [vmem:[#allocation5 + $0x10f8] sm:$0xff]  ;;  %v5646_v15 = vld [vmem:[#allocation5 + $0x1108] sm:$0xff] }
 0xcde   :  { %6223 = vmatprep.subr.bf16.mxu0 %v5502_v1  ;;  %6387 = vmatprep.subr.bf16.mxu1 %v5504_v16  ;;  %v5656_v1 = vld [vmem:[#allocation5 + $0x1158] sm:$0xff]  ;;  %v5658_v16 = vld [vmem:[#allocation5 + $0x1168] sm:$0xff] }
 0xce1   :  { %6224 = vmatpush1.bf16.msra.mxu0 %v5501_v30  ;;  %6388 = vmatpush1.bf16.msra.mxu1 %v5503_v21  ;;  %v5655_v30 = vld [vmem:[#allocation5 + $0x1150] sm:$0xff]  ;;  %v5657_v21 = vld [vmem:[#allocation5 + $0x1160] sm:$0xff] }
 0xce2   :  { %6225 = vmatprep.subr.bf16.mxu0 %v5513_v20  ;;  %6389 = vmatprep.subr.bf16.mxu1 %v5515_v27  ;;  %v5667_v20 = vld [vmem:[#allocation5 + $0x11b0] sm:$0xff]  ;;  %v5669_v27 = vld [vmem:[#allocation5 + $0x11c0] sm:$0xff] }
 0xce5   :  { %6226 = vmatpush1.bf16.msra.mxu0 %v5512_v6  ;;  %6390 = vmatpush1.bf16.msra.mxu1 %v5514_v23  ;;  %v5666_v6 = vld [vmem:[#allocation5 + $0x11a8] sm:$0xff]  ;;  %v5668_v23 = vld [vmem:[#allocation5 + $0x11b8] sm:$0xff] }
 0xce6   :  { %6227 = vmatprep.subr.bf16.mxu0 %v5524_v8  ;;  %6391 = vmatprep.subr.bf16.mxu1 %v5526_v32  ;;  %v5678_v8 = vld [vmem:[#allocation5 + $0x1208] sm:$0xff]  ;;  %v5680_v32 = vld [vmem:[#allocation5 + $0x1218] sm:$0xff] }
 0xce9   :  { %6228 = vmatpush1.bf16.msra.mxu0 %v5523_v26  ;;  %6392 = vmatpush1.bf16.msra.mxu1 %v5525_v28  ;;  %v5677_v26 = vld [vmem:[#allocation5 + $0x1200] sm:$0xff]  ;;  %v5679_v28 = vld [vmem:[#allocation5 + $0x1210] sm:$0xff] }
 0xcea   :  { %6229 = vmatprep.subr.bf16.mxu0 %v5535_v13  ;;  %6393 = vmatprep.subr.bf16.mxu1 %v5537_v34  ;;  %v5689_v13 = vld [vmem:[#allocation5 + $0x1260] sm:$0xff]  ;;  %v5691_v34 = vld [vmem:[#allocation5 + $0x1270] sm:$0xff] }
 0xced   :  { %6230 = vmatpush1.bf16.msra.mxu0 %v5534_v35  ;;  %6394 = vmatpush1.bf16.msra.mxu1 %v5536_v37  ;;  %v5688_v35 = vld [vmem:[#allocation5 + $0x1258] sm:$0xff]  ;;  %v5690_v37 = vld [vmem:[#allocation5 + $0x1268] sm:$0xff] }
 0xcee   :  { %6231 = vmatprep.subr.bf16.mxu0 %v5546_v31  ;;  %6395 = vmatprep.subr.bf16.mxu1 %v5548_v41 }
 0xcf1   :  { %6232 = vmatpush1.bf16.msra.mxu0 %v5545_v29  ;;  %6396 = vmatpush1.bf16.msra.mxu1 %v5547_v42  ;;  %v5700_v29 = vld [vmem:[#allocation5 + $0x12b8] sm:$0xff]  ;;  %v5702_v42 = vld [vmem:[#allocation5 + $0x12c8] sm:$0xff] }
 0xcf2   :  { %6233 = vmatprep.subr.bf16.mxu0 %v5557_v43  ;;  %6397 = vmatprep.subr.bf16.mxu1 %v5559_v44 }
 0xcf5   :  { %6234 = vmatpush1.bf16.msra.mxu0 %v5556_v45  ;;  %6398 = vmatpush1.bf16.msra.mxu1 %v5558_v46 }
 0xcf6   :  { %6235 = vmatprep.subr.bf16.mxu0 %v5568_v17  ;;  %6399 = vmatprep.subr.bf16.mxu1 %v5570_v47 }
 0xcf9   :  { %6236 = vmatpush1.bf16.msra.mxu0 %v5567_v48  ;;  %6400 = vmatpush1.bf16.msra.mxu1 %v5569_v49  ;;  %v5699_v48 = vld [vmem:[#allocation5 + $0x12b0] sm:$0xff]  ;;  %v5701_v49 = vld [vmem:[#allocation5 + $0x12c0] sm:$0xff] }
 0xcfa   :  { %6237 = vmatprep.subr.bf16.mxu0 %v5579_v50  ;;  %6401 = vmatprep.subr.bf16.mxu1 %v5581_v54  ;;  %v5711_v50 = vld [vmem:[#allocation5 + $0x1310] sm:$0xff]  ;;  %v5713_v54 = vld [vmem:[#allocation5 + $0x1320] sm:$0xff] }
 0xcfd   :  { %6238 = vmatpush1.bf16.msra.mxu0 %v5578_v33  ;;  %6402 = vmatpush1.bf16.msra.mxu1 %v5580_v55  ;;  %v5710_v33 = vld [vmem:[#allocation5 + $0x1308] sm:$0xff]  ;;  %v5712_v55 = vld [vmem:[#allocation5 + $0x1318] sm:$0xff] }
 0xcfe   :  { %6239 = vmatprep.subr.bf16.mxu0 %v5590_v7  ;;  %6403 = vmatprep.subr.bf16.mxu1 %v5592_v39  ;;  %v5722_v7 = vld [vmem:[#allocation5 + $0x1368] sm:$0xff]  ;;  %v5724_v39 = vld [vmem:[#allocation5 + $0x1378] sm:$0xff] }
 0xd01   :  { %6240 = vmatpush1.bf16.msra.mxu0 %v5589_v56  ;;  %6404 = vmatpush1.bf16.msra.mxu1 %v5591_v57  ;;  %v5721_v56 = vld [vmem:[#allocation5 + $0x1360] sm:$0xff]  ;;  %v5723_v57 = vld [vmem:[#allocation5 + $0x1370] sm:$0xff] }
 0xd02   :  { %6241 = vmatprep.subr.bf16.mxu0 %v5601_v11  ;;  %6405 = vmatprep.subr.bf16.mxu1 %v5603_v62  ;;  %v5733_v11 = vld [vmem:[#allocation5 + $0x13c0] sm:$0xff]  ;;  %v5735_v62 = vld [vmem:[#allocation5 + $0x13d0] sm:$0xff] }
 0xd05   :  { %6242 = vmatpush1.bf16.msra.mxu0 %v5600_v36  ;;  %6406 = vmatpush1.bf16.msra.mxu1 %v5602_v14  ;;  %v5732_v36 = vld [vmem:[#allocation5 + $0x13b8] sm:$0xff]  ;;  %v5734_v14 = vld [vmem:[#allocation5 + $0x13c8] sm:$0xff] }
 0xd06   :  { %6243 = vmatprep.subr.bf16.mxu0 %v5612_v19  ;;  %6407 = vmatprep.subr.bf16.mxu1 %v5614_v12  ;;  %v5744_v19 = vld [vmem:[#allocation5 + $0x1418] sm:$0xff]  ;;  %v5746_v12 = vld [vmem:[#allocation5 + $0x1428] sm:$0xff] }
 0xd09   :  { %6244 = vmatpush1.bf16.msra.mxu0 %v5611_v40  ;;  %6408 = vmatpush1.bf16.msra.mxu1 %v5613_v0  ;;  %v5743_v40 = vld [vmem:[#allocation5 + $0x1410] sm:$0xff]  ;;  %v5745_v0 = vld [vmem:[#allocation5 + $0x1420] sm:$0xff] }
 0xd0a   :  { %6245 = vmatprep.subr.bf16.mxu0 %v5623_v58  ;;  %6409 = vmatprep.subr.bf16.mxu1 %v5625_v52  ;;  %v5755_v58 = vld [vmem:[#allocation5 + $0x1470] sm:$0xff]  ;;  %v5757_v52 = vld [vmem:[#allocation5 + $0x1480] sm:$0xff] }
 0xd0d   :  { %6246 = vmatpush1.bf16.msra.mxu0 %v5622_v59  ;;  %6410 = vmatpush1.bf16.msra.mxu1 %v5624_v63  ;;  %v5754_v59 = vld [vmem:[#allocation5 + $0x1468] sm:$0xff]  ;;  %v5756_v63 = vld [vmem:[#allocation5 + $0x1478] sm:$0xff] }
 0xd0e   :  { %6256 = vmatprep.subr.bf16.mxu0 %v5634_v61  ;;  %6420 = vmatprep.subr.bf16.mxu1 %v5636_v18  ;;  %v5766_v61 = vld [vmem:[#allocation5 + $0x14c8] sm:$0xff]  ;;  %v5768_v18 = vld [vmem:[#allocation5 + $0x14d8] sm:$0xff] }
 0xd10   :  { %6248 = vmatmul.mubr.bf16.vlgmr.msra.gmra.mrb[28].mxu0 %v7836_v25  ;;  %6412 = vmatmul.mubr.bf16.vlgmr.msra.gmra.mrb[32].mxu1 %v7836_v25 }
 0xd11   :  { %6257 = vmatpush1.bf16.msra.mxu0 %v5633_v4  ;;  %6421 = vmatpush1.bf16.msra.mxu1 %v5635_v51  ;;  %v5765_v4 = vld [vmem:[#allocation5 + $0x14c0] sm:$0xff]  ;;  %v5767_v51 = vld [vmem:[#allocation5 + $0x14d0] sm:$0xff] }
 0xd12   :  { %6258 = vmatprep.subr.bf16.mxu0 %v5645_v5  ;;  %6422 = vmatprep.subr.bf16.mxu1 %v5647_v9  ;;  %v5777_v5 = vld [vmem:[#allocation5 + $0x1520] sm:$0xff]  ;;  %v5779_v9 = vld [vmem:[#allocation5 + $0x1530] sm:$0xff] }
 0xd13   :  { %6288 = vmatprep.mubr.bf16.mxu0 %v7842_v38  ;;  %6452 = vmatprep.mubr.bf16.mxu1 %v7842_v38 }
 0xd15   :  { %6259 = vmatpush1.bf16.msra.mxu0 %v5644_v10  ;;  %6423 = vmatpush1.bf16.msra.mxu1 %v5646_v15  ;;  %v5776_v10 = vld [vmem:[#allocation5 + $0x1518] sm:$0xff]  ;;  %v5778_v15 = vld [vmem:[#allocation5 + $0x1528] sm:$0xff] }
 0xd16   :  { %6260 = vmatprep.subr.bf16.mxu0 %v5656_v1  ;;  %6424 = vmatprep.subr.bf16.mxu1 %v5658_v16  ;;  %v5788_v1 = vld [vmem:[#allocation5 + $0x1578] sm:$0xff]  ;;  %v5790_v16 = vld [vmem:[#allocation5 + $0x1588] sm:$0xff] }
 0xd19   :  { %6261 = vmatpush1.bf16.msra.mxu0 %v5655_v30  ;;  %6425 = vmatpush1.bf16.msra.mxu1 %v5657_v21  ;;  %v5787_v30 = vld [vmem:[#allocation5 + $0x1570] sm:$0xff]  ;;  %v5789_v21 = vld [vmem:[#allocation5 + $0x1580] sm:$0xff] }
 0xd1a   :  { %6262 = vmatprep.subr.bf16.mxu0 %v5667_v20  ;;  %6426 = vmatprep.subr.bf16.mxu1 %v5669_v27  ;;  %v5799_v20 = vld [vmem:[#allocation5 + $0x15d0] sm:$0xff]  ;;  %v5801_v27 = vld [vmem:[#allocation5 + $0x15e0] sm:$0xff] }
 0xd1d   :  { %6263 = vmatpush1.bf16.msra.mxu0 %v5666_v6  ;;  %6427 = vmatpush1.bf16.msra.mxu1 %v5668_v23  ;;  %v5798_v6 = vld [vmem:[#allocation5 + $0x15c8] sm:$0xff]  ;;  %v5800_v23 = vld [vmem:[#allocation5 + $0x15d8] sm:$0xff] }
 0xd1e   :  { %6264 = vmatprep.subr.bf16.mxu0 %v5678_v8  ;;  %6428 = vmatprep.subr.bf16.mxu1 %v5680_v32  ;;  %v5110_v8 = vld [vmem:[#allocation5 + $0x48] sm:$0xff]  ;;  %v5199_v32 = vld [vmem:[#allocation5 + $0x310] sm:$0xff] }
 0xd21   :  { %6265 = vmatpush1.bf16.msra.mxu0 %v5677_v26  ;;  %6429 = vmatpush1.bf16.msra.mxu1 %v5679_v28  ;;  %v5109_v26 = vld [vmem:[#allocation5 + $0x40] sm:$0xff]  ;;  %v5111_v28 = vld [vmem:[#allocation5 + $0x50] sm:$0xff] }
 0xd22   :  { %6266 = vmatprep.subr.bf16.mxu0 %v5689_v13  ;;  %6430 = vmatprep.subr.bf16.mxu1 %v5691_v34  ;;  %v5121_v13 = vld [vmem:[#allocation5 + $0xa0] sm:$0xff]  ;;  %v5210_v34 = vld [vmem:[#allocation5 + $0x368] sm:$0xff] }
 0xd23   :  { %v5962_v31 = vpop.f32.mrb[24].mxu0  ;;  %v6126_v41 = vpop.f32.mrb[28].mxu1 }
 0xd24   :  { %6785 = vst [vmem:[#allocation15] sm:$0xff] %v5962_v31  ;;  %6787 = vst [vmem:[#allocation15 + $0x10] sm:$0xff] %v6126_v41  ;;  %v5964_v43 = vpop.f32.mrb[25].mxu0  ;;  %v6128_v44 = vpop.f32.mrb[29].mxu1  ;;  %v5132_v31 = vld [vmem:[#allocation5 + $0xf8] sm:$0xff]  ;;  %v5221_v41 = vld [vmem:[#allocation5 + $0x3c0] sm:$0xff] }
 0xd25   :  { %6786 = vst [vmem:[#allocation15 + $0x8] sm:$0xff] %v5964_v43  ;;  %6788 = vst [vmem:[#allocation15 + $0x18] sm:$0xff] %v6128_v44  ;;  %v5966_v45 = vpop.f32.mrb[26].mxu0  ;;  %v6130_v46 = vpop.f32.mrb[30].mxu1  ;;  %6267 = vmatpush1.bf16.msra.mxu0 %v5688_v35  ;;  %6431 = vmatpush1.bf16.msra.mxu1 %v5690_v37  ;;  %v5120_v35 = vld [vmem:[#allocation5 + $0x98] sm:$0xff]  ;;  %v5122_v37 = vld [vmem:[#allocation5 + $0xa8] sm:$0xff] }
 0xd26   :  { %v5967_v17 = vpop.f32.mrb[27].mxu0  ;;  %v6131_v47 = vpop.f32.mrb[31].mxu1  ;;  %6268 = vmatprep.subr.bf16.mxu0 %v5700_v29  ;;  %6432 = vmatprep.subr.bf16.mxu1 %v5702_v42  ;;  %v5131_v29 = vld [vmem:[#allocation5 + $0xf0] sm:$0xff]  ;;  %v5133_v42 = vld [vmem:[#allocation5 + $0x100] sm:$0xff]  ;;  %v5232_v44 = vld [vmem:[#allocation5 + $0x418] sm:$0xff] }
 0xd27   :  { %v5143_v43 = vld [vmem:[#allocation5 + $0x150] sm:$0xff]  ;;  %v5142_v45 = vld [vmem:[#allocation5 + $0x148] sm:$0xff]  ;;  %v5144_v46 = vld [vmem:[#allocation5 + $0x158] sm:$0xff] }
 0xd28   :  { %v5154_v17 = vld [vmem:[#allocation5 + $0x1a8] sm:$0xff]  ;;  %v5243_v47 = vld [vmem:[#allocation5 + $0x470] sm:$0xff] }
 0xd29   :  { %6269 = vmatpush1.bf16.msra.mxu0 %v5699_v48  ;;  %6433 = vmatpush1.bf16.msra.mxu1 %v5701_v49  ;;  %v5155_v48 = vld [vmem:[#allocation5 + $0x1b0] sm:$0xff]  ;;  %v5165_v49 = vld [vmem:[#allocation5 + $0x200] sm:$0xff] }
 0xd2a   :  { %6270 = vmatprep.subr.bf16.mxu0 %v5711_v50  ;;  %6434 = vmatprep.subr.bf16.mxu1 %v5713_v54  ;;  %v5254_v50 = vld [vmem:[#allocation5 + $0x4c8] sm:$0xff]  ;;  %v5164_v54 = vld [vmem:[#allocation5 + $0x1f8] sm:$0xff] }
 0xd2d   :  { %6271 = vmatpush1.bf16.msra.mxu0 %v5710_v33  ;;  %6435 = vmatpush1.bf16.msra.mxu1 %v5712_v55  ;;  %v5166_v33 = vld [vmem:[#allocation5 + $0x208] sm:$0xff]  ;;  %v5176_v55 = vld [vmem:[#allocation5 + $0x258] sm:$0xff] }
 0xd2e   :  { %6272 = vmatprep.subr.bf16.mxu0 %v5722_v7  ;;  %6436 = vmatprep.subr.bf16.mxu1 %v5724_v39  ;;  %v5265_v7 = vld [vmem:[#allocation5 + $0x520] sm:$0xff]  ;;  %v5175_v39 = vld [vmem:[#allocation5 + $0x250] sm:$0xff] }
 0xd31   :  { %6273 = vmatpush1.bf16.msra.mxu0 %v5721_v56  ;;  %6437 = vmatpush1.bf16.msra.mxu1 %v5723_v57  ;;  %v5177_v56 = vld [vmem:[#allocation5 + $0x260] sm:$0xff]  ;;  %v5187_v57 = vld [vmem:[#allocation5 + $0x2b0] sm:$0xff] }
 0xd32   :  { %6274 = vmatprep.subr.bf16.mxu0 %v5733_v11  ;;  %6438 = vmatprep.subr.bf16.mxu1 %v5735_v62  ;;  %v5276_v11 = vld [vmem:[#allocation5 + $0x578] sm:$0xff]  ;;  %v5186_v62 = vld [vmem:[#allocation5 + $0x2a8] sm:$0xff] }
 0xd35   :  { %6275 = vmatpush1.bf16.msra.mxu0 %v5732_v36  ;;  %6439 = vmatpush1.bf16.msra.mxu1 %v5734_v14  ;;  %v5188_v36 = vld [vmem:[#allocation5 + $0x2b8] sm:$0xff]  ;;  %v5198_v14 = vld [vmem:[#allocation5 + $0x308] sm:$0xff] }
 0xd36   :  { %6276 = vmatprep.subr.bf16.mxu0 %v5744_v19  ;;  %6440 = vmatprep.subr.bf16.mxu1 %v5746_v12  ;;  %v5375_v19 = vld [vmem:[#allocation5 + $0x890] sm:$0xff]  ;;  %v5197_v12 = vld [vmem:[#allocation5 + $0x300] sm:$0xff] }
 0xd39   :  { %6277 = vmatpush1.bf16.msra.mxu0 %v5743_v40  ;;  %6441 = vmatpush1.bf16.msra.mxu1 %v5745_v0  ;;  %v5287_v40 = vld [vmem:[#allocation5 + $0x5d0] sm:$0xff]  ;;  %v5209_v0 = vld [vmem:[#allocation5 + $0x360] sm:$0xff] }
 0xd3a   :  { %6278 = vmatprep.subr.bf16.mxu0 %v5755_v58  ;;  %6442 = vmatprep.subr.bf16.mxu1 %v5757_v52  ;;  %v5386_v58 = vld [vmem:[#allocation5 + $0x8e8] sm:$0xff]  ;;  %v5208_v52 = vld [vmem:[#allocation5 + $0x358] sm:$0xff] }
 0xd3d   :  { %6279 = vmatpush1.bf16.msra.mxu0 %v5754_v59  ;;  %6443 = vmatpush1.bf16.msra.mxu1 %v5756_v63  ;;  %v5298_v59 = vld [vmem:[#allocation5 + $0x628] sm:$0xff]  ;;  %v5220_v63 = vld [vmem:[#allocation5 + $0x3b8] sm:$0xff] }
 0xd3e   :  { %6280 = vmatprep.subr.bf16.mxu0 %v5766_v61  ;;  %6444 = vmatprep.subr.bf16.mxu1 %v5768_v18  ;;  %v5397_v61 = vld [vmem:[#allocation5 + $0x940] sm:$0xff]  ;;  %v5219_v18 = vld [vmem:[#allocation5 + $0x3b0] sm:$0xff] }
 0xd41   :  { %6281 = vmatpush1.bf16.msra.mxu0 %v5765_v4  ;;  %6445 = vmatpush1.bf16.msra.mxu1 %v5767_v51  ;;  %v5309_v4 = vld [vmem:[#allocation5 + $0x680] sm:$0xff]  ;;  %v5231_v51 = vld [vmem:[#allocation5 + $0x410] sm:$0xff] }
 0xd42   :  { %6282 = vmatprep.subr.bf16.mxu0 %v5777_v5  ;;  %6446 = vmatprep.subr.bf16.mxu1 %v5779_v9  ;;  %v5408_v5 = vld [vmem:[#allocation5 + $0x998] sm:$0xff]  ;;  %v5230_v9 = vld [vmem:[#allocation5 + $0x408] sm:$0xff] }
 0xd45   :  { %6283 = vmatpush1.bf16.msra.mxu0 %v5776_v10  ;;  %6447 = vmatpush1.bf16.msra.mxu1 %v5778_v15  ;;  %v5320_v10 = vld [vmem:[#allocation5 + $0x6d8] sm:$0xff]  ;;  %v5242_v15 = vld [vmem:[#allocation5 + $0x468] sm:$0xff] }
 0xd46   :  { %6284 = vmatprep.subr.bf16.mxu0 %v5788_v1  ;;  %6448 = vmatprep.subr.bf16.mxu1 %v5790_v16  ;;  %v5419_v1 = vld [vmem:[#allocation5 + $0x9f0] sm:$0xff]  ;;  %v5241_v16 = vld [vmem:[#allocation5 + $0x460] sm:$0xff] }
 0xd49   :  { %6285 = vmatpush1.bf16.msra.mxu0 %v5787_v30  ;;  %6449 = vmatpush1.bf16.msra.mxu1 %v5789_v21  ;;  %v5331_v30 = vld [vmem:[#allocation5 + $0x730] sm:$0xff]  ;;  %v5253_v21 = vld [vmem:[#allocation5 + $0x4c0] sm:$0xff] }
 0xd4a   :  { %6286 = vmatprep.subr.bf16.mxu0 %v5799_v20  ;;  %6450 = vmatprep.subr.bf16.mxu1 %v5801_v27  ;;  %v5430_v20 = vld [vmem:[#allocation5 + $0xa48] sm:$0xff]  ;;  %v5252_v27 = vld [vmem:[#allocation5 + $0x4b8] sm:$0xff] }
 0xd4d   :  { %6287 = vmatpush1.bf16.msra.mxu0 %v5798_v6  ;;  %6451 = vmatpush1.bf16.msra.mxu1 %v5800_v23  ;;  %v5342_v6 = vld [vmem:[#allocation5 + $0x788] sm:$0xff]  ;;  %v5264_v23 = vld [vmem:[#allocation5 + $0x518] sm:$0xff] }
 0xd4e   :  { %6461 = vmatprep.subr.bf16.mxu0 %v5110_v8  ;;  %6852 = vmatprep.subr.bf16.mxu1 %v5199_v32  ;;  %v5441_v8 = vld [vmem:[#allocation5 + $0xaa0] sm:$0xff]  ;;  %v5263_v32 = vld [vmem:[#allocation5 + $0x510] sm:$0xff] }
 0xd50   :  { %6289 = vmatmul.mubr.bf16.vlgmr.msra.gmra.mrb[28].mxu0 %v7838_v22  ;;  %6453 = vmatmul.mubr.bf16.vlgmr.msra.gmra.mrb[32].mxu1 %v7838_v22 }
 0xd51   :  { %6462 = vmatpush1.bf16.msra.mxu0 %v5109_v26  ;;  %6853 = vmatpush3.bf16.msra.mxu1 %v5111_v28  ;;  %v5353_v26 = vld [vmem:[#allocation5 + $0x7e0] sm:$0xff]  ;;  %v5275_v28 = vld [vmem:[#allocation5 + $0x570] sm:$0xff] }
 0xd52   :  { %6463 = vmatprep.subr.bf16.mxu0 %v5121_v13  ;;  %6854 = vmatprep.subr.bf16.mxu1 %v5210_v34  ;;  %v5452_v13 = vld [vmem:[#allocation5 + $0xaf8] sm:$0xff]  ;;  %v5274_v34 = vld [vmem:[#allocation5 + $0x568] sm:$0xff] }
 0xd53   :  { %6493 = vmatprep.mubr.bf16.mxu0 %v7822_v24  ;;  %6657 = vmatprep.mubr.bf16.mxu1 %v7822_v24  ;;  %v5153_v24 = vld [vmem:[#allocation5 + $0x1a0] sm:$0xff] }
 0xd55   :  { %6464 = vmatpush1.bf16.msra.mxu0 %v5120_v35  ;;  %6855 = vmatpush3.bf16.msra.mxu1 %v5122_v37  ;;  %v5364_v35 = vld [vmem:[#allocation5 + $0x838] sm:$0xff]  ;;  %v5286_v37 = vld [vmem:[#allocation5 + $0x5c8] sm:$0xff] }
 0xd56   :  { %6465 = vmatprep.subr.bf16.mxu0 %v5132_v31  ;;  %6856 = vmatprep.subr.bf16.mxu1 %v5221_v41  ;;  %v5551_v31 = vld [vmem:[#allocation5 + $0xe10] sm:$0xff]  ;;  %v5285_v41 = vld [vmem:[#allocation5 + $0x5c0] sm:$0xff] }
 0xd59   :  { %6466 = vmatpush1.bf16.msra.mxu0 %v5131_v29  ;;  %6857 = vmatpush3.bf16.msra.mxu1 %v5133_v42  ;;  %v5463_v29 = vld [vmem:[#allocation5 + $0xb50] sm:$0xff]  ;;  %v5297_v42 = vld [vmem:[#allocation5 + $0x620] sm:$0xff] }
 0xd5a   :  { %6467 = vmatprep.subr.bf16.mxu0 %v5143_v43  ;;  %6858 = vmatprep.subr.bf16.mxu1 %v5232_v44  ;;  %v5562_v43 = vld [vmem:[#allocation5 + $0xe68] sm:$0xff]  ;;  %v5296_v44 = vld [vmem:[#allocation5 + $0x618] sm:$0xff] }
 0xd5d   :  { %6468 = vmatpush1.bf16.msra.mxu0 %v5142_v45  ;;  %6859 = vmatpush3.bf16.msra.mxu1 %v5144_v46  ;;  %v5474_v45 = vld [vmem:[#allocation5 + $0xba8] sm:$0xff]  ;;  %v5308_v46 = vld [vmem:[#allocation5 + $0x678] sm:$0xff] }
 0xd5e   :  { %6469 = vmatprep.subr.bf16.mxu0 %v5154_v17  ;;  %6860 = vmatprep.subr.bf16.mxu1 %v5243_v47  ;;  %v5573_v17 = vld [vmem:[#allocation5 + $0xec0] sm:$0xff]  ;;  %v5307_v47 = vld [vmem:[#allocation5 + $0x670] sm:$0xff] }
 0xd61   :  { %6470 = vmatpush1.bf16.msra.mxu0 %v5153_v24  ;;  %6861 = vmatpush3.bf16.msra.mxu1 %v5155_v48  ;;  %v5319_v24 = vld [vmem:[#allocation5 + $0x6d0] sm:$0xff]  ;;  %v5584_v48 = vld [vmem:[#allocation5 + $0xf18] sm:$0xff] }
 0xd62   :  { %6471 = vmatprep.subr.bf16.mxu0 %v5165_v49  ;;  %6862 = vmatprep.subr.bf16.mxu1 %v5254_v50  ;;  %v5318_v49 = vld [vmem:[#allocation5 + $0x6c8] sm:$0xff]  ;;  %v5496_v50 = vld [vmem:[#allocation5 + $0xc58] sm:$0xff] }
 0xd65   :  { %6472 = vmatpush1.bf16.msra.mxu0 %v5164_v54  ;;  %6863 = vmatpush3.bf16.msra.mxu1 %v5166_v33  ;;  %v5330_v54 = vld [vmem:[#allocation5 + $0x728] sm:$0xff]  ;;  %v5595_v33 = vld [vmem:[#allocation5 + $0xf70] sm:$0xff] }
 0xd66   :  { %6473 = vmatprep.subr.bf16.mxu0 %v5176_v55  ;;  %6864 = vmatprep.subr.bf16.mxu1 %v5265_v7  ;;  %v5507_v55 = vld [vmem:[#allocation5 + $0xcb0] sm:$0xff]  ;;  %v5341_v7 = vld [vmem:[#allocation5 + $0x780] sm:$0xff] }
 0xd69   :  { %6474 = vmatpush1.bf16.msra.mxu0 %v5175_v39  ;;  %6865 = vmatpush3.bf16.msra.mxu1 %v5177_v56  ;;  %v5606_v39 = vld [vmem:[#allocation5 + $0xfc8] sm:$0xff]  ;;  %v5340_v56 = vld [vmem:[#allocation5 + $0x778] sm:$0xff] }
 0xd6a   :  { %6475 = vmatprep.subr.bf16.mxu0 %v5187_v57  ;;  %6866 = vmatprep.subr.bf16.mxu1 %v5276_v11  ;;  %v5518_v57 = vld [vmem:[#allocation5 + $0xd08] sm:$0xff]  ;;  %v5352_v11 = vld [vmem:[#allocation5 + $0x7d8] sm:$0xff] }
 0xd6d   :  { %6476 = vmatpush1.bf16.msra.mxu0 %v5186_v62  ;;  %6867 = vmatpush3.bf16.msra.mxu1 %v5188_v36  ;;  %v5617_v62 = vld [vmem:[#allocation5 + $0x1020] sm:$0xff]  ;;  %v5351_v36 = vld [vmem:[#allocation5 + $0x7d0] sm:$0xff] }
 0xd6e   :  { %6477 = vmatprep.subr.bf16.mxu0 %v5198_v14  ;;  %6874 = vmatprep.subr.bf16.mxu1 %v5375_v19  ;;  %v5529_v14 = vld [vmem:[#allocation5 + $0xd60] sm:$0xff]  ;;  %v5363_v19 = vld [vmem:[#allocation5 + $0x830] sm:$0xff] }
 0xd70   :  { %6658 = vmatmul.mubr.bf16.vlgmr.msra.gmra.mrb[36].mxu1 %v7818_v2 }
 0xd71   :  { %6478 = vmatpush1.bf16.msra.mxu0 %v5197_v12  ;;  %6875 = vmatpush3.bf16.msra.mxu1 %v5287_v40  ;;  %v5628_v12 = vld [vmem:[#allocation5 + $0x1078] sm:$0xff]  ;;  %v5362_v40 = vld [vmem:[#allocation5 + $0x828] sm:$0xff] }
 0xd72   :  { %6479 = vmatprep.subr.bf16.mxu0 %v5209_v0  ;;  %6876 = vmatprep.subr.bf16.mxu1 %v5386_v58  ;;  %v5540_v0 = vld [vmem:[#allocation5 + $0xdb8] sm:$0xff]  ;;  %v5374_v58 = vld [vmem:[#allocation5 + $0x888] sm:$0xff] }
 0xd73   :  { %6697 = vmatprep.mubr.bf16.mxu1 %v7824_v60 }
 0xd75   :  { %6480 = vmatpush1.bf16.msra.mxu0 %v5208_v52  ;;  %6877 = vmatpush3.bf16.msra.mxu1 %v5298_v59  ;;  %v5727_v52 = vld [vmem:[#allocation5 + $0x1390] sm:$0xff]  ;;  %v5373_v59 = vld [vmem:[#allocation5 + $0x880] sm:$0xff] }
 0xd76   :  { %6481 = vmatprep.subr.bf16.mxu0 %v5220_v63  ;;  %6878 = vmatprep.subr.bf16.mxu1 %v5397_v61  ;;  %v5639_v63 = vld [vmem:[#allocation5 + $0x10d0] sm:$0xff]  ;;  %v5385_v61 = vld [vmem:[#allocation5 + $0x8e0] sm:$0xff] }
 0xd79   :  { %6482 = vmatpush1.bf16.msra.mxu0 %v5219_v18  ;;  %6879 = vmatpush3.bf16.msra.mxu1 %v5309_v4  ;;  %v5738_v18 = vld [vmem:[#allocation5 + $0x13e8] sm:$0xff]  ;;  %v5384_v4 = vld [vmem:[#allocation5 + $0x8d8] sm:$0xff] }
 0xd7a   :  { %6483 = vmatprep.subr.bf16.mxu0 %v5231_v51  ;;  %6880 = vmatprep.subr.bf16.mxu1 %v5408_v5  ;;  %v5650_v51 = vld [vmem:[#allocation5 + $0x1128] sm:$0xff]  ;;  %v5396_v5 = vld [vmem:[#allocation5 + $0x938] sm:$0xff] }
 0xd7d   :  { %6484 = vmatpush1.bf16.msra.mxu0 %v5230_v9  ;;  %6881 = vmatpush3.bf16.msra.mxu1 %v5320_v10  ;;  %v5749_v9 = vld [vmem:[#allocation5 + $0x1440] sm:$0xff]  ;;  %v5395_v10 = vld [vmem:[#allocation5 + $0x930] sm:$0xff] }
 0xd7e   :  { %6485 = vmatprep.subr.bf16.mxu0 %v5242_v15  ;;  %6882 = vmatprep.subr.bf16.mxu1 %v5419_v1  ;;  %v5661_v15 = vld [vmem:[#allocation5 + $0x1180] sm:$0xff]  ;;  %v5407_v1 = vld [vmem:[#allocation5 + $0x990] sm:$0xff] }
 0xd81   :  { %6486 = vmatpush1.bf16.msra.mxu0 %v5241_v16  ;;  %6883 = vmatpush3.bf16.msra.mxu1 %v5331_v30  ;;  %v5760_v16 = vld [vmem:[#allocation5 + $0x1498] sm:$0xff]  ;;  %v5406_v30 = vld [vmem:[#allocation5 + $0x988] sm:$0xff] }
 0xd82   :  { %6487 = vmatprep.subr.bf16.mxu0 %v5253_v21  ;;  %6884 = vmatprep.subr.bf16.mxu1 %v5430_v20  ;;  %v5672_v21 = vld [vmem:[#allocation5 + $0x11d8] sm:$0xff]  ;;  %v5418_v20 = vld [vmem:[#allocation5 + $0x9e8] sm:$0xff] }
 0xd85   :  { %6488 = vmatpush1.bf16.msra.mxu0 %v5252_v27  ;;  %6885 = vmatpush3.bf16.msra.mxu1 %v5342_v6  ;;  %v5771_v27 = vld [vmem:[#allocation5 + $0x14f0] sm:$0xff]  ;;  %v5417_v6 = vld [vmem:[#allocation5 + $0x9e0] sm:$0xff] }
 0xd86   :  { %6489 = vmatprep.subr.bf16.mxu0 %v5264_v23  ;;  %6886 = vmatprep.subr.bf16.mxu1 %v5441_v8  ;;  %v5683_v23 = vld [vmem:[#allocation5 + $0x1230] sm:$0xff]  ;;  %v5429_v8 = vld [vmem:[#allocation5 + $0xa40] sm:$0xff] }
 0xd89   :  { %6490 = vmatpush1.bf16.msra.mxu0 %v5263_v32  ;;  %6887 = vmatpush3.bf16.msra.mxu1 %v5353_v26  ;;  %v5782_v32 = vld [vmem:[#allocation5 + $0x1548] sm:$0xff]  ;;  %v5428_v26 = vld [vmem:[#allocation5 + $0xa38] sm:$0xff] }
 0xd8a   :  { %6491 = vmatprep.subr.bf16.mxu0 %v5275_v28  ;;  %6888 = vmatprep.subr.bf16.mxu1 %v5452_v13  ;;  %v5694_v28 = vld [vmem:[#allocation5 + $0x1288] sm:$0xff]  ;;  %v5440_v13 = vld [vmem:[#allocation5 + $0xa98] sm:$0xff] }
 0xd8d   :  { %6492 = vmatpush1.bf16.msra.mxu0 %v5274_v34  ;;  %6889 = vmatpush3.bf16.msra.mxu1 %v5364_v35  ;;  %v5793_v34 = vld [vmem:[#allocation5 + $0x15a0] sm:$0xff]  ;;  %v5439_v35 = vld [vmem:[#allocation5 + $0xa90] sm:$0xff] }
 0xd8e   :  { %6502 = vmatprep.subr.bf16.mxu0 %v5286_v37  ;;  %6896 = vmatprep.subr.bf16.mxu1 %v5551_v31  ;;  %v5705_v37 = vld [vmem:[#allocation5 + $0x12e0] sm:$0xff]  ;;  %v5451_v31 = vld [vmem:[#allocation5 + $0xaf0] sm:$0xff] }
 0xd90   :  { %6494 = vmatmul.mubr.bf16.vlgmr.msra.gmra.mrb[32].mxu0 %v7818_v2  ;;  %6698 = vmatmul.mubr.bf16.vlgmr.msra.gmra.mrb[40].mxu1 %v7820_v3  ;;  %v5485_v2 = vld [vmem:[#allocation5 + $0xc00] sm:$0xff] }
 0xd91   :  { %6503 = vmatpush1.bf16.msra.mxu0 %v5285_v41  ;;  %6897 = vmatpush3.bf16.msra.mxu1 %v5463_v29  ;;  %v5804_v41 = vld [vmem:[#allocation5 + $0x15f8] sm:$0xff]  ;;  %v5450_v29 = vld [vmem:[#allocation5 + $0xae8] sm:$0xff] }
 0xd92   :  { %6504 = vmatprep.subr.bf16.mxu0 %v5297_v42  ;;  %6898 = vmatprep.subr.bf16.mxu1 %v5562_v43  ;;  %v5716_v42 = vld [vmem:[#allocation5 + $0x1338] sm:$0xff]  ;;  %v5462_v43 = vld [vmem:[#allocation5 + $0xb48] sm:$0xff] }
 0xd93   :  { %6534 = vmatprep.mubr.bf16.mxu0 %v7824_v60  ;;  %6737 = vmatprep.mubr.bf16.mxu1 %v7840_v53  ;;  %v5329_v60 = vld [vmem:[#allocation5 + $0x720] sm:$0xff] }
 0xd95   :  { %6505 = vmatpush1.bf16.msra.mxu0 %v5296_v44  ;;  %6899 = vmatpush3.bf16.msra.mxu1 %v5474_v45  ;;  %v5461_v44 = vld [vmem:[#allocation5 + $0xb40] sm:$0xff] }
 0xd96   :  { %6506 = vmatprep.subr.bf16.mxu0 %v5308_v46  ;;  %6900 = vmatprep.subr.bf16.mxu1 %v5573_v17  ;;  %v5473_v45 = vld [vmem:[#allocation5 + $0xba0] sm:$0xff]  ;;  %v5472_v46 = vld [vmem:[#allocation5 + $0xb98] sm:$0xff] }
 0xd97   :  { %v5484_v17 = vld [vmem:[#allocation5 + $0xbf8] sm:$0xff] }
 0xd99   :  { %6507 = vmatpush1.bf16.msra.mxu0 %v5307_v47  ;;  %6901 = vmatpush3.bf16.msra.mxu1 %v5485_v2  ;;  %v5483_v47 = vld [vmem:[#allocation5 + $0xbf0] sm:$0xff] }
 0xd9a   :  { %6508 = vmatprep.subr.bf16.mxu0 %v5319_v24  ;;  %6902 = vmatprep.subr.bf16.mxu1 %v5584_v48  ;;  %v5495_v2 = vld [vmem:[#allocation5 + $0xc50] sm:$0xff]  ;;  %v5494_v24 = vld [vmem:[#allocation5 + $0xc48] sm:$0xff] }
 0xd9b   :  { %v5506_v48 = vld [vmem:[#allocation5 + $0xca8] sm:$0xff] }
 0xd9d   :  { %6509 = vmatpush1.bf16.msra.mxu0 %v5318_v49  ;;  %6903 = vmatpush3.bf16.msra.mxu1 %v5496_v50  ;;  %v5505_v49 = vld [vmem:[#allocation5 + $0xca0] sm:$0xff]  ;;  %v5516_v50 = vld [vmem:[#allocation5 + $0xcf8] sm:$0xff] }
 0xd9e   :  { %6510 = vmatprep.subr.bf16.mxu0 %v5330_v54  ;;  %6904 = vmatprep.subr.bf16.mxu1 %v5595_v33  ;;  %v5528_v54 = vld [vmem:[#allocation5 + $0xd58] sm:$0xff]  ;;  %v5539_v33 = vld [vmem:[#allocation5 + $0xdb0] sm:$0xff] }
 0xda1   :  { %6511 = vmatpush1.bf16.msra.mxu0 %v5329_v60  ;;  %6905 = vmatpush3.bf16.msra.mxu1 %v5507_v55  ;;  %v5538_v60 = vld [vmem:[#allocation5 + $0xda8] sm:$0xff] }
 0xda2   :  { %6512 = vmatprep.subr.bf16.mxu0 %v5341_v7  ;;  %6906 = vmatprep.subr.bf16.mxu1 %v5606_v39  ;;  %v5550_v55 = vld [vmem:[#allocation5 + $0xe08] sm:$0xff]  ;;  %v5549_v7 = vld [vmem:[#allocation5 + $0xe00] sm:$0xff] }
 0xda3   :  { %v5561_v39 = vld [vmem:[#allocation5 + $0xe60] sm:$0xff] }
 0xda5   :  { %6513 = vmatpush1.bf16.msra.mxu0 %v5340_v56  ;;  %6907 = vmatpush3.bf16.msra.mxu1 %v5518_v57  ;;  %v5560_v56 = vld [vmem:[#allocation5 + $0xe58] sm:$0xff] }
 0xda6   :  { %6514 = vmatprep.subr.bf16.mxu0 %v5352_v11  ;;  %6908 = vmatprep.subr.bf16.mxu1 %v5617_v62  ;;  %v5572_v57 = vld [vmem:[#allocation5 + $0xeb8] sm:$0xff]  ;;  %v5571_v11 = vld [vmem:[#allocation5 + $0xeb0] sm:$0xff] }
 0xda7   :  { %v5583_v62 = vld [vmem:[#allocation5 + $0xf10] sm:$0xff] }
 0xda9   :  { %6515 = vmatpush1.bf16.msra.mxu0 %v5351_v36  ;;  %6909 = vmatpush3.bf16.msra.mxu1 %v5529_v14  ;;  %v5582_v36 = vld [vmem:[#allocation5 + $0xf08] sm:$0xff] }
 0xdaa   :  { %6516 = vmatprep.subr.bf16.mxu0 %v5363_v19  ;;  %6910 = vmatprep.subr.bf16.mxu1 %v5628_v12  ;;  %v5594_v14 = vld [vmem:[#allocation5 + $0xf68] sm:$0xff]  ;;  %v5593_v19 = vld [vmem:[#allocation5 + $0xf60] sm:$0xff] }
 0xdab   :  { %v5605_v12 = vld [vmem:[#allocation5 + $0xfc0] sm:$0xff] }
 0xdad   :  { %6517 = vmatpush1.bf16.msra.mxu0 %v5362_v40  ;;  %6911 = vmatpush3.bf16.msra.mxu1 %v5540_v0  ;;  %v5604_v40 = vld [vmem:[#allocation5 + $0xfb8] sm:$0xff] }
 0xdae   :  { %6518 = vmatprep.subr.bf16.mxu0 %v5374_v58  ;;  %6918 = vmatprep.subr.bf16.mxu1 %v5727_v52  ;;  %v5616_v0 = vld [vmem:[#allocation5 + $0x1018] sm:$0xff]  ;;  %v5615_v58 = vld [vmem:[#allocation5 + $0x1010] sm:$0xff] }
 0xdaf   :  { %v5627_v52 = vld [vmem:[#allocation5 + $0x1070] sm:$0xff] }
 0xdb0   :  { %6738 = vmatmul.mubr.bf16.vlgmr.msra.gmra.mrb[44].mxu1 %v7836_v25 }
 0xdb1   :  { %6519 = vmatpush1.bf16.msra.mxu0 %v5373_v59  ;;  %6919 = vmatpush3.bf16.msra.mxu1 %v5639_v63  ;;  %v5626_v59 = vld [vmem:[#allocation5 + $0x1068] sm:$0xff] }
 0xdb2   :  { %6520 = vmatprep.subr.bf16.mxu0 %v5385_v61  ;;  %6920 = vmatprep.subr.bf16.mxu1 %v5738_v18  ;;  %v5638_v63 = vld [vmem:[#allocation5 + $0x10c8] sm:$0xff]  ;;  %v5637_v61 = vld [vmem:[#allocation5 + $0x10c0] sm:$0xff] }
 0xdb3   :  { %6777 = vmatprep.mubr.bf16.mxu1 %v7842_v38  ;;  %v5649_v18 = vld [vmem:[#allocation5 + $0x1120] sm:$0xff] }
 0xdb5   :  { %6521 = vmatpush1.bf16.msra.mxu0 %v5384_v4  ;;  %6921 = vmatpush3.bf16.msra.mxu1 %v5650_v51  ;;  %v5648_v4 = vld [vmem:[#allocation5 + $0x1118] sm:$0xff] }
 0xdb6   :  { %6522 = vmatprep.subr.bf16.mxu0 %v5396_v5  ;;  %6922 = vmatprep.subr.bf16.mxu1 %v5749_v9  ;;  %v5660_v51 = vld [vmem:[#allocation5 + $0x1178] sm:$0xff]  ;;  %v5659_v5 = vld [vmem:[#allocation5 + $0x1170] sm:$0xff] }
 0xdb7   :  { %v5671_v9 = vld [vmem:[#allocation5 + $0x11d0] sm:$0xff] }
 0xdb9   :  { %6523 = vmatpush1.bf16.msra.mxu0 %v5395_v10  ;;  %6923 = vmatpush3.bf16.msra.mxu1 %v5661_v15  ;;  %v5670_v10 = vld [vmem:[#allocation5 + $0x11c8] sm:$0xff] }
 0xdba   :  { %6524 = vmatprep.subr.bf16.mxu0 %v5407_v1  ;;  %6924 = vmatprep.subr.bf16.mxu1 %v5760_v16  ;;  %v5682_v15 = vld [vmem:[#allocation5 + $0x1228] sm:$0xff]  ;;  %v5681_v1 = vld [vmem:[#allocation5 + $0x1220] sm:$0xff] }
 0xdbb   :  { %v5693_v16 = vld [vmem:[#allocation5 + $0x1280] sm:$0xff] }
 0xdbd   :  { %6525 = vmatpush1.bf16.msra.mxu0 %v5406_v30  ;;  %6925 = vmatpush3.bf16.msra.mxu1 %v5672_v21  ;;  %v5704_v21 = vld [vmem:[#allocation5 + $0x12d8] sm:$0xff] }
 0xdbe   :  { %6526 = vmatprep.subr.bf16.mxu0 %v5418_v20  ;;  %6926 = vmatprep.subr.bf16.mxu1 %v5771_v27 }
 0xdc1   :  { %6527 = vmatpush1.bf16.msra.mxu0 %v5417_v6  ;;  %6927 = vmatpush3.bf16.msra.mxu1 %v5683_v23 }
 0xdc2   :  { %6528 = vmatprep.subr.bf16.mxu0 %v5429_v8  ;;  %6928 = vmatprep.subr.bf16.mxu1 %v5782_v32 }
 0xdc5   :  { %6529 = vmatpush1.bf16.msra.mxu0 %v5428_v26  ;;  %6929 = vmatpush3.bf16.msra.mxu1 %v5694_v28  ;;  %v5703_v26 = vld [vmem:[#allocation5 + $0x12d0] sm:$0xff] }
 0xdc6   :  { %6530 = vmatprep.subr.bf16.mxu0 %v5440_v13  ;;  %6930 = vmatprep.subr.bf16.mxu1 %v5793_v34  ;;  %v5715_v28 = vld [vmem:[#allocation5 + $0x1330] sm:$0xff]  ;;  %v5714_v13 = vld [vmem:[#allocation5 + $0x1328] sm:$0xff] }
 0xdc7   :  { %v5726_v34 = vld [vmem:[#allocation5 + $0x1388] sm:$0xff] }
 0xdc9   :  { %6531 = vmatpush1.bf16.msra.mxu0 %v5439_v35  ;;  %6931 = vmatpush3.bf16.msra.mxu1 %v5705_v37  ;;  %v5725_v35 = vld [vmem:[#allocation5 + $0x1380] sm:$0xff] }
 0xdca   :  { %6532 = vmatprep.subr.bf16.mxu0 %v5451_v31  ;;  %6932 = vmatprep.subr.bf16.mxu1 %v5804_v41  ;;  %v5737_v37 = vld [vmem:[#allocation5 + $0x13e0] sm:$0xff]  ;;  %v5736_v31 = vld [vmem:[#allocation5 + $0x13d8] sm:$0xff] }
 0xdcb   :  { %v5748_v41 = vld [vmem:[#allocation5 + $0x1438] sm:$0xff] }
 0xdcd   :  { %6533 = vmatpush1.bf16.msra.mxu0 %v5450_v29  ;;  %6933 = vmatpush3.bf16.msra.mxu1 %v5716_v42  ;;  %v5747_v29 = vld [vmem:[#allocation5 + $0x1430] sm:$0xff] }
 0xdce   :  { %6543 = vmatprep.subr.bf16.mxu0 %v5462_v43  ;;  %v5759_v42 = vld [vmem:[#allocation5 + $0x1490] sm:$0xff]  ;;  %v5758_v43 = vld [vmem:[#allocation5 + $0x1488] sm:$0xff] }
 0xdd0   :  { %6535 = vmatmul.mubr.bf16.vlgmr.msra.gmra.mrb[32].mxu0 %v7820_v3  ;;  %6778 = vmatmul.mubr.bf16.vlgmr.msra.gmra.mrb[48].mxu1 %v7838_v22  ;;  %v5517_v3 = vld [vmem:[#allocation5 + $0xd00] sm:$0xff] }
 0xdd1   :  { %6544 = vmatpush1.bf16.msra.mxu0 %v5461_v44  ;;  %6575 = vmatprep.mubr.bf16.mxu0 %v7840_v53  ;;  %v5527_v53 = vld [vmem:[#allocation5 + $0xd50] sm:$0xff]  ;;  %v5770_v44 = vld [vmem:[#allocation5 + $0x14e8] sm:$0xff] }
 0xdd2   :  { %6545 = vmatprep.subr.bf16.mxu0 %v5473_v45  ;;  %v5769_v45 = vld [vmem:[#allocation5 + $0x14e0] sm:$0xff] }
 0xdd5   :  { %6546 = vmatpush1.bf16.msra.mxu0 %v5472_v46  ;;  %v5781_v46 = vld [vmem:[#allocation5 + $0x1540] sm:$0xff] }
 0xdd6   :  { %6547 = vmatprep.subr.bf16.mxu0 %v5484_v17  ;;  %v5780_v17 = vld [vmem:[#allocation5 + $0x1538] sm:$0xff] }
 0xdd9   :  { %6548 = vmatpush1.bf16.msra.mxu0 %v5483_v47  ;;  %v5792_v47 = vld [vmem:[#allocation5 + $0x1598] sm:$0xff] }
 0xdda   :  { %6549 = vmatprep.subr.bf16.mxu0 %v5495_v2 }
 0xddd   :  { %6550 = vmatpush1.bf16.msra.mxu0 %v5494_v24 }
 0xdde   :  { %6551 = vmatprep.subr.bf16.mxu0 %v5506_v48 }
 0xde1   :  { %6552 = vmatpush1.bf16.msra.mxu0 %v5505_v49 }
 0xde2   :  { %6553 = vmatprep.subr.bf16.mxu0 %v5517_v3  ;;  %v5791_v3 = vld [vmem:[#allocation5 + $0x1590] sm:$0xff] }
 0xde5   :  { %6554 = vmatpush1.bf16.msra.mxu0 %v5516_v50 }
 0xde6   :  { %6555 = vmatprep.subr.bf16.mxu0 %v5528_v54  ;;  %v5803_v54 = vld [vmem:[#allocation5 + $0x15f0] sm:$0xff] }
 0xde9   :  { %6556 = vmatpush1.bf16.msra.mxu0 %v5527_v53  ;;  %v5802_v53 = vld [vmem:[#allocation5 + $0x15e8] sm:$0xff] }
 0xdea   :  { %6557 = vmatprep.subr.bf16.mxu0 %v5539_v33 }
 0xded   :  { %6558 = vmatpush1.bf16.msra.mxu0 %v5538_v60 }
 0xdee   :  { %6559 = vmatprep.subr.bf16.mxu0 %v5550_v55 }
 0xdf1   :  { %6560 = vmatpush1.bf16.msra.mxu0 %v5549_v7 }
 0xdf2   :  { %6561 = vmatprep.subr.bf16.mxu0 %v5561_v39 }
 0xdf5   :  { %6562 = vmatpush1.bf16.msra.mxu0 %v5560_v56 }
 0xdf6   :  { %6563 = vmatprep.subr.bf16.mxu0 %v5572_v57 }
 0xdf9   :  { %6564 = vmatpush1.bf16.msra.mxu0 %v5571_v11 }
 0xdfa   :  { %6565 = vmatprep.subr.bf16.mxu0 %v5583_v62 }
 0xdfd   :  { %6566 = vmatpush1.bf16.msra.mxu0 %v5582_v36 }
 0xdfe   :  { %6567 = vmatprep.subr.bf16.mxu0 %v5594_v14 }
 0xe01   :  { %6568 = vmatpush1.bf16.msra.mxu0 %v5593_v19 }
 0xe02   :  { %6569 = vmatprep.subr.bf16.mxu0 %v5605_v12 }
 0xe05   :  { %6570 = vmatpush1.bf16.msra.mxu0 %v5604_v40 }
 0xe06   :  { %6571 = vmatprep.subr.bf16.mxu0 %v5616_v0 }
 0xe09   :  { %6572 = vmatpush1.bf16.msra.mxu0 %v5615_v58 }
 0xe0a   :  { %6573 = vmatprep.subr.bf16.mxu0 %v5627_v52 }
 0xe0d   :  { %6574 = vmatpush1.bf16.msra.mxu0 %v5626_v59 }
 0xe0e   :  { %6584 = vmatprep.subr.bf16.mxu0 %v5638_v63 }
 0xe10   :  { %6576 = vmatmul.mubr.bf16.vlgmr.msra.gmra.mrb[32].mxu0 %v7836_v25  ;;  %v5692_v25 = vld [vmem:[#allocation5 + $0x1278] sm:$0xff] }
 0xe11   :  { %6585 = vmatpush1.bf16.msra.mxu0 %v5637_v61  ;;  %6616 = vmatprep.mubr.bf16.mxu0 %v7842_v38 }
 0xe12   :  { %6586 = vmatprep.subr.bf16.mxu0 %v5649_v18 }
 0xe15   :  { %6587 = vmatpush1.bf16.msra.mxu0 %v5648_v4 }
 0xe16   :  { %6588 = vmatprep.subr.bf16.mxu0 %v5660_v51 }
 0xe19   :  { %6589 = vmatpush1.bf16.msra.mxu0 %v5659_v5 }
 0xe1a   :  { %6590 = vmatprep.subr.bf16.mxu0 %v5671_v9 }
 0xe1d   :  { %6591 = vmatpush1.bf16.msra.mxu0 %v5670_v10 }
 0xe1e   :  { %6592 = vmatprep.subr.bf16.mxu0 %v5682_v15 }
 0xe21   :  { %6593 = vmatpush1.bf16.msra.mxu0 %v5681_v1 }
 0xe22   :  { %6594 = vmatprep.subr.bf16.mxu0 %v5693_v16 }
 0xe23   :  { %v6290_v30 = vpop.f32.mrb[28].mxu0  ;;  %v6454_v38 = vpop.f32.mrb[32].mxu1 }
 0xe24   :  { %6789 = vst [vmem:[#allocation15 + $0x20] sm:$0xff] %v6290_v30  ;;  %6791 = vst [vmem:[#allocation15 + $0x30] sm:$0xff] %v6454_v38  ;;  %v6292_v20 = vpop.f32.mrb[29].mxu0  ;;  %v6456_v27 = vpop.f32.mrb[33].mxu1 }
 0xe25   :  { %6790 = vst [vmem:[#allocation15 + $0x28] sm:$0xff] %v6292_v20  ;;  %6792 = vst [vmem:[#allocation15 + $0x38] sm:$0xff] %v6456_v27  ;;  %v6294_v6 = vpop.f32.mrb[30].mxu0  ;;  %v6458_v23 = vpop.f32.mrb[34].mxu1  ;;  %6595 = vmatpush1.bf16.msra.mxu0 %v5692_v25 }
 0xe26   :  { %v6295_v8 = vpop.f32.mrb[31].mxu0  ;;  %v6459_v32 = vpop.f32.mrb[35].mxu1  ;;  %6596 = vmatprep.subr.bf16.mxu0 %v5704_v21 }
 0xe29   :  { %6597 = vmatpush1.bf16.msra.mxu0 %v5703_v26 }
 0xe2a   :  { %6598 = vmatprep.subr.bf16.mxu0 %v5715_v28 }
 0xe2d   :  { %6599 = vmatpush1.bf16.msra.mxu0 %v5714_v13 }
 0xe2e   :  { %6600 = vmatprep.subr.bf16.mxu0 %v5726_v34 }
 0xe31   :  { %6601 = vmatpush1.bf16.msra.mxu0 %v5725_v35 }
 0xe32   :  { %6602 = vmatprep.subr.bf16.mxu0 %v5737_v37 }
 0xe35   :  { %6603 = vmatpush1.bf16.msra.mxu0 %v5736_v31 }
 0xe36   :  { %6604 = vmatprep.subr.bf16.mxu0 %v5748_v41 }
 0xe39   :  { %6605 = vmatpush1.bf16.msra.mxu0 %v5747_v29 }
 0xe3a   :  { %6606 = vmatprep.subr.bf16.mxu0 %v5759_v42 }
 0xe3d   :  { %6607 = vmatpush1.bf16.msra.mxu0 %v5758_v43 }
 0xe3e   :  { %6608 = vmatprep.subr.bf16.mxu0 %v5770_v44 }
 0xe41   :  { %6609 = vmatpush1.bf16.msra.mxu0 %v5769_v45 }
 0xe42   :  { %6610 = vmatprep.subr.bf16.mxu0 %v5781_v46 }
 0xe43   :  { %v6868_v2 = vpop.f32.mrb[36].mxu1 }
 0xe44   :  { %v6869_v24 = vpop.f32.mrb[37].mxu1 }
 0xe45   :  { %6611 = vmatpush1.bf16.msra.mxu0 %v5780_v17  ;;  %v6870_v48 = vadd.f32 %v6869_v24, %v6868_v2  ;;  %v6871_v49 = vpop.f32.mrb[38].mxu1 }
 0xe46   :  { %6612 = vmatprep.subr.bf16.mxu0 %v5792_v47  ;;  %v6872_v50 = vpop.f32.mrb[39].mxu1 }
 0xe49   :  { %6613 = vmatpush1.bf16.msra.mxu0 %v5791_v3 }
 0xe4a   :  { %6614 = vmatprep.subr.bf16.mxu0 %v5803_v54 }
 0xe4d   :  { %6615 = vmatpush1.bf16.msra.mxu0 %v5802_v53 }
 0xe50   :  { %6617 = vmatmul.mubr.bf16.vlgmr.msra.gmra.mrb[32].mxu0 %v7838_v22 }
 0xe63   :  { %v6890_v33 = vpop.f32.mrb[40].mxu1 }
 0xe64   :  { %v6891_v60 = vpop.f32.mrb[41].mxu1 }
 0xe65   :  { %v6892_v55 = vadd.f32 %v6891_v60, %v6890_v33  ;;  %v6893_v7 = vpop.f32.mrb[42].mxu1 }
 0xe66   :  { %v6894_v39 = vpop.f32.mrb[43].mxu1 }
 0xe67   :  { %v6700_v56 = vadd.f32 %v6892_v55, %v6870_v48 }
 0xe83   :  { %v6912_v57 = vpop.f32.mrb[44].mxu1 }
 0xe84   :  { %v6913_v11 = vpop.f32.mrb[45].mxu1 }
 0xe85   :  { %v6914_v62 = vadd.f32 %v6913_v11, %v6912_v57  ;;  %v6915_v36 = vpop.f32.mrb[46].mxu1 }
 0xe86   :  { %v6916_v14 = vpop.f32.mrb[47].mxu1 }
 0xe87   :  { %v6740_v19 = vadd.f32 %v6914_v62, %v6700_v56 }
 0xea3   :  { %v6934_v12 = vpop.f32.mrb[48].mxu1 }
 0xea4   :  { %v6935_v40 = vpop.f32.mrb[49].mxu1 }
 0xea5   :  { %v6936_v0 = vadd.f32 %v6935_v40, %v6934_v12  ;;  %v6937_v58 = vpop.f32.mrb[50].mxu1 }
 0xea6   :  { %v6938_v52 = vpop.f32.mrb[51].mxu1 }
 0xea7   :  { %v6780_v59 = vadd.f32 %v6936_v0, %v6740_v19 }
 0xea9   :  { %6795 = vst [vmem:[#allocation15 + $0x50] sm:$0xff] %v6780_v59 }
 0xf23   :  { %v6618_v22 = vpop.f32.mrb[32].mxu0 }
 0xf24   :  { %6793 = vst [vmem:[#allocation15 + $0x40] sm:$0xff] %v6618_v22  ;;  %v6620_v63 = vpop.f32.mrb[33].mxu0 }
 0xf25   :  { %6794 = vst [vmem:[#allocation15 + $0x48] sm:$0xff] %v6620_v63  ;;  %v6622_v61 = vpop.f32.mrb[34].mxu0 }
 0xf26   :  { %v6623_v18 = vpop.f32.mrb[35].mxu0 }
 0xf27   :  { %7357 = shalt.err (!%p7354_p8)
}
 0xf28   :  { %s7358_s16 = scalar_lea.hbm %s7912_s8, 1408 }
 0xf29   :  { %p7359_p9 = scmp.ne.s32.totalorder %s7912_s8, %s7358_s16  ;;  %p7362_p10 = scmp.lt.u32.totalorder %s7358_s16, %s7912_s8 }
 0xf2b   :  { %p7364_p11 = pnand %p7362_p10, %p7359_p9 }
 0xf2d   :  { %7367 = shalt.err (!%p7364_p11)
}
 0xf2e   :  { %6805 = dma.vmem_to_hbm [thread:$0]  %s6803_s29, 1408, %s7912_s8, [#allocation9]  }
 0xf2f   :  { %7382 = dma.done.wait [#allocation9], 1408  }
 0xf30   :  { %7383 = vsyncadd [#allocation9], 4294965888 }
 0xf31   :  { %6809 = vsyncpa [#allocation8], 1 }
 0xf32   :  { %6810 = vsyncpa [#allocation11], 1 }
 0xf33   :  { %6811 = vsyncpa [#allocation14], 1 }
 0xf34   :  { %6812 = vsyncpa [#allocation9], 1 }
 0xf35   :  { %6813 = vsyncmov [#allocation6] }
 0xf38   :  { %s6814_s21 = vpop.sfrf %6813 }
 0xf39   :  { %p6848_p12 = scmp.ne.s32.totalorder %s6814_s21, 0 }
 0xf3b   :  { %6818 = shalt.err (%p6848_p12)  }
 0xf3c   :  { %6820 = vsyncmov [#allocation6 + $0x1] }
 0xf3f   :  { %s6821_s22 = vpop.sfrf %6820 }
 0xf40   :  { %p6849_p13 = scmp.ne.s32.totalorder %s6821_s22, 0 }
 0xf42   :  { %6825 = shalt.err (%p6849_p13)  }
 0xf43   :  { %6827 = vsyncmov [#allocation6 + $0x2] }
 0xf46   :  { %s6828_s23 = vpop.sfrf %6827 }
 0xf47   :  { %p6850_p0 = scmp.ne.s32.totalorder %s6828_s23, 0 }
 0xf49   :  { %6832 = shalt.err (%p6850_p0)  }
 0xf4a   :  { %6834 = vsyncmov [#allocation6 + $0x3] }
 0xf4d   :  { %s6835_s8 = vpop.sfrf %6834 }
 0xf4e   :  { %p6851_p1 = scmp.ne.s32.totalorder %s6835_s8, 0 }
 0xf50   :  { %6839 = shalt.err (%p6851_p1)  }

</bundles_post_ra>
